<compile_context>
chip_gen: v7x
topology: tpu7x:2x2x1
jax: 0.10.0
libtpu: 0.0.40
codegen_flags: <defaults>
</compile_context>

<pallas_src>
import functools

import jax
import jax.numpy as jnp
from jax.experimental import pallas as pl
from jax.experimental.pallas import tpu as pltpu


# ----------------------------- Pallas kernel ------------------------------- #

def _fused_layer_kernel(x_ref, w_ref, p_ref, o_ref, *, use_bn):
    """matmul + bias [+ train-mode BatchNorm] + LeakyReLU(0.2), in VMEM.

    x_ref : (rows, Kdim)        bf16 im2col patches (rows = N*Ho*Wo), resident
    w_ref : (Kdim, tile_cout)   bf16 flattened conv-weight tile (streamed)
    p_ref : (1|3, tile_cout)    f32 packed [bias] or [bias; gamma; beta]
    o_ref : (rows, tile_cout)   bf16 output tile
    """
    # bf16 x bf16 -> f32 accumulate on the MXU.
    y = jnp.dot(x_ref[...], w_ref[...], preferred_element_type=jnp.float32)
    p = p_ref[...]
    y = y + p[0:1, :]

    if use_bn:
        # Training-mode BatchNorm2d: biased batch stats over the rows axis
        # (N*H*W), eps=1e-5, all in f32.  Clamp var against cancellation.
        mean = jnp.mean(y, axis=0, keepdims=True)
        var = jnp.mean(y * y, axis=0, keepdims=True) - mean * mean
        var = jnp.maximum(var, 0.0)
        y = (y - mean) * jax.lax.rsqrt(var + 1e-5)
        y = y * p[1:2, :] + p[2:3, :]

    # LeakyReLU(0.2)
    y = jnp.where(y >= 0.0, y, 0.2 * y)
    o_ref[...] = y.astype(o_ref.dtype)


def fused_conv_layer(x_cols, w_flat, pvec, *, use_bn, cout_tile=128):
    """One fused conv-as-matmul layer.  Grid over Cout when it tiles by 128."""
    rows, kdim = x_cols.shape
    cout = w_flat.shape[1]
    prows = pvec.shape[0]

    if cout > cout_tile and cout % cout_tile == 0:
        nco, tc = cout // cout_tile, cout_tile
    else:
        nco, tc = 1, cout

    kernel = functools.partial(_fused_layer_kernel, use_bn=use_bn)

    flops = 2 * rows * kdim * cout
    bytes_accessed = (
        rows * kdim * 2          # bf16 patches (read once, stays resident)
        + kdim * cout * 2        # bf16 weight stream
        + prows * cout * 4       # packed f32 bias/gamma/beta
        + rows * cout * 2        # bf16 output writeback
    )
    cost = pl.CostEstimate(
        flops=flops,
        transcendentals=cout if use_bn else 0,
        bytes_accessed=bytes_accessed,
    )

    return pl.pallas_call(
        kernel,
        out_shape=jax.ShapeDtypeStruct((rows, cout), jnp.bfloat16),
        grid=(nco,),
        in_specs=[
            # im2col block: same block index every step -> VMEM-resident.
            pl.BlockSpec((rows, kdim), lambda j: (0, 0)),
            # weight tile streams along Cout -> double-buffered DMA.
            pl.BlockSpec((kdim, tc), lambda j: (0, j)),
            # packed bias/gamma/beta tile.
            pl.BlockSpec((prows, tc), lambda j: (0, j)),
        ],
        out_specs=pl.BlockSpec((rows, tc), lambda j: (0, j)),
        compiler_params=pltpu.CompilerParams(
            dimension_semantics=("parallel",),
            vmem_limit_bytes=32 * 1024 * 1024,
        ),
        cost_estimate=cost,
    )(x_cols, w_flat, pvec)


# ------------------------------ glue / params ------------------------------ #

def _im2col(x_nhwc, k, stride, pad):
    """(N,H,W,C) -> (N*Ho*Wo, K*K*C) patches, column index (kh*K+kw)*C + c."""
    n, h, w, c = x_nhwc.shape
    if pad:
        x_nhwc = jnp.pad(x_nhwc, ((0, 0), (pad, pad), (pad, pad), (0, 0)))
    ho = (h + 2 * pad - k) // stride + 1
    wo = (w + 2 * pad - k) // stride + 1
    patches = []
    for kh in range(k):
        for kw in range(k):
            patches.append(
                x_nhwc[:,
                       kh:kh + stride * (ho - 1) + 1:stride,
                       kw:kw + stride * (wo - 1) + 1:stride, :]
            )
    col = jnp.stack(patches, axis=3)  # (N, Ho, Wo, K*K, C)
    return col.reshape(n * ho * wo, k * k * c), ho, wo


def _flatten_conv_weight(w):
    # PyTorch Conv2d weight (Cout, Cin, KH, KW) -> (KH*KW*Cin, Cout), bf16.
    cout, cin, kh, kw = w.shape
    return (
        jnp.transpose(w, (2, 3, 1, 0)).reshape(kh * kw * cin, cout)
    ).astype(jnp.bfloat16)


def init_params(key, d=128, channels=1, std=0.02):
    ks = jax.random.split(key, 4)

    def w(k, shape):
        return std * jax.random.normal(k, shape, jnp.float32)

    def pack(bias, gamma=None, beta=None):
        if gamma is None:
            return bias.reshape(1, -1)
        return jnp.stack([bias, gamma, beta], axis=0)  # (3, Cout) f32

    c1, c2, c3 = d // 2, d * 2, d * 4
    # Weights are flattened / cast to bf16 once here (out of the forward path).
    return {
        # conv1_1: Conv2d(channels, d//2, 4, 2, 1)
        "w1f": _flatten_conv_weight(w(ks[0], (c1, channels, 4, 4))),
        "p1": pack(jnp.zeros((c1,), jnp.float32)),
        # conv2: Conv2d(d//2, d*2, 4, 2, 1) + BatchNorm2d(d*2)
        "w2f": _flatten_conv_weight(w(ks[1], (c2, c1, 4, 4))),
        "p2": pack(jnp.zeros((c2,), jnp.float32),
                   jnp.ones((c2,), jnp.float32),
                   jnp.zeros((c2,), jnp.float32)),
        # conv3: Conv2d(d*2, d*4, 4, 2, 1) + BatchNorm2d(d*4)
        "w3f": _flatten_conv_weight(w(ks[2], (c3, c2, 4, 4))),
        "p3": pack(jnp.zeros((c3,), jnp.float32),
                   jnp.ones((c3,), jnp.float32),
                   jnp.zeros((c3,), jnp.float32)),
        # conv4: Conv2d(d*4, 1, 4, 1, 0)
        "w4f": _flatten_conv_weight(w(ks[3], (1, c3, 4, 4))),
        "b4": jnp.zeros((1,), jnp.float32),
    }


@jax.jit
def discriminator_forward(x, params):
    """x: (N, channels, H, W) float32 (NCHW, like PyTorch). Returns NCHW f32."""
    n = x.shape[0]
    # NCHW -> NHWC, bf16 activations end-to-end (f32 accumulate in-kernel).
    h = jnp.transpose(x, (0, 2, 3, 1)).astype(jnp.bfloat16)

    # conv1_1 (4,2,1) + LeakyReLU(0.2)
    cols, ho, wo = _im2col(h, 4, 2, 1)
    y = fused_conv_layer(cols, params["w1f"], params["p1"], use_bn=False)
    h = y.reshape(n, ho, wo, -1)

    # conv2 (4,2,1) + BN(train) + LeakyReLU(0.2)   [Cout grid, parallel]
    cols, ho, wo = _im2col(h, 4, 2, 1)
    y = fused_conv_layer(cols, params["w2f"], params["p2"], use_bn=True)
    h = y.reshape(n, ho, wo, -1)

    # conv3 (4,2,1) + BN(train) + LeakyReLU(0.2)   [Cout grid, parallel]
    cols, ho, wo = _im2col(h, 4, 2, 1)
    y = fused_conv_layer(cols, params["w3f"], params["p3"], use_bn=True)
    h = y.reshape(n, ho, wo, -1)

    # conv4 (4,1,0) + sigmoid: Cout=1, ~32 KFLOP -> overhead-dominated as a
    # pallas_call, so compute it with plain jnp inside the jit (per review).
    cols, ho, wo = _im2col(h, 4, 1, 0)
    logits = jnp.dot(cols, params["w4f"], preferred_element_type=jnp.float32)
    logits = logits + params["b4"][None, :]
    out = jax.nn.sigmoid(logits).reshape(n, ho, wo, 1)
    return jnp.transpose(out, (0, 3, 1, 2)).astype(jnp.float32)  # NHWC -> NCHW


# ---------------------------------- main ----------------------------------- #

if __name__ == "__main__":
    key = jax.random.PRNGKey(0)
    pkey, xkey = jax.random.split(key)

    d, channels = 128, 1
    params = init_params(pkey, d=d, channels=channels)

    # Small shapes: batch=2, channels=1, 32x32 image -> output (2, 1, 1, 1)
    x = jax.random.normal(xkey, (2, channels, 32, 32), dtype=jnp.float32)

    out = discriminator_forward(x, params)
    out = jax.block_until_ready(out)

    assert out.shape == (2, 1, 1, 1), out.shape
    assert out.dtype == jnp.float32
    assert bool(jnp.all(jnp.isfinite(out)))
    assert bool(jnp.all((out >= 0.0) & (out <= 1.0)))  # sigmoid range
    print("KERNEL_OK")
</pallas_src>

<mosaic_0001>
module attributes {stable_mosaic.version = 11 : i64} {
  func.func @_fused_layer_kernel(%arg0: i32, %arg1: memref<512x16xbf16, #tpu.memory_space<vmem>>, %arg2: memref<16x64xbf16, #tpu.memory_space<vmem>>, %arg3: memref<1x64xf32, #tpu.memory_space<vmem>>, %arg4: memref<512x64xbf16, #tpu.memory_space<vmem>>) attributes {dimension_semantics = [#tpu.dimension_semantics<parallel>], iteration_bounds = array<i64: 1>, scalar_prefetch = 0 : i64, scratch_operands = 0 : i64, tpu.core_type = #tpu.core_type<tc>, window_params = [{pipeline_mode = #tpu.pipeline_mode<synchronous>, transform_indices = @transform_0, window_bounds = array<i64: 512, 16>}, {transform_indices = @transform_1, window_bounds = array<i64: 16, 64>}, {transform_indices = @transform_2, window_bounds = array<i64: 1, 64>}, {transform_indices = @transform_3, window_bounds = array<i64: 512, 64>}]} {
    %c0 = arith.constant 0 : index
    %c0_0 = arith.constant 0 : index
    %0 = vector.load %arg1[%c0, %c0_0] : memref<512x16xbf16, #tpu.memory_space<vmem>>, vector<512x16xbf16>
    %c0_1 = arith.constant 0 : index
    %c0_2 = arith.constant 0 : index
    %1 = vector.load %arg2[%c0_1, %c0_2] : memref<16x64xbf16, #tpu.memory_space<vmem>>, vector<16x64xbf16>
    %cst = arith.constant dense<0.000000e+00> : vector<512x64xf32>
    %2 = tpu.matmul %0, %1, %cst {dimension_numbers = #tpu.dot_dimension_numbers<[1], [0], [0], [1], [0, 0, 1, 1], [], []>} : vector<512x16xbf16>, vector<16x64xbf16>, vector<512x64xf32> -> vector<512x64xf32>
    %c0_3 = arith.constant 0 : index
    %c0_4 = arith.constant 0 : index
    %3 = vector.load %arg3[%c0_3, %c0_4] : memref<1x64xf32, #tpu.memory_space<vmem>>, vector<1x64xf32>
    %4 = vector.broadcast %3 : vector<1x64xf32> to vector<512x64xf32>
    %5 = arith.addf %2, %4 : vector<512x64xf32>
    %cst_5 = arith.constant 0.000000e+00 : f32
    %6 = vector.broadcast %cst_5 : f32 to vector<512x64xf32>
    %7 = arith.cmpf oge, %5, %6 : vector<512x64xf32>
    %cst_6 = arith.constant 2.000000e-01 : f32
    %8 = vector.broadcast %cst_6 : f32 to vector<512x64xf32>
    %9 = arith.mulf %8, %5 : vector<512x64xf32>
    %10 = arith.select %7, %5, %9 : vector<512x64xi1>, vector<512x64xf32>
    %11 = arith.truncf %10 : vector<512x64xf32> to vector<512x64xbf16>
    %c0_7 = arith.constant 0 : index
    %c0_8 = arith.constant 0 : index
    %12 = vector.load %arg4[%c0_7, %c0_8] : memref<512x64xbf16, #tpu.memory_space<vmem>>, vector<512x64xbf16>
    tpu.vector_store %arg4[%c0_7, %c0_8], %11 {strides = array<i32>} : memref<512x64xbf16, #tpu.memory_space<vmem>>, vector<512x64xbf16>,
    return
  }
  func.func @transform_0(%arg0: i32) -> (i32, i32) {
    %c0_i32 = arith.constant 0 : i32
    %c0_i32_0 = arith.constant 0 : i32
    %c0_i32_1 = arith.constant 0 : i32
    return %c0_i32, %c0_i32_0 : i32, i32
  }
  func.func @transform_1(%arg0: i32) -> (i32, i32) {
    %c0_i32 = arith.constant 0 : i32
    %c0_i32_0 = arith.constant 0 : i32
    return %c0_i32, %arg0 : i32, i32
  }
  func.func @transform_2(%arg0: i32) -> (i32, i32) {
    %c0_i32 = arith.constant 0 : i32
    %c0_i32_0 = arith.constant 0 : i32
    return %c0_i32, %arg0 : i32, i32
  }
  func.func @transform_3(%arg0: i32) -> (i32, i32) {
    %c0_i32 = arith.constant 0 : i32
    %c0_i32_0 = arith.constant 0 : i32
    return %c0_i32, %arg0 : i32, i32
  }
}

module attributes {stable_mosaic.version = 11 : i64} {
  func.func @_fused_layer_kernel(%arg0: i32, %arg1: memref<128x1024xbf16, #tpu.memory_space<vmem>>, %arg2: memref<1024x128xbf16, #tpu.memory_space<vmem>>, %arg3: memref<3x128xf32, #tpu.memory_space<vmem>>, %arg4: memref<128x128xbf16, #tpu.memory_space<vmem>>) attributes {dimension_semantics = [#tpu.dimension_semantics<parallel>], iteration_bounds = array<i64: 2>, scalar_prefetch = 0 : i64, scratch_operands = 0 : i64, tpu.core_type = #tpu.core_type<tc>, window_params = [{pipeline_mode = #tpu.pipeline_mode<synchronous>, transform_indices = @transform_0, window_bounds = array<i64: 128, 1024>}, {transform_indices = @transform_1, window_bounds = array<i64: 1024, 128>}, {transform_indices = @transform_2, window_bounds = array<i64: 3, 128>}, {transform_indices = @transform_3, window_bounds = array<i64: 128, 128>}]} {
    %c0 = arith.constant 0 : index
    %c0_0 = arith.constant 0 : index
    %0 = vector.load %arg1[%c0, %c0_0] : memref<128x1024xbf16, #tpu.memory_space<vmem>>, vector<128x1024xbf16>
    %c0_1 = arith.constant 0 : index
    %c0_2 = arith.constant 0 : index
    %1 = vector.load %arg2[%c0_1, %c0_2] : memref<1024x128xbf16, #tpu.memory_space<vmem>>, vector<1024x128xbf16>
    %cst = arith.constant dense<0.000000e+00> : vector<128x128xf32>
    %2 = tpu.matmul %0, %1, %cst {dimension_numbers = #tpu.dot_dimension_numbers<[1], [0], [0], [1], [0, 0, 1, 1], [], []>} : vector<128x1024xbf16>, vector<1024x128xbf16>, vector<128x128xf32> -> vector<128x128xf32>
    %c0_3 = arith.constant 0 : index
    %c0_4 = arith.constant 0 : index
    %3 = vector.load %arg3[%c0_3, %c0_4] : memref<3x128xf32, #tpu.memory_space<vmem>>, vector<3x128xf32>
    %4 = vector.extract_strided_slice %3 {offsets = [0, 0], sizes = [1, 128], strides = [1, 1]} : vector<3x128xf32> to vector<1x128xf32>
    %5 = vector.broadcast %4 : vector<1x128xf32> to vector<128x128xf32>
    %6 = arith.addf %2, %5 : vector<128x128xf32>
    %cst_5 = arith.constant dense<0.000000e+00> : vector<128xf32>
    %7 = vector.multi_reduction <add>, %6, %cst_5 [0] : vector<128x128xf32> to vector<128xf32>
    %8 = vector.shape_cast %7 : vector<128xf32> to vector<1x128xf32>
    %cst_6 = arith.constant 1.280000e+02 : f32
    %9 = vector.broadcast %cst_6 : f32 to vector<1x128xf32>
    %10 = arith.divf %8, %9 : vector<1x128xf32>
    %11 = arith.mulf %6, %6 : vector<128x128xf32>
    %cst_7 = arith.constant dense<0.000000e+00> : vector<128xf32>
    %12 = vector.multi_reduction <add>, %11, %cst_7 [0] : vector<128x128xf32> to vector<128xf32>
    %13 = vector.shape_cast %12 : vector<128xf32> to vector<1x128xf32>
    %cst_8 = arith.constant 1.280000e+02 : f32
    %14 = vector.broadcast %cst_8 : f32 to vector<1x128xf32>
    %15 = arith.divf %13, %14 : vector<1x128xf32>
    %16 = arith.mulf %10, %10 : vector<1x128xf32>
    %17 = arith.subf %15, %16 : vector<1x128xf32>
    %cst_9 = arith.constant 0.000000e+00 : f32
    %18 = vector.broadcast %cst_9 : f32 to vector<1x128xf32>
    %19 = arith.maximumf %17, %18 : vector<1x128xf32>
    %20 = vector.broadcast %10 : vector<1x128xf32> to vector<128x128xf32>
    %21 = arith.subf %6, %20 : vector<128x128xf32>
    %cst_10 = arith.constant 9.99999974E-6 : f32
    %22 = vector.broadcast %cst_10 : f32 to vector<1x128xf32>
    %23 = arith.addf %19, %22 : vector<1x128xf32>
    %24 = math.rsqrt %23 : vector<1x128xf32>
    %25 = vector.broadcast %24 : vector<1x128xf32> to vector<128x128xf32>
    %26 = arith.mulf %21, %25 : vector<128x128xf32>
    %27 = vector.extract_strided_slice %3 {offsets = [1, 0], sizes = [1, 128], strides = [1, 1]} : vector<3x128xf32> to vector<1x128xf32>
    %28 = vector.broadcast %27 : vector<1x128xf32> to vector<128x128xf32>
    %29 = arith.mulf %26, %28 : vector<128x128xf32>
    %30 = vector.extract_strided_slice %3 {offsets = [2, 0], sizes = [1, 128], strides = [1, 1]} : vector<3x128xf32> to vector<1x128xf32>
    %31 = vector.broadcast %30 : vector<1x128xf32> to vector<128x128xf32>
    %32 = arith.addf %29, %31 : vector<128x128xf32>
    %cst_11 = arith.constant 0.000000e+00 : f32
    %33 = vector.broadcast %cst_11 : f32 to vector<128x128xf32>
    %34 = arith.cmpf oge, %32, %33 : vector<128x128xf32>
    %cst_12 = arith.constant 2.000000e-01 : f32
    %35 = vector.broadcast %cst_12 : f32 to vector<128x128xf32>
    %36 = arith.mulf %35, %32 : vector<128x128xf32>
    %37 = arith.select %34, %32, %36 : vector<128x128xi1>, vector<128x128xf32>
    %38 = arith.truncf %37 : vector<128x128xf32> to vector<128x128xbf16>
    %c0_13 = arith.constant 0 : index
    %c0_14 = arith.constant 0 : index
    %39 = vector.load %arg4[%c0_13, %c0_14] : memref<128x128xbf16, #tpu.memory_space<vmem>>, vector<128x128xbf16>
    tpu.vector_store %arg4[%c0_13, %c0_14], %38 {strides = array<i32>} : memref<128x128xbf16, #tpu.memory_space<vmem>>, vector<128x128xbf16>,
    return
  }
  func.func @transform_0(%arg0: i32) -> (i32, i32) {
    %c0_i32 = arith.constant 0 : i32
    %c0_i32_0 = arith.constant 0 : i32
    %c0_i32_1 = arith.constant 0 : i32
    return %c0_i32, %c0_i32_0 : i32, i32
  }
  func.func @transform_1(%arg0: i32) -> (i32, i32) {
    %c0_i32 = arith.constant 0 : i32
    %c0_i32_0 = arith.constant 0 : i32
    return %c0_i32, %arg0 : i32, i32
  }
  func.func @transform_2(%arg0: i32) -> (i32, i32) {
    %c0_i32 = arith.constant 0 : i32
    %c0_i32_0 = arith.constant 0 : i32
    return %c0_i32, %arg0 : i32, i32
  }
  func.func @transform_3(%arg0: i32) -> (i32, i32) {
    %c0_i32 = arith.constant 0 : i32
    %c0_i32_0 = arith.constant 0 : i32
    return %c0_i32, %arg0 : i32, i32
  }
}

module attributes {stable_mosaic.version = 11 : i64} {
  func.func @_fused_layer_kernel(%arg0: i32, %arg1: memref<32x4096xbf16, #tpu.memory_space<vmem>>, %arg2: memref<4096x128xbf16, #tpu.memory_space<vmem>>, %arg3: memref<3x128xf32, #tpu.memory_space<vmem>>, %arg4: memref<32x128xbf16, #tpu.memory_space<vmem>>) attributes {dimension_semantics = [#tpu.dimension_semantics<parallel>], iteration_bounds = array<i64: 4>, scalar_prefetch = 0 : i64, scratch_operands = 0 : i64, tpu.core_type = #tpu.core_type<tc>, window_params = [{pipeline_mode = #tpu.pipeline_mode<synchronous>, transform_indices = @transform_0, window_bounds = array<i64: 32, 4096>}, {transform_indices = @transform_1, window_bounds = array<i64: 4096, 128>}, {transform_indices = @transform_2, window_bounds = array<i64: 3, 128>}, {transform_indices = @transform_3, window_bounds = array<i64: 32, 128>}]} {
    %c0 = arith.constant 0 : index
    %c0_0 = arith.constant 0 : index
    %0 = vector.load %arg1[%c0, %c0_0] : memref<32x4096xbf16, #tpu.memory_space<vmem>>, vector<32x4096xbf16>
    %c0_1 = arith.constant 0 : index
    %c0_2 = arith.constant 0 : index
    %1 = vector.load %arg2[%c0_1, %c0_2] : memref<4096x128xbf16, #tpu.memory_space<vmem>>, vector<4096x128xbf16>
    %cst = arith.constant dense<0.000000e+00> : vector<32x128xf32>
    %2 = tpu.matmul %0, %1, %cst {dimension_numbers = #tpu.dot_dimension_numbers<[1], [0], [0], [1], [0, 0, 1, 1], [], []>} : vector<32x4096xbf16>, vector<4096x128xbf16>, vector<32x128xf32> -> vector<32x128xf32>
    %c0_3 = arith.constant 0 : index
    %c0_4 = arith.constant 0 : index
    %3 = vector.load %arg3[%c0_3, %c0_4] : memref<3x128xf32, #tpu.memory_space<vmem>>, vector<3x128xf32>
    %4 = vector.extract_strided_slice %3 {offsets = [0, 0], sizes = [1, 128], strides = [1, 1]} : vector<3x128xf32> to vector<1x128xf32>
    %5 = vector.broadcast %4 : vector<1x128xf32> to vector<32x128xf32>
    %6 = arith.addf %2, %5 : vector<32x128xf32>
    %cst_5 = arith.constant dense<0.000000e+00> : vector<128xf32>
    %7 = vector.multi_reduction <add>, %6, %cst_5 [0] : vector<32x128xf32> to vector<128xf32>
    %8 = vector.shape_cast %7 : vector<128xf32> to vector<1x128xf32>
    %cst_6 = arith.constant 3.200000e+01 : f32
    %9 = vector.broadcast %cst_6 : f32 to vector<1x128xf32>
    %10 = arith.divf %8, %9 : vector<1x128xf32>
    %11 = arith.mulf %6, %6 : vector<32x128xf32>
    %cst_7 = arith.constant dense<0.000000e+00> : vector<128xf32>
    %12 = vector.multi_reduction <add>, %11, %cst_7 [0] : vector<32x128xf32> to vector<128xf32>
    %13 = vector.shape_cast %12 : vector<128xf32> to vector<1x128xf32>
    %cst_8 = arith.constant 3.200000e+01 : f32
    %14 = vector.broadcast %cst_8 : f32 to vector<1x128xf32>
    %15 = arith.divf %13, %14 : vector<1x128xf32>
    %16 = arith.mulf %10, %10 : vector<1x128xf32>
    %17 = arith.subf %15, %16 : vector<1x128xf32>
    %cst_9 = arith.constant 0.000000e+00 : f32
    %18 = vector.broadcast %cst_9 : f32 to vector<1x128xf32>
    %19 = arith.maximumf %17, %18 : vector<1x128xf32>
    %20 = vector.broadcast %10 : vector<1x128xf32> to vector<32x128xf32>
    %21 = arith.subf %6, %20 : vector<32x128xf32>
    %cst_10 = arith.constant 9.99999974E-6 : f32
    %22 = vector.broadcast %cst_10 : f32 to vector<1x128xf32>
    %23 = arith.addf %19, %22 : vector<1x128xf32>
    %24 = math.rsqrt %23 : vector<1x128xf32>
    %25 = vector.broadcast %24 : vector<1x128xf32> to vector<32x128xf32>
    %26 = arith.mulf %21, %25 : vector<32x128xf32>
    %27 = vector.extract_strided_slice %3 {offsets = [1, 0], sizes = [1, 128], strides = [1, 1]} : vector<3x128xf32> to vector<1x128xf32>
    %28 = vector.broadcast %27 : vector<1x128xf32> to vector<32x128xf32>
    %29 = arith.mulf %26, %28 : vector<32x128xf32>
    %30 = vector.extract_strided_slice %3 {offsets = [2, 0], sizes = [1, 128], strides = [1, 1]} : vector<3x128xf32> to vector<1x128xf32>
    %31 = vector.broadcast %30 : vector<1x128xf32> to vector<32x128xf32>
    %32 = arith.addf %29, %31 : vector<32x128xf32>
    %cst_11 = arith.constant 0.000000e+00 : f32
    %33 = vector.broadcast %cst_11 : f32 to vector<32x128xf32>
    %34 = arith.cmpf oge, %32, %33 : vector<32x128xf32>
    %cst_12 = arith.constant 2.000000e-01 : f32
    %35 = vector.broadcast %cst_12 : f32 to vector<32x128xf32>
    %36 = arith.mulf %35, %32 : vector<32x128xf32>
    %37 = arith.select %34, %32, %36 : vector<32x128xi1>, vector<32x128xf32>
    %38 = arith.truncf %37 : vector<32x128xf32> to vector<32x128xbf16>
    %c0_13 = arith.constant 0 : index
    %c0_14 = arith.constant 0 : index
    %39 = vector.load %arg4[%c0_13, %c0_14] : memref<32x128xbf16, #tpu.memory_space<vmem>>, vector<32x128xbf16>
    tpu.vector_store %arg4[%c0_13, %c0_14], %38 {strides = array<i32>} : memref<32x128xbf16, #tpu.memory_space<vmem>>, vector<32x128xbf16>,
    return
  }
  func.func @transform_0(%arg0: i32) -> (i32, i32) {
    %c0_i32 = arith.constant 0 : i32
    %c0_i32_0 = arith.constant 0 : i32
    %c0_i32_1 = arith.constant 0 : i32
    return %c0_i32, %c0_i32_0 : i32, i32
  }
  func.func @transform_1(%arg0: i32) -> (i32, i32) {
    %c0_i32 = arith.constant 0 : i32
    %c0_i32_0 = arith.constant 0 : i32
    return %c0_i32, %arg0 : i32, i32
  }
  func.func @transform_2(%arg0: i32) -> (i32, i32) {
    %c0_i32 = arith.constant 0 : i32
    %c0_i32_0 = arith.constant 0 : i32
    return %c0_i32, %arg0 : i32, i32
  }
  func.func @transform_3(%arg0: i32) -> (i32, i32) {
    %c0_i32 = arith.constant 0 : i32
    %c0_i32_0 = arith.constant 0 : i32
    return %c0_i32, %arg0 : i32, i32
  }
}

</mosaic_0001>

<bundles_post_ra>
// kernel: discriminator_forward.3
= control target key start
LH: loop header
LB: loop body
LE: loop exit
PB: predicated region body
PF: predicated region fallthrough
CT: control target
= control target key end

     0   :  { %8 = vsyncpa [#allocation3], 0  ;;  %s2142_s0 = inlined_call_operand.vmem [shape: bf16[512,16], index: 0, kind: input, shape index: {}]   ;;  %s2143_s1 = inlined_call_operand.hbm [shape: bf16[16,64], index: 1, kind: input, shape index: {}]   ;;  %s2144_s2 = inlined_call_operand.hbm [shape: f32[1,64], index: 2, kind: input, shape index: {}]   ;;  %s2145_s3 = inlined_call_operand.vmem [shape: bf16[512,64], index: 3, kind: output, shape index: {}]  }
   0x1   :  { %9 = vsyncpa [#allocation5], 0  ;;  %s1565_s12 = smov [#allocation2]   ;;  %s1517_s16 = scalar_lea.hbm %s2143_s1, 128 }
   0x2   :  { %s17_s13 = sshll.u32 %s1565_s12, 4  ;;  %p1518_p0 = scmp.ne.s32.totalorder %s2143_s1, %s1517_s16  ;;  %s18_s13 = int_to_ptr.vmem [resolvable:$true] %s17_s13 }
   0x3   :  { %p1521_p1 = scmp.lt.u32.totalorder %s1517_s16, %s2143_s1 }
   0x5   :  { %p1523_p2 = pnand %p1521_p1, %p1518_p0 }
   0x7   :  { %1526 = shalt.err (!%p1523_p2)
}
   0x8   :  { %s1527_s21 = scalar_lea.vmem %s18_s13, 128  ;;  %p1532_p4 = scmp.lt.s32.totalorder %s18_s13, %s18_s13 }
   0x9   :  { %p1528_p3 = scmp.ne.s32.totalorder %s18_s13, %s1527_s21  ;;  %p1533_p5 = scmp.lt.s32.totalorder %s1527_s21, %s1527_s21 }
   0xb   :  { %p1534_p6 = por %p1533_p5, %p1532_p4 }
   0xd   :  { %p1535_p7 = pnand %p1534_p6, %p1528_p3 }
   0xf   :  { %1538 = shalt.err (!%p1535_p7)
}
  0x10   :  { %s1566_s22 = smov 64   ;;  %s1567_s23 = smov 4  }
  0x11   :  { %23 = dma.hbm_to_vmem [thread:$0]  %s2143_s1, 128, %s18_s13, [#allocation3], %s1566_s22, %s1566_s22, %s1567_s23  }
  0x12   :  { %s1568_s26 = smov [#allocation4]   ;;  %s1539_s30 = scalar_lea.hbm %s2144_s2, 16 }
  0x13   :  { %s30_s27 = sshll.u32 %s1568_s26, 4  ;;  %p1540_p8 = scmp.ne.s32.totalorder %s2144_s2, %s1539_s30  ;;  %s31_s27 = int_to_ptr.vmem [resolvable:$true] %s30_s27 }
  0x14   :  { %p1543_p9 = scmp.lt.u32.totalorder %s1539_s30, %s2144_s2 }
  0x16   :  { %p1545_p10 = pnand %p1543_p9, %p1540_p8 }
  0x18   :  { %1548 = shalt.err (!%p1545_p10)
}
  0x19   :  { %s1549_s8 = scalar_lea.vmem %s31_s27, 16  ;;  %s1553_s1 = scalar_lea.vmem %s31_s27, 32 }
  0x1a   :  { %p1550_p11 = scmp.ne.s32.totalorder %s31_s27, %s1549_s8  ;;  %p1554_p12 = scmp.lt.s32.totalorder %s31_s27, %s31_s27 }
  0x1b   :  { %p1555_p13 = scmp.lt.s32.totalorder %s1553_s1, %s1549_s8 }
  0x1d   :  { %p1556_p0 = por %p1555_p13, %p1554_p12 }
  0x1f   :  { %p1557_p1 = pnand %p1556_p0, %p1550_p11 }
  0x21   :  { %1560 = shalt.err (!%p1557_p1)
}
  0x22   :  { %33 = dma.hbm_to_vmem [thread:$0]  %s2144_s2, 16, %s31_s27, [#allocation5]  }
  0x23   :  { %1561 = dma.done.wait [#allocation3], 128  }
  0x24   :  { %1562 = vsyncadd [#allocation3], 4294967168 }
  0x25   :  { %1563 = dma.done.wait [#allocation5], 16  }
  0x26   :  { %1564 = vsyncadd [#allocation5], 4294967280  ;;  %v1484_v0 = vld [vmem:[#allocation2] sm:$0xff]   ;;  %vm280_vm0 = vcmask 130048   ;;  %v1487_v3 = vld [vmem:[%s2142_s0 + $0x8] sm:$0xff]   ;;  %vm1114_vm1 = vcmask 519168  }
  0x27   :  { %v1485_v1 = vld [vmem:[%s2142_s0] sm:$0xff]   ;;  %1412 = vmatprep.subr.bf16.mxu0 %v1484_v0  ;;  %1478 = vmatprep.subr.bf16.mxu1 %v1484_v0  ;;  %v1488_v4 = vld [vmem:[%s2142_s0 + $0x88] sm:$0xff]   ;;  %v1489_v5 = vld [vmem:[%s2142_s0 + $0x10] sm:$0xff]  }
  0x28   :  { %v1486_v2 = vld [vmem:[%s2142_s0 + $0x80] sm:$0xff]   ;;  %1413 = vmatpush3.bf16.msra.mxu0 %v1484_v0  ;;  %1479 = vmatpush3.bf16.msra.mxu1 %v1484_v0  ;;  %v1490_v6 = vld [vmem:[%s2142_s0 + $0x90] sm:$0xff]   ;;  %v1491_v7 = vld [vmem:[%s2142_s0 + $0x18] sm:$0xff]  }
  0x29   :  { %1414 = vmatprep.mubr.msk.bf16.mxu0 %vm280_vm0, %v1485_v1  ;;  %1446 = vmatprep.mubr.msk.bf16.mxu1 %vm280_vm0, %v1486_v2  ;;  %v1492_v8 = vld [vmem:[%s2142_s0 + $0x98] sm:$0xff]   ;;  %v1493_v9 = vld [vmem:[%s2142_s0 + $0x20] sm:$0xff]   ;;  %v1495_v11 = vld [vmem:[%s2142_s0 + $0x28] sm:$0xff]  }
  0x2a   :  { %v1494_v10 = vld [vmem:[%s2142_s0 + $0xa0] sm:$0xff]   ;;  %v1496_v12 = vld [vmem:[%s2142_s0 + $0xa8] sm:$0xff]   ;;  %v1497_v13 = vld [vmem:[%s2142_s0 + $0x30] sm:$0xff]  }
  0x2b   :  { %1415 = vmatmul.mubr.msk.bf16.vlgmr.msra.gmra.mrb[0].mxu0 %vm280_vm0, %v1487_v3  ;;  %1447 = vmatmul.mubr.msk.bf16.vlgmr.msra.gmra.mrb[0].mxu1 %vm280_vm0, %v1488_v4  ;;  %v1498_v14 = vld [vmem:[%s2142_s0 + $0xb0] sm:$0xff]   ;;  %v1499_v15 = vld [vmem:[%s2142_s0 + $0x38] sm:$0xff]   ;;  %v1501_v17 = vld [vmem:[%s2142_s0 + $0x40] sm:$0xff]  }
  0x2c   :  { %1418 = vmatprep.mubr.msk.bf16.mxu0 %vm280_vm0, %v1489_v5  ;;  %1450 = vmatprep.mubr.msk.bf16.mxu1 %vm280_vm0, %v1490_v6  ;;  %v1500_v16 = vld [vmem:[%s2142_s0 + $0xb8] sm:$0xff]   ;;  %v1502_v18 = vld [vmem:[%s2142_s0 + $0xc0] sm:$0xff]   ;;  %v1503_v19 = vld [vmem:[%s2142_s0 + $0x48] sm:$0xff]  }
  0x2d   :  { %v1504_v20 = vld [vmem:[%s2142_s0 + $0xc8] sm:$0xff]   ;;  %v1505_v21 = vld [vmem:[%s2142_s0 + $0x50] sm:$0xff]   ;;  %v1507_v23 = vld [vmem:[%s2142_s0 + $0x58] sm:$0xff]  }
  0x2e   :  { %v1506_v22 = vld [vmem:[%s2142_s0 + $0xd0] sm:$0xff]   ;;  %v1508_v24 = vld [vmem:[%s2142_s0 + $0xd8] sm:$0xff]   ;;  %v1509_v25 = vld [vmem:[%s2142_s0 + $0x60] sm:$0xff]  }
  0x2f   :  { %v1510_v26 = vld [vmem:[%s2142_s0 + $0xe0] sm:$0xff]   ;;  %v1511_v27 = vld [vmem:[%s2142_s0 + $0x68] sm:$0xff]   ;;  %v1513_v29 = vld [vmem:[%s2142_s0 + $0x70] sm:$0xff]  }
  0x30   :  { %v1512_v28 = vld [vmem:[%s2142_s0 + $0xe8] sm:$0xff]   ;;  %v1514_v30 = vld [vmem:[%s2142_s0 + $0xf0] sm:$0xff]   ;;  %v1515_v31 = vld [vmem:[%s2142_s0 + $0x78] sm:$0xff]  }
  0x31   :  { %v1516_v32 = vld [vmem:[%s2142_s0 + $0xf8] sm:$0xff]   ;;  %v1741_v33 = vld [vmem:[#allocation4] ss:$0 sm:$0xff] }
  0x33   :  { %1419 = vmatmul.mubr.msk.bf16.gmra.mrb[4].mxu0 %vm280_vm0, %v1491_v7  ;;  %1451 = vmatmul.mubr.msk.bf16.gmra.mrb[4].mxu1 %vm280_vm0, %v1492_v8 }
  0x34   :  { %1422 = vmatprep.mubr.msk.bf16.mxu0 %vm280_vm0, %v1493_v9  ;;  %1454 = vmatprep.mubr.msk.bf16.mxu1 %vm280_vm0, %v1494_v10 }
  0x3b   :  { %1423 = vmatmul.mubr.msk.bf16.gmra.mrb[8].mxu0 %vm280_vm0, %v1495_v11  ;;  %1455 = vmatmul.mubr.msk.bf16.gmra.mrb[8].mxu1 %vm280_vm0, %v1496_v12 }
  0x3c   :  { %1426 = vmatprep.mubr.msk.bf16.mxu0 %vm280_vm0, %v1497_v13  ;;  %1458 = vmatprep.mubr.msk.bf16.mxu1 %vm280_vm0, %v1498_v14 }
  0x43   :  { %1427 = vmatmul.mubr.msk.bf16.gmra.mrb[12].mxu0 %vm280_vm0, %v1499_v15  ;;  %1459 = vmatmul.mubr.msk.bf16.gmra.mrb[12].mxu1 %vm280_vm0, %v1500_v16 }
  0x44   :  { %1430 = vmatprep.mubr.msk.bf16.mxu0 %vm280_vm0, %v1501_v17  ;;  %1462 = vmatprep.mubr.msk.bf16.mxu1 %vm280_vm0, %v1502_v18 }
  0x4b   :  { %1431 = vmatmul.mubr.msk.bf16.gmra.mrb[16].mxu0 %vm280_vm0, %v1503_v19  ;;  %1463 = vmatmul.mubr.msk.bf16.gmra.mrb[16].mxu1 %vm280_vm0, %v1504_v20 }
  0x4c   :  { %1434 = vmatprep.mubr.msk.bf16.mxu0 %vm280_vm0, %v1505_v21  ;;  %1466 = vmatprep.mubr.msk.bf16.mxu1 %vm280_vm0, %v1506_v22 }
  0x53   :  { %1435 = vmatmul.mubr.msk.bf16.gmra.mrb[20].mxu0 %vm280_vm0, %v1507_v23  ;;  %1467 = vmatmul.mubr.msk.bf16.gmra.mrb[20].mxu1 %vm280_vm0, %v1508_v24 }
  0x54   :  { %1438 = vmatprep.mubr.msk.bf16.mxu0 %vm280_vm0, %v1509_v25  ;;  %1470 = vmatprep.mubr.msk.bf16.mxu1 %vm280_vm0, %v1510_v26 }
  0x5b   :  { %1439 = vmatmul.mubr.msk.bf16.gmra.mrb[24].mxu0 %vm280_vm0, %v1511_v27  ;;  %1471 = vmatmul.mubr.msk.bf16.gmra.mrb[24].mxu1 %vm280_vm0, %v1512_v28 }
  0x5c   :  { %1442 = vmatprep.mubr.msk.bf16.mxu0 %vm280_vm0, %v1513_v29  ;;  %1474 = vmatprep.mubr.msk.bf16.mxu1 %vm280_vm0, %v1514_v30 }
  0x63   :  { %1443 = vmatmul.mubr.msk.bf16.gmra.mrb[28].mxu0 %vm280_vm0, %v1515_v31  ;;  %1475 = vmatmul.mubr.msk.bf16.gmra.mrb[28].mxu1 %vm280_vm0, %v1516_v32 }
  0xfe   :  { %v1416_v34 = vpop.f32.mrb[0].mxu0  ;;  %v1448_v35 = vpop.f32.mrb[0].mxu1 }
  0xff   :  { %v420_v36 = vadd.f32 %v1416_v34, %v1741_v33  ;;  %v548_v37 = vadd.f32 %v1448_v35, %v1741_v33  ;;  %v411_v38 = vpop.f32.mrb[1].mxu0  ;;  %v539_v39 = vpop.f32.mrb[1].mxu1 }
 0x100   :  { %v412_v40 = vadd.f32 %v1741_v33, %v411_v38  ;;  %v540_v41 = vadd.f32 %v1741_v33, %v539_v39  ;;  %v1417_v42 = vpop.f32.mrb[2].mxu0  ;;  %v1449_v43 = vpop.f32.mrb[2].mxu1 }
 0x101   :  { %vm668_vm2 = vcmp.ge.f32.partialorder %v420_v36, 0.0  ;;  %v732_v44 = vmul.f32 0.2, %v420_v36  ;;  %vm700_vm3 = vcmp.ge.f32.partialorder %v548_v37, 0.0  ;;  %v764_v45 = vmul.f32 0.2, %v548_v37 }
 0x102   :  { %vm666_vm4 = vcmp.ge.f32.partialorder %v412_v40, 0.0  ;;  %v730_v46 = vmul.f32 0.2, %v412_v40  ;;  %vm698_vm5 = vcmp.ge.f32.partialorder %v540_v41, 0.0  ;;  %v762_v47 = vmul.f32 0.2, %v540_v41 }
 0x103   :  { %v796_v48 = vsel %vm668_vm2, %v420_v36, %v732_v44  ;;  %v828_v49 = vsel %vm700_vm3, %v548_v37, %v764_v45  ;;  %v423_v50 = vadd.f32 %v1417_v42, %v1741_v33  ;;  %v551_v51 = vadd.f32 %v1449_v43, %v1741_v33  ;;  %v414_v52 = vpop.f32.mrb[3].mxu0  ;;  %v542_v53 = vpop.f32.mrb[3].mxu1 }
 0x104   :  { %v1317_v54 = vpack.c.bf16 %v796_v48, %v796_v48  ;;  %v1349_v55 = vpack.c.bf16 %v828_v49, %v828_v49  ;;  %v794_v56 = vsel %vm666_vm4, %v412_v40, %v730_v46  ;;  %v826_v57 = vsel %vm698_vm5, %v540_v41, %v762_v47 }
 0x105   :  { %v1315_v58 = vpack.c.bf16 %v794_v56, %v794_v56  ;;  %v1347_v59 = vpack.c.bf16 %v826_v57, %v826_v57  ;;  %vm669_vm6 = vcmp.ge.f32.partialorder %v423_v50, 0.0  ;;  %v733_v60 = vmul.f32 0.2, %v423_v50 }
 0x106   :  { %1117 = vst.msk [vmem:[%s2145_s3 + $0x8] sm:$0xf] %vm1114_vm1, %v1317_v54  ;;  %1149 = vst.msk [vmem:[%s2145_s3 + $0x88] sm:$0xf] %vm1114_vm1, %v1349_v55  ;;  %vm701_vm7 = vcmp.ge.f32.partialorder %v551_v51, 0.0  ;;  %v415_v62 = vadd.f32 %v1741_v33, %v414_v52  ;;  %v543_v63 = vadd.f32 %v1741_v33, %v542_v53  ;;  %v1420_v0 = vpop.f32.mrb[4].mxu0 }
 0x107   :  { %v765_v61 = vmul.f32 0.2, %v551_v51  ;;  %v1452_v1 = vpop.f32.mrb[4].mxu1  ;;  %1115 = vst.msk [vmem:[%s2145_s3] sm:$0xf] %vm1114_vm1, %v1315_v58  ;;  %v797_v2 = vsel %vm669_vm6, %v423_v50, %v733_v60  ;;  %v436_v3 = vadd.f32 %v1420_v0, %v1741_v33  ;;  %v427_v5 = vpop.f32.mrb[5].mxu0 }
 0x108   :  { %1147 = vst.msk [vmem:[%s2145_s3 + $0x80] sm:$0xf] %vm1114_vm1, %v1347_v59  ;;  %v564_v4 = vadd.f32 %v1452_v1, %v1741_v33  ;;  %v555_v6 = vpop.f32.mrb[5].mxu1  ;;  %v1318_v7 = vpack.c.bf16 %v797_v2, %v797_v2  ;;  %vm667_vm8 = vcmp.ge.f32.partialorder %v415_v62, 0.0  ;;  %v731_v9 = vmul.f32 0.2, %v415_v62 }
 0x109   :  { %v829_v8 = vsel %vm701_vm7, %v551_v51, %v765_v61  ;;  %v1421_v10 = vpop.f32.mrb[6].mxu0  ;;  %v1453_v11 = vpop.f32.mrb[6].mxu1  ;;  %vm699_vm9 = vcmp.ge.f32.partialorder %v543_v63, 0.0  ;;  %v763_v13 = vmul.f32 0.2, %v543_v63  ;;  %vm672_vm10 = vcmp.ge.f32.partialorder %v436_v3, 0.0 }
 0x10a   :  { %v1350_v12 = vpack.c.bf16 %v829_v8, %v829_v8  ;;  %v430_v14 = vpop.f32.mrb[7].mxu0  ;;  %v558_v15 = vpop.f32.mrb[7].mxu1  ;;  %1118 = vst.msk [vmem:[%s2145_s3 + $0xc] sm:$0xf] %vm1114_vm1, %v1318_v7  ;;  %v795_v16 = vsel %vm667_vm8, %v415_v62, %v731_v9  ;;  %v736_v17 = vmul.f32 0.2, %v436_v3  ;;  %v428_v21 = vadd.f32 %v1741_v33, %v427_v5 }
 0x10b   :  { %vm704_vm11 = vcmp.ge.f32.partialorder %v564_v4, 0.0  ;;  %v768_v18 = vmul.f32 0.2, %v564_v4  ;;  %v1316_v19 = vpack.c.bf16 %v795_v16, %v795_v16  ;;  %v827_v20 = vsel %vm699_vm9, %v543_v63, %v763_v13 }
 0x10c   :  { %1150 = vst.msk [vmem:[%s2145_s3 + $0x8c] sm:$0xf] %vm1114_vm1, %v1350_v12  ;;  %v556_v22 = vadd.f32 %v1741_v33, %v555_v6  ;;  %v1348_v23 = vpack.c.bf16 %v827_v20, %v827_v20  ;;  %v800_v24 = vsel %vm672_vm10, %v436_v3, %v736_v17  ;;  %v439_v26 = vadd.f32 %v1421_v10, %v1741_v33 }
 0x10d   :  { %v832_v25 = vsel %vm704_vm11, %v564_v4, %v768_v18  ;;  %1116 = vst.msk [vmem:[%s2145_s3 + $0x4] sm:$0xf] %vm1114_vm1, %v1316_v19  ;;  %v1321_v27 = vpack.c.bf16 %v800_v24, %v800_v24  ;;  %vm670_vm12 = vcmp.ge.f32.partialorder %v428_v21, 0.0  ;;  %v734_v29 = vmul.f32 0.2, %v428_v21 }
 0x10e   :  { %v1353_v28 = vpack.c.bf16 %v832_v25, %v832_v25  ;;  %1148 = vst.msk [vmem:[%s2145_s3 + $0x84] sm:$0xf] %vm1114_vm1, %v1348_v23  ;;  %vm702_vm13 = vcmp.ge.f32.partialorder %v556_v22, 0.0  ;;  %v766_v30 = vmul.f32 0.2, %v556_v22  ;;  %vm673_vm14 = vcmp.ge.f32.partialorder %v439_v26, 0.0 }
 0x10f   :  { %v737_v31 = vmul.f32 0.2, %v439_v26  ;;  %1121 = vst.msk [vmem:[%s2145_s3 + $0x18] sm:$0xf] %vm1114_vm1, %v1321_v27  ;;  %v798_v32 = vsel %vm670_vm12, %v428_v21, %v734_v29  ;;  %v567_v34 = vadd.f32 %v1453_v11, %v1741_v33  ;;  %v431_v35 = vadd.f32 %v1741_v33, %v430_v14  ;;  %v1424_v37 = vpop.f32.mrb[8].mxu0  ;;  %v1456_v38 = vpop.f32.mrb[8].mxu1 }
 0x110   :  { %1153 = vst.msk [vmem:[%s2145_s3 + $0x98] sm:$0xf] %vm1114_vm1, %v1353_v28  ;;  %v559_v36 = vadd.f32 %v1741_v33, %v558_v15  ;;  %v1319_v39 = vpack.c.bf16 %v798_v32, %v798_v32  ;;  %v830_v40 = vsel %vm702_vm13, %v556_v22, %v766_v30  ;;  %v452_v42 = vadd.f32 %v1424_v37, %v1741_v33  ;;  %v443_v43 = vpop.f32.mrb[9].mxu0  ;;  %v571_v44 = vpop.f32.mrb[9].mxu1 }
 0x111   :  { %v801_v41 = vsel %vm673_vm14, %v439_v26, %v737_v31  ;;  %v1351_v45 = vpack.c.bf16 %v830_v40, %v830_v40  ;;  %vm705_vm15 = vcmp.ge.f32.partialorder %v567_v34, 0.0  ;;  %v769_v47 = vmul.f32 0.2, %v567_v34  ;;  %v1425_v48 = vpop.f32.mrb[10].mxu0  ;;  %v1457_v49 = vpop.f32.mrb[10].mxu1 }
 0x112   :  { %v1322_v46 = vpack.c.bf16 %v801_v41, %v801_v41  ;;  %1119 = vst.msk [vmem:[%s2145_s3 + $0x10] sm:$0xf] %vm1114_vm1, %v1319_v39  ;;  %vm671_vm0 = vcmp.ge.f32.partialorder %v431_v35, 0.0  ;;  %v735_v50 = vmul.f32 0.2, %v431_v35  ;;  %vm703_vm2 = vcmp.ge.f32.partialorder %v559_v36, 0.0 }
 0x113   :  { %v767_v51 = vmul.f32 0.2, %v559_v36  ;;  %1151 = vst.msk [vmem:[%s2145_s3 + $0x90] sm:$0xf] %vm1114_vm1, %v1351_v45  ;;  %v833_v52 = vsel %vm705_vm15, %v567_v34, %v769_v47  ;;  %vm676_vm3 = vcmp.ge.f32.partialorder %v452_v42, 0.0  ;;  %v580_v54 = vadd.f32 %v1456_v38, %v1741_v33  ;;  %v446_v55 = vpop.f32.mrb[11].mxu0 }
 0x114   :  { %1122 = vst.msk [vmem:[%s2145_s3 + $0x1c] sm:$0xf] %vm1114_vm1, %v1322_v46  ;;  %v740_v53 = vmul.f32 0.2, %v452_v42  ;;  %v574_v56 = vpop.f32.mrb[11].mxu1  ;;  %v1354_v57 = vpack.c.bf16 %v833_v52, %v833_v52  ;;  %v799_v58 = vsel %vm671_vm0, %v431_v35, %v735_v50  ;;  %v444_v60 = vadd.f32 %v1741_v33, %v443_v43 }
 0x115   :  { %v831_v59 = vsel %vm703_vm2, %v559_v36, %v767_v51  ;;  %v1320_v61 = vpack.c.bf16 %v799_v58, %v799_v58  ;;  %vm708_vm4 = vcmp.ge.f32.partialorder %v580_v54, 0.0  ;;  %v772_v1 = vmul.f32 0.2, %v580_v54 }
 0x116   :  { %v1352_v62 = vpack.c.bf16 %v831_v59, %v831_v59  ;;  %v804_v63 = vsel %vm676_vm3, %v452_v42, %v740_v53  ;;  %1154 = vst.msk [vmem:[%s2145_s3 + $0x9c] sm:$0xf] %vm1114_vm1, %v1354_v57  ;;  %vm674_vm5 = vcmp.ge.f32.partialorder %v444_v60, 0.0  ;;  %v738_v2 = vmul.f32 0.2, %v444_v60  ;;  %v1428_v3 = vpop.f32.mrb[12].mxu0 }
 0x117   :  { %v1325_v0 = vpack.c.bf16 %v804_v63, %v804_v63  ;;  %1120 = vst.msk [vmem:[%s2145_s3 + $0x14] sm:$0xf] %vm1114_vm1, %v1320_v61  ;;  %v572_v4 = vadd.f32 %v1741_v33, %v571_v44  ;;  %v455_v5 = vadd.f32 %v1425_v48, %v1741_v33  ;;  %v583_v6 = vadd.f32 %v1457_v49, %v1741_v33  ;;  %v1460_v8 = vpop.f32.mrb[12].mxu1  ;;  %v459_v9 = vpop.f32.mrb[13].mxu0 }
 0x118   :  { %1152 = vst.msk [vmem:[%s2145_s3 + $0x94] sm:$0xf] %vm1114_vm1, %v1352_v62  ;;  %v447_v7 = vadd.f32 %v1741_v33, %v446_v55  ;;  %v836_v10 = vsel %vm708_vm4, %v580_v54, %v772_v1  ;;  %v802_v11 = vsel %vm674_vm5, %v444_v60, %v738_v2  ;;  %v575_v12 = vadd.f32 %v1741_v33, %v574_v56  ;;  %v587_v14 = vpop.f32.mrb[13].mxu1  ;;  %v1429_v15 = vpop.f32.mrb[14].mxu0 }
 0x119   :  { %1125 = vst.msk [vmem:[%s2145_s3 + $0x28] sm:$0xf] %vm1114_vm1, %v1325_v0  ;;  %v468_v13 = vadd.f32 %v1428_v3, %v1741_v33  ;;  %v1357_v16 = vpack.c.bf16 %v836_v10, %v836_v10  ;;  %v1323_v17 = vpack.c.bf16 %v802_v11, %v802_v11  ;;  %vm706_vm6 = vcmp.ge.f32.partialorder %v572_v4, 0.0  ;;  %v1461_v19 = vpop.f32.mrb[14].mxu1  ;;  %v462_v20 = vpop.f32.mrb[15].mxu0 }
 0x11a   :  { %v770_v18 = vmul.f32 0.2, %v572_v4  ;;  %vm677_vm7 = vcmp.ge.f32.partialorder %v455_v5, 0.0  ;;  %v741_v21 = vmul.f32 0.2, %v455_v5  ;;  %vm709_vm8 = vcmp.ge.f32.partialorder %v583_v6, 0.0 }
 0x11b   :  { %v773_v22 = vmul.f32 0.2, %v583_v6  ;;  %1157 = vst.msk [vmem:[%s2145_s3 + $0xa8] sm:$0xf] %vm1114_vm1, %v1357_v16  ;;  %1123 = vst.msk [vmem:[%s2145_s3 + $0x20] sm:$0xf] %vm1114_vm1, %v1323_v17  ;;  %v596_v37 = vadd.f32 %v1460_v8, %v1741_v33  ;;  %v460_v41 = vadd.f32 %v1741_v33, %v459_v9  ;;  %v588_v42 = vadd.f32 %v1741_v33, %v587_v14 }
 0x11c   :  { %v834_v23 = vsel %vm706_vm6, %v572_v4, %v770_v18  ;;  %vm675_vm9 = vcmp.ge.f32.partialorder %v447_v7, 0.0  ;;  %v739_v24 = vmul.f32 0.2, %v447_v7  ;;  %vm707_vm10 = vcmp.ge.f32.partialorder %v575_v12, 0.0  ;;  %v590_v25 = vpop.f32.mrb[15].mxu1 }
 0x11d   :  { %v1355_v26 = vpack.c.bf16 %v834_v23, %v834_v23  ;;  %v805_v27 = vsel %vm677_vm7, %v455_v5, %v741_v21  ;;  %v837_v28 = vsel %vm709_vm8, %v583_v6, %v773_v22  ;;  %v771_v29 = vmul.f32 0.2, %v575_v12 }
 0x11e   :  { %v1326_v30 = vpack.c.bf16 %v805_v27, %v805_v27  ;;  %v1358_v31 = vpack.c.bf16 %v837_v28, %v837_v28  ;;  %v803_v32 = vsel %vm675_vm9, %v447_v7, %v739_v24  ;;  %vm680_vm11 = vcmp.ge.f32.partialorder %v468_v13, 0.0  ;;  %v1432_v38 = vpop.f32.mrb[16].mxu0  ;;  %v1464_v39 = vpop.f32.mrb[16].mxu1 }
 0x11f   :  { %1155 = vst.msk [vmem:[%s2145_s3 + $0xa0] sm:$0xf] %vm1114_vm1, %v1355_v26  ;;  %v1324_v34 = vpack.c.bf16 %v803_v32, %v803_v32  ;;  %v835_v35 = vsel %vm707_vm10, %v575_v12, %v771_v29  ;;  %v744_v36 = vmul.f32 0.2, %v468_v13  ;;  %v471_v43 = vadd.f32 %v1429_v15, %v1741_v33  ;;  %v475_v44 = vpop.f32.mrb[17].mxu0  ;;  %v603_v45 = vpop.f32.mrb[17].mxu1 }
 0x120   :  { %1126 = vst.msk [vmem:[%s2145_s3 + $0x2c] sm:$0xf] %vm1114_vm1, %v1326_v30  ;;  %1158 = vst.msk [vmem:[%s2145_s3 + $0xac] sm:$0xf] %vm1114_vm1, %v1358_v31  ;;  %v1356_v40 = vpack.c.bf16 %v835_v35, %v835_v35  ;;  %vm712_vm12 = vcmp.ge.f32.partialorder %v596_v37, 0.0  ;;  %v599_v48 = vadd.f32 %v1461_v19, %v1741_v33  ;;  %v1867_v49 = vpop.f32.mrb[18].mxu0  ;;  %v463_v0 = vadd.f32 %v1741_v33, %v462_v20 }
 0x121   :  { %1124 = vst.msk [vmem:[%s2145_s3 + $0x24] sm:$0xf] %vm1114_vm1, %v1324_v34  ;;  %v808_v46 = vsel %vm680_vm11, %v468_v13, %v744_v36  ;;  %v776_v47 = vmul.f32 0.2, %v596_v37  ;;  %v1869_v50 = vpop.f32.mrb[18].mxu1  ;;  %vm678_vm13 = vcmp.ge.f32.partialorder %v460_v41, 0.0  ;;  %v591_v4 = vadd.f32 %v1741_v33, %v590_v25 }
 0x122   :  { %1156 = vst.msk [vmem:[%s2145_s3 + $0xa4] sm:$0xf] %vm1114_vm1, %v1356_v40  ;;  %v1329_v51 = vpack.c.bf16 %v808_v46, %v808_v46  ;;  %v742_v52 = vmul.f32 0.2, %v460_v41  ;;  %vm710_vm14 = vcmp.ge.f32.partialorder %v588_v42, 0.0  ;;  %v1875_v53 = vpop.f32.mrb[19].mxu0  ;;  %v484_v7 = vadd.f32 %v1432_v38, %v1741_v33 }
 0x123   :  { %v1877_v54 = vpop.f32.mrb[19].mxu1  ;;  %v840_v55 = vsel %vm712_vm12, %v596_v37, %v776_v47  ;;  %v774_v56 = vmul.f32 0.2, %v588_v42  ;;  %vm681_vm15 = vcmp.ge.f32.partialorder %v471_v43, 0.0  ;;  %v745_v57 = vmul.f32 0.2, %v471_v43 }
 0x124   :  { %1129 = vst.msk [vmem:[%s2145_s3 + $0x38] sm:$0xf] %vm1114_vm1, %v1329_v51  ;;  %v1361_v58 = vpack.c.bf16 %v840_v55, %v840_v55  ;;  %v806_v59 = vsel %vm678_vm13, %v460_v41, %v742_v52  ;;  %vm713_vm0 = vcmp.ge.f32.partialorder %v599_v48, 0.0  ;;  %v777_v60 = vmul.f32 0.2, %v599_v48 }
 0x125   :  { %v1327_v61 = vpack.c.bf16 %v806_v59, %v806_v59  ;;  %v838_v62 = vsel %vm710_vm14, %v588_v42, %v774_v56  ;;  %v809_v63 = vsel %vm681_vm15, %v471_v43, %v745_v57  ;;  %vm679_vm2 = vcmp.ge.f32.partialorder %v463_v0, 0.0 }
 0x126   :  { %1161 = vst.msk [vmem:[%s2145_s3 + $0xb8] sm:$0xf] %vm1114_vm1, %v1361_v58  ;;  %v1359_v1 = vpack.c.bf16 %v838_v62, %v838_v62  ;;  %v1330_v2 = vpack.c.bf16 %v809_v63, %v809_v63  ;;  %v841_v3 = vsel %vm713_vm0, %v599_v48, %v777_v60  ;;  %v743_v6 = vmul.f32 0.2, %v463_v0  ;;  %v1436_v8 = vpop.f32.mrb[20].mxu0  ;;  %v1468_v9 = vpop.f32.mrb[20].mxu1 }
 0x127   :  { %1127 = vst.msk [vmem:[%s2145_s3 + $0x30] sm:$0xf] %vm1114_vm1, %v1327_v61  ;;  %v1362_v5 = vpack.c.bf16 %v841_v3, %v841_v3  ;;  %vm711_vm3 = vcmp.ge.f32.partialorder %v591_v4, 0.0  ;;  %v775_v10 = vmul.f32 0.2, %v591_v4  ;;  %v612_v11 = vadd.f32 %v1464_v39, %v1741_v33  ;;  %v491_v13 = vpop.f32.mrb[21].mxu0 }
 0x128   :  { %1159 = vst.msk [vmem:[%s2145_s3 + $0xb0] sm:$0xf] %vm1114_vm1, %v1359_v1  ;;  %1130 = vst.msk [vmem:[%s2145_s3 + $0x3c] sm:$0xf] %vm1114_vm1, %v1330_v2  ;;  %v476_v12 = vadd.f32 %v1741_v33, %v475_v44  ;;  %v1904_v14 = vpop.f32.mrb[21].mxu1  ;;  %v807_v15 = vsel %vm679_vm2, %v463_v0, %v743_v6  ;;  %vm684_vm4 = vcmp.ge.f32.partialorder %v484_v7, 0.0  ;;  %v604_v17 = vadd.f32 %v1741_v33, %v603_v45 }
 0x129   :  { %1162 = vst.msk [vmem:[%s2145_s3 + $0xbc] sm:$0xf] %vm1114_vm1, %v1362_v5  ;;  %v748_v16 = vmul.f32 0.2, %v484_v7  ;;  %v1911_v18 = vpop.f32.mrb[22].mxu0  ;;  %v1913_v19 = vpop.f32.mrb[22].mxu1  ;;  %v1328_v20 = vpack.c.bf16 %v807_v15, %v807_v15  ;;  %v839_v21 = vsel %vm711_vm3, %v591_v4, %v775_v10  ;;  %v487_v34 = vadd.f32 %v1867_v49, %v1741_v33 }
 0x12a   :  { %vm716_vm5 = vcmp.ge.f32.partialorder %v612_v11, 0.0  ;;  %v780_v22 = vmul.f32 0.2, %v612_v11  ;;  %v1915_v23 = vpop.f32.mrb[23].mxu0  ;;  %v1917_v24 = vpop.f32.mrb[23].mxu1  ;;  %v1360_v25 = vpack.c.bf16 %v839_v21, %v839_v21  ;;  %vm682_vm6 = vcmp.ge.f32.partialorder %v476_v12, 0.0 }
 0x12b   :  { %v812_v26 = vsel %vm684_vm4, %v484_v7, %v748_v16  ;;  %v746_v27 = vmul.f32 0.2, %v476_v12  ;;  %1128 = vst.msk [vmem:[%s2145_s3 + $0x34] sm:$0xf] %vm1114_vm1, %v1328_v20  ;;  %vm714_vm7 = vcmp.ge.f32.partialorder %v604_v17, 0.0  ;;  %v615_v35 = vadd.f32 %v1869_v50, %v1741_v33 }
 0x12c   :  { %v1333_v28 = vpack.c.bf16 %v812_v26, %v812_v26  ;;  %v844_v29 = vsel %vm716_vm5, %v612_v11, %v780_v22  ;;  %v778_v30 = vmul.f32 0.2, %v604_v17  ;;  %1160 = vst.msk [vmem:[%s2145_s3 + $0xb4] sm:$0xf] %vm1114_vm1, %v1360_v25  ;;  %v479_v38 = vadd.f32 %v1741_v33, %v1875_v53 }
 0x12d   :  { %v1365_v31 = vpack.c.bf16 %v844_v29, %v844_v29  ;;  %v810_v32 = vsel %vm682_vm6, %v476_v12, %v746_v27  ;;  %v607_v39 = vadd.f32 %v1741_v33, %v1877_v54  ;;  %vm685_vm8 = vcmp.ge.f32.partialorder %v487_v34, 0.0 }
 0x12e   :  { %1133 = vst.msk [vmem:[%s2145_s3 + $0x48] sm:$0xf] %vm1114_vm1, %v1333_v28  ;;  %v1331_v36 = vpack.c.bf16 %v810_v32, %v810_v32  ;;  %v842_v37 = vsel %vm714_vm7, %v604_v17, %v778_v30  ;;  %v749_v41 = vmul.f32 0.2, %v487_v34  ;;  %vm717_vm9 = vcmp.ge.f32.partialorder %v615_v35, 0.0  ;;  %v1943_v42 = vpop.f32.mrb[24].mxu0 }
 0x12f   :  { %1165 = vst.msk [vmem:[%s2145_s3 + $0xc8] sm:$0xf] %vm1114_vm1, %v1365_v31  ;;  %v1363_v40 = vpack.c.bf16 %v842_v37, %v842_v37  ;;  %v1945_v43 = vpop.f32.mrb[24].mxu1  ;;  %v781_v44 = vmul.f32 0.2, %v615_v35  ;;  %vm683_vm10 = vcmp.ge.f32.partialorder %v479_v38, 0.0  ;;  %v500_v48 = vadd.f32 %v1436_v8, %v1741_v33 }
 0x130   :  { %1131 = vst.msk [vmem:[%s2145_s3 + $0x40] sm:$0xf] %vm1114_vm1, %v1331_v36  ;;  %v747_v45 = vmul.f32 0.2, %v479_v38  ;;  %vm715_vm11 = vcmp.ge.f32.partialorder %v607_v39, 0.0  ;;  %v813_v46 = vsel %vm685_vm8, %v487_v34, %v749_v41  ;;  %v628_v49 = vadd.f32 %v1468_v9, %v1741_v33  ;;  %v1957_v50 = vpop.f32.mrb[25].mxu0 }
 0x131   :  { %1163 = vst.msk [vmem:[%s2145_s3 + $0xc0] sm:$0xf] %vm1114_vm1, %v1363_v40  ;;  %v779_v47 = vmul.f32 0.2, %v607_v39  ;;  %v1959_v51 = vpop.f32.mrb[25].mxu1  ;;  %v1334_v52 = vpack.c.bf16 %v813_v46, %v813_v46  ;;  %v845_v53 = vsel %vm717_vm9, %v615_v35, %v781_v44  ;;  %v492_v55 = vadd.f32 %v1741_v33, %v491_v13  ;;  %v1963_v56 = vpop.f32.mrb[26].mxu0 }
 0x132   :  { %v811_v54 = vsel %vm683_vm10, %v479_v38, %v747_v45  ;;  %v1965_v57 = vpop.f32.mrb[26].mxu1  ;;  %v1366_v58 = vpack.c.bf16 %v845_v53, %v845_v53  ;;  %vm688_vm12 = vcmp.ge.f32.partialorder %v500_v48, 0.0  ;;  %v1968_v61 = vpop.f32.mrb[27].mxu0  ;;  %v752_v0 = vmul.f32 0.2, %v500_v48 }
 0x133   :  { %v1332_v59 = vpack.c.bf16 %v811_v54, %v811_v54  ;;  %v843_v60 = vsel %vm715_vm11, %v607_v39, %v779_v47  ;;  %v1970_v62 = vpop.f32.mrb[27].mxu1  ;;  %1134 = vst.msk [vmem:[%s2145_s3 + $0x4c] sm:$0xf] %vm1114_vm1, %v1334_v52  ;;  %vm720_vm13 = vcmp.ge.f32.partialorder %v628_v49, 0.0  ;;  %v784_v1 = vmul.f32 0.2, %v628_v49 }
 0x134   :  { %v1364_v63 = vpack.c.bf16 %v843_v60, %v843_v60  ;;  %1166 = vst.msk [vmem:[%s2145_s3 + $0xcc] sm:$0xf] %vm1114_vm1, %v1366_v58  ;;  %vm686_vm14 = vcmp.ge.f32.partialorder %v492_v55, 0.0  ;;  %v750_v2 = vmul.f32 0.2, %v492_v55  ;;  %v620_v3 = vadd.f32 %v1741_v33, %v1904_v14 }
 0x135   :  { %1132 = vst.msk [vmem:[%s2145_s3 + $0x44] sm:$0xf] %vm1114_vm1, %v1332_v59  ;;  %v503_v4 = vadd.f32 %v1911_v18, %v1741_v33  ;;  %v816_v5 = vsel %vm688_vm12, %v500_v48, %v752_v0  ;;  %v848_v6 = vsel %vm720_vm13, %v628_v49, %v784_v1  ;;  %v631_v7 = vadd.f32 %v1913_v19, %v1741_v33 }
 0x136   :  { %1164 = vst.msk [vmem:[%s2145_s3 + $0xc4] sm:$0xf] %vm1114_vm1, %v1364_v63  ;;  %v495_v8 = vadd.f32 %v1741_v33, %v1915_v23  ;;  %v1337_v9 = vpack.c.bf16 %v816_v5, %v816_v5  ;;  %v1369_v10 = vpack.c.bf16 %v848_v6, %v848_v6  ;;  %v814_v11 = vsel %vm686_vm14, %v492_v55, %v750_v2  ;;  %v1996_v12 = vpop.f32.mrb[28].mxu0  ;;  %v1998_v13 = vpop.f32.mrb[28].mxu1 }
 0x137   :  { %vm718_vm15 = vcmp.ge.f32.partialorder %v620_v3, 0.0  ;;  %v1335_v14 = vpack.c.bf16 %v814_v11, %v814_v11  ;;  %v782_v15 = vmul.f32 0.2, %v620_v3  ;;  %vm689_vm0 = vcmp.ge.f32.partialorder %v503_v4, 0.0  ;;  %v2000_v17 = vpop.f32.mrb[29].mxu0  ;;  %v2018_v25 = vpop.f32.mrb[29].mxu1 }
 0x138   :  { %v753_v16 = vmul.f32 0.2, %v503_v4  ;;  %1137 = vst.msk [vmem:[%s2145_s3 + $0x58] sm:$0xf] %vm1114_vm1, %v1337_v9  ;;  %1169 = vst.msk [vmem:[%s2145_s3 + $0xd8] sm:$0xf] %vm1114_vm1, %v1369_v10  ;;  %v623_v22 = vadd.f32 %v1741_v33, %v1917_v24  ;;  %v516_v23 = vadd.f32 %v1943_v42, %v1741_v33  ;;  %v644_v38 = vadd.f32 %v1945_v43, %v1741_v33 }
 0x139   :  { %vm721_vm2 = vcmp.ge.f32.partialorder %v631_v7, 0.0  ;;  %v785_v18 = vmul.f32 0.2, %v631_v7  ;;  %vm687_vm3 = vcmp.ge.f32.partialorder %v495_v8, 0.0  ;;  %v751_v19 = vmul.f32 0.2, %v495_v8 }
 0x13a   :  { %1135 = vst.msk [vmem:[%s2145_s3 + $0x50] sm:$0xf] %vm1114_vm1, %v1335_v14  ;;  %v846_v20 = vsel %vm718_vm15, %v620_v3, %v782_v15  ;;  %v817_v21 = vsel %vm689_vm0, %v503_v4, %v753_v16  ;;  %v2020_v26 = vpop.f32.mrb[30].mxu0  ;;  %v2022_v31 = vpop.f32.mrb[30].mxu1  ;;  %vm719_vm4 = vcmp.ge.f32.partialorder %v623_v22, 0.0  ;;  %vm692_vm5 = vcmp.ge.f32.partialorder %v516_v23, 0.0 }
 0x13b   :  { %v1367_v27 = vpack.c.bf16 %v846_v20, %v846_v20  ;;  %v1338_v28 = vpack.c.bf16 %v817_v21, %v817_v21  ;;  %v849_v29 = vsel %vm721_vm2, %v631_v7, %v785_v18  ;;  %v815_v30 = vsel %vm687_vm3, %v495_v8, %v751_v19  ;;  %v2024_v32 = vpop.f32.mrb[31].mxu0  ;;  %v2026_v24 = vpop.f32.mrb[31].mxu1 }
 0x13c   :  { %v1370_v34 = vpack.c.bf16 %v849_v29, %v849_v29  ;;  %v1336_v35 = vpack.c.bf16 %v815_v30, %v815_v30  ;;  %v783_v36 = vmul.f32 0.2, %v623_v22  ;;  %v756_v37 = vmul.f32 0.2, %v516_v23 }
 0x13d   :  { %1167 = vst.msk [vmem:[%s2145_s3 + $0xd0] sm:$0xf] %vm1114_vm1, %v1367_v27  ;;  %1138 = vst.msk [vmem:[%s2145_s3 + $0x5c] sm:$0xf] %vm1114_vm1, %v1338_v28  ;;  %v508_v39 = vadd.f32 %v1741_v33, %v1957_v50  ;;  %v636_v41 = vadd.f32 %v1741_v33, %v1959_v51  ;;  %v519_v42 = vadd.f32 %v1963_v56, %v1741_v33  ;;  %vm724_vm6 = vcmp.ge.f32.partialorder %v644_v38, 0.0 }
 0x13e   :  { %1170 = vst.msk [vmem:[%s2145_s3 + $0xdc] sm:$0xf] %vm1114_vm1, %v1370_v34  ;;  %1136 = vst.msk [vmem:[%s2145_s3 + $0x54] sm:$0xf] %vm1114_vm1, %v1336_v35  ;;  %v847_v40 = vsel %vm719_vm4, %v623_v22, %v783_v36  ;;  %v647_v43 = vadd.f32 %v1965_v57, %v1741_v33  ;;  %v820_v45 = vsel %vm692_vm5, %v516_v23, %v756_v37  ;;  %v788_v46 = vmul.f32 0.2, %v644_v38 }
 0x13f   :  { %v1368_v44 = vpack.c.bf16 %v847_v40, %v847_v40  ;;  %v1341_v47 = vpack.c.bf16 %v820_v45, %v820_v45  ;;  %vm690_vm7 = vcmp.ge.f32.partialorder %v508_v39, 0.0  ;;  %v754_v48 = vmul.f32 0.2, %v508_v39 }
 0x140   :  { %vm722_vm8 = vcmp.ge.f32.partialorder %v636_v41, 0.0  ;;  %v852_v49 = vsel %vm724_vm6, %v644_v38, %v788_v46  ;;  %v786_v50 = vmul.f32 0.2, %v636_v41  ;;  %vm693_vm9 = vcmp.ge.f32.partialorder %v519_v42, 0.0 }
 0x141   :  { %1168 = vst.msk [vmem:[%s2145_s3 + $0xd4] sm:$0xf] %vm1114_vm1, %v1368_v44  ;;  %v757_v51 = vmul.f32 0.2, %v519_v42  ;;  %1141 = vst.msk [vmem:[%s2145_s3 + $0x68] sm:$0xf] %vm1114_vm1, %v1341_v47  ;;  %v1373_v52 = vpack.c.bf16 %v852_v49, %v852_v49  ;;  %v818_v53 = vsel %vm690_vm7, %v508_v39, %v754_v48  ;;  %v511_v58 = vadd.f32 %v1741_v33, %v1968_v61 }
 0x142   :  { %vm725_vm10 = vcmp.ge.f32.partialorder %v647_v43, 0.0  ;;  %v789_v54 = vmul.f32 0.2, %v647_v43  ;;  %v1339_v55 = vpack.c.bf16 %v818_v53, %v818_v53  ;;  %v850_v56 = vsel %vm722_vm8, %v636_v41, %v786_v50 }
 0x143   :  { %v821_v57 = vsel %vm693_vm9, %v519_v42, %v757_v51  ;;  %1173 = vst.msk [vmem:[%s2145_s3 + $0xe8] sm:$0xf] %vm1114_vm1, %v1373_v52  ;;  %v1371_v59 = vpack.c.bf16 %v850_v56, %v850_v56  ;;  %v639_v0 = vadd.f32 %v1741_v33, %v1970_v62  ;;  %vm691_vm11 = vcmp.ge.f32.partialorder %v511_v58, 0.0 }
 0x144   :  { %v1342_v60 = vpack.c.bf16 %v821_v57, %v821_v57  ;;  %v853_v63 = vsel %vm725_vm10, %v647_v43, %v789_v54  ;;  %1139 = vst.msk [vmem:[%s2145_s3 + $0x60] sm:$0xf] %vm1114_vm1, %v1339_v55  ;;  %v755_v2 = vmul.f32 0.2, %v511_v58  ;;  %v532_v61 = vadd.f32 %v1996_v12, %v1741_v33 }
 0x145   :  { %v1374_v1 = vpack.c.bf16 %v853_v63, %v853_v63  ;;  %1171 = vst.msk [vmem:[%s2145_s3 + $0xe0] sm:$0xf] %vm1114_vm1, %v1371_v59  ;;  %vm723_vm12 = vcmp.ge.f32.partialorder %v639_v0, 0.0  ;;  %v787_v62 = vmul.f32 0.2, %v639_v0  ;;  %v660_v3 = vadd.f32 %v1998_v13, %v1741_v33 }
 0x146   :  { %1142 = vst.msk [vmem:[%s2145_s3 + $0x6c] sm:$0xf] %vm1114_vm1, %v1342_v60  ;;  %v524_v4 = vadd.f32 %v1741_v33, %v2000_v17  ;;  %v819_v5 = vsel %vm691_vm11, %v511_v58, %v755_v2  ;;  %vm696_vm13 = vcmp.ge.f32.partialorder %v532_v61, 0.0  ;;  %v760_v6 = vmul.f32 0.2, %v532_v61 }
 0x147   :  { %1174 = vst.msk [vmem:[%s2145_s3 + $0xec] sm:$0xf] %vm1114_vm1, %v1374_v1  ;;  %v652_v7 = vadd.f32 %v1741_v33, %v2018_v25  ;;  %v1340_v8 = vpack.c.bf16 %v819_v5, %v819_v5  ;;  %v851_v9 = vsel %vm723_vm12, %v639_v0, %v787_v62  ;;  %vm728_vm14 = vcmp.ge.f32.partialorder %v660_v3, 0.0 }
 0x148   :  { %v792_v10 = vmul.f32 0.2, %v660_v3  ;;  %v1372_v11 = vpack.c.bf16 %v851_v9, %v851_v9  ;;  %v824_v12 = vsel %vm696_vm13, %v532_v61, %v760_v6  ;;  %vm694_vm15 = vcmp.ge.f32.partialorder %v524_v4, 0.0 }
 0x149   :  { %v758_v13 = vmul.f32 0.2, %v524_v4  ;;  %1140 = vst.msk [vmem:[%s2145_s3 + $0x64] sm:$0xf] %vm1114_vm1, %v1340_v8  ;;  %v1345_v14 = vpack.c.bf16 %v824_v12, %v824_v12  ;;  %vm726_vm0 = vcmp.ge.f32.partialorder %v652_v7, 0.0  ;;  %v535_v19 = vadd.f32 %v2020_v26, %v1741_v33 }
 0x14a   :  { %v856_v15 = vsel %vm728_vm14, %v660_v3, %v792_v10  ;;  %v790_v16 = vmul.f32 0.2, %v652_v7  ;;  %1172 = vst.msk [vmem:[%s2145_s3 + $0xe4] sm:$0xf] %vm1114_vm1, %v1372_v11  ;;  %v663_v20 = vadd.f32 %v2022_v31, %v1741_v33  ;;  %v527_v23 = vadd.f32 %v1741_v33, %v2024_v32 }
 0x14b   :  { %v1377_v17 = vpack.c.bf16 %v856_v15, %v856_v15  ;;  %v822_v18 = vsel %vm694_vm15, %v524_v4, %v758_v13  ;;  %1145 = vst.msk [vmem:[%s2145_s3 + $0x78] sm:$0xf] %vm1114_vm1, %v1345_v14  ;;  %v655_v25 = vadd.f32 %v1741_v33, %v2026_v24  ;;  %vm697_vm2 = vcmp.ge.f32.partialorder %v535_v19, 0.0 }
 0x14c   :  { %v1343_v21 = vpack.c.bf16 %v822_v18, %v822_v18  ;;  %v854_v22 = vsel %vm726_vm0, %v652_v7, %v790_v16  ;;  %v761_v27 = vmul.f32 0.2, %v535_v19  ;;  %vm729_vm3 = vcmp.ge.f32.partialorder %v663_v20, 0.0 }
 0x14d   :  { %1177 = vst.msk [vmem:[%s2145_s3 + $0xf8] sm:$0xf] %vm1114_vm1, %v1377_v17  ;;  %v1375_v26 = vpack.c.bf16 %v854_v22, %v854_v22  ;;  %v793_v28 = vmul.f32 0.2, %v663_v20  ;;  %vm695_vm4 = vcmp.ge.f32.partialorder %v527_v23, 0.0  ;;  %vm727_vm5 = vcmp.ge.f32.partialorder %v655_v25, 0.0 }
 0x14e   :  { %1143 = vst.msk [vmem:[%s2145_s3 + $0x70] sm:$0xf] %vm1114_vm1, %v1343_v21  ;;  %v759_v29 = vmul.f32 0.2, %v527_v23  ;;  %v825_v33 = vsel %vm697_vm2, %v535_v19, %v761_v27  ;;  %v791_v30 = vmul.f32 0.2, %v655_v25 }
 0x14f   :  { %1175 = vst.msk [vmem:[%s2145_s3 + $0xf0] sm:$0xf] %vm1114_vm1, %v1375_v26  ;;  %v1346_v31 = vpack.c.bf16 %v825_v33, %v825_v33  ;;  %v857_v32 = vsel %vm729_vm3, %v663_v20, %v793_v28 }
 0x150   :  { %v823_v34 = vsel %vm695_vm4, %v527_v23, %v759_v29  ;;  %v1378_v35 = vpack.c.bf16 %v857_v32, %v857_v32  ;;  %v855_v24 = vsel %vm727_vm5, %v655_v25, %v791_v30 }
 0x151   :  { %v1344_v36 = vpack.c.bf16 %v823_v34, %v823_v34  ;;  %1146 = vst.msk [vmem:[%s2145_s3 + $0x7c] sm:$0xf] %vm1114_vm1, %v1346_v31  ;;  %v1376_v37 = vpack.c.bf16 %v855_v24, %v855_v24 }
 0x152   :  { %1178 = vst.msk [vmem:[%s2145_s3 + $0xfc] sm:$0xf] %vm1114_vm1, %v1378_v35 }
 0x153   :  { %1144 = vst.msk [vmem:[%s2145_s3 + $0x74] sm:$0xf] %vm1114_vm1, %v1344_v36  ;;  %1176 = vst.msk [vmem:[%s2145_s3 + $0xf4] sm:$0xf] %vm1114_vm1, %v1376_v37 }
 0x154   :  { %1183 = vsyncpa [#allocation3], 1 }
 0x155   :  { %1184 = vsyncpa [#allocation5], 1 }

// kernel: discriminator_forward.4
= control target key start
LH: loop header
LB: loop body
LE: loop exit
PB: predicated region body
PF: predicated region fallthrough
CT: control target
= control target key end

     0   :  { %s3074_s12 = smov 0   ;;  %s3076_s13 = smov 0   ;;  %s3888_s0 = inlined_call_operand.vmem [shape: bf16[128,1024], index: 0, kind: input, shape index: {}]   ;;  %s3889_s1 = inlined_call_operand.vmem [shape: bf16[1024,256], index: 1, kind: input, shape index: {}]   ;;  %s3890_s2 = inlined_call_operand.vmem [shape: f32[3,256], index: 2, kind: input, shape index: {}]   ;;  %s3891_s3 = inlined_call_operand.vmem [shape: bf16[128,256], index: 3, kind: output, shape index: {}]  }
   0x1   :  { %s3078_s14 = smov 0  }
   0x2 LB: > { %s3090_s15 = sadd.s32 4294967295, %s3052_s14   ;;  %s3093_s16 = sadd.s32 1, %s3052_s14   ;;  %s3052_s14 = sphi %s3078_s14, %s3895_s14   ;;  %s3048_s13 = sphi %s3076_s13, %s3894_s13   ;;  %s3044_s12 = sphi %s3074_s12, %s3893_s12  }
   0x3   : > { %s38_s17 = ssub.s32 %s3052_s14, %s3093_s16  ;;  %s41_s18 = sadd.s32 1, %s3048_s13 }
   0x4   : > { %p39_p0 = scmp.eq.s32.totalorder %s38_s17, 0  ;;  %p48_p1 = scmp.ne.s32.totalorder %s3048_s13, %s3044_s12 }
   0x5   : > { %p49_p2 = scmp.eq.s32.totalorder %s3052_s14, 0  ;;  %p104_p3 = scmp.eq.s32.totalorder %s3090_s15, 1 }
   0x6   : > { %s3103_s19 = scalar_select %p39_p0, %s3048_s13, %s41_s18  }
   0x7   : > { %p50_p4 = por %p49_p2, %p48_p1  ;;  %p3105_p5 = por %p104_p3, %p48_p1 }
   0x8   : > { %p2466_p6 = scmp.ge.s32.totalorder %s3052_s14, 2 }
   0xa   : > { %129 = sbr.rel (%p2466_p6) target bundleno = 106 (0x6a), region = 20 }
  0x11   : > { %132 = sbr.rel (!%p50_p4) target bundleno = 106 (0x6a), region = 24  ;;  %s134_s21 = sand.u32 (%p50_p4), 1, %s3048_s13  }
  0x12   : > { %s2468_s22 = sshll.u32 (%p50_p4), %s3052_s14, 2  ;;  %s2467_s23 = sshll.u32 (%p50_p4), %s134_s21, 9 }
  0x13   : > { %s3115_s26 = scalar_lea.vmem (%p50_p4), %s3889_s1, %s2468_s22  ;;  %s3119_s27 = scalar_lea.vmem (%p50_p4), [#allocation2], %s2467_s23 }
  0x14   : > { %v154_v0 = vld [vmem:[%s3115_s26] sm:$0xf] (%p50_p4)  ;;  %v156_v1 = vld [vmem:[%s3115_s26 + $0x8] sm:$0xf] (%p50_p4)  ;;  %v158_v2 = vld [vmem:[%s3115_s26 + $0x10] sm:$0xf] (%p50_p4) }
  0x15   : > { %155 = vst [vmem:[%s3119_s27] sm:$0xf] (%p50_p4), %v154_v0  ;;  %157 = vst [vmem:[%s3119_s27 + $0x4] sm:$0xf] (%p50_p4), %v156_v1  ;;  %v160_v3 = vld [vmem:[%s3115_s26 + $0x18] sm:$0xf] (%p50_p4) }
  0x16   : > { %v162_v4 = vld [vmem:[%s3115_s26 + $0x20] sm:$0xf] (%p50_p4)  ;;  %159 = vst [vmem:[%s3119_s27 + $0x8] sm:$0xf] (%p50_p4), %v158_v2  ;;  %161 = vst [vmem:[%s3119_s27 + $0xc] sm:$0xf] (%p50_p4), %v160_v3 }
  0x17   : > { %163 = vst [vmem:[%s3119_s27 + $0x10] sm:$0xf] (%p50_p4), %v162_v4  ;;  %v164_v5 = vld [vmem:[%s3115_s26 + $0x28] sm:$0xf] (%p50_p4)  ;;  %v166_v6 = vld [vmem:[%s3115_s26 + $0x30] sm:$0xf] (%p50_p4) }
  0x18   : > { %v168_v7 = vld [vmem:[%s3115_s26 + $0x38] sm:$0xf]  ;;  %165 = vst [vmem:[%s3119_s27 + $0x14] sm:$0xf] %v164_v5  ;;  %167 = vst [vmem:[%s3119_s27 + $0x18] sm:$0xf] %v166_v6 }
  0x19   : > { %169 = vst [vmem:[%s3119_s27 + $0x1c] sm:$0xf] %v168_v7  ;;  %v170_v8 = vld [vmem:[%s3115_s26 + $0x40] sm:$0xf]  ;;  %v172_v9 = vld [vmem:[%s3115_s26 + $0x48] sm:$0xf] }
  0x1a   : > { %v174_v10 = vld [vmem:[%s3115_s26 + $0x50] sm:$0xf]  ;;  %171 = vst [vmem:[%s3119_s27 + $0x20] sm:$0xf] %v170_v8  ;;  %173 = vst [vmem:[%s3119_s27 + $0x24] sm:$0xf] %v172_v9 }
  0x1b   : > { %175 = vst [vmem:[%s3119_s27 + $0x28] sm:$0xf] %v174_v10  ;;  %v176_v11 = vld [vmem:[%s3115_s26 + $0x58] sm:$0xf]  ;;  %v178_v12 = vld [vmem:[%s3115_s26 + $0x60] sm:$0xf] }
  0x1c   : > { %v180_v13 = vld [vmem:[%s3115_s26 + $0x68] sm:$0xf]  ;;  %177 = vst [vmem:[%s3119_s27 + $0x2c] sm:$0xf] %v176_v11  ;;  %179 = vst [vmem:[%s3119_s27 + $0x30] sm:$0xf] %v178_v12 }
  0x1d   : > { %181 = vst [vmem:[%s3119_s27 + $0x34] sm:$0xf] %v180_v13  ;;  %v182_v14 = vld [vmem:[%s3115_s26 + $0x70] sm:$0xf]  ;;  %v184_v15 = vld [vmem:[%s3115_s26 + $0x78] sm:$0xf] }
  0x1e   : > { %v186_v16 = vld [vmem:[%s3115_s26 + $0x80] sm:$0xf]  ;;  %183 = vst [vmem:[%s3119_s27 + $0x38] sm:$0xf] %v182_v14  ;;  %185 = vst [vmem:[%s3119_s27 + $0x3c] sm:$0xf] %v184_v15 }
  0x1f   : > { %187 = vst [vmem:[%s3119_s27 + $0x40] sm:$0xf] %v186_v16  ;;  %v188_v17 = vld [vmem:[%s3115_s26 + $0x88] sm:$0xf]  ;;  %v190_v18 = vld [vmem:[%s3115_s26 + $0x90] sm:$0xf] }
  0x20   : > { %v192_v19 = vld [vmem:[%s3115_s26 + $0x98] sm:$0xf]  ;;  %189 = vst [vmem:[%s3119_s27 + $0x44] sm:$0xf] %v188_v17  ;;  %191 = vst [vmem:[%s3119_s27 + $0x48] sm:$0xf] %v190_v18 }
  0x21   : > { %193 = vst [vmem:[%s3119_s27 + $0x4c] sm:$0xf] %v192_v19  ;;  %v194_v20 = vld [vmem:[%s3115_s26 + $0xa0] sm:$0xf]  ;;  %v196_v21 = vld [vmem:[%s3115_s26 + $0xa8] sm:$0xf] }
  0x22   : > { %v198_v22 = vld [vmem:[%s3115_s26 + $0xb0] sm:$0xf]  ;;  %195 = vst [vmem:[%s3119_s27 + $0x50] sm:$0xf] %v194_v20  ;;  %197 = vst [vmem:[%s3119_s27 + $0x54] sm:$0xf] %v196_v21 }
  0x23   : > { %199 = vst [vmem:[%s3119_s27 + $0x58] sm:$0xf] %v198_v22  ;;  %v200_v23 = vld [vmem:[%s3115_s26 + $0xb8] sm:$0xf]  ;;  %v202_v24 = vld [vmem:[%s3115_s26 + $0xc0] sm:$0xf] }
  0x24   : > { %v204_v25 = vld [vmem:[%s3115_s26 + $0xc8] sm:$0xf]  ;;  %201 = vst [vmem:[%s3119_s27 + $0x5c] sm:$0xf] %v200_v23  ;;  %203 = vst [vmem:[%s3119_s27 + $0x60] sm:$0xf] %v202_v24 }
  0x25   : > { %205 = vst [vmem:[%s3119_s27 + $0x64] sm:$0xf] %v204_v25  ;;  %v206_v26 = vld [vmem:[%s3115_s26 + $0xd0] sm:$0xf]  ;;  %v208_v27 = vld [vmem:[%s3115_s26 + $0xd8] sm:$0xf] }
  0x26   : > { %v210_v28 = vld [vmem:[%s3115_s26 + $0xe0] sm:$0xf]  ;;  %207 = vst [vmem:[%s3119_s27 + $0x68] sm:$0xf] %v206_v26  ;;  %209 = vst [vmem:[%s3119_s27 + $0x6c] sm:$0xf] %v208_v27 }
  0x27   : > { %211 = vst [vmem:[%s3119_s27 + $0x70] sm:$0xf] %v210_v28  ;;  %v212_v29 = vld [vmem:[%s3115_s26 + $0xe8] sm:$0xf]  ;;  %v214_v30 = vld [vmem:[%s3115_s26 + $0xf0] sm:$0xf] }
  0x28   : > { %v216_v31 = vld [vmem:[%s3115_s26 + $0xf8] sm:$0xf]  ;;  %213 = vst [vmem:[%s3119_s27 + $0x74] sm:$0xf] %v212_v29  ;;  %215 = vst [vmem:[%s3119_s27 + $0x78] sm:$0xf] %v214_v30 }
  0x29   : > { %217 = vst [vmem:[%s3119_s27 + $0x7c] sm:$0xf] %v216_v31  ;;  %v218_v32 = vld [vmem:[%s3115_s26 + $0x100] sm:$0xf]  ;;  %v220_v33 = vld [vmem:[%s3115_s26 + $0x108] sm:$0xf] }
  0x2a   : > { %v222_v34 = vld [vmem:[%s3115_s26 + $0x110] sm:$0xf]  ;;  %219 = vst [vmem:[%s3119_s27 + $0x80] sm:$0xf] %v218_v32  ;;  %221 = vst [vmem:[%s3119_s27 + $0x84] sm:$0xf] %v220_v33 }
  0x2b   : > { %223 = vst [vmem:[%s3119_s27 + $0x88] sm:$0xf] %v222_v34  ;;  %v224_v35 = vld [vmem:[%s3115_s26 + $0x118] sm:$0xf]  ;;  %v226_v36 = vld [vmem:[%s3115_s26 + $0x120] sm:$0xf] }
  0x2c   : > { %v228_v37 = vld [vmem:[%s3115_s26 + $0x128] sm:$0xf]  ;;  %225 = vst [vmem:[%s3119_s27 + $0x8c] sm:$0xf] %v224_v35  ;;  %227 = vst [vmem:[%s3119_s27 + $0x90] sm:$0xf] %v226_v36 }
  0x2d   : > { %229 = vst [vmem:[%s3119_s27 + $0x94] sm:$0xf] %v228_v37  ;;  %v230_v38 = vld [vmem:[%s3115_s26 + $0x130] sm:$0xf]  ;;  %v232_v39 = vld [vmem:[%s3115_s26 + $0x138] sm:$0xf] }
  0x2e   : > { %v234_v40 = vld [vmem:[%s3115_s26 + $0x140] sm:$0xf]  ;;  %231 = vst [vmem:[%s3119_s27 + $0x98] sm:$0xf] %v230_v38  ;;  %233 = vst [vmem:[%s3119_s27 + $0x9c] sm:$0xf] %v232_v39 }
  0x2f   : > { %235 = vst [vmem:[%s3119_s27 + $0xa0] sm:$0xf] %v234_v40  ;;  %v236_v41 = vld [vmem:[%s3115_s26 + $0x148] sm:$0xf]  ;;  %v238_v42 = vld [vmem:[%s3115_s26 + $0x150] sm:$0xf] }
  0x30   : > { %v240_v43 = vld [vmem:[%s3115_s26 + $0x158] sm:$0xf]  ;;  %237 = vst [vmem:[%s3119_s27 + $0xa4] sm:$0xf] %v236_v41  ;;  %239 = vst [vmem:[%s3119_s27 + $0xa8] sm:$0xf] %v238_v42 }
  0x31   : > { %241 = vst [vmem:[%s3119_s27 + $0xac] sm:$0xf] %v240_v43  ;;  %v242_v44 = vld [vmem:[%s3115_s26 + $0x160] sm:$0xf]  ;;  %v244_v45 = vld [vmem:[%s3115_s26 + $0x168] sm:$0xf] }
  0x32   : > { %v246_v46 = vld [vmem:[%s3115_s26 + $0x170] sm:$0xf]  ;;  %243 = vst [vmem:[%s3119_s27 + $0xb0] sm:$0xf] %v242_v44  ;;  %245 = vst [vmem:[%s3119_s27 + $0xb4] sm:$0xf] %v244_v45 }
  0x33   : > { %247 = vst [vmem:[%s3119_s27 + $0xb8] sm:$0xf] %v246_v46  ;;  %v248_v47 = vld [vmem:[%s3115_s26 + $0x178] sm:$0xf]  ;;  %v250_v48 = vld [vmem:[%s3115_s26 + $0x180] sm:$0xf] }
  0x34   : > { %v252_v49 = vld [vmem:[%s3115_s26 + $0x188] sm:$0xf]  ;;  %249 = vst [vmem:[%s3119_s27 + $0xbc] sm:$0xf] %v248_v47  ;;  %251 = vst [vmem:[%s3119_s27 + $0xc0] sm:$0xf] %v250_v48 }
  0x35   : > { %253 = vst [vmem:[%s3119_s27 + $0xc4] sm:$0xf] %v252_v49  ;;  %v254_v50 = vld [vmem:[%s3115_s26 + $0x190] sm:$0xf]  ;;  %v256_v51 = vld [vmem:[%s3115_s26 + $0x198] sm:$0xf] }
  0x36   : > { %v258_v52 = vld [vmem:[%s3115_s26 + $0x1a0] sm:$0xf]  ;;  %255 = vst [vmem:[%s3119_s27 + $0xc8] sm:$0xf] %v254_v50  ;;  %257 = vst [vmem:[%s3119_s27 + $0xcc] sm:$0xf] %v256_v51 }
  0x37   : > { %259 = vst [vmem:[%s3119_s27 + $0xd0] sm:$0xf] %v258_v52  ;;  %v260_v53 = vld [vmem:[%s3115_s26 + $0x1a8] sm:$0xf]  ;;  %v262_v54 = vld [vmem:[%s3115_s26 + $0x1b0] sm:$0xf] }
  0x38   : > { %v264_v55 = vld [vmem:[%s3115_s26 + $0x1b8] sm:$0xf]  ;;  %261 = vst [vmem:[%s3119_s27 + $0xd4] sm:$0xf] %v260_v53  ;;  %263 = vst [vmem:[%s3119_s27 + $0xd8] sm:$0xf] %v262_v54 }
  0x39   : > { %265 = vst [vmem:[%s3119_s27 + $0xdc] sm:$0xf] %v264_v55  ;;  %v266_v56 = vld [vmem:[%s3115_s26 + $0x1c0] sm:$0xf]  ;;  %v268_v57 = vld [vmem:[%s3115_s26 + $0x1c8] sm:$0xf] }
  0x3a   : > { %v270_v58 = vld [vmem:[%s3115_s26 + $0x1d0] sm:$0xf]  ;;  %267 = vst [vmem:[%s3119_s27 + $0xe0] sm:$0xf] %v266_v56  ;;  %269 = vst [vmem:[%s3119_s27 + $0xe4] sm:$0xf] %v268_v57 }
  0x3b   : > { %271 = vst [vmem:[%s3119_s27 + $0xe8] sm:$0xf] %v270_v58  ;;  %v272_v59 = vld [vmem:[%s3115_s26 + $0x1d8] sm:$0xf]  ;;  %v274_v60 = vld [vmem:[%s3115_s26 + $0x1e0] sm:$0xf] }
  0x3c   : > { %v276_v61 = vld [vmem:[%s3115_s26 + $0x1e8] sm:$0xf]  ;;  %273 = vst [vmem:[%s3119_s27 + $0xec] sm:$0xf] %v272_v59  ;;  %275 = vst [vmem:[%s3119_s27 + $0xf0] sm:$0xf] %v274_v60 }
  0x3d   : > { %277 = vst [vmem:[%s3119_s27 + $0xf4] sm:$0xf] %v276_v61  ;;  %v278_v62 = vld [vmem:[%s3115_s26 + $0x1f0] sm:$0xf]  ;;  %v280_v63 = vld [vmem:[%s3115_s26 + $0x1f8] sm:$0xf] }
  0x3e   : > { %v282_v0 = vld [vmem:[%s3115_s26 + $0x200] sm:$0xf]  ;;  %279 = vst [vmem:[%s3119_s27 + $0xf8] sm:$0xf] %v278_v62  ;;  %281 = vst [vmem:[%s3119_s27 + $0xfc] sm:$0xf] %v280_v63 }
  0x3f   : > { %283 = vst [vmem:[%s3119_s27 + $0x100] sm:$0xf] %v282_v0  ;;  %v284_v1 = vld [vmem:[%s3115_s26 + $0x208] sm:$0xf]  ;;  %v286_v2 = vld [vmem:[%s3115_s26 + $0x210] sm:$0xf] }
  0x40   : > { %v288_v3 = vld [vmem:[%s3115_s26 + $0x218] sm:$0xf]  ;;  %285 = vst [vmem:[%s3119_s27 + $0x104] sm:$0xf] %v284_v1  ;;  %287 = vst [vmem:[%s3119_s27 + $0x108] sm:$0xf] %v286_v2 }
  0x41   : > { %289 = vst [vmem:[%s3119_s27 + $0x10c] sm:$0xf] %v288_v3  ;;  %v290_v4 = vld [vmem:[%s3115_s26 + $0x220] sm:$0xf]  ;;  %v292_v5 = vld [vmem:[%s3115_s26 + $0x228] sm:$0xf] }
  0x42   : > { %v294_v6 = vld [vmem:[%s3115_s26 + $0x230] sm:$0xf]  ;;  %291 = vst [vmem:[%s3119_s27 + $0x110] sm:$0xf] %v290_v4  ;;  %293 = vst [vmem:[%s3119_s27 + $0x114] sm:$0xf] %v292_v5 }
  0x43   : > { %295 = vst [vmem:[%s3119_s27 + $0x118] sm:$0xf] %v294_v6  ;;  %v296_v7 = vld [vmem:[%s3115_s26 + $0x238] sm:$0xf]  ;;  %v298_v8 = vld [vmem:[%s3115_s26 + $0x240] sm:$0xf] }
  0x44   : > { %v300_v9 = vld [vmem:[%s3115_s26 + $0x248] sm:$0xf]  ;;  %297 = vst [vmem:[%s3119_s27 + $0x11c] sm:$0xf] %v296_v7  ;;  %299 = vst [vmem:[%s3119_s27 + $0x120] sm:$0xf] %v298_v8 }
  0x45   : > { %301 = vst [vmem:[%s3119_s27 + $0x124] sm:$0xf] %v300_v9  ;;  %v302_v10 = vld [vmem:[%s3115_s26 + $0x250] sm:$0xf]  ;;  %v304_v11 = vld [vmem:[%s3115_s26 + $0x258] sm:$0xf] }
  0x46   : > { %v306_v12 = vld [vmem:[%s3115_s26 + $0x260] sm:$0xf]  ;;  %303 = vst [vmem:[%s3119_s27 + $0x128] sm:$0xf] %v302_v10  ;;  %305 = vst [vmem:[%s3119_s27 + $0x12c] sm:$0xf] %v304_v11 }
  0x47   : > { %307 = vst [vmem:[%s3119_s27 + $0x130] sm:$0xf] %v306_v12  ;;  %v308_v13 = vld [vmem:[%s3115_s26 + $0x268] sm:$0xf]  ;;  %v310_v14 = vld [vmem:[%s3115_s26 + $0x270] sm:$0xf] }
  0x48   : > { %v312_v15 = vld [vmem:[%s3115_s26 + $0x278] sm:$0xf]  ;;  %309 = vst [vmem:[%s3119_s27 + $0x134] sm:$0xf] %v308_v13  ;;  %311 = vst [vmem:[%s3119_s27 + $0x138] sm:$0xf] %v310_v14 }
  0x49   : > { %313 = vst [vmem:[%s3119_s27 + $0x13c] sm:$0xf] %v312_v15  ;;  %v314_v16 = vld [vmem:[%s3115_s26 + $0x280] sm:$0xf]  ;;  %v316_v17 = vld [vmem:[%s3115_s26 + $0x288] sm:$0xf] }
  0x4a   : > { %v318_v18 = vld [vmem:[%s3115_s26 + $0x290] sm:$0xf]  ;;  %315 = vst [vmem:[%s3119_s27 + $0x140] sm:$0xf] %v314_v16  ;;  %317 = vst [vmem:[%s3119_s27 + $0x144] sm:$0xf] %v316_v17 }
  0x4b   : > { %319 = vst [vmem:[%s3119_s27 + $0x148] sm:$0xf] %v318_v18  ;;  %v320_v19 = vld [vmem:[%s3115_s26 + $0x298] sm:$0xf]  ;;  %v322_v20 = vld [vmem:[%s3115_s26 + $0x2a0] sm:$0xf] }
  0x4c   : > { %v324_v21 = vld [vmem:[%s3115_s26 + $0x2a8] sm:$0xf]  ;;  %321 = vst [vmem:[%s3119_s27 + $0x14c] sm:$0xf] %v320_v19  ;;  %323 = vst [vmem:[%s3119_s27 + $0x150] sm:$0xf] %v322_v20 }
  0x4d   : > { %325 = vst [vmem:[%s3119_s27 + $0x154] sm:$0xf] %v324_v21  ;;  %v326_v22 = vld [vmem:[%s3115_s26 + $0x2b0] sm:$0xf]  ;;  %v328_v23 = vld [vmem:[%s3115_s26 + $0x2b8] sm:$0xf] }
  0x4e   : > { %v330_v24 = vld [vmem:[%s3115_s26 + $0x2c0] sm:$0xf]  ;;  %327 = vst [vmem:[%s3119_s27 + $0x158] sm:$0xf] %v326_v22  ;;  %329 = vst [vmem:[%s3119_s27 + $0x15c] sm:$0xf] %v328_v23 }
  0x4f   : > { %331 = vst [vmem:[%s3119_s27 + $0x160] sm:$0xf] %v330_v24  ;;  %v332_v25 = vld [vmem:[%s3115_s26 + $0x2c8] sm:$0xf]  ;;  %v334_v26 = vld [vmem:[%s3115_s26 + $0x2d0] sm:$0xf] }
  0x50   : > { %v336_v27 = vld [vmem:[%s3115_s26 + $0x2d8] sm:$0xf]  ;;  %333 = vst [vmem:[%s3119_s27 + $0x164] sm:$0xf] %v332_v25  ;;  %335 = vst [vmem:[%s3119_s27 + $0x168] sm:$0xf] %v334_v26 }
  0x51   : > { %337 = vst [vmem:[%s3119_s27 + $0x16c] sm:$0xf] %v336_v27  ;;  %v338_v28 = vld [vmem:[%s3115_s26 + $0x2e0] sm:$0xf]  ;;  %v340_v29 = vld [vmem:[%s3115_s26 + $0x2e8] sm:$0xf] }
  0x52   : > { %v342_v30 = vld [vmem:[%s3115_s26 + $0x2f0] sm:$0xf]  ;;  %339 = vst [vmem:[%s3119_s27 + $0x170] sm:$0xf] %v338_v28  ;;  %341 = vst [vmem:[%s3119_s27 + $0x174] sm:$0xf] %v340_v29 }
  0x53   : > { %343 = vst [vmem:[%s3119_s27 + $0x178] sm:$0xf] %v342_v30  ;;  %v344_v31 = vld [vmem:[%s3115_s26 + $0x2f8] sm:$0xf]  ;;  %v346_v32 = vld [vmem:[%s3115_s26 + $0x300] sm:$0xf] }
  0x54   : > { %v348_v33 = vld [vmem:[%s3115_s26 + $0x308] sm:$0xf]  ;;  %345 = vst [vmem:[%s3119_s27 + $0x17c] sm:$0xf] %v344_v31  ;;  %347 = vst [vmem:[%s3119_s27 + $0x180] sm:$0xf] %v346_v32 }
  0x55   : > { %349 = vst [vmem:[%s3119_s27 + $0x184] sm:$0xf] %v348_v33  ;;  %v350_v34 = vld [vmem:[%s3115_s26 + $0x310] sm:$0xf]  ;;  %v352_v35 = vld [vmem:[%s3115_s26 + $0x318] sm:$0xf] }
  0x56   : > { %v354_v36 = vld [vmem:[%s3115_s26 + $0x320] sm:$0xf]  ;;  %351 = vst [vmem:[%s3119_s27 + $0x188] sm:$0xf] %v350_v34  ;;  %353 = vst [vmem:[%s3119_s27 + $0x18c] sm:$0xf] %v352_v35 }
  0x57   : > { %355 = vst [vmem:[%s3119_s27 + $0x190] sm:$0xf] %v354_v36  ;;  %v356_v37 = vld [vmem:[%s3115_s26 + $0x328] sm:$0xf]  ;;  %v358_v38 = vld [vmem:[%s3115_s26 + $0x330] sm:$0xf] }
  0x58   : > { %v360_v39 = vld [vmem:[%s3115_s26 + $0x338] sm:$0xf]  ;;  %357 = vst [vmem:[%s3119_s27 + $0x194] sm:$0xf] %v356_v37  ;;  %359 = vst [vmem:[%s3119_s27 + $0x198] sm:$0xf] %v358_v38 }
  0x59   : > { %361 = vst [vmem:[%s3119_s27 + $0x19c] sm:$0xf] %v360_v39  ;;  %v362_v40 = vld [vmem:[%s3115_s26 + $0x340] sm:$0xf]  ;;  %v364_v41 = vld [vmem:[%s3115_s26 + $0x348] sm:$0xf] }
  0x5a   : > { %v366_v42 = vld [vmem:[%s3115_s26 + $0x350] sm:$0xf]  ;;  %363 = vst [vmem:[%s3119_s27 + $0x1a0] sm:$0xf] %v362_v40  ;;  %365 = vst [vmem:[%s3119_s27 + $0x1a4] sm:$0xf] %v364_v41 }
  0x5b   : > { %367 = vst [vmem:[%s3119_s27 + $0x1a8] sm:$0xf] %v366_v42  ;;  %v368_v43 = vld [vmem:[%s3115_s26 + $0x358] sm:$0xf]  ;;  %v370_v44 = vld [vmem:[%s3115_s26 + $0x360] sm:$0xf] }
  0x5c   : > { %v372_v45 = vld [vmem:[%s3115_s26 + $0x368] sm:$0xf]  ;;  %369 = vst [vmem:[%s3119_s27 + $0x1ac] sm:$0xf] %v368_v43  ;;  %371 = vst [vmem:[%s3119_s27 + $0x1b0] sm:$0xf] %v370_v44 }
  0x5d   : > { %373 = vst [vmem:[%s3119_s27 + $0x1b4] sm:$0xf] %v372_v45  ;;  %v374_v46 = vld [vmem:[%s3115_s26 + $0x370] sm:$0xf]  ;;  %v376_v47 = vld [vmem:[%s3115_s26 + $0x378] sm:$0xf] }
  0x5e   : > { %v378_v48 = vld [vmem:[%s3115_s26 + $0x380] sm:$0xf]  ;;  %375 = vst [vmem:[%s3119_s27 + $0x1b8] sm:$0xf] %v374_v46  ;;  %377 = vst [vmem:[%s3119_s27 + $0x1bc] sm:$0xf] %v376_v47 }
  0x5f   : > { %379 = vst [vmem:[%s3119_s27 + $0x1c0] sm:$0xf] %v378_v48  ;;  %v380_v49 = vld [vmem:[%s3115_s26 + $0x388] sm:$0xf]  ;;  %v382_v50 = vld [vmem:[%s3115_s26 + $0x390] sm:$0xf] }
  0x60   : > { %v384_v51 = vld [vmem:[%s3115_s26 + $0x398] sm:$0xf]  ;;  %381 = vst [vmem:[%s3119_s27 + $0x1c4] sm:$0xf] %v380_v49  ;;  %383 = vst [vmem:[%s3119_s27 + $0x1c8] sm:$0xf] %v382_v50 }
  0x61   : > { %385 = vst [vmem:[%s3119_s27 + $0x1cc] sm:$0xf] %v384_v51  ;;  %v386_v52 = vld [vmem:[%s3115_s26 + $0x3a0] sm:$0xf]  ;;  %v388_v53 = vld [vmem:[%s3115_s26 + $0x3a8] sm:$0xf] }
  0x62   : > { %v390_v54 = vld [vmem:[%s3115_s26 + $0x3b0] sm:$0xf]  ;;  %387 = vst [vmem:[%s3119_s27 + $0x1d0] sm:$0xf] %v386_v52  ;;  %389 = vst [vmem:[%s3119_s27 + $0x1d4] sm:$0xf] %v388_v53 }
  0x63   : > { %391 = vst [vmem:[%s3119_s27 + $0x1d8] sm:$0xf] %v390_v54  ;;  %v392_v55 = vld [vmem:[%s3115_s26 + $0x3b8] sm:$0xf]  ;;  %v394_v56 = vld [vmem:[%s3115_s26 + $0x3c0] sm:$0xf] }
  0x64   : > { %v396_v57 = vld [vmem:[%s3115_s26 + $0x3c8] sm:$0xf]  ;;  %393 = vst [vmem:[%s3119_s27 + $0x1dc] sm:$0xf] %v392_v55  ;;  %395 = vst [vmem:[%s3119_s27 + $0x1e0] sm:$0xf] %v394_v56 }
  0x65   : > { %397 = vst [vmem:[%s3119_s27 + $0x1e4] sm:$0xf] %v396_v57  ;;  %v398_v58 = vld [vmem:[%s3115_s26 + $0x3d0] sm:$0xf]  ;;  %v400_v59 = vld [vmem:[%s3115_s26 + $0x3d8] sm:$0xf] }
  0x66   : > { %v402_v60 = vld [vmem:[%s3115_s26 + $0x3e0] sm:$0xf]  ;;  %399 = vst [vmem:[%s3119_s27 + $0x1e8] sm:$0xf] %v398_v58  ;;  %401 = vst [vmem:[%s3119_s27 + $0x1ec] sm:$0xf] %v400_v59 }
  0x67   : > { %403 = vst [vmem:[%s3119_s27 + $0x1f0] sm:$0xf] %v402_v60  ;;  %v404_v61 = vld [vmem:[%s3115_s26 + $0x3e8] sm:$0xf]  ;;  %v406_v62 = vld [vmem:[%s3115_s26 + $0x3f0] sm:$0xf] }
  0x68   : > { %v408_v63 = vld [vmem:[%s3115_s26 + $0x3f8] sm:$0xf]  ;;  %405 = vst [vmem:[%s3119_s27 + $0x1f4] sm:$0xf] %v404_v61  ;;  %407 = vst [vmem:[%s3119_s27 + $0x1f8] sm:$0xf] %v406_v62 }
  0x69   : > { %409 = vst [vmem:[%s3119_s27 + $0x1fc] sm:$0xf] %v408_v63 }
  0x6a PF: > { %p2469_p7 = scmp.ge.s32.totalorder %s3052_s14, 1  ;;  %p694_p8 = scmp.lt.s32.totalorder %s3052_s14, 3 }
  0x6c   : > { %p695_p9 = pnand %p2469_p7, %p694_p8 }
  0x6d   : > { %s701_s28 = sand.u32 (!%p695_p9), 1, %s3044_s12   ;;  %v3381_v0 = vld [vmem:[%s3888_s0] sm:$0xff] (!%p695_p9)  ;;  %v3391_v2 = vld [vmem:[%s3888_s0 + $0x8] sm:$0xff] (!%p695_p9)  ;;  %p727_p10 = scmp.lt.s32.totalorder (!%p695_p9), %s3090_s15, 1 }
  0x6e   : > { %698 = sbr.rel (%p695_p9) target bundleno = 566 (0x236), region = 69  ;;  %v3386_v1 = vld [vmem:[%s3888_s0 + $0x20] sm:$0xff] (!%p695_p9)  ;;  %s2470_s8 = sshll.u32 (!%p695_p9), %s701_s28, 9  ;;  %v3400_v4 = vld [vmem:[%s3888_s0 + $0x28] sm:$0xff] (!%p695_p9) }
  0x6f   : > { %v2474_v3 = vcombine.high (!%p695_p9), %v3381_v0, %v3386_v1  ;;  %v2476_v5 = vcombine.high (!%p695_p9), %v3391_v2, %v3400_v4  ;;  %s3404_s11 = scalar_lea.vmem (!%p695_p9), [#allocation2], %s2470_s8  ;;  %v740_v35 = vld [vmem:[%s3888_s0 + $0x40] sm:$0xff] (!%p695_p9)  ;;  %v741_v38 = vld [vmem:[%s3888_s0 + $0x48] sm:$0xff] (!%p695_p9)  ;;  %v2473_v42 = vcombine.low (!%p695_p9), %v3381_v0, %v3386_v1  ;;  %v2475_v43 = vcombine.low (!%p695_p9), %v3391_v2, %v3400_v4  ;;  %s3827_s25 = sshll.u32 (!%p695_p9), %s701_s28, 6 }
  0x70   : > { %v2964_v6 = vld [vmem:[%s3404_s11 + $0x40] sm:$0xff] (!%p695_p9)   ;;  %v2968_v10 = vld [vmem:[%s3404_s11 + $0x48] sm:$0xff] (!%p695_p9)   ;;  %v2972_v14 = vld [vmem:[%s3404_s11 + $0x50] sm:$0xff] (!%p695_p9)   ;;  %s3846_s12 = scalar_lea.vmem (!%p695_p9), [#allocation3], %s3827_s25 }
  0x71   : > { %1665 = vmatprep.mubr.bf16.mxu0 (!%p695_p9), %v2474_v3  ;;  %v2965_v7 = vld [vmem:[%s3404_s11 + $0xc0] sm:$0xff] (!%p695_p9)   ;;  %1762 = vmatprep.mubr.bf16.mxu1 (!%p695_p9), %v2476_v5  ;;  %v2969_v11 = vld [vmem:[%s3404_s11 + $0xc8] sm:$0xff] (!%p695_p9)   ;;  %v2973_v15 = vld [vmem:[%s3404_s11 + $0xd0] sm:$0xff] (!%p695_p9)  }
  0x72   : > { %2684 = vmatprep.subr.bf16.mxu0 (!%p695_p9), %v2964_v6  ;;  %v2966_v8 = vld [vmem:[%s3404_s11] sm:$0xff] (!%p695_p9)   ;;  %2748 = vmatprep.subr.bf16.mxu1 (!%p695_p9), %v2965_v7  ;;  %v2970_v12 = vld [vmem:[%s3404_s11 + $0x8] sm:$0xff] (!%p695_p9)   ;;  %v2974_v16 = vld [vmem:[%s3404_s11 + $0x10] sm:$0xff] (!%p695_p9)  }
  0x73   : > { %v2967_v9 = vld [vmem:[%s3404_s11 + $0x80] sm:$0xff] (!%p695_p9)   ;;  %2685 = vmatpush3.bf16.msra.mxu0 (!%p695_p9), %v2966_v8  ;;  %v2971_v13 = vld [vmem:[%s3404_s11 + $0x88] sm:$0xff] (!%p695_p9)   ;;  %v2975_v17 = vld [vmem:[%s3404_s11 + $0x90] sm:$0xff] (!%p695_p9)  }
  0x74   : > { %2749 = vmatpush3.bf16.msra.mxu1 (!%p695_p9), %v2967_v9  ;;  %2686 = vmatprep.subr.bf16.mxu0 (!%p695_p9), %v2968_v10  ;;  %v2976_v18 = vld [vmem:[%s3404_s11 + $0x58] sm:$0xff] (!%p695_p9)   ;;  %v2980_v22 = vld [vmem:[%s3404_s11 + $0x60] sm:$0xff] (!%p695_p9)   ;;  %v2984_v26 = vld [vmem:[%s3404_s11 + $0x68] sm:$0xff] (!%p695_p9)  }
  0x75   : > { %2750 = vmatprep.subr.bf16.mxu1 %v2969_v11  ;;  %v2977_v19 = vld [vmem:[%s3404_s11 + $0xd8] sm:$0xff]   ;;  %v2981_v23 = vld [vmem:[%s3404_s11 + $0xe0] sm:$0xff]   ;;  %v2985_v27 = vld [vmem:[%s3404_s11 + $0xe8] sm:$0xff]   ;;  %s728_s18 = scalar_select %p727_p10, %s3090_s15, 1 }
  0x76   : > { %v2978_v20 = vld [vmem:[%s3404_s11 + $0x18] sm:$0xff]   ;;  %v2982_v24 = vld [vmem:[%s3404_s11 + $0x20] sm:$0xff]   ;;  %v2986_v28 = vld [vmem:[%s3404_s11 + $0x28] sm:$0xff]   ;;  %s2618_s28 = sshll.u32 (%p3105_p5), %s3090_s15, 2 }
  0x77   : > { %2687 = vmatpush3.bf16.msra.mxu0 %v2970_v12  ;;  %v2979_v21 = vld [vmem:[%s3404_s11 + $0x98] sm:$0xff]   ;;  %v2983_v25 = vld [vmem:[%s3404_s11 + $0xa0] sm:$0xff]   ;;  %v2987_v29 = vld [vmem:[%s3404_s11 + $0xa8] sm:$0xff]   ;;  %s2472_s21 = sshll.u32 %s728_s18, 2  ;;  %s2295_s29 = scalar_lea.vmem (%p3105_p5), %s3891_s3, %s2618_s28 }
  0x78   : > { %2751 = vmatpush3.bf16.msra.mxu1 %v2971_v13  ;;  %2688 = vmatprep.subr.bf16.mxu0 %v2972_v14  ;;  %v2988_v30 = vld [vmem:[%s3404_s11 + $0x70] sm:$0xff]   ;;  %v2992_v34 = vld [vmem:[%s3404_s11 + $0x78] sm:$0xff]   ;;  %v744_v36 = vld [vmem:[%s3888_s0 + $0x60] sm:$0xff]  ;;  %s730_s24 = scalar_lea.vmem %s3890_s2, %s2472_s21 }
  0x79   : > { %2752 = vmatprep.subr.bf16.mxu1 %v2973_v15  ;;  %v2989_v31 = vld [vmem:[%s3404_s11 + $0xf0] sm:$0xff]   ;;  %v2993_v37 = vld [vmem:[%s3404_s11 + $0xf8] sm:$0xff]   ;;  %v745_v39 = vld [vmem:[%s3888_s0 + $0x68] sm:$0xff]  ;;  %v2482_v46 = vcombine.high %v740_v35, %v744_v36  ;;  %v2481_v54 = vcombine.low %v740_v35, %v744_v36 }
  0x7a   : > { %v2990_v32 = vld [vmem:[%s3404_s11 + $0x30] sm:$0xff]   ;;  %v2994_v40 = vld [vmem:[%s3404_s11 + $0x38] sm:$0xff]   ;;  %v2996_v44 = vld [vmem:[%s3404_s11 + $0x140] sm:$0xff]   ;;  %v2484_v48 = vcombine.high %v741_v38, %v745_v39  ;;  %v2483_v56 = vcombine.low %v741_v38, %v745_v39 }
  0x7b   : > { %2689 = vmatpush3.bf16.msra.mxu0 %v2974_v16  ;;  %v2991_v33 = vld [vmem:[%s3404_s11 + $0xb0] sm:$0xff]   ;;  %v2995_v41 = vld [vmem:[%s3404_s11 + $0xb8] sm:$0xff]   ;;  %v2997_v45 = vld [vmem:[%s3404_s11 + $0x100] sm:$0xff]  }
  0x7c   : > { %2753 = vmatpush3.bf16.msra.mxu1 %v2975_v17  ;;  %2690 = vmatprep.subr.bf16.mxu0 %v2976_v18  ;;  %v2998_v47 = vld [vmem:[%s3404_s11 + $0x1c0] sm:$0xff]   ;;  %v3000_v50 = vld [vmem:[%s3404_s11 + $0x148] sm:$0xff]   ;;  %v3004_v62 = vld [vmem:[%s3404_s11 + $0x150] sm:$0xff]  }
  0x7d   : > { %2754 = vmatprep.subr.bf16.mxu1 %v2977_v19  ;;  %v2999_v49 = vld [vmem:[%s3404_s11 + $0x180] sm:$0xff]   ;;  %v3001_v52 = vld [vmem:[%s3404_s11 + $0x108] sm:$0xff]   ;;  %v3005_v63 = vld [vmem:[%s3404_s11 + $0x110] sm:$0xff]  }
  0x7e   : > { %v748_v51 = vld [vmem:[%s3888_s0 + $0x80] sm:$0xff]  ;;  %v3002_v53 = vld [vmem:[%s3404_s11 + $0x1c8] sm:$0xff]   ;;  %v3006_v0 = vld [vmem:[%s3404_s11 + $0x1d0] sm:$0xff]  }
  0x7f   : > { %2691 = vmatpush3.bf16.msra.mxu0 %v2978_v20  ;;  %v3003_v55 = vld [vmem:[%s3404_s11 + $0x188] sm:$0xff]   ;;  %v752_v57 = vld [vmem:[%s3888_s0 + $0xa0] sm:$0xff]  ;;  %v3007_v1 = vld [vmem:[%s3404_s11 + $0x190] sm:$0xff]  }
  0x80   : > { %2755 = vmatpush3.bf16.msra.mxu1 %v2979_v21  ;;  %2692 = vmatprep.subr.bf16.mxu0 %v2980_v22  ;;  %v749_v58 = vld [vmem:[%s3888_s0 + $0x88] sm:$0xff]  ;;  %v2490_v60 = vcombine.high %v748_v51, %v752_v57  ;;  %v756_v2 = vld [vmem:[%s3888_s0 + $0xc0] sm:$0xff]  ;;  %v2489_v6 = vcombine.low %v748_v51, %v752_v57  ;;  %v3008_v7 = vld [vmem:[%s3404_s11 + $0x158] sm:$0xff]  }
  0x81   : > { %2756 = vmatprep.subr.bf16.mxu1 %v2981_v23  ;;  %v753_v59 = vld [vmem:[%s3888_s0 + $0xa8] sm:$0xff]  ;;  %v760_v3 = vld [vmem:[%s3888_s0 + $0xe0] sm:$0xff]  ;;  %v3009_v10 = vld [vmem:[%s3404_s11 + $0x118] sm:$0xff]  }
  0x82   : > { %v2492_v61 = vcombine.high %v749_v58, %v753_v59  ;;  %v757_v4 = vld [vmem:[%s3888_s0 + $0xc8] sm:$0xff]  ;;  %v2491_v8 = vcombine.low %v749_v58, %v753_v59  ;;  %v2498_v9 = vcombine.high %v756_v2, %v760_v3  ;;  %v3010_v12 = vld [vmem:[%s3404_s11 + $0x1d8] sm:$0xff]   ;;  %v764_v14 = vld [vmem:[%s3888_s0 + $0x100] sm:$0xff]  ;;  %v2497_v21 = vcombine.low %v756_v2, %v760_v3 }
  0x83   : > { %2693 = vmatpush3.bf16.msra.mxu0 %v2982_v24  ;;  %v761_v5 = vld [vmem:[%s3888_s0 + $0xe8] sm:$0xff]  ;;  %v3011_v13 = vld [vmem:[%s3404_s11 + $0x198] sm:$0xff]   ;;  %v768_v15 = vld [vmem:[%s3888_s0 + $0x120] sm:$0xff] }
  0x84   : > { %2757 = vmatpush3.bf16.msra.mxu1 %v2983_v25  ;;  %2694 = vmatprep.subr.bf16.mxu0 %v2984_v26  ;;  %v2500_v11 = vcombine.high %v757_v4, %v761_v5  ;;  %v765_v16 = vld [vmem:[%s3888_s0 + $0x108] sm:$0xff]  ;;  %v3012_v18 = vld [vmem:[%s3404_s11 + $0x160] sm:$0xff]   ;;  %v2499_v23 = vcombine.low %v757_v4, %v761_v5  ;;  %v2506_v24 = vcombine.high %v764_v14, %v768_v15  ;;  %v3020_v35 = vld [vmem:[%s3404_s11 + $0x170] sm:$0xff]  }
  0x85   : > { %2758 = vmatprep.subr.bf16.mxu1 %v2985_v27  ;;  %v769_v17 = vld [vmem:[%s3888_s0 + $0x128] sm:$0xff]  ;;  %v3013_v19 = vld [vmem:[%s3404_s11 + $0x120] sm:$0xff]   ;;  %v3021_v38 = vld [vmem:[%s3404_s11 + $0x130] sm:$0xff]  }
  0x86   : > { %v3014_v20 = vld [vmem:[%s3404_s11 + $0x1e0] sm:$0xff]   ;;  %v2508_v25 = vcombine.high %v765_v16, %v769_v17  ;;  %v3016_v26 = vld [vmem:[%s3404_s11 + $0x168] sm:$0xff]   ;;  %v2507_v36 = vcombine.low %v765_v16, %v769_v17  ;;  %v751_v16 = vld [vmem:[%s3888_s0 + $0x98] sm:$0xff] }
  0x87   : > { %2695 = vmatpush3.bf16.msra.mxu0 %v2986_v28  ;;  %v3015_v22 = vld [vmem:[%s3404_s11 + $0x1a0] sm:$0xff]   ;;  %v3017_v27 = vld [vmem:[%s3404_s11 + $0x128] sm:$0xff]   ;;  %v755_v17 = vld [vmem:[%s3888_s0 + $0xb8] sm:$0xff] }
  0x88   : > { %2759 = vmatpush3.bf16.msra.mxu1 %v2987_v29  ;;  %2696 = vmatprep.subr.bf16.mxu0 %v2988_v30  ;;  %v3018_v28 = vld [vmem:[%s3404_s11 + $0x1e8] sm:$0xff]   ;;  %v772_v30 = vld [vmem:[%s3888_s0 + $0x140] sm:$0xff] }
  0x89   : > { %2760 = vmatprep.subr.bf16.mxu1 %v2989_v31  ;;  %v3019_v29 = vld [vmem:[%s3404_s11 + $0x1a8] sm:$0xff]   ;;  %v776_v31 = vld [vmem:[%s3888_s0 + $0x160] sm:$0xff] }
  0x8a   : > { %v793_v57 = vld [vmem:[%s3888_s0 + $0x1e8] sm:$0xff] }
  0x8b   : > { %2697 = vmatpush3.bf16.msra.mxu0 %v2990_v32  ;;  %v773_v32 = vld [vmem:[%s3888_s0 + $0x148] sm:$0xff] }
  0x8c   : > { %2761 = vmatpush3.bf16.msra.mxu1 %v2991_v33  ;;  %2698 = vmatprep.subr.bf16.mxu0 %v2992_v34  ;;  %v777_v33 = vld [vmem:[%s3888_s0 + $0x168] sm:$0xff]  ;;  %v2505_v34 = vcombine.low %v764_v14, %v768_v15  ;;  %v750_v14 = vld [vmem:[%s3888_s0 + $0x90] sm:$0xff] }
  0x8d   : > { %2762 = vmatprep.subr.bf16.mxu1 %v2993_v37  ;;  %v2514_v37 = vcombine.high %v772_v30, %v776_v31  ;;  %v2516_v39 = vcombine.high %v773_v32, %v777_v33  ;;  %v2515_v51 = vcombine.low %v773_v32, %v777_v33  ;;  %v754_v15 = vld [vmem:[%s3888_s0 + $0xb0] sm:$0xff]  ;;  %v767_v32 = vld [vmem:[%s3888_s0 + $0x118] sm:$0xff] }
  0x8e   : > { %v771_v33 = vld [vmem:[%s3888_s0 + $0x138] sm:$0xff] }
  0x8f   : > { %2699 = vmatpush3.bf16.msra.mxu0 %v2994_v40  ;;  %v3022_v40 = vld [vmem:[%s3404_s11 + $0x1f0] sm:$0xff]  }
  0x90   : > { %2763 = vmatpush3.bf16.msra.mxu1 %v2995_v41  ;;  %2812 = vmatprep.subr.bf16.mxu0 %v2996_v44  ;;  %v3023_v41 = vld [vmem:[%s3404_s11 + $0x1b0] sm:$0xff]   ;;  %v781_v44 = vld [vmem:[%s3888_s0 + $0x188] sm:$0xff] }
  0x91   : > { %2876 = vmatprep.subr.bf16.mxu1 %v2998_v47  ;;  %v3025_v47 = vld [vmem:[%s3404_s11 + $0x138] sm:$0xff]  }
  0x92   : > { %1666 = vmatmul.mubr.bf16.vlgmr.msra.gmra.mrb[0].mxu0 %v2473_v42  ;;  %v780_v42 = vld [vmem:[%s3888_s0 + $0x180] sm:$0xff] }
  0x93   : > { %1763 = vmatmul.mubr.bf16.vlgmr.msra.gmra.mrb[0].mxu1 %v2475_v43  ;;  %2813 = vmatpush3.bf16.msra.mxu0 %v2997_v45  ;;  %v784_v43 = vld [vmem:[%s3888_s0 + $0x1a0] sm:$0xff]  ;;  %v785_v45 = vld [vmem:[%s3888_s0 + $0x1a8] sm:$0xff] }
  0x94   : > { %1673 = vmatprep.mubr.bf16.mxu0 %v2482_v46  ;;  %2877 = vmatpush3.bf16.msra.mxu1 %v2999_v49  ;;  %v3024_v46 = vld [vmem:[%s3404_s11 + $0x178] sm:$0xff]   ;;  %v2513_v49 = vcombine.low %v772_v30, %v776_v31  ;;  %v2521_v58 = vcombine.low %v780_v42, %v784_v43  ;;  %v2523_v59 = vcombine.low %v781_v44, %v785_v45  ;;  %v766_v30 = vld [vmem:[%s3888_s0 + $0x110] sm:$0xff] }
  0x95   : > { %1770 = vmatprep.mubr.bf16.mxu1 %v2484_v48  ;;  %2814 = vmatprep.subr.bf16.mxu0 %v3000_v50  ;;  %v3026_v48 = vld [vmem:[%s3404_s11 + $0x1f8] sm:$0xff]   ;;  %v770_v31 = vld [vmem:[%s3888_s0 + $0x130] sm:$0xff] }
  0x96   : > { %2878 = vmatprep.subr.bf16.mxu1 %v3002_v53  ;;  %v3027_v50 = vld [vmem:[%s3404_s11 + $0x1b8] sm:$0xff]   ;;  %v2524_v53 = vcombine.high %v781_v44, %v785_v45 }
  0x97   : > { %2815 = vmatpush3.bf16.msra.mxu0 %v3001_v52  ;;  %v2522_v52 = vcombine.high %v780_v42, %v784_v43  ;;  %v2509_v42 = vcombine.low %v766_v30, %v770_v31  ;;  %v2511_v43 = vcombine.low %v767_v32, %v771_v33 }
  0x98   : > { %2879 = vmatpush3.bf16.msra.mxu1 %v3003_v55  ;;  %2816 = vmatprep.subr.bf16.mxu0 %v3004_v62  ;;  %v792_v55 = vld [vmem:[%s3888_s0 + $0x1e0] sm:$0xff]  ;;  %v734_v62 = vld [vmem:[%s3888_s0 + $0x10] sm:$0xff] }
  0x99   : > { %2880 = vmatprep.subr.bf16.mxu1 %v3006_v0  ;;  %v735_v0 = vld [vmem:[%s3888_s0 + $0x18] sm:$0xff] }
  0x9a   : > { %1674 = vmatmul.mubr.bf16.gmra.mrb[4].mxu0 %v2481_v54  ;;  %v788_v54 = vld [vmem:[%s3888_s0 + $0x1c0] sm:$0xff] }
  0x9b   : > { %1771 = vmatmul.mubr.bf16.gmra.mrb[4].mxu1 %v2483_v56  ;;  %1681 = vmatprep.mubr.bf16.mxu0 %v2490_v60  ;;  %v789_v56 = vld [vmem:[%s3888_s0 + $0x1c8] sm:$0xff]  ;;  %v2530_v60 = vcombine.high %v788_v54, %v792_v55  ;;  %v2529_v2 = vcombine.low %v788_v54, %v792_v55  ;;  %v790_v54 = vld [vmem:[%s3888_s0 + $0x1d0] sm:$0xff] }
  0x9c   : > { %1778 = vmatprep.mubr.bf16.mxu1 %v2492_v61  ;;  %2817 = vmatpush3.bf16.msra.mxu0 %v3005_v63  ;;  %v2532_v61 = vcombine.high %v789_v56, %v793_v57  ;;  %v738_v63 = vld [vmem:[%s3888_s0 + $0x30] sm:$0xff]  ;;  %v2531_v3 = vcombine.low %v789_v56, %v793_v57  ;;  %v791_v56 = vld [vmem:[%s3888_s0 + $0x1d8] sm:$0xff] }
  0x9d   : > { %2881 = vmatpush3.bf16.msra.mxu1 %v3007_v1  ;;  %2818 = vmatprep.subr.bf16.mxu0 %v3008_v7  ;;  %v739_v1 = vld [vmem:[%s3888_s0 + $0x38] sm:$0xff]  ;;  %v2478_v4 = vcombine.high %v734_v62, %v738_v63  ;;  %v746_v7 = vld [vmem:[%s3888_s0 + $0x70] sm:$0xff] }
  0x9e   : > { %2882 = vmatprep.subr.bf16.mxu1 %v3010_v12  ;;  %v2480_v5 = vcombine.high %v735_v0, %v739_v1  ;;  %v794_v55 = vld [vmem:[%s3888_s0 + $0x1f0] sm:$0xff]  ;;  %v795_v57 = vld [vmem:[%s3888_s0 + $0x1f8] sm:$0xff] }
  0xa0   : > { %2819 = vmatpush3.bf16.msra.mxu0 %v3009_v10  ;;  %v2477_v10 = vcombine.low %v734_v62, %v738_v63  ;;  %v2533_v62 = vcombine.low %v790_v54, %v794_v55  ;;  %v2535_v63 = vcombine.low %v791_v56, %v795_v57 }
  0xa1   : > { %2883 = vmatpush3.bf16.msra.mxu1 %v3011_v13  ;;  %2820 = vmatprep.subr.bf16.mxu0 %v3012_v18 }
  0xa2   : > { %1682 = vmatmul.mubr.bf16.gmra.mrb[8].mxu0 %v2489_v6  ;;  %2884 = vmatprep.subr.bf16.mxu1 %v3014_v20  ;;  %v742_v6 = vld [vmem:[%s3888_s0 + $0x50] sm:$0xff]  ;;  %v2494_v20 = vcombine.high %v750_v14, %v754_v15 }
  0xa3   : > { %1779 = vmatmul.mubr.bf16.gmra.mrb[8].mxu1 %v2491_v8  ;;  %1689 = vmatprep.mubr.bf16.mxu0 %v2498_v9  ;;  %v743_v8 = vld [vmem:[%s3888_s0 + $0x58] sm:$0xff]  ;;  %v2486_v12 = vcombine.high %v742_v6, %v746_v7  ;;  %v2485_v18 = vcombine.low %v742_v6, %v746_v7 }
  0xa4   : > { %1786 = vmatprep.mubr.bf16.mxu1 %v2500_v11  ;;  %2821 = vmatpush3.bf16.msra.mxu0 %v3013_v19  ;;  %v747_v9 = vld [vmem:[%s3888_s0 + $0x78] sm:$0xff]  ;;  %v2479_v11 = vcombine.low %v735_v0, %v739_v1  ;;  %v925_v0 = vlaneseq }
  0xa5   : > { %2885 = vmatpush3.bf16.msra.mxu1 %v3015_v22  ;;  %2822 = vmatprep.subr.bf16.mxu0 %v3016_v26  ;;  %v2488_v13 = vcombine.high %v743_v8, %v747_v9  ;;  %v2487_v19 = vcombine.low %v743_v8, %v747_v9  ;;  %v758_v22 = vld [vmem:[%s3888_s0 + $0xd0] sm:$0xff]  ;;  %v2493_v26 = vcombine.low %v750_v14, %v754_v15 }
  0xa6   : > { %2886 = vmatprep.subr.bf16.mxu1 %v3018_v28  ;;  %v3656_v1 = vshrl.u32 %v925_v0, 7 }
  0xa8   : > { %2823 = vmatpush3.bf16.msra.mxu0 %v3017_v27  ;;  %v2495_v27 = vcombine.low %v751_v16, %v755_v17 }
  0xa9   : > { %2887 = vmatpush3.bf16.msra.mxu1 %v3019_v29  ;;  %2824 = vmatprep.subr.bf16.mxu0 %v3020_v35 }
  0xaa   : > { %1690 = vmatmul.mubr.bf16.gmra.mrb[12].mxu0 %v2497_v21  ;;  %2888 = vmatprep.subr.bf16.mxu1 %v3022_v40  ;;  %v2496_v21 = vcombine.high %v751_v16, %v755_v17  ;;  %v775_v40 = vld [vmem:[%s3888_s0 + $0x158] sm:$0xff] }
  0xab   : > { %1787 = vmatmul.mubr.bf16.gmra.mrb[12].mxu1 %v2499_v23  ;;  %1697 = vmatprep.mubr.bf16.mxu0 %v2506_v24  ;;  %v762_v23 = vld [vmem:[%s3888_s0 + $0xf0] sm:$0xff]  ;;  %v759_v24 = vld [vmem:[%s3888_s0 + $0xd8] sm:$0xff] }
  0xac   : > { %1794 = vmatprep.mubr.bf16.mxu1 %v2508_v25  ;;  %2825 = vmatpush3.bf16.msra.mxu0 %v3021_v38  ;;  %v763_v25 = vld [vmem:[%s3888_s0 + $0xf8] sm:$0xff]  ;;  %v2502_v28 = vcombine.high %v758_v22, %v762_v23  ;;  %v774_v38 = vld [vmem:[%s3888_s0 + $0x150] sm:$0xff] }
  0xad   : > { %2889 = vmatpush3.bf16.msra.mxu1 %v3023_v41  ;;  %2826 = vmatprep.subr.bf16.mxu0 %v3024_v46  ;;  %v2504_v29 = vcombine.high %v759_v24, %v763_v25  ;;  %v2503_v35 = vcombine.low %v759_v24, %v763_v25  ;;  %v779_v41 = vld [vmem:[%s3888_s0 + $0x178] sm:$0xff]  ;;  %v782_v46 = vld [vmem:[%s3888_s0 + $0x190] sm:$0xff] }
  0xae   : > { %2890 = vmatprep.subr.bf16.mxu1 %v3026_v48  ;;  %v2520_v45 = vcombine.high %v775_v40, %v779_v41  ;;  %v783_v48 = vld [vmem:[%s3888_s0 + $0x198] sm:$0xff] }
  0xb0   : > { %2827 = vmatpush3.bf16.msra.mxu0 %v3025_v47  ;;  %v786_v47 = vld [vmem:[%s3888_s0 + $0x1b0] sm:$0xff] }
  0xb1   : > { %2891 = vmatpush3.bf16.msra.mxu1 %v3027_v50 }
  0xb2   : > { %1698 = vmatmul.mubr.bf16.gmra.mrb[16].mxu0 %v2505_v34  ;;  %v2501_v34 = vcombine.low %v758_v22, %v762_v23 }
  0xb3   : > { %1795 = vmatmul.mubr.bf16.gmra.mrb[16].mxu1 %v2507_v36  ;;  %1705 = vmatprep.mubr.bf16.mxu0 %v2514_v37  ;;  %v2510_v36 = vcombine.high %v766_v30, %v770_v31  ;;  %v2512_v37 = vcombine.high %v767_v32, %v771_v33 }
  0xb4   : > { %1802 = vmatprep.mubr.bf16.mxu1 %v2516_v39  ;;  %v778_v39 = vld [vmem:[%s3888_s0 + $0x170] sm:$0xff] }
  0xb5   : > { %v2518_v44 = vcombine.high %v774_v38, %v778_v39  ;;  %v2517_v50 = vcombine.low %v774_v38, %v778_v39 }
  0xba   : > { %1706 = vmatmul.mubr.bf16.gmra.mrb[20].mxu0 %v2513_v49  ;;  %v787_v49 = vld [vmem:[%s3888_s0 + $0x1b8] sm:$0xff] }
  0xbb   : > { %1803 = vmatmul.mubr.bf16.gmra.mrb[20].mxu1 %v2515_v51  ;;  %1713 = vmatprep.mubr.bf16.mxu0 %v2522_v52  ;;  %v2519_v51 = vcombine.low %v775_v40, %v779_v41  ;;  %v2526_v52 = vcombine.high %v782_v46, %v786_v47 }
  0xbc   : > { %1810 = vmatprep.mubr.bf16.mxu1 %v2524_v53  ;;  %v2528_v53 = vcombine.high %v783_v48, %v787_v49 }
  0xc2   : > { %1714 = vmatmul.mubr.bf16.gmra.mrb[24].mxu0 %v2521_v58  ;;  %v2525_v58 = vcombine.low %v782_v46, %v786_v47 }
  0xc3   : > { %1811 = vmatmul.mubr.bf16.gmra.mrb[24].mxu1 %v2523_v59  ;;  %1721 = vmatprep.mubr.bf16.mxu0 %v2530_v60  ;;  %v2527_v59 = vcombine.low %v783_v48, %v787_v49  ;;  %v2534_v60 = vcombine.high %v790_v54, %v794_v55 }
  0xc4   : > { %1818 = vmatprep.mubr.bf16.mxu1 %v2532_v61  ;;  %v2536_v61 = vcombine.high %v791_v56, %v795_v57 }
  0xca   : > { %1722 = vmatmul.mubr.bf16.gmra.mrb[28].mxu0 %v2529_v2  ;;  %v927_v2 = vsub.s32 0, %v3656_v1 }
  0xcb   : > { %1819 = vmatmul.mubr.bf16.gmra.mrb[28].mxu1 %v2531_v3  ;;  %1859 = vmatprep.mubr.bf16.mxu0 %v2478_v4  ;;  %v3662_v3 = vld [vmem:[%s730_s24] sm:$0x7] }
  0xcc   : > { %1956 = vmatprep.mubr.bf16.mxu1 %v2480_v5  ;;  %v3665_v5 = vrot.slane %v3662_v3, %v927_v2 }
  0xd2   : > { %1860 = vmatmul.mubr.bf16.vlgmr.msra.gmra.mrb[32].mxu0 %v2477_v10 }
  0xd3   : > { %1957 = vmatmul.mubr.bf16.vlgmr.msra.gmra.mrb[32].mxu1 %v2479_v11  ;;  %1867 = vmatprep.mubr.bf16.mxu0 %v2486_v12 }
  0xd4   : > { %1964 = vmatprep.mubr.bf16.mxu1 %v2488_v13 }
  0xda   : > { %1868 = vmatmul.mubr.bf16.gmra.mrb[36].mxu0 %v2485_v18 }
  0xdb   : > { %1965 = vmatmul.mubr.bf16.gmra.mrb[36].mxu1 %v2487_v19  ;;  %1875 = vmatprep.mubr.bf16.mxu0 %v2494_v20 }
  0xdc   : > { %1972 = vmatprep.mubr.bf16.mxu1 %v2496_v21 }
  0xe2   : > { %1876 = vmatmul.mubr.bf16.gmra.mrb[40].mxu0 %v2493_v26 }
  0xe3   : > { %1973 = vmatmul.mubr.bf16.gmra.mrb[40].mxu1 %v2495_v27  ;;  %1883 = vmatprep.mubr.bf16.mxu0 %v2502_v28 }
  0xe4   : > { %1980 = vmatprep.mubr.bf16.mxu1 %v2504_v29 }
  0xea   : > { %1884 = vmatmul.mubr.bf16.gmra.mrb[44].mxu0 %v2501_v34 }
  0xeb   : > { %1981 = vmatmul.mubr.bf16.gmra.mrb[44].mxu1 %v2503_v35  ;;  %1891 = vmatprep.mubr.bf16.mxu0 %v2510_v36 }
  0xec   : > { %1988 = vmatprep.mubr.bf16.mxu1 %v2512_v37 }
  0xf2   : > { %1892 = vmatmul.mubr.bf16.gmra.mrb[48].mxu0 %v2509_v42 }
  0xf3   : > { %1989 = vmatmul.mubr.bf16.gmra.mrb[48].mxu1 %v2511_v43  ;;  %1899 = vmatprep.mubr.bf16.mxu0 %v2518_v44 }
  0xf4   : > { %1996 = vmatprep.mubr.bf16.mxu1 %v2520_v45 }
  0xfa   : > { %1900 = vmatmul.mubr.bf16.gmra.mrb[52].mxu0 %v2517_v50 }
  0xfb   : > { %1997 = vmatmul.mubr.bf16.gmra.mrb[52].mxu1 %v2519_v51  ;;  %1907 = vmatprep.mubr.bf16.mxu0 %v2526_v52 }
  0xfc   : > { %2004 = vmatprep.mubr.bf16.mxu1 %v2528_v53 }
 0x102   : > { %1908 = vmatmul.mubr.bf16.gmra.mrb[56].mxu0 %v2525_v58 }
 0x103   : > { %2005 = vmatmul.mubr.bf16.gmra.mrb[56].mxu1 %v2527_v59  ;;  %1915 = vmatprep.mubr.bf16.mxu0 %v2534_v60 }
 0x104   : > { %2012 = vmatprep.mubr.bf16.mxu1 %v2536_v61 }
 0x10a   : > { %1916 = vmatmul.mubr.bf16.gmra.mrb[60].mxu0 %v2533_v62 }
 0x10b   : > { %2013 = vmatmul.mubr.bf16.gmra.mrb[60].mxu1 %v2535_v63 }
 0x165   : > { %v2700_v4 = vpop.f32.mrb[0].mxu0 }
 0x166   : > { %v2764_v6 = vpop.f32.mrb[0].mxu1  ;;  %v2701_v7 = vpop.f32.mrb[1].mxu0 }
 0x167   : > { %v2702_v8 = vadd.f32 %v2701_v7, %v2700_v4  ;;  %v2765_v9 = vpop.f32.mrb[1].mxu1  ;;  %v2703_v10 = vpop.f32.mrb[2].mxu0 }
 0x168   : > { %v2766_v11 = vadd.f32 %v2765_v9, %v2764_v6  ;;  %v2767_v12 = vpop.f32.mrb[2].mxu1  ;;  %v2704_v13 = vpop.f32.mrb[3].mxu0 }
 0x169   : > { %v1668_v14 = vadd.f32 %v2702_v8, %v3665_v5  ;;  %v2705_v15 = vadd.f32 %v2704_v13, %v2703_v10  ;;  %v2768_v16 = vpop.f32.mrb[3].mxu1 }
 0x16a   : > { %v2769_v17 = vadd.f32 %v2768_v16, %v2767_v12 }
 0x16b   : > { %v3668_v18 = vadd.f32 %v2766_v11, %v1668_v14  ;;  %v1671_v19 = vadd.f32 %v2705_v15, %v3665_v5 }
 0x16d   : > { %v3671_v20 = vadd.f32 %v2769_v17, %v1671_v19  ;;  %v2706_v21 = vpop.f32.mrb[4].mxu0 }
 0x16e   : > { %v2770_v22 = vpop.f32.mrb[4].mxu1  ;;  %v2707_v23 = vpop.f32.mrb[5].mxu0 }
 0x16f   : > { %v2708_v24 = vadd.f32 %v2707_v23, %v2706_v21  ;;  %v2771_v25 = vpop.f32.mrb[5].mxu1  ;;  %v2709_v26 = vpop.f32.mrb[6].mxu0 }
 0x170   : > { %v2772_v27 = vadd.f32 %v2771_v25, %v2770_v22  ;;  %v2773_v28 = vpop.f32.mrb[6].mxu1  ;;  %v2710_v29 = vpop.f32.mrb[7].mxu0 }
 0x171   : > { %v1676_v30 = vadd.f32 %v2708_v24, %v3665_v5  ;;  %v2711_v31 = vadd.f32 %v2710_v29, %v2709_v26  ;;  %v2774_v32 = vpop.f32.mrb[7].mxu1 }
 0x172   : > { %v2775_v33 = vadd.f32 %v2774_v32, %v2773_v28 }
 0x173   : > { %v3674_v34 = vadd.f32 %v2772_v27, %v1676_v30  ;;  %v1679_v35 = vadd.f32 %v2711_v31, %v3665_v5 }
 0x175   : > { %v3677_v36 = vadd.f32 %v2775_v33, %v1679_v35  ;;  %v2712_v37 = vpop.f32.mrb[8].mxu0 }
 0x176   : > { %v2776_v38 = vpop.f32.mrb[8].mxu1  ;;  %v2713_v39 = vpop.f32.mrb[9].mxu0 }
 0x177   : > { %v2714_v40 = vadd.f32 %v2713_v39, %v2712_v37  ;;  %v2777_v41 = vpop.f32.mrb[9].mxu1  ;;  %v2715_v42 = vpop.f32.mrb[10].mxu0 }
 0x178   : > { %v2778_v43 = vadd.f32 %v2777_v41, %v2776_v38  ;;  %v2779_v44 = vpop.f32.mrb[10].mxu1  ;;  %v2716_v45 = vpop.f32.mrb[11].mxu0 }
 0x179   : > { %v1684_v46 = vadd.f32 %v2714_v40, %v3665_v5  ;;  %v2717_v47 = vadd.f32 %v2716_v45, %v2715_v42  ;;  %v2780_v48 = vpop.f32.mrb[11].mxu1 }
 0x17a   : > { %v2781_v49 = vadd.f32 %v2780_v48, %v2779_v44 }
 0x17b   : > { %v3680_v50 = vadd.f32 %v2778_v43, %v1684_v46  ;;  %v1687_v51 = vadd.f32 %v2717_v47, %v3665_v5 }
 0x17d   : > { %v3683_v52 = vadd.f32 %v2781_v49, %v1687_v51  ;;  %v2718_v53 = vpop.f32.mrb[12].mxu0 }
 0x17e   : > { %v2782_v54 = vpop.f32.mrb[12].mxu1  ;;  %v2719_v55 = vpop.f32.mrb[13].mxu0 }
 0x17f   : > { %v2720_v56 = vadd.f32 %v2719_v55, %v2718_v53  ;;  %v2783_v57 = vpop.f32.mrb[13].mxu1  ;;  %v2721_v58 = vpop.f32.mrb[14].mxu0 }
 0x180   : > { %v2784_v59 = vadd.f32 %v2783_v57, %v2782_v54  ;;  %v2785_v60 = vpop.f32.mrb[14].mxu1  ;;  %v2722_v61 = vpop.f32.mrb[15].mxu0 }
 0x181   : > { %v1692_v62 = vadd.f32 %v2720_v56, %v3665_v5  ;;  %v2723_v63 = vadd.f32 %v2722_v61, %v2721_v58  ;;  %v2786_v0 = vpop.f32.mrb[15].mxu1 }
 0x182   : > { %v2787_v2 = vadd.f32 %v2786_v0, %v2785_v60 }
 0x183   : > { %v3686_v4 = vadd.f32 %v2784_v59, %v1692_v62  ;;  %v1695_v6 = vadd.f32 %v2723_v63, %v3665_v5 }
 0x185   : > { %v3689_v7 = vadd.f32 %v2787_v2, %v1695_v6  ;;  %v2724_v8 = vpop.f32.mrb[16].mxu0 }
 0x186   : > { %v2788_v9 = vpop.f32.mrb[16].mxu1  ;;  %v2725_v10 = vpop.f32.mrb[17].mxu0 }
 0x187   : > { %v2726_v11 = vadd.f32 %v2725_v10, %v2724_v8  ;;  %v2789_v12 = vpop.f32.mrb[17].mxu1  ;;  %v2727_v13 = vpop.f32.mrb[18].mxu0 }
 0x188   : > { %v2790_v14 = vadd.f32 %v2789_v12, %v2788_v9  ;;  %v2791_v15 = vpop.f32.mrb[18].mxu1  ;;  %v2728_v16 = vpop.f32.mrb[19].mxu0 }
 0x189   : > { %v1700_v17 = vadd.f32 %v2726_v11, %v3665_v5  ;;  %v2729_v19 = vadd.f32 %v2728_v16, %v2727_v13  ;;  %v2792_v21 = vpop.f32.mrb[19].mxu1 }
 0x18a   : > { %v2793_v22 = vadd.f32 %v2792_v21, %v2791_v15 }
 0x18b   : > { %v3692_v23 = vadd.f32 %v2790_v14, %v1700_v17  ;;  %v1703_v24 = vadd.f32 %v2729_v19, %v3665_v5 }
 0x18d   : > { %v3695_v25 = vadd.f32 %v2793_v22, %v1703_v24  ;;  %v2730_v26 = vpop.f32.mrb[20].mxu0 }
 0x18e   : > { %v2794_v27 = vpop.f32.mrb[20].mxu1  ;;  %v2731_v28 = vpop.f32.mrb[21].mxu0 }
 0x18f   : > { %v2732_v29 = vadd.f32 %v2731_v28, %v2730_v26  ;;  %v2795_v30 = vpop.f32.mrb[21].mxu1  ;;  %v2733_v31 = vpop.f32.mrb[22].mxu0 }
 0x190   : > { %v2796_v32 = vadd.f32 %v2795_v30, %v2794_v27  ;;  %v2797_v33 = vpop.f32.mrb[22].mxu1  ;;  %v2734_v35 = vpop.f32.mrb[23].mxu0 }
 0x191   : > { %v1708_v37 = vadd.f32 %v2732_v29, %v3665_v5  ;;  %v2735_v38 = vadd.f32 %v2734_v35, %v2733_v31  ;;  %v2798_v39 = vpop.f32.mrb[23].mxu1 }
 0x192   : > { %v2799_v40 = vadd.f32 %v2798_v39, %v2797_v33 }
 0x193   : > { %v3698_v41 = vadd.f32 %v2796_v32, %v1708_v37  ;;  %v1711_v42 = vadd.f32 %v2735_v38, %v3665_v5 }
 0x195   : > { %v3701_v43 = vadd.f32 %v2799_v40, %v1711_v42  ;;  %v2736_v44 = vpop.f32.mrb[24].mxu0 }
 0x196   : > { %v2800_v45 = vpop.f32.mrb[24].mxu1  ;;  %v2737_v46 = vpop.f32.mrb[25].mxu0 }
 0x197   : > { %v2738_v47 = vadd.f32 %v2737_v46, %v2736_v44  ;;  %v2801_v48 = vpop.f32.mrb[25].mxu1  ;;  %v2739_v49 = vpop.f32.mrb[26].mxu0 }
 0x198   : > { %v2802_v51 = vadd.f32 %v2801_v48, %v2800_v45  ;;  %v2803_v53 = vpop.f32.mrb[26].mxu1  ;;  %v2740_v54 = vpop.f32.mrb[27].mxu0 }
 0x199   : > { %v1716_v55 = vadd.f32 %v2738_v47, %v3665_v5  ;;  %v2741_v56 = vadd.f32 %v2740_v54, %v2739_v49  ;;  %v2804_v57 = vpop.f32.mrb[27].mxu1 }
 0x19a   : > { %v2805_v58 = vadd.f32 %v2804_v57, %v2803_v53 }
 0x19b   : > { %v3704_v59 = vadd.f32 %v2802_v51, %v1716_v55  ;;  %v1719_v60 = vadd.f32 %v2741_v56, %v3665_v5 }
 0x19d   : > { %v3707_v61 = vadd.f32 %v2805_v58, %v1719_v60  ;;  %v2742_v62 = vpop.f32.mrb[28].mxu0 }
 0x19e   : > { %v2806_v63 = vpop.f32.mrb[28].mxu1  ;;  %v2743_v0 = vpop.f32.mrb[29].mxu0 }
 0x19f   : > { %v2744_v2 = vadd.f32 %v2743_v0, %v2742_v62  ;;  %v2807_v6 = vpop.f32.mrb[29].mxu1  ;;  %v2745_v8 = vpop.f32.mrb[30].mxu0 }
 0x1a0   : > { %v2808_v9 = vadd.f32 %v2807_v6, %v2806_v63  ;;  %v2809_v10 = vpop.f32.mrb[30].mxu1  ;;  %v2746_v11 = vpop.f32.mrb[31].mxu0 }
 0x1a1   : > { %v1724_v12 = vadd.f32 %v2744_v2, %v3665_v5  ;;  %v2747_v13 = vadd.f32 %v2746_v11, %v2745_v8  ;;  %v2810_v14 = vpop.f32.mrb[31].mxu1 }
 0x1a2   : > { %v2811_v15 = vadd.f32 %v2810_v14, %v2809_v10 }
 0x1a3   : > { %v3710_v16 = vadd.f32 %v2808_v9, %v1724_v12  ;;  %v1727_v17 = vadd.f32 %v2747_v13, %v3665_v5 }
 0x1a5   : > { %v3713_v19 = vadd.f32 %v2811_v15, %v1727_v17  ;;  %v2828_v21 = vpop.f32.mrb[32].mxu0 }
 0x1a6   : > { %v2892_v22 = vpop.f32.mrb[32].mxu1  ;;  %v2829_v24 = vpop.f32.mrb[33].mxu0 }
 0x1a7   : > { %v2830_v26 = vadd.f32 %v2829_v24, %v2828_v21  ;;  %v2893_v27 = vpop.f32.mrb[33].mxu1  ;;  %v2831_v28 = vpop.f32.mrb[34].mxu0 }
 0x1a8   : > { %v2894_v29 = vadd.f32 %v2893_v27, %v2892_v22  ;;  %v2895_v30 = vpop.f32.mrb[34].mxu1  ;;  %v2832_v31 = vpop.f32.mrb[35].mxu0 }
 0x1a9   : > { %v1862_v32 = vadd.f32 %v2830_v26, %v3668_v18  ;;  %v2833_v33 = vadd.f32 %v2832_v31, %v2831_v28  ;;  %v2896_v35 = vpop.f32.mrb[35].mxu1 }
 0x1aa   : > { %v2897_v37 = vadd.f32 %v2896_v35, %v2895_v30 }
 0x1ab   : > { %v3716_v38 = vadd.f32 %v2894_v29, %v1862_v32  ;;  %v1865_v5 = vadd.f32 %v2833_v33, %v3671_v20 }
 0x1ad   : > { %v3719_v39 = vadd.f32 %v2897_v37, %v1865_v5  ;;  %v2834_v40 = vpop.f32.mrb[36].mxu0  ;;  %v2044_v45 = vmul.f32 %v3716_v38, %v3716_v38 }
 0x1ae   : > { %v2898_v42 = vpop.f32.mrb[36].mxu1  ;;  %v2835_v44 = vpop.f32.mrb[37].mxu0 }
 0x1af   : > { %v2021_v46 = vadd.f32 %v3719_v39, %v3716_v38  ;;  %v2045_v18 = vmul.f32 %v3719_v39, %v3719_v39  ;;  %v2836_v47 = vadd.f32 %v2835_v44, %v2834_v40  ;;  %v2899_v48 = vpop.f32.mrb[37].mxu1  ;;  %v2837_v49 = vpop.f32.mrb[38].mxu0 }
 0x1b0   : > { %v2900_v51 = vadd.f32 %v2899_v48, %v2898_v42  ;;  %v2901_v53 = vpop.f32.mrb[38].mxu1  ;;  %v2838_v20 = vpop.f32.mrb[39].mxu0 }
 0x1b1   : > { %v2060_v54 = vadd.f32 %v2045_v18, %v2044_v45  ;;  %v1870_v55 = vadd.f32 %v2836_v47, %v3674_v34  ;;  %v2839_v56 = vadd.f32 %v2838_v20, %v2837_v49  ;;  %v2902_v57 = vpop.f32.mrb[39].mxu1 }
 0x1b2   : > { %v2903_v58 = vadd.f32 %v2902_v57, %v2901_v53 }
 0x1b3   : > { %v3728_v60 = vadd.f32 %v2900_v51, %v1870_v55  ;;  %v1873_v62 = vadd.f32 %v2839_v56, %v3677_v36 }
 0x1b5   : > { %v2022_v63 = vadd.f32 %v2021_v46, %v3728_v60  ;;  %v2046_v0 = vmul.f32 %v3728_v60, %v3728_v60  ;;  %v3734_v2 = vadd.f32 %v2903_v58, %v1873_v62  ;;  %v2840_v6 = vpop.f32.mrb[40].mxu0 }
 0x1b6   : > { %v2904_v8 = vpop.f32.mrb[40].mxu1  ;;  %v2841_v9 = vpop.f32.mrb[41].mxu0 }
 0x1b7   : > { %v2061_v10 = vadd.f32 %v2060_v54, %v2046_v0  ;;  %v2023_v34 = vadd.f32 %v2022_v63, %v3734_v2  ;;  %v2047_v11 = vmul.f32 %v3734_v2, %v3734_v2  ;;  %v2842_v12 = vadd.f32 %v2841_v9, %v2840_v6  ;;  %v2905_v13 = vpop.f32.mrb[41].mxu1  ;;  %v2843_v14 = vpop.f32.mrb[42].mxu0 }
 0x1b8   : > { %v2906_v36 = vadd.f32 %v2905_v13, %v2904_v8  ;;  %v2907_v15 = vpop.f32.mrb[42].mxu1  ;;  %v2844_v17 = vpop.f32.mrb[43].mxu0 }
 0x1b9   : > { %v2062_v21 = vadd.f32 %v2061_v10, %v2047_v11  ;;  %v1878_v22 = vadd.f32 %v2842_v12, %v3680_v50  ;;  %v2845_v24 = vadd.f32 %v2844_v17, %v2843_v14  ;;  %v2908_v26 = vpop.f32.mrb[43].mxu1 }
 0x1ba   : > { %v2909_v27 = vadd.f32 %v2908_v26, %v2907_v15 }
 0x1bb   : > { %v3740_v28 = vadd.f32 %v2906_v36, %v1878_v22  ;;  %v1881_v29 = vadd.f32 %v2845_v24, %v3683_v52 }
 0x1bd   : > { %v2024_v30 = vadd.f32 %v2023_v34, %v3740_v28  ;;  %v2048_v31 = vmul.f32 %v3740_v28, %v3740_v28  ;;  %v3746_v32 = vadd.f32 %v2909_v27, %v1881_v29  ;;  %v2846_v33 = vpop.f32.mrb[44].mxu0 }
 0x1be   : > { %v2910_v35 = vpop.f32.mrb[44].mxu1  ;;  %v2847_v37 = vpop.f32.mrb[45].mxu0 }
 0x1bf   : > { %v2063_v5 = vadd.f32 %v2062_v21, %v2048_v31  ;;  %v2025_v50 = vadd.f32 %v2024_v30, %v3746_v32  ;;  %v2049_v40 = vmul.f32 %v3746_v32, %v3746_v32  ;;  %v2848_v42 = vadd.f32 %v2847_v37, %v2846_v33  ;;  %v2911_v44 = vpop.f32.mrb[45].mxu1  ;;  %v2849_v45 = vpop.f32.mrb[46].mxu0 }
 0x1c0   : > { %v2912_v52 = vadd.f32 %v2911_v44, %v2910_v35  ;;  %v2913_v46 = vpop.f32.mrb[46].mxu1  ;;  %v2850_v18 = vpop.f32.mrb[47].mxu0 }
 0x1c1   : > { %v2064_v47 = vadd.f32 %v2063_v5, %v2049_v40  ;;  %v1886_v48 = vadd.f32 %v2848_v42, %v3686_v4  ;;  %v2851_v49 = vadd.f32 %v2850_v18, %v2849_v45  ;;  %v2914_v51 = vpop.f32.mrb[47].mxu1 }
 0x1c2   : > { %v2915_v53 = vadd.f32 %v2914_v51, %v2913_v46 }
 0x1c3   : > { %v3752_v20 = vadd.f32 %v2912_v52, %v1886_v48  ;;  %v1889_v54 = vadd.f32 %v2851_v49, %v3689_v7 }
 0x1c5   : > { %v2026_v55 = vadd.f32 %v2025_v50, %v3752_v20  ;;  %v2050_v56 = vmul.f32 %v3752_v20, %v3752_v20  ;;  %v3758_v57 = vadd.f32 %v2915_v53, %v1889_v54  ;;  %v2852_v58 = vpop.f32.mrb[48].mxu0 }
 0x1c6   : > { %v2916_v62 = vpop.f32.mrb[48].mxu1  ;;  %v2853_v63 = vpop.f32.mrb[49].mxu0 }
 0x1c7   : > { %v2065_v0 = vadd.f32 %v2064_v47, %v2050_v56  ;;  %v2027_v4 = vadd.f32 %v2026_v55, %v3758_v57  ;;  %v2051_v6 = vmul.f32 %v3758_v57, %v3758_v57  ;;  %v2854_v8 = vadd.f32 %v2853_v63, %v2852_v58  ;;  %v2917_v9 = vpop.f32.mrb[49].mxu1  ;;  %v2855_v10 = vpop.f32.mrb[50].mxu0 }
 0x1c8   : > { %v2918_v7 = vadd.f32 %v2917_v9, %v2916_v62  ;;  %v2919_v34 = vpop.f32.mrb[50].mxu1  ;;  %v2856_v11 = vpop.f32.mrb[51].mxu0 }
 0x1c9   : > { %v2066_v12 = vadd.f32 %v2065_v0, %v2051_v6  ;;  %v1894_v13 = vadd.f32 %v2854_v8, %v3692_v23  ;;  %v2857_v14 = vadd.f32 %v2856_v11, %v2855_v10  ;;  %v2920_v36 = vpop.f32.mrb[51].mxu1 }
 0x1ca   : > { %v2921_v15 = vadd.f32 %v2920_v36, %v2919_v34 }
 0x1cb   : > { %v3764_v17 = vadd.f32 %v2918_v7, %v1894_v13  ;;  %v1897_v21 = vadd.f32 %v2857_v14, %v3695_v25 }
 0x1cd   : > { %v2028_v22 = vadd.f32 %v2027_v4, %v3764_v17  ;;  %v2052_v24 = vmul.f32 %v3764_v17, %v3764_v17  ;;  %v3770_v26 = vadd.f32 %v2921_v15, %v1897_v21  ;;  %v2858_v27 = vpop.f32.mrb[52].mxu0 }
 0x1ce   : > { %v2922_v29 = vpop.f32.mrb[52].mxu1  ;;  %v2859_v30 = vpop.f32.mrb[53].mxu0 }
 0x1cf   : > { %v2067_v31 = vadd.f32 %v2066_v12, %v2052_v24  ;;  %v2029_v23 = vadd.f32 %v2028_v22, %v3770_v26  ;;  %v2053_v33 = vmul.f32 %v3770_v26, %v3770_v26  ;;  %v2860_v35 = vadd.f32 %v2859_v30, %v2858_v27  ;;  %v2923_v37 = vpop.f32.mrb[53].mxu1  ;;  %v2861_v5 = vpop.f32.mrb[54].mxu0 }
 0x1d0   : > { %v2924_v25 = vadd.f32 %v2923_v37, %v2922_v29  ;;  %v2925_v50 = vpop.f32.mrb[54].mxu1  ;;  %v2862_v40 = vpop.f32.mrb[55].mxu0 }
 0x1d1   : > { %v2068_v42 = vadd.f32 %v2067_v31, %v2053_v33  ;;  %v1902_v44 = vadd.f32 %v2860_v35, %v3698_v41  ;;  %v2863_v45 = vadd.f32 %v2862_v40, %v2861_v5  ;;  %v2926_v52 = vpop.f32.mrb[55].mxu1 }
 0x1d2   : > { %v2927_v46 = vadd.f32 %v2926_v52, %v2925_v50 }
 0x1d3   : > { %v3776_v18 = vadd.f32 %v2924_v25, %v1902_v44  ;;  %v1905_v47 = vadd.f32 %v2863_v45, %v3701_v43 }
 0x1d5   : > { %v2030_v48 = vadd.f32 %v2029_v23, %v3776_v18  ;;  %v2054_v49 = vmul.f32 %v3776_v18, %v3776_v18  ;;  %v3782_v51 = vadd.f32 %v2927_v46, %v1905_v47  ;;  %v2864_v53 = vpop.f32.mrb[56].mxu0 }
 0x1d6   : > { %v2928_v54 = vpop.f32.mrb[56].mxu1  ;;  %v2865_v55 = vpop.f32.mrb[57].mxu0 }
 0x1d7   : > { %v2069_v56 = vadd.f32 %v2068_v42, %v2054_v49  ;;  %v2031_v41 = vadd.f32 %v2030_v48, %v3782_v51  ;;  %v2055_v58 = vmul.f32 %v3782_v51, %v3782_v51  ;;  %v2866_v62 = vadd.f32 %v2865_v55, %v2864_v53  ;;  %v2929_v63 = vpop.f32.mrb[57].mxu1  ;;  %v2867_v0 = vpop.f32.mrb[58].mxu0 }
 0x1d8   : > { %v2930_v43 = vadd.f32 %v2929_v63, %v2928_v54  ;;  %v2931_v4 = vpop.f32.mrb[58].mxu1  ;;  %v2868_v6 = vpop.f32.mrb[59].mxu0 }
 0x1d9   : > { %v2070_v8 = vadd.f32 %v2069_v56, %v2055_v58  ;;  %v1910_v9 = vadd.f32 %v2866_v62, %v3704_v59  ;;  %v2869_v10 = vadd.f32 %v2868_v6, %v2867_v0  ;;  %v2932_v7 = vpop.f32.mrb[59].mxu1 }
 0x1da   : > { %v2933_v34 = vadd.f32 %v2932_v7, %v2931_v4 }
 0x1db   : > { %v3788_v11 = vadd.f32 %v2930_v43, %v1910_v9  ;;  %v1913_v12 = vadd.f32 %v2869_v10, %v3707_v61 }
 0x1dd   : > { %v2032_v13 = vadd.f32 %v2031_v41, %v3788_v11  ;;  %v2056_v14 = vmul.f32 %v3788_v11, %v3788_v11  ;;  %v3794_v36 = vadd.f32 %v2933_v34, %v1913_v12  ;;  %v2870_v15 = vpop.f32.mrb[60].mxu0 }
 0x1de   : > { %v2934_v21 = vpop.f32.mrb[60].mxu1  ;;  %v2871_v22 = vpop.f32.mrb[61].mxu0 }
 0x1df   : > { %v2071_v24 = vadd.f32 %v2070_v8, %v2056_v14  ;;  %v2033_v59 = vadd.f32 %v2032_v13, %v3794_v36  ;;  %v2057_v27 = vmul.f32 %v3794_v36, %v3794_v36  ;;  %v2872_v29 = vadd.f32 %v2871_v22, %v2870_v15  ;;  %v2935_v30 = vpop.f32.mrb[61].mxu1  ;;  %v2873_v31 = vpop.f32.mrb[62].mxu0 }
 0x1e0   : > { %v2936_v61 = vadd.f32 %v2935_v30, %v2934_v21  ;;  %v2937_v23 = vpop.f32.mrb[62].mxu1  ;;  %v2874_v33 = vpop.f32.mrb[63].mxu0 }
 0x1e1   : > { %v2072_v35 = vadd.f32 %v2071_v24, %v2057_v27  ;;  %v1918_v37 = vadd.f32 %v2872_v29, %v3710_v16  ;;  %v2875_v5 = vadd.f32 %v2874_v33, %v2873_v31  ;;  %v2938_v25 = vpop.f32.mrb[63].mxu1 }
 0x1e2   : > { %v2939_v50 = vadd.f32 %v2938_v25, %v2937_v23 }
 0x1e3   : > { %v3800_v40 = vadd.f32 %v2936_v61, %v1918_v37  ;;  %v1921_v42 = vadd.f32 %v2875_v5, %v3713_v19 }
 0x1e5   : > { %v2034_v44 = vadd.f32 %v2033_v59, %v3800_v40  ;;  %v2058_v45 = vmul.f32 %v3800_v40, %v3800_v40  ;;  %v2018_v52 = vadd.f32 %v2939_v50, %v1921_v42 }
 0x1e7   : > { %v2073_v46 = vadd.f32 %v2072_v35, %v2058_v45  ;;  %v2035_v47 = vadd.f32 %v2034_v44, %v2018_v52  ;;  %v2059_v48 = vmul.f32 %v2018_v52, %v2018_v52 }
 0x1e9   : > { %v2036_v49 = vrot.slane %v2035_v47, 4  ;;  %v2074_v53 = vadd.f32 %v2073_v46, %v2059_v48 }
 0x1eb   : > { %v2037_v54 = vadd.f32 %v2036_v49, %v2035_v47  ;;  %v2075_v16 = vrot.slane %v2074_v53, 4 }
 0x1ed   : > { %v2038_v55 = vrot.slane %v2037_v54, 2  ;;  %v2076_v56 = vadd.f32 %v2075_v16, %v2074_v53 }
 0x1ef   : > { %v2039_v41 = vadd.f32 %v2038_v55, %v2037_v54  ;;  %v2077_v58 = vrot.slane %v2076_v56, 2 }
 0x1f1   : > { %v2040_v62 = vrot.slane %v2039_v41, 1  ;;  %v2078_v63 = vadd.f32 %v2077_v58, %v2076_v56 }
 0x1f3   : > { %v2041_v19 = vadd.f32 %v2040_v62, %v2039_v41  ;;  %v2079_v0 = vrot.slane %v2078_v63, 1 }
 0x1f5   : > { %v2043_v43 = vmul.f32 0.0078125, %v2041_v19  ;;  %v2080_v4 = vadd.f32 %v2079_v0, %v2078_v63 }
 0x1f7   : > { %v2081_v6 = vmul.f32 0.0078125, %v2080_v4  ;;  %v2082_v8 = vmul.f32 %v2043_v43, %v2043_v43  ;;  %v2085_v9 = vsub.f32 %v3716_v38, %v2043_v43  ;;  %v2086_v10 = vsub.f32 %v3719_v39, %v2043_v43 }
 0x1f8   : > { %v2087_v7 = vsub.f32 %v3728_v60, %v2043_v43  ;;  %v2088_v34 = vsub.f32 %v3734_v2, %v2043_v43  ;;  %v2089_v12 = vsub.f32 %v3740_v28, %v2043_v43  ;;  %v2090_v13 = vsub.f32 %v3746_v32, %v2043_v43 }
 0x1f9   : > { %v2083_v14 = vsub.f32 %v2081_v6, %v2082_v8  ;;  %v2091_v15 = vsub.f32 %v3752_v20, %v2043_v43  ;;  %v2092_v21 = vsub.f32 %v3758_v57, %v2043_v43  ;;  %v2093_v22 = vsub.f32 %v3764_v17, %v2043_v43 }
 0x1fa   : > { %v2094_v24 = vsub.f32 %v3770_v26, %v2043_v43  ;;  %v2095_v38 = vsub.f32 %v3776_v18, %v2043_v43  ;;  %v2096_v39 = vsub.f32 %v3782_v51, %v2043_v43  ;;  %v2097_v60 = vsub.f32 %v3788_v11, %v2043_v43 }
 0x1fb   : > { %v2084_v2 = vmax.f32 %v2083_v14, 0.0  ;;  %v2098_v28 = vsub.f32 %v3794_v36, %v2043_v43  ;;  %v2099_v32 = vsub.f32 %v3800_v40, %v2043_v43  ;;  %v2100_v59 = vsub.f32 %v2018_v52, %v2043_v43 }
 0x1fc   : > { %v2141_v20 = vsub.s32 2, %v3656_v1  ;;  %v2121_v57 = vsub.s32 1, %v3656_v1 }
 0x1fd   : > { %v2101_v27 = vadd.f32 1e-05, %v2084_v2 }
 0x1fe   : > { %v2142_v26 = vrot.slane %v3662_v3, %v2141_v20  ;;  %v2122_v18 = vrot.slane %v3662_v3, %v2121_v57 }
 0x1ff   : > { %3028 = vrsqrt.f32 %v2101_v27 }
 0x209   : > { %v3029_v17 = vpop.eup %3028 }
 0x20a   : > { %v2103_v51 = vmul.f32 %v3029_v17, %v2085_v9  ;;  %v2104_v29 = vmul.f32 %v3029_v17, %v2086_v10  ;;  %v2105_v11 = vmul.f32 %v3029_v17, %v2087_v7  ;;  %v2106_v30 = vmul.f32 %v3029_v17, %v2088_v34 }
 0x20b   : > { %v2107_v31 = vmul.f32 %v3029_v17, %v2089_v12  ;;  %v2108_v36 = vmul.f32 %v3029_v17, %v2090_v13  ;;  %v2109_v61 = vmul.f32 %v3029_v17, %v2091_v15  ;;  %v2110_v23 = vmul.f32 %v3029_v17, %v2092_v21 }
 0x20c   : > { %v2111_v33 = vmul.f32 %v3029_v17, %v2093_v22  ;;  %v2112_v35 = vmul.f32 %v3029_v17, %v2094_v24  ;;  %v2113_v37 = vmul.f32 %v3029_v17, %v2095_v38  ;;  %v2114_v5 = vmul.f32 %v3029_v17, %v2096_v39 }
 0x20d   : > { %v2115_v25 = vmul.f32 %v3029_v17, %v2097_v60  ;;  %v2116_v50 = vmul.f32 %v3029_v17, %v2098_v28  ;;  %v2117_v1 = vmul.f32 %v3029_v17, %v2099_v32  ;;  %v2118_v40 = vmul.f32 %v3029_v17, %v2100_v59 }
 0x20e   : > { %v2123_v42 = vmul.f32 %v2122_v18, %v2103_v51  ;;  %v2124_v44 = vmul.f32 %v2122_v18, %v2104_v29  ;;  %v2125_v45 = vmul.f32 %v2122_v18, %v2105_v11  ;;  %v2126_v3 = vmul.f32 %v2122_v18, %v2106_v30 }
 0x20f   : > { %v2127_v52 = vmul.f32 %v2122_v18, %v2107_v31  ;;  %v2128_v46 = vmul.f32 %v2122_v18, %v2108_v36  ;;  %v2129_v47 = vmul.f32 %v2122_v18, %v2109_v61  ;;  %v2130_v48 = vmul.f32 %v2122_v18, %v2110_v23 }
 0x210   : > { %v2131_v49 = vmul.f32 %v2122_v18, %v2111_v33  ;;  %v2132_v53 = vmul.f32 %v2122_v18, %v2112_v35  ;;  %v2133_v54 = vmul.f32 %v2122_v18, %v2113_v37  ;;  %v2134_v16 = vmul.f32 %v2122_v18, %v2114_v5 }
 0x211   : > { %v2135_v55 = vmul.f32 %v2122_v18, %v2115_v25  ;;  %v2136_v56 = vmul.f32 %v2122_v18, %v2116_v50  ;;  %v2137_v41 = vmul.f32 %v2122_v18, %v2117_v1  ;;  %v2138_v58 = vmul.f32 %v2122_v18, %v2118_v40 }
 0x212   : > { %v2143_v62 = vadd.f32 %v2142_v26, %v2123_v42  ;;  %v2144_v63 = vadd.f32 %v2142_v26, %v2124_v44  ;;  %v2145_v19 = vadd.f32 %v2142_v26, %v2125_v45  ;;  %v2146_v0 = vadd.f32 %v2142_v26, %v2126_v3 }
 0x213   : > { %v2147_v43 = vadd.f32 %v2142_v26, %v2127_v52  ;;  %v2148_v4 = vadd.f32 %v2142_v26, %v2128_v46  ;;  %v2149_v6 = vadd.f32 %v2142_v26, %v2129_v47  ;;  %v2150_v8 = vadd.f32 %v2142_v26, %v2130_v48 }
 0x214   : > { %v2151_v9 = vadd.f32 %v2142_v26, %v2131_v49  ;;  %v2152_v10 = vadd.f32 %v2142_v26, %v2132_v53  ;;  %v2153_v7 = vadd.f32 %v2142_v26, %v2133_v54  ;;  %v2154_v34 = vadd.f32 %v2142_v26, %v2134_v16 }
 0x215   : > { %v2155_v12 = vadd.f32 %v2142_v26, %v2135_v55  ;;  %v2156_v13 = vadd.f32 %v2142_v26, %v2136_v56  ;;  %v2157_v14 = vadd.f32 %v2142_v26, %v2137_v41  ;;  %v2158_v15 = vadd.f32 %v2142_v26, %v2138_v58 }
 0x216   : > { %vm2159_vm0 = vcmp.ge.f32.partialorder %v2143_v62, 0.0  ;;  %vm2160_vm1 = vcmp.ge.f32.partialorder %v2144_v63, 0.0  ;;  %vm2161_vm2 = vcmp.ge.f32.partialorder %v2145_v19, 0.0  ;;  %vm2162_vm3 = vcmp.ge.f32.partialorder %v2146_v0, 0.0 }
 0x217   : > { %vm2163_vm4 = vcmp.ge.f32.partialorder %v2147_v43, 0.0  ;;  %vm2164_vm5 = vcmp.ge.f32.partialorder %v2148_v4, 0.0  ;;  %vm2165_vm6 = vcmp.ge.f32.partialorder %v2149_v6, 0.0  ;;  %vm2166_vm7 = vcmp.ge.f32.partialorder %v2150_v8, 0.0 }
 0x218   : > { %vm2167_vm8 = vcmp.ge.f32.partialorder %v2151_v9, 0.0  ;;  %vm2168_vm9 = vcmp.ge.f32.partialorder %v2152_v10, 0.0  ;;  %vm2169_vm10 = vcmp.ge.f32.partialorder %v2153_v7, 0.0  ;;  %vm2170_vm11 = vcmp.ge.f32.partialorder %v2154_v34, 0.0 }
 0x219   : > { %vm2171_vm12 = vcmp.ge.f32.partialorder %v2155_v12, 0.0  ;;  %vm2172_vm13 = vcmp.ge.f32.partialorder %v2156_v13, 0.0  ;;  %vm2173_vm14 = vcmp.ge.f32.partialorder %v2157_v14, 0.0  ;;  %vm2174_vm15 = vcmp.ge.f32.partialorder %v2158_v15, 0.0 }
 0x21a   : > { %v2175_v21 = vmul.f32 0.2, %v2143_v62  ;;  %v2176_v22 = vmul.f32 0.2, %v2144_v63  ;;  %v2177_v24 = vmul.f32 0.2, %v2145_v19 }
 0x21b   : > { %v2178_v38 = vmul.f32 0.2, %v2146_v0  ;;  %v2179_v39 = vmul.f32 0.2, %v2147_v43  ;;  %v2180_v60 = vmul.f32 0.2, %v2148_v4 }
 0x21c   : > { %v2181_v2 = vmul.f32 0.2, %v2149_v6  ;;  %v2182_v28 = vmul.f32 0.2, %v2150_v8  ;;  %v2183_v32 = vmul.f32 0.2, %v2151_v9  ;;  %v2191_v59 = vsel %vm2159_vm0, %v2143_v62, %v2175_v21 }
 0x21d   : > { %v2184_v27 = vmul.f32 0.2, %v2152_v10  ;;  %v2185_v20 = vmul.f32 0.2, %v2153_v7  ;;  %v2186_v57 = vmul.f32 0.2, %v2154_v34  ;;  %v2192_v17 = vsel %vm2160_vm1, %v2144_v63, %v2176_v22 }
 0x21e   : > { %v2187_v26 = vmul.f32 0.2, %v2155_v12  ;;  %v2188_v18 = vmul.f32 0.2, %v2156_v13  ;;  %v2189_v51 = vmul.f32 0.2, %v2157_v14  ;;  %v2193_v29 = vsel %vm2161_vm2, %v2145_v19, %v2177_v24 }
 0x21f   : > { %v2190_v11 = vmul.f32 0.2, %v2158_v15  ;;  %v2194_v30 = vsel %vm2162_vm3, %v2146_v0, %v2178_v38  ;;  %v2195_v31 = vsel %vm2163_vm4, %v2147_v43, %v2179_v39  ;;  %v2196_v36 = vsel %vm2164_vm5, %v2148_v4, %v2180_v60 }
 0x220   : > { %v2197_v61 = vsel %vm2165_vm6, %v2149_v6, %v2181_v2  ;;  %v2198_v23 = vsel %vm2166_vm7, %v2150_v8, %v2182_v28  ;;  %v2199_v33 = vsel %vm2167_vm8, %v2151_v9, %v2183_v32  ;;  %v2200_v35 = vsel %vm2168_vm9, %v2152_v10, %v2184_v27 }
 0x221   : > { %v2201_v37 = vsel %vm2169_vm10, %v2153_v7, %v2185_v20  ;;  %v2202_v5 = vsel %vm2170_vm11, %v2154_v34, %v2186_v57  ;;  %v2203_v25 = vsel %vm2171_vm12, %v2155_v12, %v2187_v26  ;;  %v2204_v50 = vsel %vm2172_vm13, %v2156_v13, %v2188_v18  ;;  %2293 = sbr.rel (!%p3105_p5) target bundleno = 566 (0x236), region = 77 }
 0x222   : > { %v2205_v1 = vsel %vm2173_vm14, %v2157_v14, %v2189_v51  ;;  %v2206_v40 = vsel %vm2174_vm15, %v2158_v15, %v2190_v11  ;;  %v2640_v42 = vpack.c.bf16 %v2192_v17, %v2191_v59  ;;  %v2645_v44 = vpack.c.bf16 %v2194_v30, %v2193_v29 }
 0x223   : > { %v2650_v45 = vpack.c.bf16 %v2196_v36, %v2195_v31  ;;  %v2655_v3 = vpack.c.bf16 %v2198_v23, %v2197_v61  ;;  %v2660_v52 = vpack.c.bf16 %v2200_v35, %v2199_v33  ;;  %v2665_v46 = vpack.c.bf16 %v2202_v5, %v2201_v37 }
 0x224   : > { %2641 = vst [vmem:[%s3846_s12] sm:$0xff] %v2640_v42   ;;  %2677 = vst [vmem:[%s3846_s12 + $0x8] sm:$0xff] %v2645_v44   ;;  %v2670_v47 = vpack.c.bf16 %v2204_v50, %v2203_v25  ;;  %v2675_v48 = vpack.c.bf16 %v2206_v40, %v2205_v1 }
 0x225   : > { %2678 = vst [vmem:[%s3846_s12 + $0x10] sm:$0xff] %v2650_v45   ;;  %2679 = vst [vmem:[%s3846_s12 + $0x18] sm:$0xff] %v2655_v3  }
 0x226   : > { %2680 = vst [vmem:[%s3846_s12 + $0x20] sm:$0xff] %v2660_v52   ;;  %2681 = vst [vmem:[%s3846_s12 + $0x28] sm:$0xff] %v2665_v46  }
 0x227   : > { %2682 = vst [vmem:[%s3846_s12 + $0x30] sm:$0xff] %v2670_v47   ;;  %2683 = vst [vmem:[%s3846_s12 + $0x38] sm:$0xff] %v2675_v48  }
 0x22b   : > { %v2311_v49 = vld [vmem:[%s3846_s12] sm:$0xf]  ;;  %v2313_v53 = vld [vmem:[%s3846_s12 + $0x4] sm:$0xf]  ;;  %v2315_v54 = vld [vmem:[%s3846_s12 + $0x8] sm:$0xf] }
 0x22c   : > { %v2317_v16 = vld [vmem:[%s3846_s12 + $0xc] sm:$0xf]  ;;  %v2319_v55 = vld [vmem:[%s3846_s12 + $0x10] sm:$0xf]  ;;  %2312 = vst [vmem:[%s2295_s29] sm:$0xf] %v2311_v49 }
 0x22d   : > { %2314 = vst [vmem:[%s2295_s29 + $0x8] sm:$0xf] %v2313_v53  ;;  %2316 = vst [vmem:[%s2295_s29 + $0x10] sm:$0xf] %v2315_v54  ;;  %v2321_v56 = vld [vmem:[%s3846_s12 + $0x14] sm:$0xf] }
 0x22e   : > { %2318 = vst [vmem:[%s2295_s29 + $0x18] sm:$0xf] %v2317_v16  ;;  %2320 = vst [vmem:[%s2295_s29 + $0x20] sm:$0xf] %v2319_v55  ;;  %v2323_v41 = vld [vmem:[%s3846_s12 + $0x18] sm:$0xf] }
 0x22f   : > { %v2325_v58 = vld [vmem:[%s3846_s12 + $0x1c] sm:$0xf]  ;;  %2322 = vst [vmem:[%s2295_s29 + $0x28] sm:$0xf] %v2321_v56  ;;  %2324 = vst [vmem:[%s2295_s29 + $0x30] sm:$0xf] %v2323_v41 }
 0x230   : > { %2326 = vst [vmem:[%s2295_s29 + $0x38] sm:$0xf] %v2325_v58  ;;  %v2327_v62 = vld [vmem:[%s3846_s12 + $0x20] sm:$0xf]  ;;  %v2329_v63 = vld [vmem:[%s3846_s12 + $0x24] sm:$0xf] }
 0x231   : > { %v2331_v19 = vld [vmem:[%s3846_s12 + $0x28] sm:$0xf]  ;;  %2328 = vst [vmem:[%s2295_s29 + $0x40] sm:$0xf] %v2327_v62  ;;  %2330 = vst [vmem:[%s2295_s29 + $0x48] sm:$0xf] %v2329_v63 }
 0x232   : > { %2332 = vst [vmem:[%s2295_s29 + $0x50] sm:$0xf] %v2331_v19  ;;  %v2333_v0 = vld [vmem:[%s3846_s12 + $0x2c] sm:$0xf]  ;;  %v2335_v43 = vld [vmem:[%s3846_s12 + $0x30] sm:$0xf] }
 0x233   : > { %v2337_v4 = vld [vmem:[%s3846_s12 + $0x34] sm:$0xf]  ;;  %2334 = vst [vmem:[%s2295_s29 + $0x58] sm:$0xf] %v2333_v0  ;;  %2336 = vst [vmem:[%s2295_s29 + $0x60] sm:$0xf] %v2335_v43 }
 0x234   : > { %2338 = vst [vmem:[%s2295_s29 + $0x68] sm:$0xf] %v2337_v4  ;;  %v2339_v6 = vld [vmem:[%s3846_s12 + $0x38] sm:$0xf]  ;;  %v2341_v8 = vld [vmem:[%s3846_s12 + $0x3c] sm:$0xf] }
 0x235   : > { %2340 = vst [vmem:[%s2295_s29 + $0x70] sm:$0xf] %v2339_v6  ;;  %2342 = vst [vmem:[%s2295_s29 + $0x78] sm:$0xf] %v2341_v8 }
 0x236 PF: > { %p10_p11 = scmp.ge.s32.totalorder %s3093_s16, 4   ;;  %s3893_s12 = smov %s3048_s13 }
 0x237   : > { %s3894_s13 = smov %s3103_s19  ;;  %s3895_s14 = smov %s3093_s16 }
 0x238   :  { %12 = sbr.rel (!%p10_p11) target bundleno = 2 (0x2), region = 152 }

// kernel: discriminator_forward.5
= control target key start
LH: loop header
LB: loop body
LE: loop exit
PB: predicated region body
PF: predicated region fallthrough
CT: control target
= control target key end

     0   :  { %s8916_s12 = smov 0   ;;  %s8918_s13 = smov 0   ;;  %s10500_s0 = inlined_call_operand.vmem [shape: bf16[32,4096], index: 0, kind: input, shape index: {}]   ;;  %s10501_s1 = inlined_call_operand.vmem [shape: bf16[4096,512], index: 1, kind: input, shape index: {}]   ;;  %s10502_s2 = inlined_call_operand.vmem [shape: f32[3,512], index: 2, kind: input, shape index: {}]   ;;  %s10503_s3 = inlined_call_operand.vmem [shape: bf16[32,512], index: 3, kind: output, shape index: {}]  }
   0x1   :  { %s8920_s14 = smov 0  }
   0x2 LB: > { %s8932_s15 = sadd.s32 4294967295, %s8894_s14   ;;  %s8935_s16 = sadd.s32 1, %s8894_s14   ;;  %s8894_s14 = sphi %s8920_s14, %s10507_s14   ;;  %s8890_s13 = sphi %s8918_s13, %s10506_s13   ;;  %s8886_s12 = sphi %s8916_s12, %s10505_s12  }
   0x3   : > { %s38_s17 = ssub.s32 %s8894_s14, %s8935_s16  ;;  %s41_s18 = sadd.s32 1, %s8890_s13 }
   0x4   : > { %p39_p0 = scmp.eq.s32.totalorder %s38_s17, 0  ;;  %p48_p1 = scmp.ne.s32.totalorder %s8890_s13, %s8886_s12 }
   0x5   : > { %p49_p2 = scmp.eq.s32.totalorder %s8894_s14, 0  ;;  %p104_p3 = scmp.eq.s32.totalorder %s8932_s15, 3 }
   0x6   : > { %s8945_s19 = scalar_select %p39_p0, %s8890_s13, %s41_s18  }
   0x7   : > { %p50_p4 = por %p49_p2, %p48_p1  ;;  %p8947_p5 = por %p104_p3, %p48_p1 }
   0x8   : > { %p7792_p6 = scmp.ge.s32.totalorder %s8894_s14, 4 }
   0xa   : > { %129 = sbr.rel (%p7792_p6) target bundleno = 362 (0x16a), region = 20 }
  0x11   : > { %132 = sbr.rel (!%p50_p4) target bundleno = 362 (0x16a), region = 24  ;;  %s134_s21 = sand.u32 (%p50_p4), 1, %s8890_s13  }
  0x12   : > { %s7794_s22 = sshll.u32 (%p50_p4), %s8894_s14, 2  ;;  %s7793_s23 = sshll.u32 (%p50_p4), %s134_s21, 11 }
  0x13   : > { %s8957_s26 = scalar_lea.vmem (%p50_p4), %s10501_s1, %s7794_s22  ;;  %s8961_s27 = scalar_lea.vmem (%p50_p4), [#allocation2], %s7793_s23 }
  0x14   : > { %v154_v0 = vld [vmem:[%s8957_s26] sm:$0xf] (%p50_p4)  ;;  %v156_v1 = vld [vmem:[%s8957_s26 + $0x10] sm:$0xf] (%p50_p4) }
  0x15   : > { %155 = vst [vmem:[%s8961_s27] sm:$0xf] (%p50_p4), %v154_v0  ;;  %157 = vst [vmem:[%s8961_s27 + $0x4] sm:$0xf] (%p50_p4), %v156_v1  ;;  %v158_v2 = vld [vmem:[%s8957_s26 + $0x20] sm:$0xf] (%p50_p4) }
  0x16   : > { %v160_v3 = vld [vmem:[%s8957_s26 + $0x30] sm:$0xf] (%p50_p4)  ;;  %v162_v4 = vld [vmem:[%s8957_s26 + $0x40] sm:$0xf] (%p50_p4)  ;;  %159 = vst [vmem:[%s8961_s27 + $0x8] sm:$0xf] (%p50_p4), %v158_v2 }
  0x17   : > { %161 = vst [vmem:[%s8961_s27 + $0xc] sm:$0xf] (%p50_p4), %v160_v3  ;;  %163 = vst [vmem:[%s8961_s27 + $0x10] sm:$0xf] (%p50_p4), %v162_v4  ;;  %v164_v5 = vld [vmem:[%s8957_s26 + $0x50] sm:$0xf] (%p50_p4) }
  0x18   : > { %v166_v6 = vld [vmem:[%s8957_s26 + $0x60] sm:$0xf]  ;;  %v168_v7 = vld [vmem:[%s8957_s26 + $0x70] sm:$0xf]  ;;  %165 = vst [vmem:[%s8961_s27 + $0x14] sm:$0xf] %v164_v5 }
  0x19   : > { %167 = vst [vmem:[%s8961_s27 + $0x18] sm:$0xf] %v166_v6  ;;  %169 = vst [vmem:[%s8961_s27 + $0x1c] sm:$0xf] %v168_v7  ;;  %v170_v8 = vld [vmem:[%s8957_s26 + $0x80] sm:$0xf] }
  0x1a   : > { %v172_v9 = vld [vmem:[%s8957_s26 + $0x90] sm:$0xf]  ;;  %v174_v10 = vld [vmem:[%s8957_s26 + $0xa0] sm:$0xf]  ;;  %171 = vst [vmem:[%s8961_s27 + $0x20] sm:$0xf] %v170_v8 }
  0x1b   : > { %173 = vst [vmem:[%s8961_s27 + $0x24] sm:$0xf] %v172_v9  ;;  %175 = vst [vmem:[%s8961_s27 + $0x28] sm:$0xf] %v174_v10  ;;  %v176_v11 = vld [vmem:[%s8957_s26 + $0xb0] sm:$0xf] }
  0x1c   : > { %v178_v12 = vld [vmem:[%s8957_s26 + $0xc0] sm:$0xf]  ;;  %v180_v13 = vld [vmem:[%s8957_s26 + $0xd0] sm:$0xf]  ;;  %177 = vst [vmem:[%s8961_s27 + $0x2c] sm:$0xf] %v176_v11 }
  0x1d   : > { %179 = vst [vmem:[%s8961_s27 + $0x30] sm:$0xf] %v178_v12  ;;  %181 = vst [vmem:[%s8961_s27 + $0x34] sm:$0xf] %v180_v13  ;;  %v182_v14 = vld [vmem:[%s8957_s26 + $0xe0] sm:$0xf] }
  0x1e   : > { %v184_v15 = vld [vmem:[%s8957_s26 + $0xf0] sm:$0xf]  ;;  %v186_v16 = vld [vmem:[%s8957_s26 + $0x100] sm:$0xf]  ;;  %183 = vst [vmem:[%s8961_s27 + $0x38] sm:$0xf] %v182_v14 }
  0x1f   : > { %185 = vst [vmem:[%s8961_s27 + $0x3c] sm:$0xf] %v184_v15  ;;  %187 = vst [vmem:[%s8961_s27 + $0x40] sm:$0xf] %v186_v16  ;;  %v188_v17 = vld [vmem:[%s8957_s26 + $0x110] sm:$0xf] }
  0x20   : > { %v190_v18 = vld [vmem:[%s8957_s26 + $0x120] sm:$0xf]  ;;  %v192_v19 = vld [vmem:[%s8957_s26 + $0x130] sm:$0xf]  ;;  %189 = vst [vmem:[%s8961_s27 + $0x44] sm:$0xf] %v188_v17 }
  0x21   : > { %191 = vst [vmem:[%s8961_s27 + $0x48] sm:$0xf] %v190_v18  ;;  %193 = vst [vmem:[%s8961_s27 + $0x4c] sm:$0xf] %v192_v19  ;;  %v194_v20 = vld [vmem:[%s8957_s26 + $0x140] sm:$0xf] }
  0x22   : > { %v196_v21 = vld [vmem:[%s8957_s26 + $0x150] sm:$0xf]  ;;  %v198_v22 = vld [vmem:[%s8957_s26 + $0x160] sm:$0xf]  ;;  %195 = vst [vmem:[%s8961_s27 + $0x50] sm:$0xf] %v194_v20 }
  0x23   : > { %197 = vst [vmem:[%s8961_s27 + $0x54] sm:$0xf] %v196_v21  ;;  %199 = vst [vmem:[%s8961_s27 + $0x58] sm:$0xf] %v198_v22  ;;  %v200_v23 = vld [vmem:[%s8957_s26 + $0x170] sm:$0xf] }
  0x24   : > { %v202_v24 = vld [vmem:[%s8957_s26 + $0x180] sm:$0xf]  ;;  %v204_v25 = vld [vmem:[%s8957_s26 + $0x190] sm:$0xf]  ;;  %201 = vst [vmem:[%s8961_s27 + $0x5c] sm:$0xf] %v200_v23 }
  0x25   : > { %203 = vst [vmem:[%s8961_s27 + $0x60] sm:$0xf] %v202_v24  ;;  %205 = vst [vmem:[%s8961_s27 + $0x64] sm:$0xf] %v204_v25  ;;  %v206_v26 = vld [vmem:[%s8957_s26 + $0x1a0] sm:$0xf] }
  0x26   : > { %v208_v27 = vld [vmem:[%s8957_s26 + $0x1b0] sm:$0xf]  ;;  %v210_v28 = vld [vmem:[%s8957_s26 + $0x1c0] sm:$0xf]  ;;  %207 = vst [vmem:[%s8961_s27 + $0x68] sm:$0xf] %v206_v26 }
  0x27   : > { %209 = vst [vmem:[%s8961_s27 + $0x6c] sm:$0xf] %v208_v27  ;;  %211 = vst [vmem:[%s8961_s27 + $0x70] sm:$0xf] %v210_v28  ;;  %v212_v29 = vld [vmem:[%s8957_s26 + $0x1d0] sm:$0xf] }
  0x28   : > { %v214_v30 = vld [vmem:[%s8957_s26 + $0x1e0] sm:$0xf]  ;;  %v216_v31 = vld [vmem:[%s8957_s26 + $0x1f0] sm:$0xf]  ;;  %213 = vst [vmem:[%s8961_s27 + $0x74] sm:$0xf] %v212_v29 }
  0x29   : > { %215 = vst [vmem:[%s8961_s27 + $0x78] sm:$0xf] %v214_v30  ;;  %217 = vst [vmem:[%s8961_s27 + $0x7c] sm:$0xf] %v216_v31  ;;  %v218_v32 = vld [vmem:[%s8957_s26 + $0x200] sm:$0xf] }
  0x2a   : > { %v220_v33 = vld [vmem:[%s8957_s26 + $0x210] sm:$0xf]  ;;  %v222_v34 = vld [vmem:[%s8957_s26 + $0x220] sm:$0xf]  ;;  %219 = vst [vmem:[%s8961_s27 + $0x80] sm:$0xf] %v218_v32 }
  0x2b   : > { %221 = vst [vmem:[%s8961_s27 + $0x84] sm:$0xf] %v220_v33  ;;  %223 = vst [vmem:[%s8961_s27 + $0x88] sm:$0xf] %v222_v34  ;;  %v224_v35 = vld [vmem:[%s8957_s26 + $0x230] sm:$0xf] }
  0x2c   : > { %v226_v36 = vld [vmem:[%s8957_s26 + $0x240] sm:$0xf]  ;;  %v228_v37 = vld [vmem:[%s8957_s26 + $0x250] sm:$0xf]  ;;  %225 = vst [vmem:[%s8961_s27 + $0x8c] sm:$0xf] %v224_v35 }
  0x2d   : > { %227 = vst [vmem:[%s8961_s27 + $0x90] sm:$0xf] %v226_v36  ;;  %229 = vst [vmem:[%s8961_s27 + $0x94] sm:$0xf] %v228_v37  ;;  %v230_v38 = vld [vmem:[%s8957_s26 + $0x260] sm:$0xf] }
  0x2e   : > { %v232_v39 = vld [vmem:[%s8957_s26 + $0x270] sm:$0xf]  ;;  %v234_v40 = vld [vmem:[%s8957_s26 + $0x280] sm:$0xf]  ;;  %231 = vst [vmem:[%s8961_s27 + $0x98] sm:$0xf] %v230_v38 }
  0x2f   : > { %233 = vst [vmem:[%s8961_s27 + $0x9c] sm:$0xf] %v232_v39  ;;  %235 = vst [vmem:[%s8961_s27 + $0xa0] sm:$0xf] %v234_v40  ;;  %v236_v41 = vld [vmem:[%s8957_s26 + $0x290] sm:$0xf] }
  0x30   : > { %v238_v42 = vld [vmem:[%s8957_s26 + $0x2a0] sm:$0xf]  ;;  %v240_v43 = vld [vmem:[%s8957_s26 + $0x2b0] sm:$0xf]  ;;  %237 = vst [vmem:[%s8961_s27 + $0xa4] sm:$0xf] %v236_v41 }
  0x31   : > { %239 = vst [vmem:[%s8961_s27 + $0xa8] sm:$0xf] %v238_v42  ;;  %241 = vst [vmem:[%s8961_s27 + $0xac] sm:$0xf] %v240_v43  ;;  %v242_v44 = vld [vmem:[%s8957_s26 + $0x2c0] sm:$0xf] }
  0x32   : > { %v244_v45 = vld [vmem:[%s8957_s26 + $0x2d0] sm:$0xf]  ;;  %v246_v46 = vld [vmem:[%s8957_s26 + $0x2e0] sm:$0xf]  ;;  %243 = vst [vmem:[%s8961_s27 + $0xb0] sm:$0xf] %v242_v44 }
  0x33   : > { %245 = vst [vmem:[%s8961_s27 + $0xb4] sm:$0xf] %v244_v45  ;;  %247 = vst [vmem:[%s8961_s27 + $0xb8] sm:$0xf] %v246_v46  ;;  %v248_v47 = vld [vmem:[%s8957_s26 + $0x2f0] sm:$0xf] }
  0x34   : > { %v250_v48 = vld [vmem:[%s8957_s26 + $0x300] sm:$0xf]  ;;  %v252_v49 = vld [vmem:[%s8957_s26 + $0x310] sm:$0xf]  ;;  %249 = vst [vmem:[%s8961_s27 + $0xbc] sm:$0xf] %v248_v47 }
  0x35   : > { %251 = vst [vmem:[%s8961_s27 + $0xc0] sm:$0xf] %v250_v48  ;;  %253 = vst [vmem:[%s8961_s27 + $0xc4] sm:$0xf] %v252_v49  ;;  %v254_v50 = vld [vmem:[%s8957_s26 + $0x320] sm:$0xf] }
  0x36   : > { %v256_v51 = vld [vmem:[%s8957_s26 + $0x330] sm:$0xf]  ;;  %v258_v52 = vld [vmem:[%s8957_s26 + $0x340] sm:$0xf]  ;;  %255 = vst [vmem:[%s8961_s27 + $0xc8] sm:$0xf] %v254_v50 }
  0x37   : > { %257 = vst [vmem:[%s8961_s27 + $0xcc] sm:$0xf] %v256_v51  ;;  %259 = vst [vmem:[%s8961_s27 + $0xd0] sm:$0xf] %v258_v52  ;;  %v260_v53 = vld [vmem:[%s8957_s26 + $0x350] sm:$0xf] }
  0x38   : > { %v262_v54 = vld [vmem:[%s8957_s26 + $0x360] sm:$0xf]  ;;  %v264_v55 = vld [vmem:[%s8957_s26 + $0x370] sm:$0xf]  ;;  %261 = vst [vmem:[%s8961_s27 + $0xd4] sm:$0xf] %v260_v53 }
  0x39   : > { %263 = vst [vmem:[%s8961_s27 + $0xd8] sm:$0xf] %v262_v54  ;;  %265 = vst [vmem:[%s8961_s27 + $0xdc] sm:$0xf] %v264_v55  ;;  %v266_v56 = vld [vmem:[%s8957_s26 + $0x380] sm:$0xf] }
  0x3a   : > { %v268_v57 = vld [vmem:[%s8957_s26 + $0x390] sm:$0xf]  ;;  %v270_v58 = vld [vmem:[%s8957_s26 + $0x3a0] sm:$0xf]  ;;  %267 = vst [vmem:[%s8961_s27 + $0xe0] sm:$0xf] %v266_v56 }
  0x3b   : > { %269 = vst [vmem:[%s8961_s27 + $0xe4] sm:$0xf] %v268_v57  ;;  %271 = vst [vmem:[%s8961_s27 + $0xe8] sm:$0xf] %v270_v58  ;;  %v272_v59 = vld [vmem:[%s8957_s26 + $0x3b0] sm:$0xf] }
  0x3c   : > { %v274_v60 = vld [vmem:[%s8957_s26 + $0x3c0] sm:$0xf]  ;;  %v276_v61 = vld [vmem:[%s8957_s26 + $0x3d0] sm:$0xf]  ;;  %273 = vst [vmem:[%s8961_s27 + $0xec] sm:$0xf] %v272_v59 }
  0x3d   : > { %275 = vst [vmem:[%s8961_s27 + $0xf0] sm:$0xf] %v274_v60  ;;  %277 = vst [vmem:[%s8961_s27 + $0xf4] sm:$0xf] %v276_v61  ;;  %v278_v62 = vld [vmem:[%s8957_s26 + $0x3e0] sm:$0xf] }
  0x3e   : > { %v280_v63 = vld [vmem:[%s8957_s26 + $0x3f0] sm:$0xf]  ;;  %v282_v0 = vld [vmem:[%s8957_s26 + $0x400] sm:$0xf]  ;;  %279 = vst [vmem:[%s8961_s27 + $0xf8] sm:$0xf] %v278_v62 }
  0x3f   : > { %281 = vst [vmem:[%s8961_s27 + $0xfc] sm:$0xf] %v280_v63  ;;  %283 = vst [vmem:[%s8961_s27 + $0x100] sm:$0xf] %v282_v0  ;;  %v284_v1 = vld [vmem:[%s8957_s26 + $0x410] sm:$0xf] }
  0x40   : > { %v286_v2 = vld [vmem:[%s8957_s26 + $0x420] sm:$0xf]  ;;  %v288_v3 = vld [vmem:[%s8957_s26 + $0x430] sm:$0xf]  ;;  %285 = vst [vmem:[%s8961_s27 + $0x104] sm:$0xf] %v284_v1 }
  0x41   : > { %287 = vst [vmem:[%s8961_s27 + $0x108] sm:$0xf] %v286_v2  ;;  %289 = vst [vmem:[%s8961_s27 + $0x10c] sm:$0xf] %v288_v3  ;;  %v290_v4 = vld [vmem:[%s8957_s26 + $0x440] sm:$0xf] }
  0x42   : > { %v292_v5 = vld [vmem:[%s8957_s26 + $0x450] sm:$0xf]  ;;  %v294_v6 = vld [vmem:[%s8957_s26 + $0x460] sm:$0xf]  ;;  %291 = vst [vmem:[%s8961_s27 + $0x110] sm:$0xf] %v290_v4 }
  0x43   : > { %293 = vst [vmem:[%s8961_s27 + $0x114] sm:$0xf] %v292_v5  ;;  %295 = vst [vmem:[%s8961_s27 + $0x118] sm:$0xf] %v294_v6  ;;  %v296_v7 = vld [vmem:[%s8957_s26 + $0x470] sm:$0xf] }
  0x44   : > { %v298_v8 = vld [vmem:[%s8957_s26 + $0x480] sm:$0xf]  ;;  %v300_v9 = vld [vmem:[%s8957_s26 + $0x490] sm:$0xf]  ;;  %297 = vst [vmem:[%s8961_s27 + $0x11c] sm:$0xf] %v296_v7 }
  0x45   : > { %299 = vst [vmem:[%s8961_s27 + $0x120] sm:$0xf] %v298_v8  ;;  %301 = vst [vmem:[%s8961_s27 + $0x124] sm:$0xf] %v300_v9  ;;  %v302_v10 = vld [vmem:[%s8957_s26 + $0x4a0] sm:$0xf] }
  0x46   : > { %v304_v11 = vld [vmem:[%s8957_s26 + $0x4b0] sm:$0xf]  ;;  %v306_v12 = vld [vmem:[%s8957_s26 + $0x4c0] sm:$0xf]  ;;  %303 = vst [vmem:[%s8961_s27 + $0x128] sm:$0xf] %v302_v10 }
  0x47   : > { %305 = vst [vmem:[%s8961_s27 + $0x12c] sm:$0xf] %v304_v11  ;;  %307 = vst [vmem:[%s8961_s27 + $0x130] sm:$0xf] %v306_v12  ;;  %v308_v13 = vld [vmem:[%s8957_s26 + $0x4d0] sm:$0xf] }
  0x48   : > { %v310_v14 = vld [vmem:[%s8957_s26 + $0x4e0] sm:$0xf]  ;;  %v312_v15 = vld [vmem:[%s8957_s26 + $0x4f0] sm:$0xf]  ;;  %309 = vst [vmem:[%s8961_s27 + $0x134] sm:$0xf] %v308_v13 }
  0x49   : > { %311 = vst [vmem:[%s8961_s27 + $0x138] sm:$0xf] %v310_v14  ;;  %313 = vst [vmem:[%s8961_s27 + $0x13c] sm:$0xf] %v312_v15  ;;  %v314_v16 = vld [vmem:[%s8957_s26 + $0x500] sm:$0xf] }
  0x4a   : > { %v316_v17 = vld [vmem:[%s8957_s26 + $0x510] sm:$0xf]  ;;  %v318_v18 = vld [vmem:[%s8957_s26 + $0x520] sm:$0xf]  ;;  %315 = vst [vmem:[%s8961_s27 + $0x140] sm:$0xf] %v314_v16 }
  0x4b   : > { %317 = vst [vmem:[%s8961_s27 + $0x144] sm:$0xf] %v316_v17  ;;  %319 = vst [vmem:[%s8961_s27 + $0x148] sm:$0xf] %v318_v18  ;;  %v320_v19 = vld [vmem:[%s8957_s26 + $0x530] sm:$0xf] }
  0x4c   : > { %v322_v20 = vld [vmem:[%s8957_s26 + $0x540] sm:$0xf]  ;;  %v324_v21 = vld [vmem:[%s8957_s26 + $0x550] sm:$0xf]  ;;  %321 = vst [vmem:[%s8961_s27 + $0x14c] sm:$0xf] %v320_v19 }
  0x4d   : > { %323 = vst [vmem:[%s8961_s27 + $0x150] sm:$0xf] %v322_v20  ;;  %325 = vst [vmem:[%s8961_s27 + $0x154] sm:$0xf] %v324_v21  ;;  %v326_v22 = vld [vmem:[%s8957_s26 + $0x560] sm:$0xf] }
  0x4e   : > { %v328_v23 = vld [vmem:[%s8957_s26 + $0x570] sm:$0xf]  ;;  %v330_v24 = vld [vmem:[%s8957_s26 + $0x580] sm:$0xf]  ;;  %327 = vst [vmem:[%s8961_s27 + $0x158] sm:$0xf] %v326_v22 }
  0x4f   : > { %329 = vst [vmem:[%s8961_s27 + $0x15c] sm:$0xf] %v328_v23  ;;  %331 = vst [vmem:[%s8961_s27 + $0x160] sm:$0xf] %v330_v24  ;;  %v332_v25 = vld [vmem:[%s8957_s26 + $0x590] sm:$0xf] }
  0x50   : > { %v334_v26 = vld [vmem:[%s8957_s26 + $0x5a0] sm:$0xf]  ;;  %v336_v27 = vld [vmem:[%s8957_s26 + $0x5b0] sm:$0xf]  ;;  %333 = vst [vmem:[%s8961_s27 + $0x164] sm:$0xf] %v332_v25 }
  0x51   : > { %335 = vst [vmem:[%s8961_s27 + $0x168] sm:$0xf] %v334_v26  ;;  %337 = vst [vmem:[%s8961_s27 + $0x16c] sm:$0xf] %v336_v27  ;;  %v338_v28 = vld [vmem:[%s8957_s26 + $0x5c0] sm:$0xf] }
  0x52   : > { %v340_v29 = vld [vmem:[%s8957_s26 + $0x5d0] sm:$0xf]  ;;  %v342_v30 = vld [vmem:[%s8957_s26 + $0x5e0] sm:$0xf]  ;;  %339 = vst [vmem:[%s8961_s27 + $0x170] sm:$0xf] %v338_v28 }
  0x53   : > { %341 = vst [vmem:[%s8961_s27 + $0x174] sm:$0xf] %v340_v29  ;;  %343 = vst [vmem:[%s8961_s27 + $0x178] sm:$0xf] %v342_v30  ;;  %v344_v31 = vld [vmem:[%s8957_s26 + $0x5f0] sm:$0xf] }
  0x54   : > { %v346_v32 = vld [vmem:[%s8957_s26 + $0x600] sm:$0xf]  ;;  %v348_v33 = vld [vmem:[%s8957_s26 + $0x610] sm:$0xf]  ;;  %345 = vst [vmem:[%s8961_s27 + $0x17c] sm:$0xf] %v344_v31 }
  0x55   : > { %347 = vst [vmem:[%s8961_s27 + $0x180] sm:$0xf] %v346_v32  ;;  %349 = vst [vmem:[%s8961_s27 + $0x184] sm:$0xf] %v348_v33  ;;  %v350_v34 = vld [vmem:[%s8957_s26 + $0x620] sm:$0xf] }
  0x56   : > { %v352_v35 = vld [vmem:[%s8957_s26 + $0x630] sm:$0xf]  ;;  %v354_v36 = vld [vmem:[%s8957_s26 + $0x640] sm:$0xf]  ;;  %351 = vst [vmem:[%s8961_s27 + $0x188] sm:$0xf] %v350_v34 }
  0x57   : > { %353 = vst [vmem:[%s8961_s27 + $0x18c] sm:$0xf] %v352_v35  ;;  %355 = vst [vmem:[%s8961_s27 + $0x190] sm:$0xf] %v354_v36  ;;  %v356_v37 = vld [vmem:[%s8957_s26 + $0x650] sm:$0xf] }
  0x58   : > { %v358_v38 = vld [vmem:[%s8957_s26 + $0x660] sm:$0xf]  ;;  %v360_v39 = vld [vmem:[%s8957_s26 + $0x670] sm:$0xf]  ;;  %357 = vst [vmem:[%s8961_s27 + $0x194] sm:$0xf] %v356_v37 }
  0x59   : > { %359 = vst [vmem:[%s8961_s27 + $0x198] sm:$0xf] %v358_v38  ;;  %361 = vst [vmem:[%s8961_s27 + $0x19c] sm:$0xf] %v360_v39  ;;  %v362_v40 = vld [vmem:[%s8957_s26 + $0x680] sm:$0xf] }
  0x5a   : > { %v364_v41 = vld [vmem:[%s8957_s26 + $0x690] sm:$0xf]  ;;  %v366_v42 = vld [vmem:[%s8957_s26 + $0x6a0] sm:$0xf]  ;;  %363 = vst [vmem:[%s8961_s27 + $0x1a0] sm:$0xf] %v362_v40 }
  0x5b   : > { %365 = vst [vmem:[%s8961_s27 + $0x1a4] sm:$0xf] %v364_v41  ;;  %367 = vst [vmem:[%s8961_s27 + $0x1a8] sm:$0xf] %v366_v42  ;;  %v368_v43 = vld [vmem:[%s8957_s26 + $0x6b0] sm:$0xf] }
  0x5c   : > { %v370_v44 = vld [vmem:[%s8957_s26 + $0x6c0] sm:$0xf]  ;;  %v372_v45 = vld [vmem:[%s8957_s26 + $0x6d0] sm:$0xf]  ;;  %369 = vst [vmem:[%s8961_s27 + $0x1ac] sm:$0xf] %v368_v43 }
  0x5d   : > { %371 = vst [vmem:[%s8961_s27 + $0x1b0] sm:$0xf] %v370_v44  ;;  %373 = vst [vmem:[%s8961_s27 + $0x1b4] sm:$0xf] %v372_v45  ;;  %v374_v46 = vld [vmem:[%s8957_s26 + $0x6e0] sm:$0xf] }
  0x5e   : > { %v376_v47 = vld [vmem:[%s8957_s26 + $0x6f0] sm:$0xf]  ;;  %v378_v48 = vld [vmem:[%s8957_s26 + $0x700] sm:$0xf]  ;;  %375 = vst [vmem:[%s8961_s27 + $0x1b8] sm:$0xf] %v374_v46 }
  0x5f   : > { %377 = vst [vmem:[%s8961_s27 + $0x1bc] sm:$0xf] %v376_v47  ;;  %379 = vst [vmem:[%s8961_s27 + $0x1c0] sm:$0xf] %v378_v48  ;;  %v380_v49 = vld [vmem:[%s8957_s26 + $0x710] sm:$0xf] }
  0x60   : > { %v382_v50 = vld [vmem:[%s8957_s26 + $0x720] sm:$0xf]  ;;  %v384_v51 = vld [vmem:[%s8957_s26 + $0x730] sm:$0xf]  ;;  %381 = vst [vmem:[%s8961_s27 + $0x1c4] sm:$0xf] %v380_v49 }
  0x61   : > { %383 = vst [vmem:[%s8961_s27 + $0x1c8] sm:$0xf] %v382_v50  ;;  %385 = vst [vmem:[%s8961_s27 + $0x1cc] sm:$0xf] %v384_v51  ;;  %v386_v52 = vld [vmem:[%s8957_s26 + $0x740] sm:$0xf] }
  0x62   : > { %v388_v53 = vld [vmem:[%s8957_s26 + $0x750] sm:$0xf]  ;;  %v390_v54 = vld [vmem:[%s8957_s26 + $0x760] sm:$0xf]  ;;  %387 = vst [vmem:[%s8961_s27 + $0x1d0] sm:$0xf] %v386_v52 }
  0x63   : > { %389 = vst [vmem:[%s8961_s27 + $0x1d4] sm:$0xf] %v388_v53  ;;  %391 = vst [vmem:[%s8961_s27 + $0x1d8] sm:$0xf] %v390_v54  ;;  %v392_v55 = vld [vmem:[%s8957_s26 + $0x770] sm:$0xf] }
  0x64   : > { %v394_v56 = vld [vmem:[%s8957_s26 + $0x780] sm:$0xf]  ;;  %v396_v57 = vld [vmem:[%s8957_s26 + $0x790] sm:$0xf]  ;;  %393 = vst [vmem:[%s8961_s27 + $0x1dc] sm:$0xf] %v392_v55 }
  0x65   : > { %395 = vst [vmem:[%s8961_s27 + $0x1e0] sm:$0xf] %v394_v56  ;;  %397 = vst [vmem:[%s8961_s27 + $0x1e4] sm:$0xf] %v396_v57  ;;  %v398_v58 = vld [vmem:[%s8957_s26 + $0x7a0] sm:$0xf] }
  0x66   : > { %v400_v59 = vld [vmem:[%s8957_s26 + $0x7b0] sm:$0xf]  ;;  %v402_v60 = vld [vmem:[%s8957_s26 + $0x7c0] sm:$0xf]  ;;  %399 = vst [vmem:[%s8961_s27 + $0x1e8] sm:$0xf] %v398_v58 }
  0x67   : > { %401 = vst [vmem:[%s8961_s27 + $0x1ec] sm:$0xf] %v400_v59  ;;  %403 = vst [vmem:[%s8961_s27 + $0x1f0] sm:$0xf] %v402_v60  ;;  %v404_v61 = vld [vmem:[%s8957_s26 + $0x7d0] sm:$0xf] }
  0x68   : > { %v406_v62 = vld [vmem:[%s8957_s26 + $0x7e0] sm:$0xf]  ;;  %v408_v63 = vld [vmem:[%s8957_s26 + $0x7f0] sm:$0xf]  ;;  %405 = vst [vmem:[%s8961_s27 + $0x1f4] sm:$0xf] %v404_v61 }
  0x69   : > { %407 = vst [vmem:[%s8961_s27 + $0x1f8] sm:$0xf] %v406_v62  ;;  %409 = vst [vmem:[%s8961_s27 + $0x1fc] sm:$0xf] %v408_v63  ;;  %v410_v0 = vld [vmem:[%s8957_s26 + $0x800] sm:$0xf] }
  0x6a   : > { %v412_v1 = vld [vmem:[%s8957_s26 + $0x810] sm:$0xf]  ;;  %v414_v2 = vld [vmem:[%s8957_s26 + $0x820] sm:$0xf]  ;;  %411 = vst [vmem:[%s8961_s27 + $0x200] sm:$0xf] %v410_v0 }
  0x6b   : > { %413 = vst [vmem:[%s8961_s27 + $0x204] sm:$0xf] %v412_v1  ;;  %415 = vst [vmem:[%s8961_s27 + $0x208] sm:$0xf] %v414_v2  ;;  %v416_v3 = vld [vmem:[%s8957_s26 + $0x830] sm:$0xf] }
  0x6c   : > { %v418_v4 = vld [vmem:[%s8957_s26 + $0x840] sm:$0xf]  ;;  %v420_v5 = vld [vmem:[%s8957_s26 + $0x850] sm:$0xf]  ;;  %417 = vst [vmem:[%s8961_s27 + $0x20c] sm:$0xf] %v416_v3 }
  0x6d   : > { %419 = vst [vmem:[%s8961_s27 + $0x210] sm:$0xf] %v418_v4  ;;  %421 = vst [vmem:[%s8961_s27 + $0x214] sm:$0xf] %v420_v5  ;;  %v422_v6 = vld [vmem:[%s8957_s26 + $0x860] sm:$0xf] }
  0x6e   : > { %v424_v7 = vld [vmem:[%s8957_s26 + $0x870] sm:$0xf]  ;;  %v426_v8 = vld [vmem:[%s8957_s26 + $0x880] sm:$0xf]  ;;  %423 = vst [vmem:[%s8961_s27 + $0x218] sm:$0xf] %v422_v6 }
  0x6f   : > { %425 = vst [vmem:[%s8961_s27 + $0x21c] sm:$0xf] %v424_v7  ;;  %427 = vst [vmem:[%s8961_s27 + $0x220] sm:$0xf] %v426_v8  ;;  %v428_v9 = vld [vmem:[%s8957_s26 + $0x890] sm:$0xf] }
  0x70   : > { %v430_v10 = vld [vmem:[%s8957_s26 + $0x8a0] sm:$0xf]  ;;  %v432_v11 = vld [vmem:[%s8957_s26 + $0x8b0] sm:$0xf]  ;;  %429 = vst [vmem:[%s8961_s27 + $0x224] sm:$0xf] %v428_v9 }
  0x71   : > { %431 = vst [vmem:[%s8961_s27 + $0x228] sm:$0xf] %v430_v10  ;;  %433 = vst [vmem:[%s8961_s27 + $0x22c] sm:$0xf] %v432_v11  ;;  %v434_v12 = vld [vmem:[%s8957_s26 + $0x8c0] sm:$0xf] }
  0x72   : > { %v436_v13 = vld [vmem:[%s8957_s26 + $0x8d0] sm:$0xf]  ;;  %v438_v14 = vld [vmem:[%s8957_s26 + $0x8e0] sm:$0xf]  ;;  %435 = vst [vmem:[%s8961_s27 + $0x230] sm:$0xf] %v434_v12 }
  0x73   : > { %437 = vst [vmem:[%s8961_s27 + $0x234] sm:$0xf] %v436_v13  ;;  %439 = vst [vmem:[%s8961_s27 + $0x238] sm:$0xf] %v438_v14  ;;  %v440_v15 = vld [vmem:[%s8957_s26 + $0x8f0] sm:$0xf] }
  0x74   : > { %v442_v16 = vld [vmem:[%s8957_s26 + $0x900] sm:$0xf]  ;;  %v444_v17 = vld [vmem:[%s8957_s26 + $0x910] sm:$0xf]  ;;  %441 = vst [vmem:[%s8961_s27 + $0x23c] sm:$0xf] %v440_v15 }
  0x75   : > { %443 = vst [vmem:[%s8961_s27 + $0x240] sm:$0xf] %v442_v16  ;;  %445 = vst [vmem:[%s8961_s27 + $0x244] sm:$0xf] %v444_v17  ;;  %v446_v18 = vld [vmem:[%s8957_s26 + $0x920] sm:$0xf] }
  0x76   : > { %v448_v19 = vld [vmem:[%s8957_s26 + $0x930] sm:$0xf]  ;;  %v450_v20 = vld [vmem:[%s8957_s26 + $0x940] sm:$0xf]  ;;  %447 = vst [vmem:[%s8961_s27 + $0x248] sm:$0xf] %v446_v18 }
  0x77   : > { %449 = vst [vmem:[%s8961_s27 + $0x24c] sm:$0xf] %v448_v19  ;;  %451 = vst [vmem:[%s8961_s27 + $0x250] sm:$0xf] %v450_v20  ;;  %v452_v21 = vld [vmem:[%s8957_s26 + $0x950] sm:$0xf] }
  0x78   : > { %v454_v22 = vld [vmem:[%s8957_s26 + $0x960] sm:$0xf]  ;;  %v456_v23 = vld [vmem:[%s8957_s26 + $0x970] sm:$0xf]  ;;  %453 = vst [vmem:[%s8961_s27 + $0x254] sm:$0xf] %v452_v21 }
  0x79   : > { %455 = vst [vmem:[%s8961_s27 + $0x258] sm:$0xf] %v454_v22  ;;  %457 = vst [vmem:[%s8961_s27 + $0x25c] sm:$0xf] %v456_v23  ;;  %v458_v24 = vld [vmem:[%s8957_s26 + $0x980] sm:$0xf] }
  0x7a   : > { %v460_v25 = vld [vmem:[%s8957_s26 + $0x990] sm:$0xf]  ;;  %v462_v26 = vld [vmem:[%s8957_s26 + $0x9a0] sm:$0xf]  ;;  %459 = vst [vmem:[%s8961_s27 + $0x260] sm:$0xf] %v458_v24 }
  0x7b   : > { %461 = vst [vmem:[%s8961_s27 + $0x264] sm:$0xf] %v460_v25  ;;  %463 = vst [vmem:[%s8961_s27 + $0x268] sm:$0xf] %v462_v26  ;;  %v464_v27 = vld [vmem:[%s8957_s26 + $0x9b0] sm:$0xf] }
  0x7c   : > { %v466_v28 = vld [vmem:[%s8957_s26 + $0x9c0] sm:$0xf]  ;;  %v468_v29 = vld [vmem:[%s8957_s26 + $0x9d0] sm:$0xf]  ;;  %465 = vst [vmem:[%s8961_s27 + $0x26c] sm:$0xf] %v464_v27 }
  0x7d   : > { %467 = vst [vmem:[%s8961_s27 + $0x270] sm:$0xf] %v466_v28  ;;  %469 = vst [vmem:[%s8961_s27 + $0x274] sm:$0xf] %v468_v29  ;;  %v470_v30 = vld [vmem:[%s8957_s26 + $0x9e0] sm:$0xf] }
  0x7e   : > { %v472_v31 = vld [vmem:[%s8957_s26 + $0x9f0] sm:$0xf]  ;;  %v474_v32 = vld [vmem:[%s8957_s26 + $0xa00] sm:$0xf]  ;;  %471 = vst [vmem:[%s8961_s27 + $0x278] sm:$0xf] %v470_v30 }
  0x7f   : > { %473 = vst [vmem:[%s8961_s27 + $0x27c] sm:$0xf] %v472_v31  ;;  %475 = vst [vmem:[%s8961_s27 + $0x280] sm:$0xf] %v474_v32  ;;  %v476_v33 = vld [vmem:[%s8957_s26 + $0xa10] sm:$0xf] }
  0x80   : > { %v478_v34 = vld [vmem:[%s8957_s26 + $0xa20] sm:$0xf]  ;;  %v480_v35 = vld [vmem:[%s8957_s26 + $0xa30] sm:$0xf]  ;;  %477 = vst [vmem:[%s8961_s27 + $0x284] sm:$0xf] %v476_v33 }
  0x81   : > { %479 = vst [vmem:[%s8961_s27 + $0x288] sm:$0xf] %v478_v34  ;;  %481 = vst [vmem:[%s8961_s27 + $0x28c] sm:$0xf] %v480_v35  ;;  %v482_v36 = vld [vmem:[%s8957_s26 + $0xa40] sm:$0xf] }
  0x82   : > { %v484_v37 = vld [vmem:[%s8957_s26 + $0xa50] sm:$0xf]  ;;  %v486_v38 = vld [vmem:[%s8957_s26 + $0xa60] sm:$0xf]  ;;  %483 = vst [vmem:[%s8961_s27 + $0x290] sm:$0xf] %v482_v36 }
  0x83   : > { %485 = vst [vmem:[%s8961_s27 + $0x294] sm:$0xf] %v484_v37  ;;  %487 = vst [vmem:[%s8961_s27 + $0x298] sm:$0xf] %v486_v38  ;;  %v488_v39 = vld [vmem:[%s8957_s26 + $0xa70] sm:$0xf] }
  0x84   : > { %v490_v40 = vld [vmem:[%s8957_s26 + $0xa80] sm:$0xf]  ;;  %v492_v41 = vld [vmem:[%s8957_s26 + $0xa90] sm:$0xf]  ;;  %489 = vst [vmem:[%s8961_s27 + $0x29c] sm:$0xf] %v488_v39 }
  0x85   : > { %491 = vst [vmem:[%s8961_s27 + $0x2a0] sm:$0xf] %v490_v40  ;;  %493 = vst [vmem:[%s8961_s27 + $0x2a4] sm:$0xf] %v492_v41  ;;  %v494_v42 = vld [vmem:[%s8957_s26 + $0xaa0] sm:$0xf] }
  0x86   : > { %v496_v43 = vld [vmem:[%s8957_s26 + $0xab0] sm:$0xf]  ;;  %v498_v44 = vld [vmem:[%s8957_s26 + $0xac0] sm:$0xf]  ;;  %495 = vst [vmem:[%s8961_s27 + $0x2a8] sm:$0xf] %v494_v42 }
  0x87   : > { %497 = vst [vmem:[%s8961_s27 + $0x2ac] sm:$0xf] %v496_v43  ;;  %499 = vst [vmem:[%s8961_s27 + $0x2b0] sm:$0xf] %v498_v44  ;;  %v500_v45 = vld [vmem:[%s8957_s26 + $0xad0] sm:$0xf] }
  0x88   : > { %v502_v46 = vld [vmem:[%s8957_s26 + $0xae0] sm:$0xf]  ;;  %v504_v47 = vld [vmem:[%s8957_s26 + $0xaf0] sm:$0xf]  ;;  %501 = vst [vmem:[%s8961_s27 + $0x2b4] sm:$0xf] %v500_v45 }
  0x89   : > { %503 = vst [vmem:[%s8961_s27 + $0x2b8] sm:$0xf] %v502_v46  ;;  %505 = vst [vmem:[%s8961_s27 + $0x2bc] sm:$0xf] %v504_v47  ;;  %v506_v48 = vld [vmem:[%s8957_s26 + $0xb00] sm:$0xf] }
  0x8a   : > { %v508_v49 = vld [vmem:[%s8957_s26 + $0xb10] sm:$0xf]  ;;  %v510_v50 = vld [vmem:[%s8957_s26 + $0xb20] sm:$0xf]  ;;  %507 = vst [vmem:[%s8961_s27 + $0x2c0] sm:$0xf] %v506_v48 }
  0x8b   : > { %509 = vst [vmem:[%s8961_s27 + $0x2c4] sm:$0xf] %v508_v49  ;;  %511 = vst [vmem:[%s8961_s27 + $0x2c8] sm:$0xf] %v510_v50  ;;  %v512_v51 = vld [vmem:[%s8957_s26 + $0xb30] sm:$0xf] }
  0x8c   : > { %v514_v52 = vld [vmem:[%s8957_s26 + $0xb40] sm:$0xf]  ;;  %v516_v53 = vld [vmem:[%s8957_s26 + $0xb50] sm:$0xf]  ;;  %513 = vst [vmem:[%s8961_s27 + $0x2cc] sm:$0xf] %v512_v51 }
  0x8d   : > { %515 = vst [vmem:[%s8961_s27 + $0x2d0] sm:$0xf] %v514_v52  ;;  %517 = vst [vmem:[%s8961_s27 + $0x2d4] sm:$0xf] %v516_v53  ;;  %v518_v54 = vld [vmem:[%s8957_s26 + $0xb60] sm:$0xf] }
  0x8e   : > { %v520_v55 = vld [vmem:[%s8957_s26 + $0xb70] sm:$0xf]  ;;  %v522_v56 = vld [vmem:[%s8957_s26 + $0xb80] sm:$0xf]  ;;  %519 = vst [vmem:[%s8961_s27 + $0x2d8] sm:$0xf] %v518_v54 }
  0x8f   : > { %521 = vst [vmem:[%s8961_s27 + $0x2dc] sm:$0xf] %v520_v55  ;;  %523 = vst [vmem:[%s8961_s27 + $0x2e0] sm:$0xf] %v522_v56  ;;  %v524_v57 = vld [vmem:[%s8957_s26 + $0xb90] sm:$0xf] }
  0x90   : > { %v526_v58 = vld [vmem:[%s8957_s26 + $0xba0] sm:$0xf]  ;;  %v528_v59 = vld [vmem:[%s8957_s26 + $0xbb0] sm:$0xf]  ;;  %525 = vst [vmem:[%s8961_s27 + $0x2e4] sm:$0xf] %v524_v57 }
  0x91   : > { %527 = vst [vmem:[%s8961_s27 + $0x2e8] sm:$0xf] %v526_v58  ;;  %529 = vst [vmem:[%s8961_s27 + $0x2ec] sm:$0xf] %v528_v59  ;;  %v530_v60 = vld [vmem:[%s8957_s26 + $0xbc0] sm:$0xf] }
  0x92   : > { %v532_v61 = vld [vmem:[%s8957_s26 + $0xbd0] sm:$0xf]  ;;  %v534_v62 = vld [vmem:[%s8957_s26 + $0xbe0] sm:$0xf]  ;;  %531 = vst [vmem:[%s8961_s27 + $0x2f0] sm:$0xf] %v530_v60 }
  0x93   : > { %533 = vst [vmem:[%s8961_s27 + $0x2f4] sm:$0xf] %v532_v61  ;;  %535 = vst [vmem:[%s8961_s27 + $0x2f8] sm:$0xf] %v534_v62  ;;  %v536_v63 = vld [vmem:[%s8957_s26 + $0xbf0] sm:$0xf] }
  0x94   : > { %v538_v0 = vld [vmem:[%s8957_s26 + $0xc00] sm:$0xf]  ;;  %v540_v1 = vld [vmem:[%s8957_s26 + $0xc10] sm:$0xf]  ;;  %537 = vst [vmem:[%s8961_s27 + $0x2fc] sm:$0xf] %v536_v63 }
  0x95   : > { %539 = vst [vmem:[%s8961_s27 + $0x300] sm:$0xf] %v538_v0  ;;  %541 = vst [vmem:[%s8961_s27 + $0x304] sm:$0xf] %v540_v1  ;;  %v542_v2 = vld [vmem:[%s8957_s26 + $0xc20] sm:$0xf] }
  0x96   : > { %v544_v3 = vld [vmem:[%s8957_s26 + $0xc30] sm:$0xf]  ;;  %v546_v4 = vld [vmem:[%s8957_s26 + $0xc40] sm:$0xf]  ;;  %543 = vst [vmem:[%s8961_s27 + $0x308] sm:$0xf] %v542_v2 }
  0x97   : > { %545 = vst [vmem:[%s8961_s27 + $0x30c] sm:$0xf] %v544_v3  ;;  %547 = vst [vmem:[%s8961_s27 + $0x310] sm:$0xf] %v546_v4  ;;  %v548_v5 = vld [vmem:[%s8957_s26 + $0xc50] sm:$0xf] }
  0x98   : > { %v550_v6 = vld [vmem:[%s8957_s26 + $0xc60] sm:$0xf]  ;;  %v552_v7 = vld [vmem:[%s8957_s26 + $0xc70] sm:$0xf]  ;;  %549 = vst [vmem:[%s8961_s27 + $0x314] sm:$0xf] %v548_v5 }
  0x99   : > { %551 = vst [vmem:[%s8961_s27 + $0x318] sm:$0xf] %v550_v6  ;;  %553 = vst [vmem:[%s8961_s27 + $0x31c] sm:$0xf] %v552_v7  ;;  %v554_v8 = vld [vmem:[%s8957_s26 + $0xc80] sm:$0xf] }
  0x9a   : > { %v556_v9 = vld [vmem:[%s8957_s26 + $0xc90] sm:$0xf]  ;;  %v558_v10 = vld [vmem:[%s8957_s26 + $0xca0] sm:$0xf]  ;;  %555 = vst [vmem:[%s8961_s27 + $0x320] sm:$0xf] %v554_v8 }
  0x9b   : > { %557 = vst [vmem:[%s8961_s27 + $0x324] sm:$0xf] %v556_v9  ;;  %559 = vst [vmem:[%s8961_s27 + $0x328] sm:$0xf] %v558_v10  ;;  %v560_v11 = vld [vmem:[%s8957_s26 + $0xcb0] sm:$0xf] }
  0x9c   : > { %v562_v12 = vld [vmem:[%s8957_s26 + $0xcc0] sm:$0xf]  ;;  %v564_v13 = vld [vmem:[%s8957_s26 + $0xcd0] sm:$0xf]  ;;  %561 = vst [vmem:[%s8961_s27 + $0x32c] sm:$0xf] %v560_v11 }
  0x9d   : > { %563 = vst [vmem:[%s8961_s27 + $0x330] sm:$0xf] %v562_v12  ;;  %565 = vst [vmem:[%s8961_s27 + $0x334] sm:$0xf] %v564_v13  ;;  %v566_v14 = vld [vmem:[%s8957_s26 + $0xce0] sm:$0xf] }
  0x9e   : > { %v568_v15 = vld [vmem:[%s8957_s26 + $0xcf0] sm:$0xf]  ;;  %v570_v16 = vld [vmem:[%s8957_s26 + $0xd00] sm:$0xf]  ;;  %567 = vst [vmem:[%s8961_s27 + $0x338] sm:$0xf] %v566_v14 }
  0x9f   : > { %569 = vst [vmem:[%s8961_s27 + $0x33c] sm:$0xf] %v568_v15  ;;  %571 = vst [vmem:[%s8961_s27 + $0x340] sm:$0xf] %v570_v16  ;;  %v572_v17 = vld [vmem:[%s8957_s26 + $0xd10] sm:$0xf] }
  0xa0   : > { %v574_v18 = vld [vmem:[%s8957_s26 + $0xd20] sm:$0xf]  ;;  %v576_v19 = vld [vmem:[%s8957_s26 + $0xd30] sm:$0xf]  ;;  %573 = vst [vmem:[%s8961_s27 + $0x344] sm:$0xf] %v572_v17 }
  0xa1   : > { %575 = vst [vmem:[%s8961_s27 + $0x348] sm:$0xf] %v574_v18  ;;  %577 = vst [vmem:[%s8961_s27 + $0x34c] sm:$0xf] %v576_v19  ;;  %v578_v20 = vld [vmem:[%s8957_s26 + $0xd40] sm:$0xf] }
  0xa2   : > { %v580_v21 = vld [vmem:[%s8957_s26 + $0xd50] sm:$0xf]  ;;  %v582_v22 = vld [vmem:[%s8957_s26 + $0xd60] sm:$0xf]  ;;  %579 = vst [vmem:[%s8961_s27 + $0x350] sm:$0xf] %v578_v20 }
  0xa3   : > { %581 = vst [vmem:[%s8961_s27 + $0x354] sm:$0xf] %v580_v21  ;;  %583 = vst [vmem:[%s8961_s27 + $0x358] sm:$0xf] %v582_v22  ;;  %v584_v23 = vld [vmem:[%s8957_s26 + $0xd70] sm:$0xf] }
  0xa4   : > { %v586_v24 = vld [vmem:[%s8957_s26 + $0xd80] sm:$0xf]  ;;  %v588_v25 = vld [vmem:[%s8957_s26 + $0xd90] sm:$0xf]  ;;  %585 = vst [vmem:[%s8961_s27 + $0x35c] sm:$0xf] %v584_v23 }
  0xa5   : > { %587 = vst [vmem:[%s8961_s27 + $0x360] sm:$0xf] %v586_v24  ;;  %589 = vst [vmem:[%s8961_s27 + $0x364] sm:$0xf] %v588_v25  ;;  %v590_v26 = vld [vmem:[%s8957_s26 + $0xda0] sm:$0xf] }
  0xa6   : > { %v592_v27 = vld [vmem:[%s8957_s26 + $0xdb0] sm:$0xf]  ;;  %v594_v28 = vld [vmem:[%s8957_s26 + $0xdc0] sm:$0xf]  ;;  %591 = vst [vmem:[%s8961_s27 + $0x368] sm:$0xf] %v590_v26 }
  0xa7   : > { %593 = vst [vmem:[%s8961_s27 + $0x36c] sm:$0xf] %v592_v27  ;;  %595 = vst [vmem:[%s8961_s27 + $0x370] sm:$0xf] %v594_v28  ;;  %v596_v29 = vld [vmem:[%s8957_s26 + $0xdd0] sm:$0xf] }
  0xa8   : > { %v598_v30 = vld [vmem:[%s8957_s26 + $0xde0] sm:$0xf]  ;;  %v600_v31 = vld [vmem:[%s8957_s26 + $0xdf0] sm:$0xf]  ;;  %597 = vst [vmem:[%s8961_s27 + $0x374] sm:$0xf] %v596_v29 }
  0xa9   : > { %599 = vst [vmem:[%s8961_s27 + $0x378] sm:$0xf] %v598_v30  ;;  %601 = vst [vmem:[%s8961_s27 + $0x37c] sm:$0xf] %v600_v31  ;;  %v602_v32 = vld [vmem:[%s8957_s26 + $0xe00] sm:$0xf] }
  0xaa   : > { %v604_v33 = vld [vmem:[%s8957_s26 + $0xe10] sm:$0xf]  ;;  %v606_v34 = vld [vmem:[%s8957_s26 + $0xe20] sm:$0xf]  ;;  %603 = vst [vmem:[%s8961_s27 + $0x380] sm:$0xf] %v602_v32 }
  0xab   : > { %605 = vst [vmem:[%s8961_s27 + $0x384] sm:$0xf] %v604_v33  ;;  %607 = vst [vmem:[%s8961_s27 + $0x388] sm:$0xf] %v606_v34  ;;  %v608_v35 = vld [vmem:[%s8957_s26 + $0xe30] sm:$0xf] }
  0xac   : > { %v610_v36 = vld [vmem:[%s8957_s26 + $0xe40] sm:$0xf]  ;;  %v612_v37 = vld [vmem:[%s8957_s26 + $0xe50] sm:$0xf]  ;;  %609 = vst [vmem:[%s8961_s27 + $0x38c] sm:$0xf] %v608_v35 }
  0xad   : > { %611 = vst [vmem:[%s8961_s27 + $0x390] sm:$0xf] %v610_v36  ;;  %613 = vst [vmem:[%s8961_s27 + $0x394] sm:$0xf] %v612_v37  ;;  %v614_v38 = vld [vmem:[%s8957_s26 + $0xe60] sm:$0xf] }
  0xae   : > { %v616_v39 = vld [vmem:[%s8957_s26 + $0xe70] sm:$0xf]  ;;  %v618_v40 = vld [vmem:[%s8957_s26 + $0xe80] sm:$0xf]  ;;  %615 = vst [vmem:[%s8961_s27 + $0x398] sm:$0xf] %v614_v38 }
  0xaf   : > { %617 = vst [vmem:[%s8961_s27 + $0x39c] sm:$0xf] %v616_v39  ;;  %619 = vst [vmem:[%s8961_s27 + $0x3a0] sm:$0xf] %v618_v40  ;;  %v620_v41 = vld [vmem:[%s8957_s26 + $0xe90] sm:$0xf] }
  0xb0   : > { %v622_v42 = vld [vmem:[%s8957_s26 + $0xea0] sm:$0xf]  ;;  %v624_v43 = vld [vmem:[%s8957_s26 + $0xeb0] sm:$0xf]  ;;  %621 = vst [vmem:[%s8961_s27 + $0x3a4] sm:$0xf] %v620_v41 }
  0xb1   : > { %623 = vst [vmem:[%s8961_s27 + $0x3a8] sm:$0xf] %v622_v42  ;;  %625 = vst [vmem:[%s8961_s27 + $0x3ac] sm:$0xf] %v624_v43  ;;  %v626_v44 = vld [vmem:[%s8957_s26 + $0xec0] sm:$0xf] }
  0xb2   : > { %v628_v45 = vld [vmem:[%s8957_s26 + $0xed0] sm:$0xf]  ;;  %v630_v46 = vld [vmem:[%s8957_s26 + $0xee0] sm:$0xf]  ;;  %627 = vst [vmem:[%s8961_s27 + $0x3b0] sm:$0xf] %v626_v44 }
  0xb3   : > { %629 = vst [vmem:[%s8961_s27 + $0x3b4] sm:$0xf] %v628_v45  ;;  %631 = vst [vmem:[%s8961_s27 + $0x3b8] sm:$0xf] %v630_v46  ;;  %v632_v47 = vld [vmem:[%s8957_s26 + $0xef0] sm:$0xf] }
  0xb4   : > { %v634_v48 = vld [vmem:[%s8957_s26 + $0xf00] sm:$0xf]  ;;  %v636_v49 = vld [vmem:[%s8957_s26 + $0xf10] sm:$0xf]  ;;  %633 = vst [vmem:[%s8961_s27 + $0x3bc] sm:$0xf] %v632_v47 }
  0xb5   : > { %635 = vst [vmem:[%s8961_s27 + $0x3c0] sm:$0xf] %v634_v48  ;;  %637 = vst [vmem:[%s8961_s27 + $0x3c4] sm:$0xf] %v636_v49  ;;  %v638_v50 = vld [vmem:[%s8957_s26 + $0xf20] sm:$0xf] }
  0xb6   : > { %v640_v51 = vld [vmem:[%s8957_s26 + $0xf30] sm:$0xf]  ;;  %v642_v52 = vld [vmem:[%s8957_s26 + $0xf40] sm:$0xf]  ;;  %639 = vst [vmem:[%s8961_s27 + $0x3c8] sm:$0xf] %v638_v50 }
  0xb7   : > { %641 = vst [vmem:[%s8961_s27 + $0x3cc] sm:$0xf] %v640_v51  ;;  %643 = vst [vmem:[%s8961_s27 + $0x3d0] sm:$0xf] %v642_v52  ;;  %v644_v53 = vld [vmem:[%s8957_s26 + $0xf50] sm:$0xf] }
  0xb8   : > { %v646_v54 = vld [vmem:[%s8957_s26 + $0xf60] sm:$0xf]  ;;  %v648_v55 = vld [vmem:[%s8957_s26 + $0xf70] sm:$0xf]  ;;  %645 = vst [vmem:[%s8961_s27 + $0x3d4] sm:$0xf] %v644_v53 }
  0xb9   : > { %647 = vst [vmem:[%s8961_s27 + $0x3d8] sm:$0xf] %v646_v54  ;;  %649 = vst [vmem:[%s8961_s27 + $0x3dc] sm:$0xf] %v648_v55  ;;  %v650_v56 = vld [vmem:[%s8957_s26 + $0xf80] sm:$0xf] }
  0xba   : > { %v652_v57 = vld [vmem:[%s8957_s26 + $0xf90] sm:$0xf]  ;;  %v654_v58 = vld [vmem:[%s8957_s26 + $0xfa0] sm:$0xf]  ;;  %651 = vst [vmem:[%s8961_s27 + $0x3e0] sm:$0xf] %v650_v56 }
  0xbb   : > { %653 = vst [vmem:[%s8961_s27 + $0x3e4] sm:$0xf] %v652_v57  ;;  %655 = vst [vmem:[%s8961_s27 + $0x3e8] sm:$0xf] %v654_v58  ;;  %v656_v59 = vld [vmem:[%s8957_s26 + $0xfb0] sm:$0xf] }
  0xbc   : > { %v658_v60 = vld [vmem:[%s8957_s26 + $0xfc0] sm:$0xf]  ;;  %v660_v61 = vld [vmem:[%s8957_s26 + $0xfd0] sm:$0xf]  ;;  %657 = vst [vmem:[%s8961_s27 + $0x3ec] sm:$0xf] %v656_v59 }
  0xbd   : > { %659 = vst [vmem:[%s8961_s27 + $0x3f0] sm:$0xf] %v658_v60  ;;  %661 = vst [vmem:[%s8961_s27 + $0x3f4] sm:$0xf] %v660_v61  ;;  %v662_v62 = vld [vmem:[%s8957_s26 + $0xfe0] sm:$0xf] }
  0xbe   : > { %v664_v63 = vld [vmem:[%s8957_s26 + $0xff0] sm:$0xf]  ;;  %v666_v0 = vld [vmem:[%s8957_s26 + $0x1000] sm:$0xf]  ;;  %663 = vst [vmem:[%s8961_s27 + $0x3f8] sm:$0xf] %v662_v62 }
  0xbf   : > { %665 = vst [vmem:[%s8961_s27 + $0x3fc] sm:$0xf] %v664_v63  ;;  %667 = vst [vmem:[%s8961_s27 + $0x400] sm:$0xf] %v666_v0  ;;  %v668_v1 = vld [vmem:[%s8957_s26 + $0x1010] sm:$0xf] }
  0xc0   : > { %v670_v2 = vld [vmem:[%s8957_s26 + $0x1020] sm:$0xf]  ;;  %v672_v3 = vld [vmem:[%s8957_s26 + $0x1030] sm:$0xf]  ;;  %669 = vst [vmem:[%s8961_s27 + $0x404] sm:$0xf] %v668_v1 }
  0xc1   : > { %671 = vst [vmem:[%s8961_s27 + $0x408] sm:$0xf] %v670_v2  ;;  %673 = vst [vmem:[%s8961_s27 + $0x40c] sm:$0xf] %v672_v3  ;;  %v674_v4 = vld [vmem:[%s8957_s26 + $0x1040] sm:$0xf] }
  0xc2   : > { %v676_v5 = vld [vmem:[%s8957_s26 + $0x1050] sm:$0xf]  ;;  %v678_v6 = vld [vmem:[%s8957_s26 + $0x1060] sm:$0xf]  ;;  %675 = vst [vmem:[%s8961_s27 + $0x410] sm:$0xf] %v674_v4 }
  0xc3   : > { %677 = vst [vmem:[%s8961_s27 + $0x414] sm:$0xf] %v676_v5  ;;  %679 = vst [vmem:[%s8961_s27 + $0x418] sm:$0xf] %v678_v6  ;;  %v680_v7 = vld [vmem:[%s8957_s26 + $0x1070] sm:$0xf] }
  0xc4   : > { %v682_v8 = vld [vmem:[%s8957_s26 + $0x1080] sm:$0xf]  ;;  %v684_v9 = vld [vmem:[%s8957_s26 + $0x1090] sm:$0xf]  ;;  %681 = vst [vmem:[%s8961_s27 + $0x41c] sm:$0xf] %v680_v7 }
  0xc5   : > { %683 = vst [vmem:[%s8961_s27 + $0x420] sm:$0xf] %v682_v8  ;;  %685 = vst [vmem:[%s8961_s27 + $0x424] sm:$0xf] %v684_v9  ;;  %v686_v10 = vld [vmem:[%s8957_s26 + $0x10a0] sm:$0xf] }
  0xc6   : > { %v688_v11 = vld [vmem:[%s8957_s26 + $0x10b0] sm:$0xf]  ;;  %v690_v12 = vld [vmem:[%s8957_s26 + $0x10c0] sm:$0xf]  ;;  %687 = vst [vmem:[%s8961_s27 + $0x428] sm:$0xf] %v686_v10 }
  0xc7   : > { %689 = vst [vmem:[%s8961_s27 + $0x42c] sm:$0xf] %v688_v11  ;;  %691 = vst [vmem:[%s8961_s27 + $0x430] sm:$0xf] %v690_v12  ;;  %v692_v13 = vld [vmem:[%s8957_s26 + $0x10d0] sm:$0xf] }
  0xc8   : > { %v694_v14 = vld [vmem:[%s8957_s26 + $0x10e0] sm:$0xf]  ;;  %v696_v15 = vld [vmem:[%s8957_s26 + $0x10f0] sm:$0xf]  ;;  %693 = vst [vmem:[%s8961_s27 + $0x434] sm:$0xf] %v692_v13 }
  0xc9   : > { %695 = vst [vmem:[%s8961_s27 + $0x438] sm:$0xf] %v694_v14  ;;  %697 = vst [vmem:[%s8961_s27 + $0x43c] sm:$0xf] %v696_v15  ;;  %v698_v16 = vld [vmem:[%s8957_s26 + $0x1100] sm:$0xf] }
  0xca   : > { %v700_v17 = vld [vmem:[%s8957_s26 + $0x1110] sm:$0xf]  ;;  %v702_v18 = vld [vmem:[%s8957_s26 + $0x1120] sm:$0xf]  ;;  %699 = vst [vmem:[%s8961_s27 + $0x440] sm:$0xf] %v698_v16 }
  0xcb   : > { %701 = vst [vmem:[%s8961_s27 + $0x444] sm:$0xf] %v700_v17  ;;  %703 = vst [vmem:[%s8961_s27 + $0x448] sm:$0xf] %v702_v18  ;;  %v704_v19 = vld [vmem:[%s8957_s26 + $0x1130] sm:$0xf] }
  0xcc   : > { %v706_v20 = vld [vmem:[%s8957_s26 + $0x1140] sm:$0xf]  ;;  %v708_v21 = vld [vmem:[%s8957_s26 + $0x1150] sm:$0xf]  ;;  %705 = vst [vmem:[%s8961_s27 + $0x44c] sm:$0xf] %v704_v19 }
  0xcd   : > { %707 = vst [vmem:[%s8961_s27 + $0x450] sm:$0xf] %v706_v20  ;;  %709 = vst [vmem:[%s8961_s27 + $0x454] sm:$0xf] %v708_v21  ;;  %v710_v22 = vld [vmem:[%s8957_s26 + $0x1160] sm:$0xf] }
  0xce   : > { %v712_v23 = vld [vmem:[%s8957_s26 + $0x1170] sm:$0xf]  ;;  %v714_v24 = vld [vmem:[%s8957_s26 + $0x1180] sm:$0xf]  ;;  %711 = vst [vmem:[%s8961_s27 + $0x458] sm:$0xf] %v710_v22 }
  0xcf   : > { %713 = vst [vmem:[%s8961_s27 + $0x45c] sm:$0xf] %v712_v23  ;;  %715 = vst [vmem:[%s8961_s27 + $0x460] sm:$0xf] %v714_v24  ;;  %v716_v25 = vld [vmem:[%s8957_s26 + $0x1190] sm:$0xf] }
  0xd0   : > { %v718_v26 = vld [vmem:[%s8957_s26 + $0x11a0] sm:$0xf]  ;;  %v720_v27 = vld [vmem:[%s8957_s26 + $0x11b0] sm:$0xf]  ;;  %717 = vst [vmem:[%s8961_s27 + $0x464] sm:$0xf] %v716_v25 }
  0xd1   : > { %719 = vst [vmem:[%s8961_s27 + $0x468] sm:$0xf] %v718_v26  ;;  %721 = vst [vmem:[%s8961_s27 + $0x46c] sm:$0xf] %v720_v27  ;;  %v722_v28 = vld [vmem:[%s8957_s26 + $0x11c0] sm:$0xf] }
  0xd2   : > { %v724_v29 = vld [vmem:[%s8957_s26 + $0x11d0] sm:$0xf]  ;;  %v726_v30 = vld [vmem:[%s8957_s26 + $0x11e0] sm:$0xf]  ;;  %723 = vst [vmem:[%s8961_s27 + $0x470] sm:$0xf] %v722_v28 }
  0xd3   : > { %725 = vst [vmem:[%s8961_s27 + $0x474] sm:$0xf] %v724_v29  ;;  %727 = vst [vmem:[%s8961_s27 + $0x478] sm:$0xf] %v726_v30  ;;  %v728_v31 = vld [vmem:[%s8957_s26 + $0x11f0] sm:$0xf] }
  0xd4   : > { %v730_v32 = vld [vmem:[%s8957_s26 + $0x1200] sm:$0xf]  ;;  %v732_v33 = vld [vmem:[%s8957_s26 + $0x1210] sm:$0xf]  ;;  %729 = vst [vmem:[%s8961_s27 + $0x47c] sm:$0xf] %v728_v31 }
  0xd5   : > { %731 = vst [vmem:[%s8961_s27 + $0x480] sm:$0xf] %v730_v32  ;;  %733 = vst [vmem:[%s8961_s27 + $0x484] sm:$0xf] %v732_v33  ;;  %v734_v34 = vld [vmem:[%s8957_s26 + $0x1220] sm:$0xf] }
  0xd6   : > { %v736_v35 = vld [vmem:[%s8957_s26 + $0x1230] sm:$0xf]  ;;  %v738_v36 = vld [vmem:[%s8957_s26 + $0x1240] sm:$0xf]  ;;  %735 = vst [vmem:[%s8961_s27 + $0x488] sm:$0xf] %v734_v34 }
  0xd7   : > { %737 = vst [vmem:[%s8961_s27 + $0x48c] sm:$0xf] %v736_v35  ;;  %739 = vst [vmem:[%s8961_s27 + $0x490] sm:$0xf] %v738_v36  ;;  %v740_v37 = vld [vmem:[%s8957_s26 + $0x1250] sm:$0xf] }
  0xd8   : > { %v742_v38 = vld [vmem:[%s8957_s26 + $0x1260] sm:$0xf]  ;;  %v744_v39 = vld [vmem:[%s8957_s26 + $0x1270] sm:$0xf]  ;;  %741 = vst [vmem:[%s8961_s27 + $0x494] sm:$0xf] %v740_v37 }
  0xd9   : > { %743 = vst [vmem:[%s8961_s27 + $0x498] sm:$0xf] %v742_v38  ;;  %745 = vst [vmem:[%s8961_s27 + $0x49c] sm:$0xf] %v744_v39  ;;  %v746_v40 = vld [vmem:[%s8957_s26 + $0x1280] sm:$0xf] }
  0xda   : > { %v748_v41 = vld [vmem:[%s8957_s26 + $0x1290] sm:$0xf]  ;;  %v750_v42 = vld [vmem:[%s8957_s26 + $0x12a0] sm:$0xf]  ;;  %747 = vst [vmem:[%s8961_s27 + $0x4a0] sm:$0xf] %v746_v40 }
  0xdb   : > { %749 = vst [vmem:[%s8961_s27 + $0x4a4] sm:$0xf] %v748_v41  ;;  %751 = vst [vmem:[%s8961_s27 + $0x4a8] sm:$0xf] %v750_v42  ;;  %v752_v43 = vld [vmem:[%s8957_s26 + $0x12b0] sm:$0xf] }
  0xdc   : > { %v754_v44 = vld [vmem:[%s8957_s26 + $0x12c0] sm:$0xf]  ;;  %v756_v45 = vld [vmem:[%s8957_s26 + $0x12d0] sm:$0xf]  ;;  %753 = vst [vmem:[%s8961_s27 + $0x4ac] sm:$0xf] %v752_v43 }
  0xdd   : > { %755 = vst [vmem:[%s8961_s27 + $0x4b0] sm:$0xf] %v754_v44  ;;  %757 = vst [vmem:[%s8961_s27 + $0x4b4] sm:$0xf] %v756_v45  ;;  %v758_v46 = vld [vmem:[%s8957_s26 + $0x12e0] sm:$0xf] }
  0xde   : > { %v760_v47 = vld [vmem:[%s8957_s26 + $0x12f0] sm:$0xf]  ;;  %v762_v48 = vld [vmem:[%s8957_s26 + $0x1300] sm:$0xf]  ;;  %759 = vst [vmem:[%s8961_s27 + $0x4b8] sm:$0xf] %v758_v46 }
  0xdf   : > { %761 = vst [vmem:[%s8961_s27 + $0x4bc] sm:$0xf] %v760_v47  ;;  %763 = vst [vmem:[%s8961_s27 + $0x4c0] sm:$0xf] %v762_v48  ;;  %v764_v49 = vld [vmem:[%s8957_s26 + $0x1310] sm:$0xf] }
  0xe0   : > { %v766_v50 = vld [vmem:[%s8957_s26 + $0x1320] sm:$0xf]  ;;  %v768_v51 = vld [vmem:[%s8957_s26 + $0x1330] sm:$0xf]  ;;  %765 = vst [vmem:[%s8961_s27 + $0x4c4] sm:$0xf] %v764_v49 }
  0xe1   : > { %767 = vst [vmem:[%s8961_s27 + $0x4c8] sm:$0xf] %v766_v50  ;;  %769 = vst [vmem:[%s8961_s27 + $0x4cc] sm:$0xf] %v768_v51  ;;  %v770_v52 = vld [vmem:[%s8957_s26 + $0x1340] sm:$0xf] }
  0xe2   : > { %v772_v53 = vld [vmem:[%s8957_s26 + $0x1350] sm:$0xf]  ;;  %v774_v54 = vld [vmem:[%s8957_s26 + $0x1360] sm:$0xf]  ;;  %771 = vst [vmem:[%s8961_s27 + $0x4d0] sm:$0xf] %v770_v52 }
  0xe3   : > { %773 = vst [vmem:[%s8961_s27 + $0x4d4] sm:$0xf] %v772_v53  ;;  %775 = vst [vmem:[%s8961_s27 + $0x4d8] sm:$0xf] %v774_v54  ;;  %v776_v55 = vld [vmem:[%s8957_s26 + $0x1370] sm:$0xf] }
  0xe4   : > { %v778_v56 = vld [vmem:[%s8957_s26 + $0x1380] sm:$0xf]  ;;  %v780_v57 = vld [vmem:[%s8957_s26 + $0x1390] sm:$0xf]  ;;  %777 = vst [vmem:[%s8961_s27 + $0x4dc] sm:$0xf] %v776_v55 }
  0xe5   : > { %779 = vst [vmem:[%s8961_s27 + $0x4e0] sm:$0xf] %v778_v56  ;;  %781 = vst [vmem:[%s8961_s27 + $0x4e4] sm:$0xf] %v780_v57  ;;  %v782_v58 = vld [vmem:[%s8957_s26 + $0x13a0] sm:$0xf] }
  0xe6   : > { %v784_v59 = vld [vmem:[%s8957_s26 + $0x13b0] sm:$0xf]  ;;  %v786_v60 = vld [vmem:[%s8957_s26 + $0x13c0] sm:$0xf]  ;;  %783 = vst [vmem:[%s8961_s27 + $0x4e8] sm:$0xf] %v782_v58 }
  0xe7   : > { %785 = vst [vmem:[%s8961_s27 + $0x4ec] sm:$0xf] %v784_v59  ;;  %787 = vst [vmem:[%s8961_s27 + $0x4f0] sm:$0xf] %v786_v60  ;;  %v788_v61 = vld [vmem:[%s8957_s26 + $0x13d0] sm:$0xf] }
  0xe8   : > { %v790_v62 = vld [vmem:[%s8957_s26 + $0x13e0] sm:$0xf]  ;;  %v792_v63 = vld [vmem:[%s8957_s26 + $0x13f0] sm:$0xf]  ;;  %789 = vst [vmem:[%s8961_s27 + $0x4f4] sm:$0xf] %v788_v61 }
  0xe9   : > { %791 = vst [vmem:[%s8961_s27 + $0x4f8] sm:$0xf] %v790_v62  ;;  %793 = vst [vmem:[%s8961_s27 + $0x4fc] sm:$0xf] %v792_v63  ;;  %v794_v0 = vld [vmem:[%s8957_s26 + $0x1400] sm:$0xf] }
  0xea   : > { %v796_v1 = vld [vmem:[%s8957_s26 + $0x1410] sm:$0xf]  ;;  %v798_v2 = vld [vmem:[%s8957_s26 + $0x1420] sm:$0xf]  ;;  %795 = vst [vmem:[%s8961_s27 + $0x500] sm:$0xf] %v794_v0 }
  0xeb   : > { %797 = vst [vmem:[%s8961_s27 + $0x504] sm:$0xf] %v796_v1  ;;  %799 = vst [vmem:[%s8961_s27 + $0x508] sm:$0xf] %v798_v2  ;;  %v800_v3 = vld [vmem:[%s8957_s26 + $0x1430] sm:$0xf] }
  0xec   : > { %v802_v4 = vld [vmem:[%s8957_s26 + $0x1440] sm:$0xf]  ;;  %v804_v5 = vld [vmem:[%s8957_s26 + $0x1450] sm:$0xf]  ;;  %801 = vst [vmem:[%s8961_s27 + $0x50c] sm:$0xf] %v800_v3 }
  0xed   : > { %803 = vst [vmem:[%s8961_s27 + $0x510] sm:$0xf] %v802_v4  ;;  %805 = vst [vmem:[%s8961_s27 + $0x514] sm:$0xf] %v804_v5  ;;  %v806_v6 = vld [vmem:[%s8957_s26 + $0x1460] sm:$0xf] }
  0xee   : > { %v808_v7 = vld [vmem:[%s8957_s26 + $0x1470] sm:$0xf]  ;;  %v810_v8 = vld [vmem:[%s8957_s26 + $0x1480] sm:$0xf]  ;;  %807 = vst [vmem:[%s8961_s27 + $0x518] sm:$0xf] %v806_v6 }
  0xef   : > { %809 = vst [vmem:[%s8961_s27 + $0x51c] sm:$0xf] %v808_v7  ;;  %811 = vst [vmem:[%s8961_s27 + $0x520] sm:$0xf] %v810_v8  ;;  %v812_v9 = vld [vmem:[%s8957_s26 + $0x1490] sm:$0xf] }
  0xf0   : > { %v814_v10 = vld [vmem:[%s8957_s26 + $0x14a0] sm:$0xf]  ;;  %v816_v11 = vld [vmem:[%s8957_s26 + $0x14b0] sm:$0xf]  ;;  %813 = vst [vmem:[%s8961_s27 + $0x524] sm:$0xf] %v812_v9 }
  0xf1   : > { %815 = vst [vmem:[%s8961_s27 + $0x528] sm:$0xf] %v814_v10  ;;  %817 = vst [vmem:[%s8961_s27 + $0x52c] sm:$0xf] %v816_v11  ;;  %v818_v12 = vld [vmem:[%s8957_s26 + $0x14c0] sm:$0xf] }
  0xf2   : > { %v820_v13 = vld [vmem:[%s8957_s26 + $0x14d0] sm:$0xf]  ;;  %v822_v14 = vld [vmem:[%s8957_s26 + $0x14e0] sm:$0xf]  ;;  %819 = vst [vmem:[%s8961_s27 + $0x530] sm:$0xf] %v818_v12 }
  0xf3   : > { %821 = vst [vmem:[%s8961_s27 + $0x534] sm:$0xf] %v820_v13  ;;  %823 = vst [vmem:[%s8961_s27 + $0x538] sm:$0xf] %v822_v14  ;;  %v824_v15 = vld [vmem:[%s8957_s26 + $0x14f0] sm:$0xf] }
  0xf4   : > { %v826_v16 = vld [vmem:[%s8957_s26 + $0x1500] sm:$0xf]  ;;  %v828_v17 = vld [vmem:[%s8957_s26 + $0x1510] sm:$0xf]  ;;  %825 = vst [vmem:[%s8961_s27 + $0x53c] sm:$0xf] %v824_v15 }
  0xf5   : > { %827 = vst [vmem:[%s8961_s27 + $0x540] sm:$0xf] %v826_v16  ;;  %829 = vst [vmem:[%s8961_s27 + $0x544] sm:$0xf] %v828_v17  ;;  %v830_v18 = vld [vmem:[%s8957_s26 + $0x1520] sm:$0xf] }
  0xf6   : > { %v832_v19 = vld [vmem:[%s8957_s26 + $0x1530] sm:$0xf]  ;;  %v834_v20 = vld [vmem:[%s8957_s26 + $0x1540] sm:$0xf]  ;;  %831 = vst [vmem:[%s8961_s27 + $0x548] sm:$0xf] %v830_v18 }
  0xf7   : > { %833 = vst [vmem:[%s8961_s27 + $0x54c] sm:$0xf] %v832_v19  ;;  %835 = vst [vmem:[%s8961_s27 + $0x550] sm:$0xf] %v834_v20  ;;  %v836_v21 = vld [vmem:[%s8957_s26 + $0x1550] sm:$0xf] }
  0xf8   : > { %v838_v22 = vld [vmem:[%s8957_s26 + $0x1560] sm:$0xf]  ;;  %v840_v23 = vld [vmem:[%s8957_s26 + $0x1570] sm:$0xf]  ;;  %837 = vst [vmem:[%s8961_s27 + $0x554] sm:$0xf] %v836_v21 }
  0xf9   : > { %839 = vst [vmem:[%s8961_s27 + $0x558] sm:$0xf] %v838_v22  ;;  %841 = vst [vmem:[%s8961_s27 + $0x55c] sm:$0xf] %v840_v23  ;;  %v842_v24 = vld [vmem:[%s8957_s26 + $0x1580] sm:$0xf] }
  0xfa   : > { %v844_v25 = vld [vmem:[%s8957_s26 + $0x1590] sm:$0xf]  ;;  %v846_v26 = vld [vmem:[%s8957_s26 + $0x15a0] sm:$0xf]  ;;  %843 = vst [vmem:[%s8961_s27 + $0x560] sm:$0xf] %v842_v24 }
  0xfb   : > { %845 = vst [vmem:[%s8961_s27 + $0x564] sm:$0xf] %v844_v25  ;;  %847 = vst [vmem:[%s8961_s27 + $0x568] sm:$0xf] %v846_v26  ;;  %v848_v27 = vld [vmem:[%s8957_s26 + $0x15b0] sm:$0xf] }
  0xfc   : > { %v850_v28 = vld [vmem:[%s8957_s26 + $0x15c0] sm:$0xf]  ;;  %v852_v29 = vld [vmem:[%s8957_s26 + $0x15d0] sm:$0xf]  ;;  %849 = vst [vmem:[%s8961_s27 + $0x56c] sm:$0xf] %v848_v27 }
  0xfd   : > { %851 = vst [vmem:[%s8961_s27 + $0x570] sm:$0xf] %v850_v28  ;;  %853 = vst [vmem:[%s8961_s27 + $0x574] sm:$0xf] %v852_v29  ;;  %v854_v30 = vld [vmem:[%s8957_s26 + $0x15e0] sm:$0xf] }
  0xfe   : > { %v856_v31 = vld [vmem:[%s8957_s26 + $0x15f0] sm:$0xf]  ;;  %v858_v32 = vld [vmem:[%s8957_s26 + $0x1600] sm:$0xf]  ;;  %855 = vst [vmem:[%s8961_s27 + $0x578] sm:$0xf] %v854_v30 }
  0xff   : > { %857 = vst [vmem:[%s8961_s27 + $0x57c] sm:$0xf] %v856_v31  ;;  %859 = vst [vmem:[%s8961_s27 + $0x580] sm:$0xf] %v858_v32  ;;  %v860_v33 = vld [vmem:[%s8957_s26 + $0x1610] sm:$0xf] }
 0x100   : > { %v862_v34 = vld [vmem:[%s8957_s26 + $0x1620] sm:$0xf]  ;;  %v864_v35 = vld [vmem:[%s8957_s26 + $0x1630] sm:$0xf]  ;;  %861 = vst [vmem:[%s8961_s27 + $0x584] sm:$0xf] %v860_v33 }
 0x101   : > { %863 = vst [vmem:[%s8961_s27 + $0x588] sm:$0xf] %v862_v34  ;;  %865 = vst [vmem:[%s8961_s27 + $0x58c] sm:$0xf] %v864_v35  ;;  %v866_v36 = vld [vmem:[%s8957_s26 + $0x1640] sm:$0xf] }
 0x102   : > { %v868_v37 = vld [vmem:[%s8957_s26 + $0x1650] sm:$0xf]  ;;  %v870_v38 = vld [vmem:[%s8957_s26 + $0x1660] sm:$0xf]  ;;  %867 = vst [vmem:[%s8961_s27 + $0x590] sm:$0xf] %v866_v36 }
 0x103   : > { %869 = vst [vmem:[%s8961_s27 + $0x594] sm:$0xf] %v868_v37  ;;  %871 = vst [vmem:[%s8961_s27 + $0x598] sm:$0xf] %v870_v38  ;;  %v872_v39 = vld [vmem:[%s8957_s26 + $0x1670] sm:$0xf] }
 0x104   : > { %v874_v40 = vld [vmem:[%s8957_s26 + $0x1680] sm:$0xf]  ;;  %v876_v41 = vld [vmem:[%s8957_s26 + $0x1690] sm:$0xf]  ;;  %873 = vst [vmem:[%s8961_s27 + $0x59c] sm:$0xf] %v872_v39 }
 0x105   : > { %875 = vst [vmem:[%s8961_s27 + $0x5a0] sm:$0xf] %v874_v40  ;;  %877 = vst [vmem:[%s8961_s27 + $0x5a4] sm:$0xf] %v876_v41  ;;  %v878_v42 = vld [vmem:[%s8957_s26 + $0x16a0] sm:$0xf] }
 0x106   : > { %v880_v43 = vld [vmem:[%s8957_s26 + $0x16b0] sm:$0xf]  ;;  %v882_v44 = vld [vmem:[%s8957_s26 + $0x16c0] sm:$0xf]  ;;  %879 = vst [vmem:[%s8961_s27 + $0x5a8] sm:$0xf] %v878_v42 }
 0x107   : > { %881 = vst [vmem:[%s8961_s27 + $0x5ac] sm:$0xf] %v880_v43  ;;  %883 = vst [vmem:[%s8961_s27 + $0x5b0] sm:$0xf] %v882_v44  ;;  %v884_v45 = vld [vmem:[%s8957_s26 + $0x16d0] sm:$0xf] }
 0x108   : > { %v886_v46 = vld [vmem:[%s8957_s26 + $0x16e0] sm:$0xf]  ;;  %v888_v47 = vld [vmem:[%s8957_s26 + $0x16f0] sm:$0xf]  ;;  %885 = vst [vmem:[%s8961_s27 + $0x5b4] sm:$0xf] %v884_v45 }
 0x109   : > { %887 = vst [vmem:[%s8961_s27 + $0x5b8] sm:$0xf] %v886_v46  ;;  %889 = vst [vmem:[%s8961_s27 + $0x5bc] sm:$0xf] %v888_v47  ;;  %v890_v48 = vld [vmem:[%s8957_s26 + $0x1700] sm:$0xf] }
 0x10a   : > { %v892_v49 = vld [vmem:[%s8957_s26 + $0x1710] sm:$0xf]  ;;  %v894_v50 = vld [vmem:[%s8957_s26 + $0x1720] sm:$0xf]  ;;  %891 = vst [vmem:[%s8961_s27 + $0x5c0] sm:$0xf] %v890_v48 }
 0x10b   : > { %893 = vst [vmem:[%s8961_s27 + $0x5c4] sm:$0xf] %v892_v49  ;;  %895 = vst [vmem:[%s8961_s27 + $0x5c8] sm:$0xf] %v894_v50  ;;  %v896_v51 = vld [vmem:[%s8957_s26 + $0x1730] sm:$0xf] }
 0x10c   : > { %v898_v52 = vld [vmem:[%s8957_s26 + $0x1740] sm:$0xf]  ;;  %v900_v53 = vld [vmem:[%s8957_s26 + $0x1750] sm:$0xf]  ;;  %897 = vst [vmem:[%s8961_s27 + $0x5cc] sm:$0xf] %v896_v51 }
 0x10d   : > { %899 = vst [vmem:[%s8961_s27 + $0x5d0] sm:$0xf] %v898_v52  ;;  %901 = vst [vmem:[%s8961_s27 + $0x5d4] sm:$0xf] %v900_v53  ;;  %v902_v54 = vld [vmem:[%s8957_s26 + $0x1760] sm:$0xf] }
 0x10e   : > { %v904_v55 = vld [vmem:[%s8957_s26 + $0x1770] sm:$0xf]  ;;  %v906_v56 = vld [vmem:[%s8957_s26 + $0x1780] sm:$0xf]  ;;  %903 = vst [vmem:[%s8961_s27 + $0x5d8] sm:$0xf] %v902_v54 }
 0x10f   : > { %905 = vst [vmem:[%s8961_s27 + $0x5dc] sm:$0xf] %v904_v55  ;;  %907 = vst [vmem:[%s8961_s27 + $0x5e0] sm:$0xf] %v906_v56  ;;  %v908_v57 = vld [vmem:[%s8957_s26 + $0x1790] sm:$0xf] }
 0x110   : > { %v910_v58 = vld [vmem:[%s8957_s26 + $0x17a0] sm:$0xf]  ;;  %v912_v59 = vld [vmem:[%s8957_s26 + $0x17b0] sm:$0xf]  ;;  %909 = vst [vmem:[%s8961_s27 + $0x5e4] sm:$0xf] %v908_v57 }
 0x111   : > { %911 = vst [vmem:[%s8961_s27 + $0x5e8] sm:$0xf] %v910_v58  ;;  %913 = vst [vmem:[%s8961_s27 + $0x5ec] sm:$0xf] %v912_v59  ;;  %v914_v60 = vld [vmem:[%s8957_s26 + $0x17c0] sm:$0xf] }
 0x112   : > { %v916_v61 = vld [vmem:[%s8957_s26 + $0x17d0] sm:$0xf]  ;;  %v918_v62 = vld [vmem:[%s8957_s26 + $0x17e0] sm:$0xf]  ;;  %915 = vst [vmem:[%s8961_s27 + $0x5f0] sm:$0xf] %v914_v60 }
 0x113   : > { %917 = vst [vmem:[%s8961_s27 + $0x5f4] sm:$0xf] %v916_v61  ;;  %919 = vst [vmem:[%s8961_s27 + $0x5f8] sm:$0xf] %v918_v62  ;;  %v920_v63 = vld [vmem:[%s8957_s26 + $0x17f0] sm:$0xf] }
 0x114   : > { %v922_v0 = vld [vmem:[%s8957_s26 + $0x1800] sm:$0xf]  ;;  %v924_v1 = vld [vmem:[%s8957_s26 + $0x1810] sm:$0xf]  ;;  %921 = vst [vmem:[%s8961_s27 + $0x5fc] sm:$0xf] %v920_v63 }
 0x115   : > { %923 = vst [vmem:[%s8961_s27 + $0x600] sm:$0xf] %v922_v0  ;;  %925 = vst [vmem:[%s8961_s27 + $0x604] sm:$0xf] %v924_v1  ;;  %v926_v2 = vld [vmem:[%s8957_s26 + $0x1820] sm:$0xf] }
 0x116   : > { %v928_v3 = vld [vmem:[%s8957_s26 + $0x1830] sm:$0xf]  ;;  %v930_v4 = vld [vmem:[%s8957_s26 + $0x1840] sm:$0xf]  ;;  %927 = vst [vmem:[%s8961_s27 + $0x608] sm:$0xf] %v926_v2 }
 0x117   : > { %929 = vst [vmem:[%s8961_s27 + $0x60c] sm:$0xf] %v928_v3  ;;  %931 = vst [vmem:[%s8961_s27 + $0x610] sm:$0xf] %v930_v4  ;;  %v932_v5 = vld [vmem:[%s8957_s26 + $0x1850] sm:$0xf] }
 0x118   : > { %v934_v6 = vld [vmem:[%s8957_s26 + $0x1860] sm:$0xf]  ;;  %v936_v7 = vld [vmem:[%s8957_s26 + $0x1870] sm:$0xf]  ;;  %933 = vst [vmem:[%s8961_s27 + $0x614] sm:$0xf] %v932_v5 }
 0x119   : > { %935 = vst [vmem:[%s8961_s27 + $0x618] sm:$0xf] %v934_v6  ;;  %937 = vst [vmem:[%s8961_s27 + $0x61c] sm:$0xf] %v936_v7  ;;  %v938_v8 = vld [vmem:[%s8957_s26 + $0x1880] sm:$0xf] }
 0x11a   : > { %v940_v9 = vld [vmem:[%s8957_s26 + $0x1890] sm:$0xf]  ;;  %v942_v10 = vld [vmem:[%s8957_s26 + $0x18a0] sm:$0xf]  ;;  %939 = vst [vmem:[%s8961_s27 + $0x620] sm:$0xf] %v938_v8 }
 0x11b   : > { %941 = vst [vmem:[%s8961_s27 + $0x624] sm:$0xf] %v940_v9  ;;  %943 = vst [vmem:[%s8961_s27 + $0x628] sm:$0xf] %v942_v10  ;;  %v944_v11 = vld [vmem:[%s8957_s26 + $0x18b0] sm:$0xf] }
 0x11c   : > { %v946_v12 = vld [vmem:[%s8957_s26 + $0x18c0] sm:$0xf]  ;;  %v948_v13 = vld [vmem:[%s8957_s26 + $0x18d0] sm:$0xf]  ;;  %945 = vst [vmem:[%s8961_s27 + $0x62c] sm:$0xf] %v944_v11 }
 0x11d   : > { %947 = vst [vmem:[%s8961_s27 + $0x630] sm:$0xf] %v946_v12  ;;  %949 = vst [vmem:[%s8961_s27 + $0x634] sm:$0xf] %v948_v13  ;;  %v950_v14 = vld [vmem:[%s8957_s26 + $0x18e0] sm:$0xf] }
 0x11e   : > { %v952_v15 = vld [vmem:[%s8957_s26 + $0x18f0] sm:$0xf]  ;;  %v954_v16 = vld [vmem:[%s8957_s26 + $0x1900] sm:$0xf]  ;;  %951 = vst [vmem:[%s8961_s27 + $0x638] sm:$0xf] %v950_v14 }
 0x11f   : > { %953 = vst [vmem:[%s8961_s27 + $0x63c] sm:$0xf] %v952_v15  ;;  %955 = vst [vmem:[%s8961_s27 + $0x640] sm:$0xf] %v954_v16  ;;  %v956_v17 = vld [vmem:[%s8957_s26 + $0x1910] sm:$0xf] }
 0x120   : > { %v958_v18 = vld [vmem:[%s8957_s26 + $0x1920] sm:$0xf]  ;;  %v960_v19 = vld [vmem:[%s8957_s26 + $0x1930] sm:$0xf]  ;;  %957 = vst [vmem:[%s8961_s27 + $0x644] sm:$0xf] %v956_v17 }
 0x121   : > { %959 = vst [vmem:[%s8961_s27 + $0x648] sm:$0xf] %v958_v18  ;;  %961 = vst [vmem:[%s8961_s27 + $0x64c] sm:$0xf] %v960_v19  ;;  %v962_v20 = vld [vmem:[%s8957_s26 + $0x1940] sm:$0xf] }
 0x122   : > { %v964_v21 = vld [vmem:[%s8957_s26 + $0x1950] sm:$0xf]  ;;  %v966_v22 = vld [vmem:[%s8957_s26 + $0x1960] sm:$0xf]  ;;  %963 = vst [vmem:[%s8961_s27 + $0x650] sm:$0xf] %v962_v20 }
 0x123   : > { %965 = vst [vmem:[%s8961_s27 + $0x654] sm:$0xf] %v964_v21  ;;  %967 = vst [vmem:[%s8961_s27 + $0x658] sm:$0xf] %v966_v22  ;;  %v968_v23 = vld [vmem:[%s8957_s26 + $0x1970] sm:$0xf] }
 0x124   : > { %v970_v24 = vld [vmem:[%s8957_s26 + $0x1980] sm:$0xf]  ;;  %v972_v25 = vld [vmem:[%s8957_s26 + $0x1990] sm:$0xf]  ;;  %969 = vst [vmem:[%s8961_s27 + $0x65c] sm:$0xf] %v968_v23 }
 0x125   : > { %971 = vst [vmem:[%s8961_s27 + $0x660] sm:$0xf] %v970_v24  ;;  %973 = vst [vmem:[%s8961_s27 + $0x664] sm:$0xf] %v972_v25  ;;  %v974_v26 = vld [vmem:[%s8957_s26 + $0x19a0] sm:$0xf] }
 0x126   : > { %v976_v27 = vld [vmem:[%s8957_s26 + $0x19b0] sm:$0xf]  ;;  %v978_v28 = vld [vmem:[%s8957_s26 + $0x19c0] sm:$0xf]  ;;  %975 = vst [vmem:[%s8961_s27 + $0x668] sm:$0xf] %v974_v26 }
 0x127   : > { %977 = vst [vmem:[%s8961_s27 + $0x66c] sm:$0xf] %v976_v27  ;;  %979 = vst [vmem:[%s8961_s27 + $0x670] sm:$0xf] %v978_v28  ;;  %v980_v29 = vld [vmem:[%s8957_s26 + $0x19d0] sm:$0xf] }
 0x128   : > { %v982_v30 = vld [vmem:[%s8957_s26 + $0x19e0] sm:$0xf]  ;;  %v984_v31 = vld [vmem:[%s8957_s26 + $0x19f0] sm:$0xf]  ;;  %981 = vst [vmem:[%s8961_s27 + $0x674] sm:$0xf] %v980_v29 }
 0x129   : > { %983 = vst [vmem:[%s8961_s27 + $0x678] sm:$0xf] %v982_v30  ;;  %985 = vst [vmem:[%s8961_s27 + $0x67c] sm:$0xf] %v984_v31  ;;  %v986_v32 = vld [vmem:[%s8957_s26 + $0x1a00] sm:$0xf] }
 0x12a   : > { %v988_v33 = vld [vmem:[%s8957_s26 + $0x1a10] sm:$0xf]  ;;  %v990_v34 = vld [vmem:[%s8957_s26 + $0x1a20] sm:$0xf]  ;;  %987 = vst [vmem:[%s8961_s27 + $0x680] sm:$0xf] %v986_v32 }
 0x12b   : > { %989 = vst [vmem:[%s8961_s27 + $0x684] sm:$0xf] %v988_v33  ;;  %991 = vst [vmem:[%s8961_s27 + $0x688] sm:$0xf] %v990_v34  ;;  %v992_v35 = vld [vmem:[%s8957_s26 + $0x1a30] sm:$0xf] }
 0x12c   : > { %v994_v36 = vld [vmem:[%s8957_s26 + $0x1a40] sm:$0xf]  ;;  %v996_v37 = vld [vmem:[%s8957_s26 + $0x1a50] sm:$0xf]  ;;  %993 = vst [vmem:[%s8961_s27 + $0x68c] sm:$0xf] %v992_v35 }
 0x12d   : > { %995 = vst [vmem:[%s8961_s27 + $0x690] sm:$0xf] %v994_v36  ;;  %997 = vst [vmem:[%s8961_s27 + $0x694] sm:$0xf] %v996_v37  ;;  %v998_v38 = vld [vmem:[%s8957_s26 + $0x1a60] sm:$0xf] }
 0x12e   : > { %v1000_v39 = vld [vmem:[%s8957_s26 + $0x1a70] sm:$0xf]  ;;  %v1002_v40 = vld [vmem:[%s8957_s26 + $0x1a80] sm:$0xf]  ;;  %999 = vst [vmem:[%s8961_s27 + $0x698] sm:$0xf] %v998_v38 }
 0x12f   : > { %1001 = vst [vmem:[%s8961_s27 + $0x69c] sm:$0xf] %v1000_v39  ;;  %1003 = vst [vmem:[%s8961_s27 + $0x6a0] sm:$0xf] %v1002_v40  ;;  %v1004_v41 = vld [vmem:[%s8957_s26 + $0x1a90] sm:$0xf] }
 0x130   : > { %v1006_v42 = vld [vmem:[%s8957_s26 + $0x1aa0] sm:$0xf]  ;;  %v1008_v43 = vld [vmem:[%s8957_s26 + $0x1ab0] sm:$0xf]  ;;  %1005 = vst [vmem:[%s8961_s27 + $0x6a4] sm:$0xf] %v1004_v41 }
 0x131   : > { %1007 = vst [vmem:[%s8961_s27 + $0x6a8] sm:$0xf] %v1006_v42  ;;  %1009 = vst [vmem:[%s8961_s27 + $0x6ac] sm:$0xf] %v1008_v43  ;;  %v1010_v44 = vld [vmem:[%s8957_s26 + $0x1ac0] sm:$0xf] }
 0x132   : > { %v1012_v45 = vld [vmem:[%s8957_s26 + $0x1ad0] sm:$0xf]  ;;  %v1014_v46 = vld [vmem:[%s8957_s26 + $0x1ae0] sm:$0xf]  ;;  %1011 = vst [vmem:[%s8961_s27 + $0x6b0] sm:$0xf] %v1010_v44 }
 0x133   : > { %1013 = vst [vmem:[%s8961_s27 + $0x6b4] sm:$0xf] %v1012_v45  ;;  %1015 = vst [vmem:[%s8961_s27 + $0x6b8] sm:$0xf] %v1014_v46  ;;  %v1016_v47 = vld [vmem:[%s8957_s26 + $0x1af0] sm:$0xf] }
 0x134   : > { %v1018_v48 = vld [vmem:[%s8957_s26 + $0x1b00] sm:$0xf]  ;;  %v1020_v49 = vld [vmem:[%s8957_s26 + $0x1b10] sm:$0xf]  ;;  %1017 = vst [vmem:[%s8961_s27 + $0x6bc] sm:$0xf] %v1016_v47 }
 0x135   : > { %1019 = vst [vmem:[%s8961_s27 + $0x6c0] sm:$0xf] %v1018_v48  ;;  %1021 = vst [vmem:[%s8961_s27 + $0x6c4] sm:$0xf] %v1020_v49  ;;  %v1022_v50 = vld [vmem:[%s8957_s26 + $0x1b20] sm:$0xf] }
 0x136   : > { %v1024_v51 = vld [vmem:[%s8957_s26 + $0x1b30] sm:$0xf]  ;;  %v1026_v52 = vld [vmem:[%s8957_s26 + $0x1b40] sm:$0xf]  ;;  %1023 = vst [vmem:[%s8961_s27 + $0x6c8] sm:$0xf] %v1022_v50 }
 0x137   : > { %1025 = vst [vmem:[%s8961_s27 + $0x6cc] sm:$0xf] %v1024_v51  ;;  %1027 = vst [vmem:[%s8961_s27 + $0x6d0] sm:$0xf] %v1026_v52  ;;  %v1028_v53 = vld [vmem:[%s8957_s26 + $0x1b50] sm:$0xf] }
 0x138   : > { %v1030_v54 = vld [vmem:[%s8957_s26 + $0x1b60] sm:$0xf]  ;;  %v1032_v55 = vld [vmem:[%s8957_s26 + $0x1b70] sm:$0xf]  ;;  %1029 = vst [vmem:[%s8961_s27 + $0x6d4] sm:$0xf] %v1028_v53 }
 0x139   : > { %1031 = vst [vmem:[%s8961_s27 + $0x6d8] sm:$0xf] %v1030_v54  ;;  %1033 = vst [vmem:[%s8961_s27 + $0x6dc] sm:$0xf] %v1032_v55  ;;  %v1034_v56 = vld [vmem:[%s8957_s26 + $0x1b80] sm:$0xf] }
 0x13a   : > { %v1036_v57 = vld [vmem:[%s8957_s26 + $0x1b90] sm:$0xf]  ;;  %v1038_v58 = vld [vmem:[%s8957_s26 + $0x1ba0] sm:$0xf]  ;;  %1035 = vst [vmem:[%s8961_s27 + $0x6e0] sm:$0xf] %v1034_v56 }
 0x13b   : > { %1037 = vst [vmem:[%s8961_s27 + $0x6e4] sm:$0xf] %v1036_v57  ;;  %1039 = vst [vmem:[%s8961_s27 + $0x6e8] sm:$0xf] %v1038_v58  ;;  %v1040_v59 = vld [vmem:[%s8957_s26 + $0x1bb0] sm:$0xf] }
 0x13c   : > { %v1042_v60 = vld [vmem:[%s8957_s26 + $0x1bc0] sm:$0xf]  ;;  %v1044_v61 = vld [vmem:[%s8957_s26 + $0x1bd0] sm:$0xf]  ;;  %1041 = vst [vmem:[%s8961_s27 + $0x6ec] sm:$0xf] %v1040_v59 }
 0x13d   : > { %1043 = vst [vmem:[%s8961_s27 + $0x6f0] sm:$0xf] %v1042_v60  ;;  %1045 = vst [vmem:[%s8961_s27 + $0x6f4] sm:$0xf] %v1044_v61  ;;  %v1046_v62 = vld [vmem:[%s8957_s26 + $0x1be0] sm:$0xf] }
 0x13e   : > { %v1048_v63 = vld [vmem:[%s8957_s26 + $0x1bf0] sm:$0xf]  ;;  %v1050_v0 = vld [vmem:[%s8957_s26 + $0x1c00] sm:$0xf]  ;;  %1047 = vst [vmem:[%s8961_s27 + $0x6f8] sm:$0xf] %v1046_v62 }
 0x13f   : > { %1049 = vst [vmem:[%s8961_s27 + $0x6fc] sm:$0xf] %v1048_v63  ;;  %1051 = vst [vmem:[%s8961_s27 + $0x700] sm:$0xf] %v1050_v0  ;;  %v1052_v1 = vld [vmem:[%s8957_s26 + $0x1c10] sm:$0xf] }
 0x140   : > { %v1054_v2 = vld [vmem:[%s8957_s26 + $0x1c20] sm:$0xf]  ;;  %v1056_v3 = vld [vmem:[%s8957_s26 + $0x1c30] sm:$0xf]  ;;  %1053 = vst [vmem:[%s8961_s27 + $0x704] sm:$0xf] %v1052_v1 }
 0x141   : > { %1055 = vst [vmem:[%s8961_s27 + $0x708] sm:$0xf] %v1054_v2  ;;  %1057 = vst [vmem:[%s8961_s27 + $0x70c] sm:$0xf] %v1056_v3  ;;  %v1058_v4 = vld [vmem:[%s8957_s26 + $0x1c40] sm:$0xf] }
 0x142   : > { %v1060_v5 = vld [vmem:[%s8957_s26 + $0x1c50] sm:$0xf]  ;;  %v1062_v6 = vld [vmem:[%s8957_s26 + $0x1c60] sm:$0xf]  ;;  %1059 = vst [vmem:[%s8961_s27 + $0x710] sm:$0xf] %v1058_v4 }
 0x143   : > { %1061 = vst [vmem:[%s8961_s27 + $0x714] sm:$0xf] %v1060_v5  ;;  %1063 = vst [vmem:[%s8961_s27 + $0x718] sm:$0xf] %v1062_v6  ;;  %v1064_v7 = vld [vmem:[%s8957_s26 + $0x1c70] sm:$0xf] }
 0x144   : > { %v1066_v8 = vld [vmem:[%s8957_s26 + $0x1c80] sm:$0xf]  ;;  %v1068_v9 = vld [vmem:[%s8957_s26 + $0x1c90] sm:$0xf]  ;;  %1065 = vst [vmem:[%s8961_s27 + $0x71c] sm:$0xf] %v1064_v7 }
 0x145   : > { %1067 = vst [vmem:[%s8961_s27 + $0x720] sm:$0xf] %v1066_v8  ;;  %1069 = vst [vmem:[%s8961_s27 + $0x724] sm:$0xf] %v1068_v9  ;;  %v1070_v10 = vld [vmem:[%s8957_s26 + $0x1ca0] sm:$0xf] }
 0x146   : > { %v1072_v11 = vld [vmem:[%s8957_s26 + $0x1cb0] sm:$0xf]  ;;  %v1074_v12 = vld [vmem:[%s8957_s26 + $0x1cc0] sm:$0xf]  ;;  %1071 = vst [vmem:[%s8961_s27 + $0x728] sm:$0xf] %v1070_v10 }
 0x147   : > { %1073 = vst [vmem:[%s8961_s27 + $0x72c] sm:$0xf] %v1072_v11  ;;  %1075 = vst [vmem:[%s8961_s27 + $0x730] sm:$0xf] %v1074_v12  ;;  %v1076_v13 = vld [vmem:[%s8957_s26 + $0x1cd0] sm:$0xf] }
 0x148   : > { %v1078_v14 = vld [vmem:[%s8957_s26 + $0x1ce0] sm:$0xf]  ;;  %v1080_v15 = vld [vmem:[%s8957_s26 + $0x1cf0] sm:$0xf]  ;;  %1077 = vst [vmem:[%s8961_s27 + $0x734] sm:$0xf] %v1076_v13 }
 0x149   : > { %1079 = vst [vmem:[%s8961_s27 + $0x738] sm:$0xf] %v1078_v14  ;;  %1081 = vst [vmem:[%s8961_s27 + $0x73c] sm:$0xf] %v1080_v15  ;;  %v1082_v16 = vld [vmem:[%s8957_s26 + $0x1d00] sm:$0xf] }
 0x14a   : > { %v1084_v17 = vld [vmem:[%s8957_s26 + $0x1d10] sm:$0xf]  ;;  %v1086_v18 = vld [vmem:[%s8957_s26 + $0x1d20] sm:$0xf]  ;;  %1083 = vst [vmem:[%s8961_s27 + $0x740] sm:$0xf] %v1082_v16 }
 0x14b   : > { %1085 = vst [vmem:[%s8961_s27 + $0x744] sm:$0xf] %v1084_v17  ;;  %1087 = vst [vmem:[%s8961_s27 + $0x748] sm:$0xf] %v1086_v18  ;;  %v1088_v19 = vld [vmem:[%s8957_s26 + $0x1d30] sm:$0xf] }
 0x14c   : > { %v1090_v20 = vld [vmem:[%s8957_s26 + $0x1d40] sm:$0xf]  ;;  %v1092_v21 = vld [vmem:[%s8957_s26 + $0x1d50] sm:$0xf]  ;;  %1089 = vst [vmem:[%s8961_s27 + $0x74c] sm:$0xf] %v1088_v19 }
 0x14d   : > { %1091 = vst [vmem:[%s8961_s27 + $0x750] sm:$0xf] %v1090_v20  ;;  %1093 = vst [vmem:[%s8961_s27 + $0x754] sm:$0xf] %v1092_v21  ;;  %v1094_v22 = vld [vmem:[%s8957_s26 + $0x1d60] sm:$0xf] }
 0x14e   : > { %v1096_v23 = vld [vmem:[%s8957_s26 + $0x1d70] sm:$0xf]  ;;  %v1098_v24 = vld [vmem:[%s8957_s26 + $0x1d80] sm:$0xf]  ;;  %1095 = vst [vmem:[%s8961_s27 + $0x758] sm:$0xf] %v1094_v22 }
 0x14f   : > { %1097 = vst [vmem:[%s8961_s27 + $0x75c] sm:$0xf] %v1096_v23  ;;  %1099 = vst [vmem:[%s8961_s27 + $0x760] sm:$0xf] %v1098_v24  ;;  %v1100_v25 = vld [vmem:[%s8957_s26 + $0x1d90] sm:$0xf] }
 0x150   : > { %v1102_v26 = vld [vmem:[%s8957_s26 + $0x1da0] sm:$0xf]  ;;  %v1104_v27 = vld [vmem:[%s8957_s26 + $0x1db0] sm:$0xf]  ;;  %1101 = vst [vmem:[%s8961_s27 + $0x764] sm:$0xf] %v1100_v25 }
 0x151   : > { %1103 = vst [vmem:[%s8961_s27 + $0x768] sm:$0xf] %v1102_v26  ;;  %1105 = vst [vmem:[%s8961_s27 + $0x76c] sm:$0xf] %v1104_v27  ;;  %v1106_v28 = vld [vmem:[%s8957_s26 + $0x1dc0] sm:$0xf] }
 0x152   : > { %v1108_v29 = vld [vmem:[%s8957_s26 + $0x1dd0] sm:$0xf]  ;;  %v1110_v30 = vld [vmem:[%s8957_s26 + $0x1de0] sm:$0xf]  ;;  %1107 = vst [vmem:[%s8961_s27 + $0x770] sm:$0xf] %v1106_v28 }
 0x153   : > { %1109 = vst [vmem:[%s8961_s27 + $0x774] sm:$0xf] %v1108_v29  ;;  %1111 = vst [vmem:[%s8961_s27 + $0x778] sm:$0xf] %v1110_v30  ;;  %v1112_v31 = vld [vmem:[%s8957_s26 + $0x1df0] sm:$0xf] }
 0x154   : > { %v1114_v32 = vld [vmem:[%s8957_s26 + $0x1e00] sm:$0xf]  ;;  %v1116_v33 = vld [vmem:[%s8957_s26 + $0x1e10] sm:$0xf]  ;;  %1113 = vst [vmem:[%s8961_s27 + $0x77c] sm:$0xf] %v1112_v31 }
 0x155   : > { %1115 = vst [vmem:[%s8961_s27 + $0x780] sm:$0xf] %v1114_v32  ;;  %1117 = vst [vmem:[%s8961_s27 + $0x784] sm:$0xf] %v1116_v33  ;;  %v1118_v34 = vld [vmem:[%s8957_s26 + $0x1e20] sm:$0xf] }
 0x156   : > { %v1120_v35 = vld [vmem:[%s8957_s26 + $0x1e30] sm:$0xf]  ;;  %v1122_v36 = vld [vmem:[%s8957_s26 + $0x1e40] sm:$0xf]  ;;  %1119 = vst [vmem:[%s8961_s27 + $0x788] sm:$0xf] %v1118_v34 }
 0x157   : > { %1121 = vst [vmem:[%s8961_s27 + $0x78c] sm:$0xf] %v1120_v35  ;;  %1123 = vst [vmem:[%s8961_s27 + $0x790] sm:$0xf] %v1122_v36  ;;  %v1124_v37 = vld [vmem:[%s8957_s26 + $0x1e50] sm:$0xf] }
 0x158   : > { %v1126_v38 = vld [vmem:[%s8957_s26 + $0x1e60] sm:$0xf]  ;;  %v1128_v39 = vld [vmem:[%s8957_s26 + $0x1e70] sm:$0xf]  ;;  %1125 = vst [vmem:[%s8961_s27 + $0x794] sm:$0xf] %v1124_v37 }
 0x159   : > { %1127 = vst [vmem:[%s8961_s27 + $0x798] sm:$0xf] %v1126_v38  ;;  %1129 = vst [vmem:[%s8961_s27 + $0x79c] sm:$0xf] %v1128_v39  ;;  %v1130_v40 = vld [vmem:[%s8957_s26 + $0x1e80] sm:$0xf] }
 0x15a   : > { %v1132_v41 = vld [vmem:[%s8957_s26 + $0x1e90] sm:$0xf]  ;;  %v1134_v42 = vld [vmem:[%s8957_s26 + $0x1ea0] sm:$0xf]  ;;  %1131 = vst [vmem:[%s8961_s27 + $0x7a0] sm:$0xf] %v1130_v40 }
 0x15b   : > { %1133 = vst [vmem:[%s8961_s27 + $0x7a4] sm:$0xf] %v1132_v41  ;;  %1135 = vst [vmem:[%s8961_s27 + $0x7a8] sm:$0xf] %v1134_v42  ;;  %v1136_v43 = vld [vmem:[%s8957_s26 + $0x1eb0] sm:$0xf] }
 0x15c   : > { %v1138_v44 = vld [vmem:[%s8957_s26 + $0x1ec0] sm:$0xf]  ;;  %v1140_v45 = vld [vmem:[%s8957_s26 + $0x1ed0] sm:$0xf]  ;;  %1137 = vst [vmem:[%s8961_s27 + $0x7ac] sm:$0xf] %v1136_v43 }
 0x15d   : > { %1139 = vst [vmem:[%s8961_s27 + $0x7b0] sm:$0xf] %v1138_v44  ;;  %1141 = vst [vmem:[%s8961_s27 + $0x7b4] sm:$0xf] %v1140_v45  ;;  %v1142_v46 = vld [vmem:[%s8957_s26 + $0x1ee0] sm:$0xf] }
 0x15e   : > { %v1144_v47 = vld [vmem:[%s8957_s26 + $0x1ef0] sm:$0xf]  ;;  %v1146_v48 = vld [vmem:[%s8957_s26 + $0x1f00] sm:$0xf]  ;;  %1143 = vst [vmem:[%s8961_s27 + $0x7b8] sm:$0xf] %v1142_v46 }
 0x15f   : > { %1145 = vst [vmem:[%s8961_s27 + $0x7bc] sm:$0xf] %v1144_v47  ;;  %1147 = vst [vmem:[%s8961_s27 + $0x7c0] sm:$0xf] %v1146_v48  ;;  %v1148_v49 = vld [vmem:[%s8957_s26 + $0x1f10] sm:$0xf] }
 0x160   : > { %v1150_v50 = vld [vmem:[%s8957_s26 + $0x1f20] sm:$0xf]  ;;  %v1152_v51 = vld [vmem:[%s8957_s26 + $0x1f30] sm:$0xf]  ;;  %1149 = vst [vmem:[%s8961_s27 + $0x7c4] sm:$0xf] %v1148_v49 }
 0x161   : > { %1151 = vst [vmem:[%s8961_s27 + $0x7c8] sm:$0xf] %v1150_v50  ;;  %1153 = vst [vmem:[%s8961_s27 + $0x7cc] sm:$0xf] %v1152_v51  ;;  %v1154_v52 = vld [vmem:[%s8957_s26 + $0x1f40] sm:$0xf] }
 0x162   : > { %v1156_v53 = vld [vmem:[%s8957_s26 + $0x1f50] sm:$0xf]  ;;  %v1158_v54 = vld [vmem:[%s8957_s26 + $0x1f60] sm:$0xf]  ;;  %1155 = vst [vmem:[%s8961_s27 + $0x7d0] sm:$0xf] %v1154_v52 }
 0x163   : > { %1157 = vst [vmem:[%s8961_s27 + $0x7d4] sm:$0xf] %v1156_v53  ;;  %1159 = vst [vmem:[%s8961_s27 + $0x7d8] sm:$0xf] %v1158_v54  ;;  %v1160_v55 = vld [vmem:[%s8957_s26 + $0x1f70] sm:$0xf] }
 0x164   : > { %v1162_v56 = vld [vmem:[%s8957_s26 + $0x1f80] sm:$0xf]  ;;  %v1164_v57 = vld [vmem:[%s8957_s26 + $0x1f90] sm:$0xf]  ;;  %1161 = vst [vmem:[%s8961_s27 + $0x7dc] sm:$0xf] %v1160_v55 }
 0x165   : > { %1163 = vst [vmem:[%s8961_s27 + $0x7e0] sm:$0xf] %v1162_v56  ;;  %1165 = vst [vmem:[%s8961_s27 + $0x7e4] sm:$0xf] %v1164_v57  ;;  %v1166_v58 = vld [vmem:[%s8957_s26 + $0x1fa0] sm:$0xf] }
 0x166   : > { %v1168_v59 = vld [vmem:[%s8957_s26 + $0x1fb0] sm:$0xf]  ;;  %v1170_v60 = vld [vmem:[%s8957_s26 + $0x1fc0] sm:$0xf]  ;;  %1167 = vst [vmem:[%s8961_s27 + $0x7e8] sm:$0xf] %v1166_v58 }
 0x167   : > { %1169 = vst [vmem:[%s8961_s27 + $0x7ec] sm:$0xf] %v1168_v59  ;;  %1171 = vst [vmem:[%s8961_s27 + $0x7f0] sm:$0xf] %v1170_v60  ;;  %v1172_v61 = vld [vmem:[%s8957_s26 + $0x1fd0] sm:$0xf] }
 0x168   : > { %v1174_v62 = vld [vmem:[%s8957_s26 + $0x1fe0] sm:$0xf]  ;;  %v1176_v63 = vld [vmem:[%s8957_s26 + $0x1ff0] sm:$0xf]  ;;  %1173 = vst [vmem:[%s8961_s27 + $0x7f4] sm:$0xf] %v1172_v61 }
 0x169   : > { %1175 = vst [vmem:[%s8961_s27 + $0x7f8] sm:$0xf] %v1174_v62  ;;  %1177 = vst [vmem:[%s8961_s27 + $0x7fc] sm:$0xf] %v1176_v63 }
 0x16a PF: > { %p7795_p7 = scmp.ge.s32.totalorder %s8894_s14, 1  ;;  %p4308_p8 = scmp.lt.s32.totalorder %s8894_s14, 5 }
 0x16c   : > { %p4309_p9 = pnand %p7795_p7, %p4308_p8 }
 0x16d   : > { %s4315_s28 = sand.u32 (!%p4309_p9), 1, %s8886_s12   ;;  %v9991_v0 = vld [vmem:[%s10500_s0] sm:$0xff] (!%p4309_p9)  ;;  %v10001_v2 = vld [vmem:[%s10500_s0 + $0x8] sm:$0xff] (!%p4309_p9)  ;;  %p4341_p10 = scmp.lt.s32.totalorder (!%p4309_p9), %s8932_s15, 3 }
 0x16e   : > { %4312 = sbr.rel (%p4309_p9) target bundleno = 913 (0x391), region = 80  ;;  %v9996_v1 = vld [vmem:[%s10500_s0 + $0x80] sm:$0xff] (!%p4309_p9)  ;;  %s7796_s8 = sshll.u32 (!%p4309_p9), %s4315_s28, 11  ;;  %v10010_v4 = vld [vmem:[%s10500_s0 + $0x88] sm:$0xff] (!%p4309_p9) }
 0x16f   : > { %v7800_v3 = vcombine.high (!%p4309_p9), %v9991_v0, %v9996_v1  ;;  %v7802_v5 = vcombine.high (!%p4309_p9), %v10001_v2, %v10010_v4  ;;  %s10014_s11 = scalar_lea.vmem (!%p4309_p9), [#allocation2], %s7796_s8  ;;  %v4378_v35 = vld [vmem:[%s10500_s0 + $0x100] sm:$0xff] (!%p4309_p9)  ;;  %v4379_v38 = vld [vmem:[%s10500_s0 + $0x108] sm:$0xff] (!%p4309_p9)  ;;  %v7799_v42 = vcombine.low (!%p4309_p9), %v9991_v0, %v9996_v1  ;;  %v7801_v43 = vcombine.low (!%p4309_p9), %v10001_v2, %v10010_v4  ;;  %s7797_s29 = sshll.u32 (!%p4309_p9), %s4315_s28, 4 }
 0x170   : > { %v8614_v6 = vld [vmem:[%s10014_s11 + $0x40] sm:$0xff] (!%p4309_p9)   ;;  %v8618_v10 = vld [vmem:[%s10014_s11 + $0x48] sm:$0xff] (!%p4309_p9)   ;;  %v8622_v14 = vld [vmem:[%s10014_s11 + $0x50] sm:$0xff] (!%p4309_p9)   ;;  %s4340_s30 = scalar_lea.vmem (!%p4309_p9), [#allocation3], %s7797_s29 }
 0x171   : > { %6815 = vmatprep.mubr.bf16.mxu0 (!%p4309_p9), %v7800_v3  ;;  %v8615_v7 = vld [vmem:[%s10014_s11 + $0xc0] sm:$0xff] (!%p4309_p9)   ;;  %6864 = vmatprep.mubr.bf16.mxu1 (!%p4309_p9), %v7802_v5  ;;  %v8619_v11 = vld [vmem:[%s10014_s11 + $0xc8] sm:$0xff] (!%p4309_p9)   ;;  %v8623_v15 = vld [vmem:[%s10014_s11 + $0xd0] sm:$0xff] (!%p4309_p9)  }
 0x172   : > { %8142 = vmatprep.subr.bf16.mxu0 (!%p4309_p9), %v8614_v6  ;;  %v8616_v8 = vld [vmem:[%s10014_s11] sm:$0xff] (!%p4309_p9)   ;;  %8170 = vmatprep.subr.bf16.mxu1 (!%p4309_p9), %v8615_v7  ;;  %v8620_v12 = vld [vmem:[%s10014_s11 + $0x8] sm:$0xff] (!%p4309_p9)   ;;  %v8624_v16 = vld [vmem:[%s10014_s11 + $0x10] sm:$0xff] (!%p4309_p9)  }
 0x173   : > { %v8617_v9 = vld [vmem:[%s10014_s11 + $0x80] sm:$0xff] (!%p4309_p9)   ;;  %8143 = vmatpush3.bf16.msra.mxu0 (!%p4309_p9), %v8616_v8  ;;  %v8621_v13 = vld [vmem:[%s10014_s11 + $0x88] sm:$0xff] (!%p4309_p9)   ;;  %v8625_v17 = vld [vmem:[%s10014_s11 + $0x90] sm:$0xff] (!%p4309_p9)  }
 0x174   : > { %8171 = vmatpush3.bf16.msra.mxu1 (!%p4309_p9), %v8617_v9  ;;  %8144 = vmatprep.subr.bf16.mxu0 (!%p4309_p9), %v8618_v10  ;;  %v8626_v18 = vld [vmem:[%s10014_s11 + $0x58] sm:$0xff] (!%p4309_p9)   ;;  %v8630_v22 = vld [vmem:[%s10014_s11 + $0x60] sm:$0xff] (!%p4309_p9)   ;;  %v8634_v26 = vld [vmem:[%s10014_s11 + $0x68] sm:$0xff] (!%p4309_p9)  }
 0x175   : > { %8172 = vmatprep.subr.bf16.mxu1 %v8619_v11  ;;  %v8627_v19 = vld [vmem:[%s10014_s11 + $0xd8] sm:$0xff]   ;;  %v8631_v23 = vld [vmem:[%s10014_s11 + $0xe0] sm:$0xff]   ;;  %v8635_v27 = vld [vmem:[%s10014_s11 + $0xe8] sm:$0xff]   ;;  %s10394_s17 = scalar_select %p4341_p10, %s8932_s15, 3 }
 0x176   : > { %v8628_v20 = vld [vmem:[%s10014_s11 + $0x18] sm:$0xff]   ;;  %v8632_v24 = vld [vmem:[%s10014_s11 + $0x20] sm:$0xff]   ;;  %v8636_v28 = vld [vmem:[%s10014_s11 + $0x28] sm:$0xff]   ;;  %s8124_s12 = sshll.u32 (%p8947_p5), %s8932_s15, 2 }
 0x177   : > { %8145 = vmatpush3.bf16.msra.mxu0 %v8620_v12  ;;  %v8629_v21 = vld [vmem:[%s10014_s11 + $0x98] sm:$0xff]   ;;  %v8633_v25 = vld [vmem:[%s10014_s11 + $0xa0] sm:$0xff]   ;;  %v8637_v29 = vld [vmem:[%s10014_s11 + $0xa8] sm:$0xff]   ;;  %s7798_s24 = sshll.u32 %s10394_s17, 2 }
 0x178   : > { %8173 = vmatpush3.bf16.msra.mxu1 %v8621_v13  ;;  %8146 = vmatprep.subr.bf16.mxu0 %v8622_v14  ;;  %v8638_v30 = vld [vmem:[%s10014_s11 + $0x70] sm:$0xff]   ;;  %v8642_v34 = vld [vmem:[%s10014_s11 + $0x78] sm:$0xff]   ;;  %v4394_v36 = vld [vmem:[%s10500_s0 + $0x180] sm:$0xff]  ;;  %s4344_s5 = scalar_lea.vmem %s10502_s2, %s7798_s24 }
 0x179   : > { %8174 = vmatprep.subr.bf16.mxu1 %v8623_v15  ;;  %v8639_v31 = vld [vmem:[%s10014_s11 + $0xf0] sm:$0xff]   ;;  %v8643_v37 = vld [vmem:[%s10014_s11 + $0xf8] sm:$0xff]   ;;  %v4395_v39 = vld [vmem:[%s10500_s0 + $0x188] sm:$0xff]  ;;  %v7832_v46 = vcombine.high %v4378_v35, %v4394_v36  ;;  %v7831_v54 = vcombine.low %v4378_v35, %v4394_v36 }
 0x17a   : > { %v8640_v32 = vld [vmem:[%s10014_s11 + $0x30] sm:$0xff]   ;;  %v8644_v40 = vld [vmem:[%s10014_s11 + $0x38] sm:$0xff]   ;;  %v8646_v44 = vld [vmem:[%s10014_s11 + $0x140] sm:$0xff]   ;;  %v7834_v48 = vcombine.high %v4379_v38, %v4395_v39  ;;  %v7833_v56 = vcombine.low %v4379_v38, %v4395_v39 }
 0x17b   : > { %8147 = vmatpush3.bf16.msra.mxu0 %v8624_v16  ;;  %v8641_v33 = vld [vmem:[%s10014_s11 + $0xb0] sm:$0xff]   ;;  %v8645_v41 = vld [vmem:[%s10014_s11 + $0xb8] sm:$0xff]   ;;  %v8647_v45 = vld [vmem:[%s10014_s11 + $0x1c0] sm:$0xff]  }
 0x17c   : > { %8175 = vmatpush3.bf16.msra.mxu1 %v8625_v17  ;;  %8148 = vmatprep.subr.bf16.mxu0 %v8626_v18  ;;  %v8648_v47 = vld [vmem:[%s10014_s11 + $0x100] sm:$0xff]   ;;  %v8650_v50 = vld [vmem:[%s10014_s11 + $0x148] sm:$0xff]   ;;  %v8654_v55 = vld [vmem:[%s10014_s11 + $0x150] sm:$0xff]  }
 0x17d   : > { %8176 = vmatprep.subr.bf16.mxu1 %v8627_v19  ;;  %v8649_v49 = vld [vmem:[%s10014_s11 + $0x180] sm:$0xff]   ;;  %v8651_v51 = vld [vmem:[%s10014_s11 + $0x1c8] sm:$0xff]   ;;  %v8655_v57 = vld [vmem:[%s10014_s11 + $0x1d0] sm:$0xff]  }
 0x17e   : > { %v8652_v52 = vld [vmem:[%s10014_s11 + $0x108] sm:$0xff]   ;;  %v8656_v58 = vld [vmem:[%s10014_s11 + $0x110] sm:$0xff]   ;;  %v8658_v60 = vld [vmem:[%s10014_s11 + $0x158] sm:$0xff]  }
 0x17f   : > { %8149 = vmatpush3.bf16.msra.mxu0 %v8628_v20  ;;  %v8653_v53 = vld [vmem:[%s10014_s11 + $0x188] sm:$0xff]   ;;  %v8657_v59 = vld [vmem:[%s10014_s11 + $0x190] sm:$0xff]   ;;  %v8659_v61 = vld [vmem:[%s10014_s11 + $0x1d8] sm:$0xff]  }
 0x180   : > { %8177 = vmatpush3.bf16.msra.mxu1 %v8629_v21  ;;  %8150 = vmatprep.subr.bf16.mxu0 %v8630_v22  ;;  %v8660_v62 = vld [vmem:[%s10014_s11 + $0x118] sm:$0xff]   ;;  %v8662_v0 = vld [vmem:[%s10014_s11 + $0x160] sm:$0xff]   ;;  %v8666_v4 = vld [vmem:[%s10014_s11 + $0x168] sm:$0xff]  }
 0x181   : > { %8178 = vmatprep.subr.bf16.mxu1 %v8631_v23  ;;  %v8661_v63 = vld [vmem:[%s10014_s11 + $0x198] sm:$0xff]   ;;  %v8663_v1 = vld [vmem:[%s10014_s11 + $0x1e0] sm:$0xff]   ;;  %v8667_v5 = vld [vmem:[%s10014_s11 + $0x1e8] sm:$0xff]  }
 0x182   : > { %v8664_v2 = vld [vmem:[%s10014_s11 + $0x120] sm:$0xff]   ;;  %v8668_v6 = vld [vmem:[%s10014_s11 + $0x128] sm:$0xff]   ;;  %v8670_v8 = vld [vmem:[%s10014_s11 + $0x170] sm:$0xff]  }
 0x183   : > { %8151 = vmatpush3.bf16.msra.mxu0 %v8632_v24  ;;  %v8665_v3 = vld [vmem:[%s10014_s11 + $0x1a0] sm:$0xff]   ;;  %v8669_v7 = vld [vmem:[%s10014_s11 + $0x1a8] sm:$0xff]   ;;  %v8671_v9 = vld [vmem:[%s10014_s11 + $0x1f0] sm:$0xff]  }
 0x184   : > { %8179 = vmatpush3.bf16.msra.mxu1 %v8633_v25  ;;  %8152 = vmatprep.subr.bf16.mxu0 %v8634_v26  ;;  %v8672_v10 = vld [vmem:[%s10014_s11 + $0x130] sm:$0xff]   ;;  %v8674_v12 = vld [vmem:[%s10014_s11 + $0x178] sm:$0xff]   ;;  %v8678_v24 = vld [vmem:[%s10014_s11 + $0x240] sm:$0xff]  }
 0x185   : > { %8180 = vmatprep.subr.bf16.mxu1 %v8635_v27  ;;  %v8673_v11 = vld [vmem:[%s10014_s11 + $0x1b0] sm:$0xff]   ;;  %v8675_v14 = vld [vmem:[%s10014_s11 + $0x1f8] sm:$0xff]   ;;  %v8679_v25 = vld [vmem:[%s10014_s11 + $0x2c0] sm:$0xff]  }
 0x186   : > { %v4348_v13 = vld [vmem:[%s10500_s0 + $0x10] sm:$0xff]  ;;  %v8676_v15 = vld [vmem:[%s10014_s11 + $0x138] sm:$0xff]   ;;  %v8680_v26 = vld [vmem:[%s10014_s11 + $0x200] sm:$0xff]  }
 0x187   : > { %8153 = vmatpush3.bf16.msra.mxu0 %v8636_v28  ;;  %v8677_v16 = vld [vmem:[%s10014_s11 + $0x1b8] sm:$0xff]   ;;  %v4364_v17 = vld [vmem:[%s10500_s0 + $0x90] sm:$0xff]  ;;  %v8681_v27 = vld [vmem:[%s10014_s11 + $0x280] sm:$0xff]  }
 0x188   : > { %8181 = vmatpush3.bf16.msra.mxu1 %v8637_v29  ;;  %8154 = vmatprep.subr.bf16.mxu0 %v8638_v30  ;;  %v4349_v18 = vld [vmem:[%s10500_s0 + $0x18] sm:$0xff]  ;;  %v7803_v20 = vcombine.low %v4348_v13, %v4364_v17  ;;  %v7804_v21 = vcombine.high %v4348_v13, %v4364_v17  ;;  %v8682_v28 = vld [vmem:[%s10014_s11 + $0x248] sm:$0xff]   ;;  %v8686_v36 = vld [vmem:[%s10014_s11 + $0x250] sm:$0xff]  }
 0x189   : > { %8182 = vmatprep.subr.bf16.mxu1 %v8639_v31  ;;  %v4365_v19 = vld [vmem:[%s10500_s0 + $0x98] sm:$0xff]  ;;  %v8683_v29 = vld [vmem:[%s10014_s11 + $0x2c8] sm:$0xff]   ;;  %v4398_v17 = vld [vmem:[%s10500_s0 + $0x1a0] sm:$0xff] }
 0x18a   : > { %v7805_v22 = vcombine.low %v4349_v18, %v4365_v19  ;;  %v7806_v23 = vcombine.high %v4349_v18, %v4365_v19  ;;  %v8684_v30 = vld [vmem:[%s10014_s11 + $0x208] sm:$0xff]   ;;  %v4381_v38 = vld [vmem:[%s10500_s0 + $0x118] sm:$0xff] }
 0x18b   : > { %8155 = vmatpush3.bf16.msra.mxu0 %v8640_v32  ;;  %v8685_v31 = vld [vmem:[%s10014_s11 + $0x288] sm:$0xff]   ;;  %v4380_v32 = vld [vmem:[%s10500_s0 + $0x110] sm:$0xff]  ;;  %v4397_v39 = vld [vmem:[%s10500_s0 + $0x198] sm:$0xff] }
 0x18c   : > { %8183 = vmatpush3.bf16.msra.mxu1 %v8641_v33  ;;  %8156 = vmatprep.subr.bf16.mxu0 %v8642_v34  ;;  %v4396_v33 = vld [vmem:[%s10500_s0 + $0x190] sm:$0xff]  ;;  %v8715_v13 = vld [vmem:[%s10014_s11 + $0x3c8] sm:$0xff]  }
 0x18d   : > { %8184 = vmatprep.subr.bf16.mxu1 %v8643_v37  ;;  %v7836_v34 = vcombine.high %v4380_v32, %v4396_v33  ;;  %v7835_v35 = vcombine.low %v4380_v32, %v4396_v33  ;;  %v8687_v37 = vld [vmem:[%s10014_s11 + $0x2d0] sm:$0xff]   ;;  %v8726_v32 = vld [vmem:[%s10014_s11 + $0x360] sm:$0xff]  }
 0x18e   : > { %v8727_v33 = vld [vmem:[%s10014_s11 + $0x3e0] sm:$0xff]  }
 0x18f   : > { %8157 = vmatpush3.bf16.msra.mxu0 %v8644_v40  ;;  %v7838_v40 = vcombine.high %v4381_v38, %v4397_v39 }
 0x190   : > { %8185 = vmatpush3.bf16.msra.mxu1 %v8645_v41  ;;  %8198 = vmatprep.subr.bf16.mxu0 %v8646_v44  ;;  %v8688_v41 = vld [vmem:[%s10014_s11 + $0x210] sm:$0xff]   ;;  %v8690_v44 = vld [vmem:[%s10014_s11 + $0x258] sm:$0xff]  }
 0x191   : > { %8226 = vmatprep.subr.bf16.mxu1 %v8647_v45  ;;  %v8691_v45 = vld [vmem:[%s10014_s11 + $0x2d8] sm:$0xff]  }
 0x192   : > { %6816 = vmatmul.mubr.bf16.vlgmr.msra.gmra.mrb[0].mxu0 %v7799_v42  ;;  %v7837_v42 = vcombine.low %v4381_v38, %v4397_v39  ;;  %v8732_v38 = vld [vmem:[%s10014_s11 + $0x328] sm:$0xff]  }
 0x193   : > { %6865 = vmatmul.mubr.bf16.vlgmr.msra.gmra.mrb[0].mxu1 %v7801_v43  ;;  %8199 = vmatpush3.bf16.msra.mxu0 %v8648_v47  ;;  %v8689_v43 = vld [vmem:[%s10014_s11 + $0x290] sm:$0xff]   ;;  %v8693_v47 = vld [vmem:[%s10014_s11 + $0x298] sm:$0xff]   ;;  %v8733_v39 = vld [vmem:[%s10014_s11 + $0x3a8] sm:$0xff]  }
 0x194   : > { %8227 = vmatpush3.bf16.msra.mxu1 %v8649_v49  ;;  %6823 = vmatprep.mubr.bf16.mxu0 %v7832_v46  ;;  %v8692_v46 = vld [vmem:[%s10014_s11 + $0x218] sm:$0xff]   ;;  %v8695_v49 = vld [vmem:[%s10014_s11 + $0x2e0] sm:$0xff]  }
 0x195   : > { %8200 = vmatprep.subr.bf16.mxu0 %v8650_v50  ;;  %6872 = vmatprep.mubr.bf16.mxu1 %v7834_v48  ;;  %v8694_v48 = vld [vmem:[%s10014_s11 + $0x260] sm:$0xff]  }
 0x196   : > { %8228 = vmatprep.subr.bf16.mxu1 %v8651_v51  ;;  %v8696_v50 = vld [vmem:[%s10014_s11 + $0x220] sm:$0xff]  }
 0x197   : > { %8201 = vmatpush3.bf16.msra.mxu0 %v8652_v52  ;;  %v8697_v51 = vld [vmem:[%s10014_s11 + $0x2a0] sm:$0xff]   ;;  %v8698_v52 = vld [vmem:[%s10014_s11 + $0x268] sm:$0xff]  }
 0x198   : > { %8229 = vmatpush3.bf16.msra.mxu1 %v8653_v53  ;;  %8202 = vmatprep.subr.bf16.mxu0 %v8654_v55  ;;  %v8699_v53 = vld [vmem:[%s10014_s11 + $0x2e8] sm:$0xff]  }
 0x199   : > { %8230 = vmatprep.subr.bf16.mxu1 %v8655_v57  ;;  %v8701_v55 = vld [vmem:[%s10014_s11 + $0x2a8] sm:$0xff]   ;;  %v8703_v57 = vld [vmem:[%s10014_s11 + $0x2f0] sm:$0xff]  }
 0x19a   : > { %6824 = vmatmul.mubr.bf16.gmra.mrb[4].mxu0 %v7831_v54  ;;  %v8700_v54 = vld [vmem:[%s10014_s11 + $0x228] sm:$0xff]  }
 0x19b   : > { %8203 = vmatpush3.bf16.msra.mxu0 %v8656_v58  ;;  %6873 = vmatmul.mubr.bf16.gmra.mrb[4].mxu1 %v7833_v56  ;;  %v8702_v56 = vld [vmem:[%s10014_s11 + $0x270] sm:$0xff]  }
 0x19c   : > { %8231 = vmatpush3.bf16.msra.mxu1 %v8657_v59  ;;  %8204 = vmatprep.subr.bf16.mxu0 %v8658_v60  ;;  %v8704_v58 = vld [vmem:[%s10014_s11 + $0x230] sm:$0xff]   ;;  %v8706_v60 = vld [vmem:[%s10014_s11 + $0x278] sm:$0xff]  }
 0x19d   : > { %8232 = vmatprep.subr.bf16.mxu1 %v8659_v61  ;;  %6913 = vmatprep.mubr.bf16.mxu0 %v7804_v21  ;;  %v8705_v59 = vld [vmem:[%s10014_s11 + $0x2b0] sm:$0xff]   ;;  %v8707_v61 = vld [vmem:[%s10014_s11 + $0x2f8] sm:$0xff]  }
 0x19e   : > { %6962 = vmatprep.mubr.bf16.mxu1 %v7806_v23  ;;  %v8719_v21 = vld [vmem:[%s10014_s11 + $0x3d0] sm:$0xff]   ;;  %v4399_v23 = vld [vmem:[%s10500_s0 + $0x1a8] sm:$0xff] }
 0x19f   : > { %8205 = vmatpush3.bf16.msra.mxu0 %v8660_v62  ;;  %v8708_v62 = vld [vmem:[%s10014_s11 + $0x238] sm:$0xff]  }
 0x1a0   : > { %8233 = vmatpush3.bf16.msra.mxu1 %v8661_v63  ;;  %8206 = vmatprep.subr.bf16.mxu0 %v8662_v0  ;;  %v8709_v63 = vld [vmem:[%s10014_s11 + $0x2b8] sm:$0xff]   ;;  %v4350_v0 = vld [vmem:[%s10500_s0 + $0x20] sm:$0xff] }
 0x1a1   : > { %8234 = vmatprep.subr.bf16.mxu1 %v8663_v1  ;;  %v4366_v1 = vld [vmem:[%s10500_s0 + $0xa0] sm:$0xff] }
 0x1a3   : > { %8207 = vmatpush3.bf16.msra.mxu0 %v8664_v2  ;;  %v7807_v2 = vcombine.low %v4350_v0, %v4366_v1 }
 0x1a4   : > { %8235 = vmatpush3.bf16.msra.mxu1 %v8665_v3  ;;  %8208 = vmatprep.subr.bf16.mxu0 %v8666_v4  ;;  %v7808_v3 = vcombine.high %v4350_v0, %v4366_v1  ;;  %v4351_v4 = vld [vmem:[%s10500_s0 + $0x28] sm:$0xff]  ;;  %v4384_v0 = vld [vmem:[%s10500_s0 + $0x130] sm:$0xff] }
 0x1a5   : > { %8236 = vmatprep.subr.bf16.mxu1 %v8667_v5  ;;  %v4367_v5 = vld [vmem:[%s10500_s0 + $0xa8] sm:$0xff]  ;;  %v4400_v1 = vld [vmem:[%s10500_s0 + $0x1b0] sm:$0xff] }
 0x1a7   : > { %8209 = vmatpush3.bf16.msra.mxu0 %v8668_v6  ;;  %v7809_v6 = vcombine.low %v4351_v4, %v4367_v5 }
 0x1a8   : > { %8237 = vmatpush3.bf16.msra.mxu1 %v8669_v7  ;;  %8210 = vmatprep.subr.bf16.mxu0 %v8670_v8  ;;  %v7810_v7 = vcombine.high %v4351_v4, %v4367_v5  ;;  %v8710_v8 = vld [vmem:[%s10014_s11 + $0x340] sm:$0xff]   ;;  %v8750_v4 = vld [vmem:[%s10014_s11 + $0x450] sm:$0xff]  }
 0x1a9   : > { %8238 = vmatprep.subr.bf16.mxu1 %v8671_v9  ;;  %v8711_v9 = vld [vmem:[%s10014_s11 + $0x3c0] sm:$0xff]   ;;  %v8751_v5 = vld [vmem:[%s10014_s11 + $0x4d0] sm:$0xff]  }
 0x1ab   : > { %8211 = vmatpush3.bf16.msra.mxu0 %v8672_v10  ;;  %v8712_v10 = vld [vmem:[%s10014_s11 + $0x300] sm:$0xff]  }
 0x1ac   : > { %8239 = vmatpush3.bf16.msra.mxu1 %v8673_v11  ;;  %8212 = vmatprep.subr.bf16.mxu0 %v8674_v12  ;;  %v8713_v11 = vld [vmem:[%s10014_s11 + $0x380] sm:$0xff]   ;;  %v8714_v12 = vld [vmem:[%s10014_s11 + $0x348] sm:$0xff]  }
 0x1ad   : > { %8240 = vmatprep.subr.bf16.mxu1 %v8675_v14  ;;  %v8716_v14 = vld [vmem:[%s10014_s11 + $0x308] sm:$0xff]  }
 0x1af   : > { %8213 = vmatpush3.bf16.msra.mxu0 %v8676_v15  ;;  %v8717_v15 = vld [vmem:[%s10014_s11 + $0x388] sm:$0xff]  }
 0x1b0   : > { %8241 = vmatpush3.bf16.msra.mxu1 %v8677_v16  ;;  %8254 = vmatprep.subr.bf16.mxu0 %v8678_v24  ;;  %v4382_v16 = vld [vmem:[%s10500_s0 + $0x120] sm:$0xff] }
 0x1b1   : > { %8282 = vmatprep.subr.bf16.mxu1 %v8679_v25  ;;  %v7840_v18 = vcombine.high %v4382_v16, %v4398_v17  ;;  %v7839_v19 = vcombine.low %v4382_v16, %v4398_v17  ;;  %v8720_v25 = vld [vmem:[%s10014_s11 + $0x310] sm:$0xff]   ;;  %v8758_v16 = vld [vmem:[%s10014_s11 + $0x460] sm:$0xff]  }
 0x1b2   : > { %6914 = vmatmul.mubr.bf16.vlgmr.msra.gmra.mrb[8].mxu0 %v7803_v20  ;;  %v8718_v20 = vld [vmem:[%s10014_s11 + $0x350] sm:$0xff]   ;;  %v8759_v17 = vld [vmem:[%s10014_s11 + $0x4e0] sm:$0xff]  }
 0x1b3   : > { %6963 = vmatmul.mubr.bf16.vlgmr.msra.gmra.mrb[8].mxu1 %v7805_v22  ;;  %8255 = vmatpush3.bf16.msra.mxu0 %v8680_v26  ;;  %v4383_v22 = vld [vmem:[%s10500_s0 + $0x128] sm:$0xff] }
 0x1b4   : > { %8283 = vmatpush3.bf16.msra.mxu1 %v8681_v27  ;;  %8256 = vmatprep.subr.bf16.mxu0 %v8682_v28  ;;  %v7842_v24 = vcombine.high %v4383_v22, %v4399_v23  ;;  %v7841_v26 = vcombine.low %v4383_v22, %v4399_v23  ;;  %v8721_v27 = vld [vmem:[%s10014_s11 + $0x390] sm:$0xff]   ;;  %v8722_v28 = vld [vmem:[%s10014_s11 + $0x358] sm:$0xff]   ;;  %v8764_v22 = vld [vmem:[%s10014_s11 + $0x428] sm:$0xff]  }
 0x1b5   : > { %8284 = vmatprep.subr.bf16.mxu1 %v8683_v29  ;;  %6921 = vmatprep.mubr.bf16.mxu0 %v7836_v34  ;;  %v8723_v29 = vld [vmem:[%s10014_s11 + $0x3d8] sm:$0xff]   ;;  %v8728_v34 = vld [vmem:[%s10014_s11 + $0x320] sm:$0xff]   ;;  %v8765_v23 = vld [vmem:[%s10014_s11 + $0x4a8] sm:$0xff]  }
 0x1b6   : > { %6970 = vmatprep.mubr.bf16.mxu1 %v7838_v40  ;;  %v8734_v40 = vld [vmem:[%s10014_s11 + $0x370] sm:$0xff]  }
 0x1b7   : > { %8257 = vmatpush3.bf16.msra.mxu0 %v8684_v30  ;;  %v8724_v30 = vld [vmem:[%s10014_s11 + $0x318] sm:$0xff]  }
 0x1b8   : > { %8285 = vmatpush3.bf16.msra.mxu1 %v8685_v31  ;;  %8258 = vmatprep.subr.bf16.mxu0 %v8686_v36  ;;  %v8725_v31 = vld [vmem:[%s10014_s11 + $0x398] sm:$0xff]   ;;  %v8730_v36 = vld [vmem:[%s10014_s11 + $0x368] sm:$0xff]  }
 0x1b9   : > { %8286 = vmatprep.subr.bf16.mxu1 %v8687_v37  ;;  %v8731_v37 = vld [vmem:[%s10014_s11 + $0x3e8] sm:$0xff]  }
 0x1ba   : > { %6922 = vmatmul.mubr.bf16.gmra.mrb[12].mxu0 %v7835_v35  ;;  %v8729_v35 = vld [vmem:[%s10014_s11 + $0x3a0] sm:$0xff]  }
 0x1bb   : > { %8259 = vmatpush3.bf16.msra.mxu0 %v8688_v41  ;;  %6971 = vmatmul.mubr.bf16.gmra.mrb[12].mxu1 %v7837_v42  ;;  %v8735_v41 = vld [vmem:[%s10014_s11 + $0x3f0] sm:$0xff]  }
 0x1bc   : > { %8287 = vmatpush3.bf16.msra.mxu1 %v8689_v43  ;;  %8260 = vmatprep.subr.bf16.mxu0 %v8690_v44  ;;  %v8736_v42 = vld [vmem:[%s10014_s11 + $0x330] sm:$0xff]   ;;  %v8738_v44 = vld [vmem:[%s10014_s11 + $0x378] sm:$0xff]  }
 0x1bd   : > { %8288 = vmatprep.subr.bf16.mxu1 %v8691_v45  ;;  %7011 = vmatprep.mubr.bf16.mxu0 %v7808_v3  ;;  %v8737_v43 = vld [vmem:[%s10014_s11 + $0x3b0] sm:$0xff]   ;;  %v8739_v45 = vld [vmem:[%s10014_s11 + $0x3f8] sm:$0xff]   ;;  %v7843_v3 = vcombine.low %v4384_v0, %v4400_v1 }
 0x1be   : > { %7060 = vmatprep.mubr.bf16.mxu1 %v7810_v7  ;;  %v4401_v7 = vld [vmem:[%s10500_s0 + $0x1b8] sm:$0xff] }
 0x1bf   : > { %8261 = vmatpush3.bf16.msra.mxu0 %v8692_v46  ;;  %v8740_v46 = vld [vmem:[%s10014_s11 + $0x338] sm:$0xff]  }
 0x1c0   : > { %8289 = vmatpush3.bf16.msra.mxu1 %v8693_v47  ;;  %8262 = vmatprep.subr.bf16.mxu0 %v8694_v48  ;;  %v8741_v47 = vld [vmem:[%s10014_s11 + $0x3b8] sm:$0xff]   ;;  %v4352_v48 = vld [vmem:[%s10500_s0 + $0x30] sm:$0xff] }
 0x1c1   : > { %8290 = vmatprep.subr.bf16.mxu1 %v8695_v49  ;;  %v4368_v49 = vld [vmem:[%s10500_s0 + $0xb0] sm:$0xff] }
 0x1c3   : > { %8263 = vmatpush3.bf16.msra.mxu0 %v8696_v50  ;;  %v4353_v50 = vld [vmem:[%s10500_s0 + $0x38] sm:$0xff] }
 0x1c4   : > { %8291 = vmatpush3.bf16.msra.mxu1 %v8697_v51  ;;  %8264 = vmatprep.subr.bf16.mxu0 %v8698_v52  ;;  %v7811_v51 = vcombine.low %v4352_v48, %v4368_v49  ;;  %v7812_v52 = vcombine.high %v4352_v48, %v4368_v49  ;;  %v4386_v48 = vld [vmem:[%s10500_s0 + $0x140] sm:$0xff] }
 0x1c5   : > { %8292 = vmatprep.subr.bf16.mxu1 %v8699_v53  ;;  %v4369_v53 = vld [vmem:[%s10500_s0 + $0xb8] sm:$0xff]  ;;  %v4402_v49 = vld [vmem:[%s10500_s0 + $0x1c0] sm:$0xff] }
 0x1c7   : > { %8265 = vmatpush3.bf16.msra.mxu0 %v8700_v54  ;;  %v7813_v54 = vcombine.low %v4353_v50, %v4369_v53 }
 0x1c8   : > { %8293 = vmatpush3.bf16.msra.mxu1 %v8701_v55  ;;  %8266 = vmatprep.subr.bf16.mxu0 %v8702_v56  ;;  %v7814_v55 = vcombine.high %v4353_v50, %v4369_v53  ;;  %v8742_v56 = vld [vmem:[%s10014_s11 + $0x440] sm:$0xff]   ;;  %v7848_v50 = vcombine.high %v4386_v48, %v4402_v49  ;;  %v8783_v53 = vld [vmem:[%s10014_s11 + $0x5d0] sm:$0xff]  }
 0x1c9   : > { %8294 = vmatprep.subr.bf16.mxu1 %v8703_v57  ;;  %v8743_v57 = vld [vmem:[%s10014_s11 + $0x4c0] sm:$0xff]  }
 0x1cb   : > { %8267 = vmatpush3.bf16.msra.mxu0 %v8704_v58  ;;  %v8744_v58 = vld [vmem:[%s10014_s11 + $0x400] sm:$0xff]  }
 0x1cc   : > { %8295 = vmatpush3.bf16.msra.mxu1 %v8705_v59  ;;  %8268 = vmatprep.subr.bf16.mxu0 %v8706_v60  ;;  %v8745_v59 = vld [vmem:[%s10014_s11 + $0x480] sm:$0xff]   ;;  %v8746_v60 = vld [vmem:[%s10014_s11 + $0x448] sm:$0xff]  }
 0x1cd   : > { %8296 = vmatprep.subr.bf16.mxu1 %v8707_v61  ;;  %v8747_v61 = vld [vmem:[%s10014_s11 + $0x4c8] sm:$0xff]  }
 0x1cf   : > { %8269 = vmatpush3.bf16.msra.mxu0 %v8708_v62  ;;  %v8748_v62 = vld [vmem:[%s10014_s11 + $0x408] sm:$0xff]  }
 0x1d0   : > { %8297 = vmatpush3.bf16.msra.mxu1 %v8709_v63  ;;  %8310 = vmatprep.subr.bf16.mxu0 %v8710_v8  ;;  %v8749_v63 = vld [vmem:[%s10014_s11 + $0x488] sm:$0xff]  }
 0x1d1   : > { %8338 = vmatprep.subr.bf16.mxu1 %v8711_v9  ;;  %v8752_v9 = vld [vmem:[%s10014_s11 + $0x410] sm:$0xff]  }
 0x1d2   : > { %7012 = vmatmul.mubr.bf16.vlgmr.msra.gmra.mrb[16].mxu0 %v7807_v2  ;;  %v7844_v2 = vcombine.high %v4384_v0, %v4400_v1  ;;  %v8790_v0 = vld [vmem:[%s10014_s11 + $0x560] sm:$0xff]  }
 0x1d3   : > { %7061 = vmatmul.mubr.bf16.vlgmr.msra.gmra.mrb[16].mxu1 %v7809_v6  ;;  %8311 = vmatpush3.bf16.msra.mxu0 %v8712_v10  ;;  %v4385_v6 = vld [vmem:[%s10500_s0 + $0x138] sm:$0xff]  ;;  %v8791_v1 = vld [vmem:[%s10014_s11 + $0x5e0] sm:$0xff]  }
 0x1d4   : > { %8339 = vmatpush3.bf16.msra.mxu1 %v8713_v11  ;;  %8312 = vmatprep.subr.bf16.mxu0 %v8714_v12  ;;  %v7846_v8 = vcombine.high %v4385_v6, %v4401_v7  ;;  %v7845_v10 = vcombine.low %v4385_v6, %v4401_v7  ;;  %v8753_v11 = vld [vmem:[%s10014_s11 + $0x490] sm:$0xff]   ;;  %v8754_v12 = vld [vmem:[%s10014_s11 + $0x458] sm:$0xff]   ;;  %v8796_v6 = vld [vmem:[%s10014_s11 + $0x528] sm:$0xff]  }
 0x1d5   : > { %8340 = vmatprep.subr.bf16.mxu1 %v8715_v13  ;;  %7019 = vmatprep.mubr.bf16.mxu0 %v7840_v18  ;;  %v8755_v13 = vld [vmem:[%s10014_s11 + $0x4d8] sm:$0xff]   ;;  %v8760_v18 = vld [vmem:[%s10014_s11 + $0x420] sm:$0xff]   ;;  %v8797_v7 = vld [vmem:[%s10014_s11 + $0x5a8] sm:$0xff]  }
 0x1d6   : > { %7068 = vmatprep.mubr.bf16.mxu1 %v7842_v24  ;;  %v8766_v24 = vld [vmem:[%s10014_s11 + $0x470] sm:$0xff]  }
 0x1d7   : > { %8313 = vmatpush3.bf16.msra.mxu0 %v8716_v14  ;;  %v8756_v14 = vld [vmem:[%s10014_s11 + $0x418] sm:$0xff]  }
 0x1d8   : > { %8341 = vmatpush3.bf16.msra.mxu1 %v8717_v15  ;;  %8314 = vmatprep.subr.bf16.mxu0 %v8718_v20  ;;  %v8757_v15 = vld [vmem:[%s10014_s11 + $0x498] sm:$0xff]   ;;  %v8762_v20 = vld [vmem:[%s10014_s11 + $0x468] sm:$0xff]  }
 0x1d9   : > { %8342 = vmatprep.subr.bf16.mxu1 %v8719_v21  ;;  %v8763_v21 = vld [vmem:[%s10014_s11 + $0x4e8] sm:$0xff]  }
 0x1da   : > { %7020 = vmatmul.mubr.bf16.gmra.mrb[20].mxu0 %v7839_v19  ;;  %v8761_v19 = vld [vmem:[%s10014_s11 + $0x4a0] sm:$0xff]  }
 0x1db   : > { %8315 = vmatpush3.bf16.msra.mxu0 %v8720_v25  ;;  %7069 = vmatmul.mubr.bf16.gmra.mrb[20].mxu1 %v7841_v26  ;;  %v8767_v25 = vld [vmem:[%s10014_s11 + $0x4f0] sm:$0xff]  }
 0x1dc   : > { %8343 = vmatpush3.bf16.msra.mxu1 %v8721_v27  ;;  %8316 = vmatprep.subr.bf16.mxu0 %v8722_v28  ;;  %v8768_v26 = vld [vmem:[%s10014_s11 + $0x430] sm:$0xff]   ;;  %v8770_v28 = vld [vmem:[%s10014_s11 + $0x478] sm:$0xff]  }
 0x1dd   : > { %8344 = vmatprep.subr.bf16.mxu1 %v8723_v29  ;;  %7109 = vmatprep.mubr.bf16.mxu0 %v7812_v52  ;;  %v8769_v27 = vld [vmem:[%s10014_s11 + $0x4b0] sm:$0xff]   ;;  %v8771_v29 = vld [vmem:[%s10014_s11 + $0x4f8] sm:$0xff]  }
 0x1de   : > { %7158 = vmatprep.mubr.bf16.mxu1 %v7814_v55  ;;  %v8782_v52 = vld [vmem:[%s10014_s11 + $0x550] sm:$0xff]   ;;  %v4403_v55 = vld [vmem:[%s10500_s0 + $0x1c8] sm:$0xff] }
 0x1df   : > { %8317 = vmatpush3.bf16.msra.mxu0 %v8724_v30  ;;  %v8772_v30 = vld [vmem:[%s10014_s11 + $0x438] sm:$0xff]  }
 0x1e0   : > { %8345 = vmatpush3.bf16.msra.mxu1 %v8725_v31  ;;  %8318 = vmatprep.subr.bf16.mxu0 %v8726_v32  ;;  %v8773_v31 = vld [vmem:[%s10014_s11 + $0x4b8] sm:$0xff]   ;;  %v4354_v32 = vld [vmem:[%s10500_s0 + $0x40] sm:$0xff] }
 0x1e1   : > { %8346 = vmatprep.subr.bf16.mxu1 %v8727_v33  ;;  %v4370_v33 = vld [vmem:[%s10500_s0 + $0xc0] sm:$0xff] }
 0x1e3   : > { %8319 = vmatpush3.bf16.msra.mxu0 %v8728_v34  ;;  %v4355_v34 = vld [vmem:[%s10500_s0 + $0x48] sm:$0xff] }
 0x1e4   : > { %8347 = vmatpush3.bf16.msra.mxu1 %v8729_v35  ;;  %8320 = vmatprep.subr.bf16.mxu0 %v8730_v36  ;;  %v4371_v35 = vld [vmem:[%s10500_s0 + $0xc8] sm:$0xff]  ;;  %v7815_v36 = vcombine.low %v4354_v32, %v4370_v33 }
 0x1e5   : > { %8348 = vmatprep.subr.bf16.mxu1 %v8731_v37  ;;  %v7816_v37 = vcombine.high %v4354_v32, %v4370_v33  ;;  %v4388_v32 = vld [vmem:[%s10500_s0 + $0x150] sm:$0xff] }
 0x1e6   : > { %v4404_v33 = vld [vmem:[%s10500_s0 + $0x1d0] sm:$0xff] }
 0x1e7   : > { %8321 = vmatpush3.bf16.msra.mxu0 %v8732_v38  ;;  %v7817_v38 = vcombine.low %v4355_v34, %v4371_v35 }
 0x1e8   : > { %8349 = vmatpush3.bf16.msra.mxu1 %v8733_v39  ;;  %8322 = vmatprep.subr.bf16.mxu0 %v8734_v40  ;;  %v7818_v39 = vcombine.high %v4355_v34, %v4371_v35  ;;  %v8774_v40 = vld [vmem:[%s10014_s11 + $0x540] sm:$0xff]   ;;  %v7852_v34 = vcombine.high %v4388_v32, %v4404_v33  ;;  %v7851_v35 = vcombine.low %v4388_v32, %v4404_v33  ;;  %v8848_v33 = vld [vmem:[%s10014_s11 + $0x710] sm:$0xff]  }
 0x1e9   : > { %8350 = vmatprep.subr.bf16.mxu1 %v8735_v41  ;;  %v8775_v41 = vld [vmem:[%s10014_s11 + $0x5c0] sm:$0xff]  }
 0x1eb   : > { %8323 = vmatpush3.bf16.msra.mxu0 %v8736_v42  ;;  %v8776_v42 = vld [vmem:[%s10014_s11 + $0x500] sm:$0xff]  }
 0x1ec   : > { %8351 = vmatpush3.bf16.msra.mxu1 %v8737_v43  ;;  %8324 = vmatprep.subr.bf16.mxu0 %v8738_v44  ;;  %v8777_v43 = vld [vmem:[%s10014_s11 + $0x580] sm:$0xff]   ;;  %v8778_v44 = vld [vmem:[%s10014_s11 + $0x548] sm:$0xff]  }
 0x1ed   : > { %8352 = vmatprep.subr.bf16.mxu1 %v8739_v45  ;;  %v8779_v45 = vld [vmem:[%s10014_s11 + $0x5c8] sm:$0xff]  }
 0x1ef   : > { %8325 = vmatpush3.bf16.msra.mxu0 %v8740_v46  ;;  %v8780_v46 = vld [vmem:[%s10014_s11 + $0x508] sm:$0xff]  }
 0x1f0   : > { %8353 = vmatpush3.bf16.msra.mxu1 %v8741_v47  ;;  %8366 = vmatprep.subr.bf16.mxu0 %v8742_v56  ;;  %v8781_v47 = vld [vmem:[%s10014_s11 + $0x588] sm:$0xff]  }
 0x1f1   : > { %8394 = vmatprep.subr.bf16.mxu1 %v8743_v57  ;;  %v8784_v57 = vld [vmem:[%s10014_s11 + $0x510] sm:$0xff]  }
 0x1f2   : > { %7110 = vmatmul.mubr.bf16.vlgmr.msra.gmra.mrb[24].mxu0 %v7811_v51  ;;  %v7847_v51 = vcombine.low %v4386_v48, %v4402_v49  ;;  %v8822_v48 = vld [vmem:[%s10014_s11 + $0x660] sm:$0xff]  }
 0x1f3   : > { %7159 = vmatmul.mubr.bf16.vlgmr.msra.gmra.mrb[24].mxu1 %v7813_v54  ;;  %8367 = vmatpush3.bf16.msra.mxu0 %v8744_v58  ;;  %v4387_v54 = vld [vmem:[%s10500_s0 + $0x148] sm:$0xff]  ;;  %v8823_v49 = vld [vmem:[%s10014_s11 + $0x6e0] sm:$0xff]  }
 0x1f4   : > { %8395 = vmatpush3.bf16.msra.mxu1 %v8745_v59  ;;  %8368 = vmatprep.subr.bf16.mxu0 %v8746_v60  ;;  %v7850_v56 = vcombine.high %v4387_v54, %v4403_v55  ;;  %v7849_v58 = vcombine.low %v4387_v54, %v4403_v55  ;;  %v8785_v59 = vld [vmem:[%s10014_s11 + $0x590] sm:$0xff]   ;;  %v8786_v60 = vld [vmem:[%s10014_s11 + $0x558] sm:$0xff]   ;;  %v8828_v54 = vld [vmem:[%s10014_s11 + $0x628] sm:$0xff]  }
 0x1f5   : > { %8396 = vmatprep.subr.bf16.mxu1 %v8747_v61  ;;  %7117 = vmatprep.mubr.bf16.mxu0 %v7844_v2  ;;  %v8787_v61 = vld [vmem:[%s10014_s11 + $0x5d8] sm:$0xff]   ;;  %v8792_v2 = vld [vmem:[%s10014_s11 + $0x520] sm:$0xff]   ;;  %v8829_v55 = vld [vmem:[%s10014_s11 + $0x6a8] sm:$0xff]  }
 0x1f6   : > { %7166 = vmatprep.mubr.bf16.mxu1 %v7846_v8  ;;  %v8798_v8 = vld [vmem:[%s10014_s11 + $0x570] sm:$0xff]  }
 0x1f7   : > { %8369 = vmatpush3.bf16.msra.mxu0 %v8748_v62  ;;  %v8788_v62 = vld [vmem:[%s10014_s11 + $0x518] sm:$0xff]  }
 0x1f8   : > { %8397 = vmatpush3.bf16.msra.mxu1 %v8749_v63  ;;  %8370 = vmatprep.subr.bf16.mxu0 %v8750_v4  ;;  %v8789_v63 = vld [vmem:[%s10014_s11 + $0x598] sm:$0xff]   ;;  %v8794_v4 = vld [vmem:[%s10014_s11 + $0x568] sm:$0xff]  }
 0x1f9   : > { %8398 = vmatprep.subr.bf16.mxu1 %v8751_v5  ;;  %v8795_v5 = vld [vmem:[%s10014_s11 + $0x5e8] sm:$0xff]  }
 0x1fa   : > { %7118 = vmatmul.mubr.bf16.gmra.mrb[28].mxu0 %v7843_v3  ;;  %v8793_v3 = vld [vmem:[%s10014_s11 + $0x5a0] sm:$0xff]  }
 0x1fb   : > { %8371 = vmatpush3.bf16.msra.mxu0 %v8752_v9  ;;  %7167 = vmatmul.mubr.bf16.gmra.mrb[28].mxu1 %v7845_v10  ;;  %v8799_v9 = vld [vmem:[%s10014_s11 + $0x5f0] sm:$0xff]  }
 0x1fc   : > { %8399 = vmatpush3.bf16.msra.mxu1 %v8753_v11  ;;  %8372 = vmatprep.subr.bf16.mxu0 %v8754_v12  ;;  %v8800_v10 = vld [vmem:[%s10014_s11 + $0x530] sm:$0xff]   ;;  %v8802_v12 = vld [vmem:[%s10014_s11 + $0x578] sm:$0xff]  }
 0x1fd   : > { %8400 = vmatprep.subr.bf16.mxu1 %v8755_v13  ;;  %7207 = vmatprep.mubr.bf16.mxu0 %v7816_v37  ;;  %v8801_v11 = vld [vmem:[%s10014_s11 + $0x5b0] sm:$0xff]   ;;  %v8803_v13 = vld [vmem:[%s10014_s11 + $0x5f8] sm:$0xff]  }
 0x1fe   : > { %7256 = vmatprep.mubr.bf16.mxu1 %v7818_v39  ;;  %v8815_v37 = vld [vmem:[%s10014_s11 + $0x6d0] sm:$0xff]   ;;  %v4405_v39 = vld [vmem:[%s10500_s0 + $0x1d8] sm:$0xff] }
 0x1ff   : > { %8373 = vmatpush3.bf16.msra.mxu0 %v8756_v14  ;;  %v8804_v14 = vld [vmem:[%s10014_s11 + $0x538] sm:$0xff]  }
 0x200   : > { %8401 = vmatpush3.bf16.msra.mxu1 %v8757_v15  ;;  %8374 = vmatprep.subr.bf16.mxu0 %v8758_v16  ;;  %v8805_v15 = vld [vmem:[%s10014_s11 + $0x5b8] sm:$0xff]   ;;  %v4356_v16 = vld [vmem:[%s10500_s0 + $0x50] sm:$0xff] }
 0x201   : > { %8402 = vmatprep.subr.bf16.mxu1 %v8759_v17  ;;  %v4372_v17 = vld [vmem:[%s10500_s0 + $0xd0] sm:$0xff] }
 0x203   : > { %8375 = vmatpush3.bf16.msra.mxu0 %v8760_v18  ;;  %v7819_v18 = vcombine.low %v4356_v16, %v4372_v17 }
 0x204   : > { %8403 = vmatpush3.bf16.msra.mxu1 %v8761_v19  ;;  %8376 = vmatprep.subr.bf16.mxu0 %v8762_v20  ;;  %v7820_v19 = vcombine.high %v4356_v16, %v4372_v17  ;;  %v4357_v20 = vld [vmem:[%s10500_s0 + $0x58] sm:$0xff]  ;;  %v8845_v16 = vld [vmem:[%s10014_s11 + $0x788] sm:$0xff]   ;;  %v4390_v17 = vld [vmem:[%s10500_s0 + $0x160] sm:$0xff] }
 0x205   : > { %8404 = vmatprep.subr.bf16.mxu1 %v8763_v21  ;;  %v4373_v21 = vld [vmem:[%s10500_s0 + $0xd8] sm:$0xff] }
 0x207   : > { %8377 = vmatpush3.bf16.msra.mxu0 %v8764_v22  ;;  %v7821_v22 = vcombine.low %v4357_v20, %v4373_v21 }
 0x208   : > { %8405 = vmatpush3.bf16.msra.mxu1 %v8765_v23  ;;  %8378 = vmatprep.subr.bf16.mxu0 %v8766_v24  ;;  %v7822_v23 = vcombine.high %v4357_v20, %v4373_v21  ;;  %v8806_v24 = vld [vmem:[%s10014_s11 + $0x640] sm:$0xff]  }
 0x209   : > { %8406 = vmatprep.subr.bf16.mxu1 %v8767_v25  ;;  %v8807_v25 = vld [vmem:[%s10014_s11 + $0x6c0] sm:$0xff]  }
 0x20b   : > { %8379 = vmatpush3.bf16.msra.mxu0 %v8768_v26  ;;  %v8808_v26 = vld [vmem:[%s10014_s11 + $0x600] sm:$0xff]  }
 0x20c   : > { %8407 = vmatpush3.bf16.msra.mxu1 %v8769_v27  ;;  %8380 = vmatprep.subr.bf16.mxu0 %v8770_v28  ;;  %v8809_v27 = vld [vmem:[%s10014_s11 + $0x680] sm:$0xff]   ;;  %v8810_v28 = vld [vmem:[%s10014_s11 + $0x648] sm:$0xff]  }
 0x20d   : > { %8408 = vmatprep.subr.bf16.mxu1 %v8771_v29  ;;  %v8811_v29 = vld [vmem:[%s10014_s11 + $0x6c8] sm:$0xff]  }
 0x20f   : > { %8381 = vmatpush3.bf16.msra.mxu0 %v8772_v30  ;;  %v8812_v30 = vld [vmem:[%s10014_s11 + $0x608] sm:$0xff]  }
 0x210   : > { %8409 = vmatpush3.bf16.msra.mxu1 %v8773_v31  ;;  %8422 = vmatprep.subr.bf16.mxu0 %v8774_v40  ;;  %v8813_v31 = vld [vmem:[%s10014_s11 + $0x688] sm:$0xff]  }
 0x211   : > { %8450 = vmatprep.subr.bf16.mxu1 %v8775_v41  ;;  %v8816_v41 = vld [vmem:[%s10014_s11 + $0x610] sm:$0xff]  }
 0x212   : > { %7208 = vmatmul.mubr.bf16.vlgmr.msra.gmra.mrb[32].mxu0 %v7815_v36  ;;  %v8814_v36 = vld [vmem:[%s10014_s11 + $0x650] sm:$0xff]  }
 0x213   : > { %7257 = vmatmul.mubr.bf16.vlgmr.msra.gmra.mrb[32].mxu1 %v7817_v38  ;;  %8423 = vmatpush3.bf16.msra.mxu0 %v8776_v42  ;;  %v4389_v38 = vld [vmem:[%s10500_s0 + $0x158] sm:$0xff] }
 0x214   : > { %8451 = vmatpush3.bf16.msra.mxu1 %v8777_v43  ;;  %8424 = vmatprep.subr.bf16.mxu0 %v8778_v44  ;;  %v7854_v40 = vcombine.high %v4389_v38, %v4405_v39  ;;  %v7853_v42 = vcombine.low %v4389_v38, %v4405_v39  ;;  %v8817_v43 = vld [vmem:[%s10014_s11 + $0x690] sm:$0xff]   ;;  %v8818_v44 = vld [vmem:[%s10014_s11 + $0x658] sm:$0xff]  }
 0x215   : > { %8452 = vmatprep.subr.bf16.mxu1 %v8779_v45  ;;  %7215 = vmatprep.mubr.bf16.mxu0 %v7848_v50  ;;  %v8819_v45 = vld [vmem:[%s10014_s11 + $0x6d8] sm:$0xff]   ;;  %v8824_v50 = vld [vmem:[%s10014_s11 + $0x620] sm:$0xff]  }
 0x216   : > { %7264 = vmatprep.mubr.bf16.mxu1 %v7850_v56  ;;  %v8830_v56 = vld [vmem:[%s10014_s11 + $0x670] sm:$0xff]   ;;  %v8850_v39 = vld [vmem:[%s10014_s11 + $0x758] sm:$0xff]  }
 0x217   : > { %8425 = vmatpush3.bf16.msra.mxu0 %v8780_v46  ;;  %v8820_v46 = vld [vmem:[%s10014_s11 + $0x618] sm:$0xff]  }
 0x218   : > { %8453 = vmatpush3.bf16.msra.mxu1 %v8781_v47  ;;  %8426 = vmatprep.subr.bf16.mxu0 %v8782_v52  ;;  %v8821_v47 = vld [vmem:[%s10014_s11 + $0x698] sm:$0xff]   ;;  %v8826_v52 = vld [vmem:[%s10014_s11 + $0x668] sm:$0xff]  }
 0x219   : > { %8454 = vmatprep.subr.bf16.mxu1 %v8783_v53  ;;  %v8827_v53 = vld [vmem:[%s10014_s11 + $0x6e8] sm:$0xff]  }
 0x21a   : > { %7216 = vmatmul.mubr.bf16.gmra.mrb[36].mxu0 %v7847_v51  ;;  %v8825_v51 = vld [vmem:[%s10014_s11 + $0x6a0] sm:$0xff]  }
 0x21b   : > { %8427 = vmatpush3.bf16.msra.mxu0 %v8784_v57  ;;  %7265 = vmatmul.mubr.bf16.gmra.mrb[36].mxu1 %v7849_v58  ;;  %v8831_v57 = vld [vmem:[%s10014_s11 + $0x6f0] sm:$0xff]  }
 0x21c   : > { %8455 = vmatpush3.bf16.msra.mxu1 %v8785_v59  ;;  %8428 = vmatprep.subr.bf16.mxu0 %v8786_v60  ;;  %v8832_v58 = vld [vmem:[%s10014_s11 + $0x630] sm:$0xff]   ;;  %v8834_v60 = vld [vmem:[%s10014_s11 + $0x678] sm:$0xff]  }
 0x21d   : > { %8456 = vmatprep.subr.bf16.mxu1 %v8787_v61  ;;  %7305 = vmatprep.mubr.bf16.mxu0 %v7820_v19  ;;  %v8833_v59 = vld [vmem:[%s10014_s11 + $0x6b0] sm:$0xff]   ;;  %v8835_v61 = vld [vmem:[%s10014_s11 + $0x6f8] sm:$0xff]  }
 0x21e   : > { %7354 = vmatprep.mubr.bf16.mxu1 %v7822_v23  ;;  %v8846_v23 = vld [vmem:[%s10014_s11 + $0x750] sm:$0xff]  }
 0x21f   : > { %8429 = vmatpush3.bf16.msra.mxu0 %v8788_v62  ;;  %v8836_v62 = vld [vmem:[%s10014_s11 + $0x638] sm:$0xff]  }
 0x220   : > { %8457 = vmatpush3.bf16.msra.mxu1 %v8789_v63  ;;  %8430 = vmatprep.subr.bf16.mxu0 %v8790_v0  ;;  %v8837_v63 = vld [vmem:[%s10014_s11 + $0x6b8] sm:$0xff]   ;;  %v4358_v0 = vld [vmem:[%s10500_s0 + $0x60] sm:$0xff] }
 0x221   : > { %8458 = vmatprep.subr.bf16.mxu1 %v8791_v1  ;;  %v4374_v1 = vld [vmem:[%s10500_s0 + $0xe0] sm:$0xff] }
 0x223   : > { %8431 = vmatpush3.bf16.msra.mxu0 %v8792_v2  ;;  %v4359_v2 = vld [vmem:[%s10500_s0 + $0x68] sm:$0xff] }
 0x224   : > { %8459 = vmatpush3.bf16.msra.mxu1 %v8793_v3  ;;  %8432 = vmatprep.subr.bf16.mxu0 %v8794_v4  ;;  %v7823_v3 = vcombine.low %v4358_v0, %v4374_v1  ;;  %v7824_v4 = vcombine.high %v4358_v0, %v4374_v1  ;;  %v8859_v0 = vld [vmem:[%s10014_s11 + $0x7e8] sm:$0xff]  }
 0x225   : > { %8460 = vmatprep.subr.bf16.mxu1 %v8795_v5  ;;  %v4375_v5 = vld [vmem:[%s10500_s0 + $0xe8] sm:$0xff] }
 0x227   : > { %8433 = vmatpush3.bf16.msra.mxu0 %v8796_v6  ;;  %v7825_v6 = vcombine.low %v4359_v2, %v4375_v5 }
 0x228   : > { %8461 = vmatpush3.bf16.msra.mxu1 %v8797_v7  ;;  %8434 = vmatprep.subr.bf16.mxu0 %v8798_v8  ;;  %v7826_v7 = vcombine.high %v4359_v2, %v4375_v5  ;;  %v8838_v8 = vld [vmem:[%s10014_s11 + $0x740] sm:$0xff]  }
 0x229   : > { %8462 = vmatprep.subr.bf16.mxu1 %v8799_v9  ;;  %v8839_v9 = vld [vmem:[%s10014_s11 + $0x7c0] sm:$0xff]  }
 0x22b   : > { %8435 = vmatpush3.bf16.msra.mxu0 %v8800_v10  ;;  %v8840_v10 = vld [vmem:[%s10014_s11 + $0x700] sm:$0xff]  }
 0x22c   : > { %8463 = vmatpush3.bf16.msra.mxu1 %v8801_v11  ;;  %8436 = vmatprep.subr.bf16.mxu0 %v8802_v12  ;;  %v8841_v11 = vld [vmem:[%s10014_s11 + $0x780] sm:$0xff]   ;;  %v4923_v12 = vlaneseq }
 0x22d   : > { %8464 = vmatprep.subr.bf16.mxu1 %v8803_v13  ;;  %v8842_v13 = vld [vmem:[%s10014_s11 + $0x748] sm:$0xff]  }
 0x22e   : > { %v10407_v20 = vshrl.u32 %v4923_v12, 7 }
 0x22f   : > { %8437 = vmatpush3.bf16.msra.mxu0 %v8804_v14  ;;  %v8843_v14 = vld [vmem:[%s10014_s11 + $0x7c8] sm:$0xff]  }
 0x230   : > { %8465 = vmatpush3.bf16.msra.mxu1 %v8805_v15  ;;  %8478 = vmatprep.subr.bf16.mxu0 %v8806_v24  ;;  %v8844_v15 = vld [vmem:[%s10014_s11 + $0x708] sm:$0xff]  }
 0x231   : > { %8506 = vmatprep.subr.bf16.mxu1 %v8807_v25  ;;  %v8847_v25 = vld [vmem:[%s10014_s11 + $0x7d0] sm:$0xff]  }
 0x232   : > { %7306 = vmatmul.mubr.bf16.vlgmr.msra.gmra.mrb[40].mxu0 %v7819_v18  ;;  %v4406_v18 = vld [vmem:[%s10500_s0 + $0x1e0] sm:$0xff] }
 0x233   : > { %7355 = vmatmul.mubr.bf16.vlgmr.msra.gmra.mrb[40].mxu1 %v7821_v22  ;;  %8479 = vmatpush3.bf16.msra.mxu0 %v8808_v26  ;;  %v7856_v21 = vcombine.high %v4390_v17, %v4406_v18  ;;  %v7855_v22 = vcombine.low %v4390_v17, %v4406_v18  ;;  %v8866_v17 = vld [vmem:[%s10014_s11 + $0x778] sm:$0xff]  }
 0x234   : > { %8507 = vmatpush3.bf16.msra.mxu1 %v8809_v27  ;;  %8480 = vmatprep.subr.bf16.mxu0 %v8810_v28  ;;  %v4391_v27 = vld [vmem:[%s10500_s0 + $0x168] sm:$0xff]  ;;  %v8867_v18 = vld [vmem:[%s10014_s11 + $0x7f8] sm:$0xff]  }
 0x235   : > { %8508 = vmatprep.subr.bf16.mxu1 %v8811_v29  ;;  %7313 = vmatprep.mubr.bf16.mxu0 %v7852_v34  ;;  %v4407_v28 = vld [vmem:[%s10500_s0 + $0x1e8] sm:$0xff] }
 0x236   : > { %7362 = vmatprep.mubr.bf16.mxu1 %v7854_v40  ;;  %v7858_v32 = vcombine.high %v4391_v27, %v4407_v28  ;;  %v7857_v34 = vcombine.low %v4391_v27, %v4407_v28  ;;  %v4377_v27 = vld [vmem:[%s10500_s0 + $0xf8] sm:$0xff]  ;;  %v4392_v28 = vld [vmem:[%s10500_s0 + $0x170] sm:$0xff] }
 0x237   : > { %8481 = vmatpush3.bf16.msra.mxu0 %v8812_v30 }
 0x238   : > { %8509 = vmatpush3.bf16.msra.mxu1 %v8813_v31  ;;  %8482 = vmatprep.subr.bf16.mxu0 %v8814_v36 }
 0x239   : > { %8510 = vmatprep.subr.bf16.mxu1 %v8815_v37  ;;  %v8849_v37 = vld [vmem:[%s10014_s11 + $0x790] sm:$0xff]  }
 0x23a   : > { %7314 = vmatmul.mubr.bf16.gmra.mrb[44].mxu0 %v7851_v35 }
 0x23b   : > { %8483 = vmatpush3.bf16.msra.mxu0 %v8816_v41  ;;  %7363 = vmatmul.mubr.bf16.gmra.mrb[44].mxu1 %v7853_v42  ;;  %v8851_v42 = vld [vmem:[%s10014_s11 + $0x7d8] sm:$0xff]  }
 0x23c   : > { %8511 = vmatpush3.bf16.msra.mxu1 %v8817_v43  ;;  %8484 = vmatprep.subr.bf16.mxu0 %v8818_v44  ;;  %v4925_v43 = vsub.s32 0, %v10407_v20 }
 0x23d   : > { %8512 = vmatprep.subr.bf16.mxu1 %v8819_v45  ;;  %7403 = vmatprep.mubr.bf16.mxu0 %v7824_v4  ;;  %v8852_v45 = vld [vmem:[%s10014_s11 + $0x718] sm:$0xff]  }
 0x23e   : > { %7452 = vmatprep.mubr.bf16.mxu1 %v7826_v7  ;;  %v8861_v7 = vld [vmem:[%s10014_s11 + $0x7a8] sm:$0xff]  }
 0x23f   : > { %8485 = vmatpush3.bf16.msra.mxu0 %v8820_v46 }
 0x240   : > { %8513 = vmatpush3.bf16.msra.mxu1 %v8821_v47  ;;  %8486 = vmatprep.subr.bf16.mxu0 %v8822_v48  ;;  %v8853_v47 = vld [vmem:[%s10014_s11 + $0x798] sm:$0xff]  }
 0x241   : > { %8514 = vmatprep.subr.bf16.mxu1 %v8823_v49  ;;  %v8854_v49 = vld [vmem:[%s10014_s11 + $0x760] sm:$0xff]  }
 0x243   : > { %8487 = vmatpush3.bf16.msra.mxu0 %v8824_v50 }
 0x244   : > { %8515 = vmatpush3.bf16.msra.mxu1 %v8825_v51  ;;  %8488 = vmatprep.subr.bf16.mxu0 %v8826_v52  ;;  %v8855_v52 = vld [vmem:[%s10014_s11 + $0x7e0] sm:$0xff]  }
 0x245   : > { %8516 = vmatprep.subr.bf16.mxu1 %v8827_v53 }
 0x247   : > { %8489 = vmatpush3.bf16.msra.mxu0 %v8828_v54  ;;  %v8856_v54 = vld [vmem:[%s10014_s11 + $0x720] sm:$0xff]  }
 0x248   : > { %8517 = vmatpush3.bf16.msra.mxu1 %v8829_v55  ;;  %8490 = vmatprep.subr.bf16.mxu0 %v8830_v56  ;;  %v8857_v56 = vld [vmem:[%s10014_s11 + $0x7a0] sm:$0xff]  }
 0x249   : > { %8518 = vmatprep.subr.bf16.mxu1 %v8831_v57  ;;  %v10433_v57 = vld [vmem:[%s4344_s5] sm:$0x7]  ;;  %s7661_s5 = scalar_lea.vmem (%p8947_p5), %s10503_s3, %s8124_s12 }
 0x24b   : > { %8491 = vmatpush3.bf16.msra.mxu0 %v8832_v58 }
 0x24c   : > { %8519 = vmatpush3.bf16.msra.mxu1 %v8833_v59  ;;  %8492 = vmatprep.subr.bf16.mxu0 %v8834_v60  ;;  %v4926_v60 = vrot.slane %v10433_v57, %v4925_v43 }
 0x24d   : > { %8520 = vmatprep.subr.bf16.mxu1 %v8835_v61  ;;  %v8858_v61 = vld [vmem:[%s10014_s11 + $0x768] sm:$0xff]  }
 0x24f   : > { %8493 = vmatpush3.bf16.msra.mxu0 %v8836_v62 }
 0x250   : > { %8521 = vmatpush3.bf16.msra.mxu1 %v8837_v63  ;;  %8534 = vmatprep.subr.bf16.mxu0 %v8838_v8 }
 0x251   : > { %8562 = vmatprep.subr.bf16.mxu1 %v8839_v9 }
 0x252   : > { %7404 = vmatmul.mubr.bf16.vlgmr.msra.gmra.mrb[48].mxu0 %v7823_v3  ;;  %v8860_v3 = vld [vmem:[%s10014_s11 + $0x728] sm:$0xff]  }
 0x253   : > { %7453 = vmatmul.mubr.bf16.vlgmr.msra.gmra.mrb[48].mxu1 %v7825_v6  ;;  %8535 = vmatpush3.bf16.msra.mxu0 %v8840_v10 }
 0x254   : > { %8563 = vmatpush3.bf16.msra.mxu1 %v8841_v11  ;;  %8536 = vmatprep.subr.bf16.mxu0 %v8842_v13  ;;  %v8862_v11 = vld [vmem:[%s10014_s11 + $0x770] sm:$0xff]  }
 0x255   : > { %8564 = vmatprep.subr.bf16.mxu1 %v8843_v14  ;;  %7411 = vmatprep.mubr.bf16.mxu0 %v7856_v21  ;;  %v8863_v13 = vld [vmem:[%s10014_s11 + $0x7f0] sm:$0xff]   ;;  %v8869_v21 = vld [vmem:[%s10014_s11 + $0x7b8] sm:$0xff]  }
 0x256   : > { %7460 = vmatprep.mubr.bf16.mxu1 %v7858_v32 }
 0x257   : > { %8537 = vmatpush3.bf16.msra.mxu0 %v8844_v15  ;;  %v8864_v15 = vld [vmem:[%s10014_s11 + $0x730] sm:$0xff]  }
 0x258   : > { %8565 = vmatpush3.bf16.msra.mxu1 %v8845_v16  ;;  %8538 = vmatprep.subr.bf16.mxu0 %v8846_v23  ;;  %v8865_v16 = vld [vmem:[%s10014_s11 + $0x7b0] sm:$0xff]  }
 0x259   : > { %8566 = vmatprep.subr.bf16.mxu1 %v8847_v25  ;;  %v4376_v23 = vld [vmem:[%s10500_s0 + $0xf0] sm:$0xff] }
 0x25a   : > { %7412 = vmatmul.mubr.bf16.gmra.mrb[52].mxu0 %v7855_v22  ;;  %v4360_v22 = vld [vmem:[%s10500_s0 + $0x70] sm:$0xff] }
 0x25b   : > { %8539 = vmatpush3.bf16.msra.mxu0 %v8848_v33  ;;  %7461 = vmatmul.mubr.bf16.gmra.mrb[52].mxu1 %v7857_v34  ;;  %v7827_v25 = vcombine.low %v4360_v22, %v4376_v23  ;;  %v4393_v33 = vld [vmem:[%s10500_s0 + $0x178] sm:$0xff] }
 0x25c   : > { %8567 = vmatpush3.bf16.msra.mxu1 %v8849_v37  ;;  %8540 = vmatprep.subr.bf16.mxu0 %v8850_v39  ;;  %v4409_v34 = vld [vmem:[%s10500_s0 + $0x1f8] sm:$0xff] }
 0x25d   : > { %8568 = vmatprep.subr.bf16.mxu1 %v8851_v42 }
 0x25f   : > { %8541 = vmatpush3.bf16.msra.mxu0 %v8852_v45 }
 0x260   : > { %8569 = vmatpush3.bf16.msra.mxu1 %v8853_v47  ;;  %8542 = vmatprep.subr.bf16.mxu0 %v8854_v49 }
 0x261   : > { %8570 = vmatprep.subr.bf16.mxu1 %v8855_v52 }
 0x263   : > { %8543 = vmatpush3.bf16.msra.mxu0 %v8856_v54 }
 0x264   : > { %8571 = vmatpush3.bf16.msra.mxu1 %v8857_v56  ;;  %8544 = vmatprep.subr.bf16.mxu0 %v8858_v61 }
 0x265   : > { %v8158_v19 = vpop.f32.mrb[0].mxu0  ;;  %8572 = vmatprep.subr.bf16.mxu1 %v8859_v0 }
 0x266   : > { %v8186_v24 = vpop.f32.mrb[0].mxu1  ;;  %v8159_v26 = vpop.f32.mrb[1].mxu0 }
 0x267   : > { %v8160_v29 = vadd.f32 %v8159_v26, %v8158_v19  ;;  %v8187_v30 = vpop.f32.mrb[1].mxu1  ;;  %v8161_v31 = vpop.f32.mrb[2].mxu0  ;;  %8545 = vmatpush3.bf16.msra.mxu0 %v8860_v3  ;;  %v8868_v19 = vld [vmem:[%s10014_s11 + $0x738] sm:$0xff]   ;;  %v7828_v26 = vcombine.high %v4360_v22, %v4376_v23 }
 0x268   : > { %v8188_v35 = vadd.f32 %v8187_v30, %v8186_v24  ;;  %v8189_v36 = vpop.f32.mrb[2].mxu1  ;;  %v8162_v38 = vpop.f32.mrb[3].mxu0  ;;  %8573 = vmatpush3.bf16.msra.mxu1 %v8861_v7  ;;  %8546 = vmatprep.subr.bf16.mxu0 %v8862_v11  ;;  %v4361_v24 = vld [vmem:[%s10500_s0 + $0x78] sm:$0xff] }
 0x269   : > { %v8163_v40 = vadd.f32 %v8162_v38, %v8161_v31  ;;  %v8190_v41 = vpop.f32.mrb[3].mxu1  ;;  %v6818_v2 = vadd.f32 %v8160_v29, %v4926_v60  ;;  %8574 = vmatprep.subr.bf16.mxu1 %v8863_v13  ;;  %v4408_v29 = vld [vmem:[%s10500_s0 + $0x1f0] sm:$0xff]  ;;  %v7829_v30 = vcombine.low %v4361_v24, %v4377_v27  ;;  %v7830_v31 = vcombine.high %v4361_v24, %v4377_v27 }
 0x26a   : > { %v8191_v44 = vadd.f32 %v8190_v41, %v8189_v36  ;;  %v7860_v32 = vcombine.high %v4392_v28, %v4408_v29  ;;  %7501 = vmatprep.mubr.bf16.mxu0 %v7828_v26  ;;  %v7859_v38 = vcombine.low %v4392_v28, %v4408_v29  ;;  %v7861_v41 = vcombine.low %v4393_v33, %v4409_v34 }
 0x26b   : > { %v6821_v4 = vadd.f32 %v8163_v40, %v4926_v60  ;;  %v6867_v9 = vadd.f32 %v8188_v35, %v6818_v2  ;;  %8547 = vmatpush3.bf16.msra.mxu0 %v8864_v15  ;;  %v7862_v35 = vcombine.high %v4393_v33, %v4409_v34  ;;  %7550 = vmatprep.mubr.bf16.mxu1 %v7830_v31 }
 0x26c   : > { %8575 = vmatpush3.bf16.msra.mxu1 %v8865_v16  ;;  %8548 = vmatprep.subr.bf16.mxu0 %v8866_v17 }
 0x26d   : > { %v8164_v46 = vpop.f32.mrb[4].mxu0  ;;  %v6870_v10 = vadd.f32 %v8191_v44, %v6821_v4  ;;  %8576 = vmatprep.subr.bf16.mxu1 %v8867_v18 }
 0x26e   : > { %v8165_v48 = vpop.f32.mrb[5].mxu0  ;;  %v8192_v53 = vpop.f32.mrb[4].mxu1 }
 0x26f   : > { %v8166_v50 = vadd.f32 %v8165_v48, %v8164_v46  ;;  %v8167_v51 = vpop.f32.mrb[6].mxu0  ;;  %v8193_v59 = vpop.f32.mrb[5].mxu1  ;;  %8549 = vmatpush3.bf16.msra.mxu0 %v8868_v19 }
 0x270   : > { %v8168_v55 = vpop.f32.mrb[7].mxu0  ;;  %v8194_v62 = vadd.f32 %v8193_v59, %v8192_v53  ;;  %v8195_v63 = vpop.f32.mrb[6].mxu1  ;;  %8577 = vmatpush3.bf16.msra.mxu1 %v8869_v21 }
 0x271   : > { %v8169_v58 = vadd.f32 %v8168_v55, %v8167_v51  ;;  %v8196_v1 = vpop.f32.mrb[7].mxu1  ;;  %v6826_v5 = vadd.f32 %v8166_v50, %v4926_v60 }
 0x272   : > { %v8197_v8 = vadd.f32 %v8196_v1, %v8195_v63  ;;  %7502 = vmatmul.mubr.bf16.vlgmr.msra.gmra.mrb[56].mxu0 %v7827_v25 }
 0x273   : > { %v6829_v6 = vadd.f32 %v8169_v58, %v4926_v60  ;;  %v10441_v12 = vadd.f32 %v8194_v62, %v6826_v5  ;;  %7551 = vmatmul.mubr.bf16.vlgmr.msra.gmra.mrb[56].mxu1 %v7829_v30  ;;  %7509 = vmatprep.mubr.bf16.mxu0 %v7860_v32 }
 0x274   : > { %7558 = vmatprep.mubr.bf16.mxu1 %v7862_v35 }
 0x275   : > { %v10444_v14 = vadd.f32 %v8197_v8, %v6829_v6 }
 0x27a   : > { %7510 = vmatmul.mubr.bf16.gmra.mrb[60].mxu0 %v7859_v38 }
 0x27b   : > { %7559 = vmatmul.mubr.bf16.gmra.mrb[60].mxu1 %v7861_v41 }
 0x285   : > { %v8214_v36 = vpop.f32.mrb[8].mxu0 }
 0x286   : > { %v8242_v37 = vpop.f32.mrb[8].mxu1  ;;  %v8215_v39 = vpop.f32.mrb[9].mxu0 }
 0x287   : > { %v8243_v40 = vpop.f32.mrb[9].mxu1  ;;  %v8216_v42 = vadd.f32 %v8215_v39, %v8214_v36  ;;  %v8217_v44 = vpop.f32.mrb[10].mxu0 }
 0x288   : > { %v8244_v43 = vadd.f32 %v8243_v40, %v8242_v37  ;;  %v8245_v45 = vpop.f32.mrb[10].mxu1  ;;  %v8218_v46 = vpop.f32.mrb[11].mxu0 }
 0x289   : > { %v8246_v47 = vpop.f32.mrb[11].mxu1  ;;  %v6916_v48 = vadd.f32 %v8216_v42, %v6867_v9  ;;  %v8219_v49 = vadd.f32 %v8218_v46, %v8217_v44 }
 0x28a   : > { %v8247_v50 = vadd.f32 %v8246_v47, %v8245_v45 }
 0x28b   : > { %v6965_v51 = vadd.f32 %v8244_v43, %v6916_v48  ;;  %v6919_v52 = vadd.f32 %v8219_v49, %v6870_v10 }
 0x28d   : > { %v6968_v53 = vadd.f32 %v8247_v50, %v6919_v52  ;;  %v8220_v54 = vpop.f32.mrb[12].mxu0 }
 0x28e   : > { %v8221_v55 = vpop.f32.mrb[13].mxu0  ;;  %v8248_v61 = vpop.f32.mrb[12].mxu1 }
 0x28f   : > { %v8222_v56 = vadd.f32 %v8221_v55, %v8220_v54  ;;  %v8223_v58 = vpop.f32.mrb[14].mxu0  ;;  %v8249_v63 = vpop.f32.mrb[13].mxu1 }
 0x290   : > { %v8224_v59 = vpop.f32.mrb[15].mxu0  ;;  %v8250_v1 = vadd.f32 %v8249_v63, %v8248_v61  ;;  %v8251_v2 = vpop.f32.mrb[14].mxu1 }
 0x291   : > { %v6924_v60 = vadd.f32 %v8222_v56, %v10441_v12  ;;  %v8225_v62 = vadd.f32 %v8224_v59, %v8223_v58  ;;  %v8252_v3 = vpop.f32.mrb[15].mxu1 }
 0x292   : > { %v8253_v5 = vadd.f32 %v8252_v3, %v8251_v2 }
 0x293   : > { %v6927_v0 = vadd.f32 %v8225_v62, %v10444_v14  ;;  %v6973_v4 = vadd.f32 %v8250_v1, %v6924_v60 }
 0x295   : > { %v6976_v6 = vadd.f32 %v8253_v5, %v6927_v0 }
 0x2a5   : > { %v8270_v7 = vpop.f32.mrb[16].mxu0 }
 0x2a6   : > { %v8298_v8 = vpop.f32.mrb[16].mxu1  ;;  %v8271_v9 = vpop.f32.mrb[17].mxu0 }
 0x2a7   : > { %v8272_v10 = vadd.f32 %v8271_v9, %v8270_v7  ;;  %v8299_v11 = vpop.f32.mrb[17].mxu1  ;;  %v8273_v13 = vpop.f32.mrb[18].mxu0 }
 0x2a8   : > { %v8300_v15 = vadd.f32 %v8299_v11, %v8298_v8  ;;  %v8301_v16 = vpop.f32.mrb[18].mxu1  ;;  %v8274_v12 = vpop.f32.mrb[19].mxu0 }
 0x2a9   : > { %v7014_v17 = vadd.f32 %v8272_v10, %v6965_v51  ;;  %v8275_v18 = vadd.f32 %v8274_v12, %v8273_v13  ;;  %v8302_v19 = vpop.f32.mrb[19].mxu1 }
 0x2aa   : > { %v8303_v21 = vadd.f32 %v8302_v19, %v8301_v16 }
 0x2ab   : > { %v7063_v14 = vadd.f32 %v8300_v15, %v7014_v17  ;;  %v7017_v22 = vadd.f32 %v8275_v18, %v6968_v53 }
 0x2ad   : > { %v7066_v23 = vadd.f32 %v8303_v21, %v7017_v22  ;;  %v8276_v24 = vpop.f32.mrb[20].mxu0 }
 0x2ae   : > { %v8277_v25 = vpop.f32.mrb[21].mxu0  ;;  %v8304_v28 = vpop.f32.mrb[20].mxu1 }
 0x2af   : > { %v8278_v26 = vadd.f32 %v8277_v25, %v8276_v24  ;;  %v8279_v27 = vpop.f32.mrb[22].mxu0  ;;  %v8305_v32 = vpop.f32.mrb[21].mxu1 }
 0x2b0   : > { %v8280_v29 = vpop.f32.mrb[23].mxu0  ;;  %v8306_v33 = vadd.f32 %v8305_v32, %v8304_v28  ;;  %v8307_v34 = vpop.f32.mrb[22].mxu1 }
 0x2b1   : > { %v7022_v30 = vadd.f32 %v8278_v26, %v6973_v4  ;;  %v8281_v31 = vadd.f32 %v8280_v29, %v8279_v27  ;;  %v8308_v36 = vpop.f32.mrb[23].mxu1 }
 0x2b2   : > { %v8309_v38 = vadd.f32 %v8308_v36, %v8307_v34 }
 0x2b3   : > { %v7025_v35 = vadd.f32 %v8281_v31, %v6976_v6  ;;  %v7071_v37 = vadd.f32 %v8306_v33, %v7022_v30 }
 0x2b5   : > { %v7074_v39 = vadd.f32 %v8309_v38, %v7025_v35 }
 0x2c5   : > { %v8326_v40 = vpop.f32.mrb[24].mxu0 }
 0x2c6   : > { %v8354_v41 = vpop.f32.mrb[24].mxu1  ;;  %v8327_v42 = vpop.f32.mrb[25].mxu0 }
 0x2c7   : > { %v8328_v43 = vadd.f32 %v8327_v42, %v8326_v40  ;;  %v8355_v44 = vpop.f32.mrb[25].mxu1  ;;  %v8329_v45 = vpop.f32.mrb[26].mxu0 }
 0x2c8   : > { %v8356_v46 = vadd.f32 %v8355_v44, %v8354_v41  ;;  %v8357_v47 = vpop.f32.mrb[26].mxu1  ;;  %v8330_v48 = vpop.f32.mrb[27].mxu0 }
 0x2c9   : > { %v7112_v49 = vadd.f32 %v8328_v43, %v7063_v14  ;;  %v8331_v50 = vadd.f32 %v8330_v48, %v8329_v45  ;;  %v8358_v51 = vpop.f32.mrb[27].mxu1 }
 0x2ca   : > { %v8359_v52 = vadd.f32 %v8358_v51, %v8357_v47 }
 0x2cb   : > { %v7161_v53 = vadd.f32 %v8356_v46, %v7112_v49  ;;  %v7115_v54 = vadd.f32 %v8331_v50, %v7066_v23 }
 0x2cd   : > { %v7164_v55 = vadd.f32 %v8359_v52, %v7115_v54  ;;  %v8332_v56 = vpop.f32.mrb[28].mxu0 }
 0x2ce   : > { %v8333_v58 = vpop.f32.mrb[29].mxu0  ;;  %v8360_v63 = vpop.f32.mrb[28].mxu1 }
 0x2cf   : > { %v8334_v59 = vadd.f32 %v8333_v58, %v8332_v56  ;;  %v8335_v60 = vpop.f32.mrb[30].mxu0  ;;  %v8361_v1 = vpop.f32.mrb[29].mxu1 }
 0x2d0   : > { %v8336_v61 = vpop.f32.mrb[31].mxu0  ;;  %v8362_v3 = vadd.f32 %v8361_v1, %v8360_v63  ;;  %v8363_v4 = vpop.f32.mrb[30].mxu1 }
 0x2d1   : > { %v7120_v62 = vadd.f32 %v8334_v59, %v7071_v37  ;;  %v8337_v0 = vadd.f32 %v8336_v61, %v8335_v60  ;;  %v8364_v5 = vpop.f32.mrb[31].mxu1 }
 0x2d2   : > { %v8365_v7 = vadd.f32 %v8364_v5, %v8363_v4 }
 0x2d3   : > { %v7123_v2 = vadd.f32 %v8337_v0, %v7074_v39  ;;  %v7169_v6 = vadd.f32 %v8362_v3, %v7120_v62 }
 0x2d5   : > { %v7172_v8 = vadd.f32 %v8365_v7, %v7123_v2 }
 0x2e5   : > { %v8382_v9 = vpop.f32.mrb[32].mxu0 }
 0x2e6   : > { %v8410_v10 = vpop.f32.mrb[32].mxu1  ;;  %v8383_v11 = vpop.f32.mrb[33].mxu0 }
 0x2e7   : > { %v8411_v13 = vpop.f32.mrb[33].mxu1  ;;  %v8384_v15 = vadd.f32 %v8383_v11, %v8382_v9  ;;  %v8385_v12 = vpop.f32.mrb[34].mxu0 }
 0x2e8   : > { %v8412_v16 = vadd.f32 %v8411_v13, %v8410_v10  ;;  %v8413_v17 = vpop.f32.mrb[34].mxu1  ;;  %v8386_v18 = vpop.f32.mrb[35].mxu0 }
 0x2e9   : > { %v8414_v19 = vpop.f32.mrb[35].mxu1  ;;  %v7210_v21 = vadd.f32 %v8384_v15, %v7161_v53  ;;  %v8387_v14 = vadd.f32 %v8386_v18, %v8385_v12 }
 0x2ea   : > { %v8415_v22 = vadd.f32 %v8414_v19, %v8413_v17 }
 0x2eb   : > { %v7259_v23 = vadd.f32 %v8412_v16, %v7210_v21  ;;  %v7213_v24 = vadd.f32 %v8387_v14, %v7164_v55 }
 0x2ed   : > { %v7262_v25 = vadd.f32 %v8415_v22, %v7213_v24  ;;  %v8388_v26 = vpop.f32.mrb[36].mxu0 }
 0x2ee   : > { %v8389_v27 = vpop.f32.mrb[37].mxu0  ;;  %v8416_v32 = vpop.f32.mrb[36].mxu1 }
 0x2ef   : > { %v8390_v28 = vadd.f32 %v8389_v27, %v8388_v26  ;;  %v8391_v29 = vpop.f32.mrb[38].mxu0  ;;  %v8417_v34 = vpop.f32.mrb[37].mxu1 }
 0x2f0   : > { %v8392_v30 = vpop.f32.mrb[39].mxu0  ;;  %v8418_v36 = vadd.f32 %v8417_v34, %v8416_v32  ;;  %v8419_v37 = vpop.f32.mrb[38].mxu1 }
 0x2f1   : > { %v7218_v31 = vadd.f32 %v8390_v28, %v7169_v6  ;;  %v8393_v33 = vadd.f32 %v8392_v30, %v8391_v29  ;;  %v8420_v38 = vpop.f32.mrb[39].mxu1 }
 0x2f2   : > { %v8421_v40 = vadd.f32 %v8420_v38, %v8419_v37 }
 0x2f3   : > { %v7221_v35 = vadd.f32 %v8393_v33, %v7172_v8  ;;  %v7267_v39 = vadd.f32 %v8418_v36, %v7218_v31 }
 0x2f5   : > { %v7270_v41 = vadd.f32 %v8421_v40, %v7221_v35 }
 0x305   : > { %v8438_v42 = vpop.f32.mrb[40].mxu0 }
 0x306   : > { %v8466_v43 = vpop.f32.mrb[40].mxu1  ;;  %v8439_v44 = vpop.f32.mrb[41].mxu0 }
 0x307   : > { %v8440_v45 = vadd.f32 %v8439_v44, %v8438_v42  ;;  %v8467_v46 = vpop.f32.mrb[41].mxu1  ;;  %v8441_v47 = vpop.f32.mrb[42].mxu0 }
 0x308   : > { %v8468_v48 = vadd.f32 %v8467_v46, %v8466_v43  ;;  %v8469_v49 = vpop.f32.mrb[42].mxu1  ;;  %v8442_v50 = vpop.f32.mrb[43].mxu0 }
 0x309   : > { %v7308_v51 = vadd.f32 %v8440_v45, %v7259_v23  ;;  %v8443_v52 = vadd.f32 %v8442_v50, %v8441_v47  ;;  %v8470_v53 = vpop.f32.mrb[43].mxu1 }
 0x30a   : > { %v8471_v54 = vadd.f32 %v8470_v53, %v8469_v49 }
 0x30b   : > { %v7357_v55 = vadd.f32 %v8468_v48, %v7308_v51  ;;  %v7311_v56 = vadd.f32 %v8443_v52, %v7262_v25 }
 0x30d   : > { %v7360_v58 = vadd.f32 %v8471_v54, %v7311_v56  ;;  %v8444_v59 = vpop.f32.mrb[44].mxu0 }
 0x30e   : > { %v8445_v60 = vpop.f32.mrb[45].mxu0  ;;  %v8472_v63 = vpop.f32.mrb[44].mxu1 }
 0x30f   : > { %v8446_v61 = vadd.f32 %v8445_v60, %v8444_v59  ;;  %v8447_v62 = vpop.f32.mrb[46].mxu0  ;;  %v8473_v3 = vpop.f32.mrb[45].mxu1 }
 0x310   : > { %v8448_v0 = vpop.f32.mrb[47].mxu0  ;;  %v8474_v4 = vadd.f32 %v8473_v3, %v8472_v63  ;;  %v8475_v5 = vpop.f32.mrb[46].mxu1 }
 0x311   : > { %v7316_v1 = vadd.f32 %v8446_v61, %v7267_v39  ;;  %v8449_v2 = vadd.f32 %v8448_v0, %v8447_v62  ;;  %v8476_v7 = vpop.f32.mrb[47].mxu1 }
 0x312   : > { %v8477_v9 = vadd.f32 %v8476_v7, %v8475_v5 }
 0x313   : > { %v7319_v6 = vadd.f32 %v8449_v2, %v7270_v41  ;;  %v7365_v8 = vadd.f32 %v8474_v4, %v7316_v1 }
 0x315   : > { %v7368_v10 = vadd.f32 %v8477_v9, %v7319_v6 }
 0x325   : > { %v8494_v11 = vpop.f32.mrb[48].mxu0 }
 0x326   : > { %v8522_v13 = vpop.f32.mrb[48].mxu1  ;;  %v8495_v15 = vpop.f32.mrb[49].mxu0 }
 0x327   : > { %v8496_v16 = vadd.f32 %v8495_v15, %v8494_v11  ;;  %v8523_v12 = vpop.f32.mrb[49].mxu1  ;;  %v8497_v17 = vpop.f32.mrb[50].mxu0 }
 0x328   : > { %v8524_v18 = vadd.f32 %v8523_v12, %v8522_v13  ;;  %v8525_v19 = vpop.f32.mrb[50].mxu1  ;;  %v8498_v21 = vpop.f32.mrb[51].mxu0 }
 0x329   : > { %v7406_v14 = vadd.f32 %v8496_v16, %v7357_v55  ;;  %v8499_v22 = vadd.f32 %v8498_v21, %v8497_v17  ;;  %v8526_v23 = vpop.f32.mrb[51].mxu1 }
 0x32a   : > { %v8527_v24 = vadd.f32 %v8526_v23, %v8525_v19 }
 0x32b   : > { %v7455_v25 = vadd.f32 %v8524_v18, %v7406_v14  ;;  %v7409_v26 = vadd.f32 %v8499_v22, %v7360_v58 }
 0x32d   : > { %v7458_v27 = vadd.f32 %v8527_v24, %v7409_v26  ;;  %v8500_v28 = vpop.f32.mrb[52].mxu0 }
 0x32e   : > { %v8501_v29 = vpop.f32.mrb[53].mxu0  ;;  %v8528_v34 = vpop.f32.mrb[52].mxu1 }
 0x32f   : > { %v8502_v30 = vadd.f32 %v8501_v29, %v8500_v28  ;;  %v8503_v31 = vpop.f32.mrb[54].mxu0  ;;  %v8529_v36 = vpop.f32.mrb[53].mxu1 }
 0x330   : > { %v8504_v32 = vpop.f32.mrb[55].mxu0  ;;  %v8530_v38 = vadd.f32 %v8529_v36, %v8528_v34  ;;  %v8531_v39 = vpop.f32.mrb[54].mxu1 }
 0x331   : > { %v7414_v33 = vadd.f32 %v8502_v30, %v7365_v8  ;;  %v8505_v35 = vadd.f32 %v8504_v32, %v8503_v31  ;;  %v8532_v40 = vpop.f32.mrb[55].mxu1 }
 0x332   : > { %v8533_v42 = vadd.f32 %v8532_v40, %v8531_v39 }
 0x333   : > { %v7417_v37 = vadd.f32 %v8505_v35, %v7368_v10  ;;  %v7463_v41 = vadd.f32 %v8530_v38, %v7414_v33 }
 0x335   : > { %v7466_v43 = vadd.f32 %v8533_v42, %v7417_v37 }
 0x345   : > { %v8550_v44 = vpop.f32.mrb[56].mxu0 }
 0x346   : > { %v8578_v45 = vpop.f32.mrb[56].mxu1  ;;  %v8551_v46 = vpop.f32.mrb[57].mxu0 }
 0x347   : > { %v8552_v47 = vadd.f32 %v8551_v46, %v8550_v44  ;;  %v8579_v48 = vpop.f32.mrb[57].mxu1  ;;  %v8553_v49 = vpop.f32.mrb[58].mxu0  ;;  %v7607_v46 = vsub.s32 1, %v10407_v20 }
 0x348   : > { %v8580_v50 = vadd.f32 %v8579_v48, %v8578_v45  ;;  %v8581_v51 = vpop.f32.mrb[58].mxu1  ;;  %v8554_v52 = vpop.f32.mrb[59].mxu0 }
 0x349   : > { %v7504_v53 = vadd.f32 %v8552_v47, %v7455_v25  ;;  %v8555_v54 = vadd.f32 %v8554_v52, %v8553_v49  ;;  %v8582_v55 = vpop.f32.mrb[59].mxu1  ;;  %v7615_v47 = vsub.s32 2, %v10407_v20  ;;  %v7608_v48 = vrot.slane %v10433_v57, %v7607_v46 }
 0x34a   : > { %v8583_v56 = vadd.f32 %v8582_v55, %v8581_v51 }
 0x34b   : > { %v7553_v58 = vadd.f32 %v8580_v50, %v7504_v53  ;;  %v7507_v59 = vadd.f32 %v8555_v54, %v7458_v27  ;;  %v7616_v50 = vrot.slane %v10433_v57, %v7615_v47 }
 0x34d   : > { %v7556_v60 = vadd.f32 %v8583_v56, %v7507_v59  ;;  %v8556_v61 = vpop.f32.mrb[60].mxu0  ;;  %v7578_v0 = vmul.f32 %v7553_v58, %v7553_v58 }
 0x34e   : > { %v8584_v62 = vpop.f32.mrb[60].mxu1  ;;  %v8557_v63 = vpop.f32.mrb[61].mxu0 }
 0x34f   : > { %v7567_v1 = vadd.f32 %v7556_v60, %v7553_v58  ;;  %v7579_v2 = vmul.f32 %v7556_v60, %v7556_v60  ;;  %v8558_v3 = vadd.f32 %v8557_v63, %v8556_v61  ;;  %v8585_v4 = vpop.f32.mrb[61].mxu1  ;;  %v8559_v5 = vpop.f32.mrb[62].mxu0 }
 0x350   : > { %v8586_v6 = vadd.f32 %v8585_v4, %v8584_v62  ;;  %v8587_v7 = vpop.f32.mrb[62].mxu1  ;;  %v8560_v8 = vpop.f32.mrb[63].mxu0 }
 0x351   : > { %v7582_v9 = vadd.f32 %v7579_v2, %v7578_v0  ;;  %v7512_v10 = vadd.f32 %v8558_v3, %v7463_v41  ;;  %v8561_v11 = vadd.f32 %v8560_v8, %v8559_v5  ;;  %v8588_v13 = vpop.f32.mrb[63].mxu1 }
 0x352   : > { %v8589_v15 = vadd.f32 %v8588_v13, %v8587_v7 }
 0x353   : > { %v7561_v16 = vadd.f32 %v8586_v6, %v7512_v10  ;;  %v7515_v12 = vadd.f32 %v8561_v11, %v7466_v43 }
 0x355   : > { %v7568_v17 = vadd.f32 %v7567_v1, %v7561_v16  ;;  %v7580_v18 = vmul.f32 %v7561_v16, %v7561_v16  ;;  %v7564_v19 = vadd.f32 %v8589_v15, %v7515_v12 }
 0x357   : > { %v7583_v21 = vadd.f32 %v7582_v9, %v7580_v18  ;;  %v7569_v14 = vadd.f32 %v7568_v17, %v7564_v19  ;;  %v7581_v22 = vmul.f32 %v7564_v19, %v7564_v19 }
 0x359   : > { %v7570_v23 = vrot.slane %v7569_v14, 4  ;;  %v7584_v24 = vadd.f32 %v7583_v21, %v7581_v22 }
 0x35b   : > { %v7571_v25 = vadd.f32 %v7570_v23, %v7569_v14  ;;  %v7585_v26 = vrot.slane %v7584_v24, 4 }
 0x35d   : > { %v7572_v27 = vrot.slane %v7571_v25, 2  ;;  %v7586_v28 = vadd.f32 %v7585_v26, %v7584_v24 }
 0x35f   : > { %v7573_v29 = vadd.f32 %v7572_v27, %v7571_v25  ;;  %v7587_v30 = vrot.slane %v7586_v28, 2 }
 0x361   : > { %v7574_v31 = vrot.slane %v7573_v29, 1  ;;  %v7588_v32 = vadd.f32 %v7587_v30, %v7586_v28 }
 0x363   : > { %v7575_v33 = vadd.f32 %v7574_v31, %v7573_v29  ;;  %v7589_v34 = vrot.slane %v7588_v32, 1 }
 0x365   : > { %v7577_v35 = vmul.f32 0.03125, %v7575_v33  ;;  %v7590_v36 = vadd.f32 %v7589_v34, %v7588_v32 }
 0x367   : > { %v7591_v37 = vmul.f32 0.03125, %v7590_v36  ;;  %v7592_v38 = vmul.f32 %v7577_v35, %v7577_v35  ;;  %v7595_v39 = vsub.f32 %v7553_v58, %v7577_v35  ;;  %v7596_v40 = vsub.f32 %v7556_v60, %v7577_v35 }
 0x368   : > { %v7597_v41 = vsub.f32 %v7561_v16, %v7577_v35  ;;  %v7598_v42 = vsub.f32 %v7564_v19, %v7577_v35 }
 0x369   : > { %v7593_v43 = vsub.f32 %v7591_v37, %v7592_v38 }
 0x36b   : > { %v7594_v44 = vmax.f32 %v7593_v43, 0.0 }
 0x36d   : > { %v7599_v45 = vadd.f32 1e-05, %v7594_v44 }
 0x36f   : > { %8870 = vrsqrt.f32 %v7599_v45 }
 0x379   : > { %v8871_v49 = vpop.eup %8870 }
 0x37a   : > { %v7601_v51 = vmul.f32 %v8871_v49, %v7595_v39  ;;  %v7602_v52 = vmul.f32 %v8871_v49, %v7596_v40  ;;  %v7603_v53 = vmul.f32 %v8871_v49, %v7597_v41  ;;  %v7604_v54 = vmul.f32 %v8871_v49, %v7598_v42 }
 0x37c   : > { %v7609_v55 = vmul.f32 %v7608_v48, %v7601_v51  ;;  %v7610_v56 = vmul.f32 %v7608_v48, %v7602_v52  ;;  %v7611_v58 = vmul.f32 %v7608_v48, %v7603_v53  ;;  %v7612_v59 = vmul.f32 %v7608_v48, %v7604_v54 }
 0x37e   : > { %v7617_v60 = vadd.f32 %v7616_v50, %v7609_v55  ;;  %v7618_v61 = vadd.f32 %v7616_v50, %v7610_v56  ;;  %v7619_v62 = vadd.f32 %v7616_v50, %v7611_v58  ;;  %v7620_v63 = vadd.f32 %v7616_v50, %v7612_v59 }
 0x380   : > { %vm7621_vm0 = vcmp.ge.f32.partialorder %v7617_v60, 0.0  ;;  %vm7622_vm1 = vcmp.ge.f32.partialorder %v7618_v61, 0.0  ;;  %vm7623_vm2 = vcmp.ge.f32.partialorder %v7619_v62, 0.0  ;;  %vm7624_vm3 = vcmp.ge.f32.partialorder %v7620_v63, 0.0 }
 0x381   : > { %v7625_v20 = vmul.f32 0.2, %v7617_v60  ;;  %v7626_v57 = vmul.f32 0.2, %v7618_v61  ;;  %v7627_v0 = vmul.f32 0.2, %v7619_v62 }
 0x382   : > { %v7628_v1 = vmul.f32 0.2, %v7620_v63  ;;  %7659 = sbr.rel (!%p8947_p5) target bundleno = 913 (0x391), region = 88 }
 0x383   : > { %v7629_v2 = vsel %vm7621_vm0, %v7617_v60, %v7625_v20  ;;  %v7630_v3 = vsel %vm7622_vm1, %v7618_v61, %v7626_v57  ;;  %v7631_v4 = vsel %vm7623_vm2, %v7619_v62, %v7627_v0 }
 0x384   : > { %v7632_v5 = vsel %vm7624_vm3, %v7620_v63, %v7628_v1  ;;  %v8134_v6 = vpack.c.bf16 %v7630_v3, %v7629_v2 }
 0x385   : > { %v8139_v7 = vpack.c.bf16 %v7632_v5, %v7631_v4 }
 0x386   : > { %8135 = vst [vmem:[%s4340_s30] sm:$0xff] %v8134_v6  }
 0x387   : > { %8141 = vst [vmem:[%s4340_s30 + $0x8] sm:$0xff] %v8139_v7  }
 0x38d   : > { %v7677_v8 = vld [vmem:[%s4340_s30] sm:$0xf]  ;;  %v7679_v9 = vld [vmem:[%s4340_s30 + $0x4] sm:$0xf] }
 0x38e   : > { %v7681_v10 = vld [vmem:[%s4340_s30 + $0x8] sm:$0xf]  ;;  %v7683_v11 = vld [vmem:[%s4340_s30 + $0xc] sm:$0xf]  ;;  %7678 = vst [vmem:[%s7661_s5] sm:$0xf] %v7677_v8 }
 0x38f   : > { %7680 = vst [vmem:[%s7661_s5 + $0x10] sm:$0xf] %v7679_v9  ;;  %7682 = vst [vmem:[%s7661_s5 + $0x20] sm:$0xf] %v7681_v10 }
 0x390   : > { %7684 = vst [vmem:[%s7661_s5 + $0x30] sm:$0xf] %v7683_v11 }
 0x391 PF: > { %p10_p11 = scmp.ge.s32.totalorder %s8935_s16, 6   ;;  %s10505_s12 = smov %s8890_s13 }
 0x392   : > { %s10506_s13 = smov %s8945_s19  ;;  %s10507_s14 = smov %s8935_s16 }
 0x393   :  { %12 = sbr.rel (!%p10_p11) target bundleno = 2 (0x2), region = 167 }

</bundles_post_ra>
